<compile_context>
chip_gen: v6e
topology: v6e:2x2x1
jax: 0.10.0
libtpu: 0.0.40
codegen_flags: <defaults>
</compile_context>

<pallas_src>
import jax
import jax.numpy as jnp
from jax.experimental import pallas as pl
from jax.experimental.pallas import tpu as pltpu

SELU_ALPHA = 1.6732632423543772
SELU_SCALE = 1.0507009873554805
BN_EPS = 1e-5
VMEM_LIMIT = 32 * 1024 * 1024  # <= physical on v5e/v6e/v7x, >= v5e's 16 MiB default


def _selu(x):
    # clamp exp argument so the untaken branch never produces inf
    return SELU_SCALE * jnp.where(
        x > 0.0, x, SELU_ALPHA * (jnp.exp(jnp.minimum(x, 0.0)) - 1.0))


def _row_tile(m, cap=512):
    """Largest row tile <= cap that divides m and is sublane friendly (mult of 16)."""
    if m <= cap:
        return m
    for t in range(cap, 15, -1):
        if m % t == 0 and t % 16 == 0:
            return t
    return m


# ----------------------------------------------------------------------------
# Kernels
# ----------------------------------------------------------------------------
def _matmul_bias_relu_kernel(a_ref, w_ref, b_ref, o_ref):
    """o = relu(a @ w + b); bf16 operands, f32 accumulate (conv1 im2col path)."""
    acc = jnp.dot(a_ref[...], w_ref[...], preferred_element_type=jnp.float32)
    o_ref[...] = jnp.maximum(acc + b_ref[...], 0.0).astype(o_ref.dtype)


def _pool_then_bn_kernel(x0_ref, x1_ref, x2_ref, x3_ref, g_ref, b_ref, o_ref):
    """MaxPool2d(2,2) (4 taps given as partitioned slices) followed by BN."""
    p = jnp.maximum(jnp.maximum(x0_ref[...], x1_ref[...]),
                    jnp.maximum(x2_ref[...], x3_ref[...])).astype(jnp.float32)
    mean = jnp.mean(p, axis=0, keepdims=True)
    var = jnp.mean(jnp.square(p - mean), axis=0, keepdims=True)  # biased batch var
    scale = jax.lax.rsqrt(var + BN_EPS) * g_ref[...]
    o_ref[...] = ((p - mean) * scale + b_ref[...]).astype(o_ref.dtype)


def _conv2_relu_kernel(x_ref, w_ref, b_ref, o_ref):
    """Fused-im2col 5x5 conv + bias + ReLU.

    x_ref: (TB, 12, 12, Cin) f32   w_ref: (25, Cin, Cout) bf16
    o_ref: (TB*8*8, Cout) f32
    Loops the 25 taps in VMEM; each tap is a shifted slice reshaped to (M, Cin)
    (tile-relabel for f32) and cast to bf16 for the MXU dot.
    """
    tb, h, w, cin = x_ref.shape
    ho, wo = h - 4, w - 4
    cout = w_ref.shape[2]
    acc = jnp.zeros((tb * ho * wo, cout), jnp.float32)
    for dy in range(5):
        for dx in range(5):
            xs = x_ref[:, dy:dy + ho, dx:dx + wo, :]          # (TB, 8, 8, Cin)
            xs = xs.reshape(tb * ho * wo, cin).astype(jnp.bfloat16)
            acc = acc + jnp.dot(xs, w_ref[dy * 5 + dx],
                                preferred_element_type=jnp.float32)
    o_ref[...] = jnp.maximum(acc + b_ref[...], 0.0)


def _bn_then_pool_kernel(x0_ref, x1_ref, x2_ref, x3_ref, g_ref, b_ref, o_ref):
    """BN (stats over the union of the 4 partitioning slices) then MaxPool2d(2,2)."""
    a0, a1, a2, a3 = x0_ref[...], x1_ref[...], x2_ref[...], x3_ref[...]
    n = 4.0 * a0.shape[0]
    s = (jnp.sum(a0, axis=0, keepdims=True) + jnp.sum(a1, axis=0, keepdims=True)
         + jnp.sum(a2, axis=0, keepdims=True) + jnp.sum(a3, axis=0, keepdims=True))
    mean = s / n
    sq = (jnp.sum(jnp.square(a0 - mean), axis=0, keepdims=True)
          + jnp.sum(jnp.square(a1 - mean), axis=0, keepdims=True)
          + jnp.sum(jnp.square(a2 - mean), axis=0, keepdims=True)
          + jnp.sum(jnp.square(a3 - mean), axis=0, keepdims=True))
    var = sq / n
    scale = jax.lax.rsqrt(var + BN_EPS) * g_ref[...]
    shift = b_ref[...] - mean * scale
    z0, z1 = a0 * scale + shift, a1 * scale + shift
    z2, z3 = a2 * scale + shift, a3 * scale + shift
    o_ref[...] = jnp.maximum(jnp.maximum(z0, z1),
                             jnp.maximum(z2, z3)).astype(o_ref.dtype)


def _mlp_kernel(x_ref, w1_ref, b1_ref, w2_ref, b2_ref, w3_ref, b3_ref, o_ref):
    """Fused Linear(1024,384)+SELU -> Linear(384,192)+SELU -> Linear(192,128pad)."""
    h = _selu(jnp.dot(x_ref[...], w1_ref[...],
                      preferred_element_type=jnp.float32) + b1_ref[...])
    h = _selu(jnp.dot(h.astype(jnp.bfloat16), w2_ref[...],
                      preferred_element_type=jnp.float32) + b2_ref[...])
    o_ref[...] = jnp.dot(h.astype(jnp.bfloat16), w3_ref[...],
                         preferred_element_type=jnp.float32) + b3_ref[...]


# ----------------------------------------------------------------------------
# Wrappers
# ----------------------------------------------------------------------------
def conv1_relu(x_nhwc, w32x64, b):
    """Conv2d(1,64,5)+ReLU as im2col (Cin=1 -> tiny K=25, padded to 32) + tiled matmul."""
    B, H, W, _ = x_nhwc.shape
    k = 5
    Ho, Wo = H - k + 1, W - k + 1
    cols = [x_nhwc[:, dy:dy + Ho, dx:dx + Wo, :] for dy in range(k) for dx in range(k)]
    patches = jnp.concatenate(cols, axis=-1).reshape(B * Ho * Wo, k * k)
    patches = jnp.pad(patches, ((0, 0), (0, 32 - k * k)))        # K=25 -> 32, bf16
    M = B * Ho * Wo
    tm = _row_tile(M)
    out = pl.pallas_call(
        _matmul_bias_relu_kernel,
        out_shape=jax.ShapeDtypeStruct((M, 64), jnp.bfloat16),
        grid=(M // tm,),
        in_specs=[
            pl.BlockSpec((tm, 32), lambda i: (i, 0)),
            pl.BlockSpec((32, 64), lambda i: (0, 0)),
            pl.BlockSpec((1, 64), lambda i: (0, 0)),
        ],
        out_specs=pl.BlockSpec((tm, 64), lambda i: (i, 0)),
        compiler_params=pltpu.CompilerParams(
            dimension_semantics=("parallel",), vmem_limit_bytes=VMEM_LIMIT),
    )(patches, w32x64, b)
    return out.reshape(B, Ho, Wo, 64)


def maxpool_then_bn(x_nhwc, gamma, beta):
    """nn.MaxPool2d(2,2) -> nn.BatchNorm2d fused; input NHWC bf16, output f32."""
    B, H, W, C = x_nhwc.shape
    Ho, Wo = H // 2, W // 2
    M = B * Ho * Wo
    taps = [x_nhwc[:, i::2, j::2, :].reshape(M, C) for i in range(2) for j in range(2)]
    out = pl.pallas_call(
        _pool_then_bn_kernel,
        out_shape=jax.ShapeDtypeStruct((M, C), jnp.float32),
        grid=(1,),
        in_specs=[pl.BlockSpec((M, C), lambda i: (0, 0))] * 4
                 + [pl.BlockSpec((1, C), lambda i: (0, 0))] * 2,
        out_specs=pl.BlockSpec((M, C), lambda i: (0, 0)),
        compiler_params=pltpu.CompilerParams(
            dimension_semantics=("arbitrary",), vmem_limit_bytes=VMEM_LIMIT),
    )(*taps, gamma, beta)
    return out.reshape(B, Ho, Wo, C)


def conv2_relu(x_nhwc, w_taps, b):
    """Conv2d(64,64,5)+ReLU as a fused-im2col Pallas kernel, grid-tiled over batch."""
    B, H, W, Cin = x_nhwc.shape
    Ho, Wo = H - 4, W - 4
    Cout = w_taps.shape[2]
    tb = 1
    for t in range(min(B, 8), 0, -1):
        if B % t == 0:
            tb = t
            break
    out = pl.pallas_call(
        _conv2_relu_kernel,
        out_shape=jax.ShapeDtypeStruct((B * Ho * Wo, Cout), jnp.float32),
        grid=(B // tb,),
        in_specs=[
            pl.BlockSpec((tb, H, W, Cin), lambda i: (i, 0, 0, 0)),
            pl.BlockSpec((25, Cin, Cout), lambda i: (0, 0, 0)),
            pl.BlockSpec((1, Cout), lambda i: (0, 0)),
        ],
        out_specs=pl.BlockSpec((tb * Ho * Wo, Cout), lambda i: (i, 0)),
        compiler_params=pltpu.CompilerParams(
            dimension_semantics=("parallel",), vmem_limit_bytes=VMEM_LIMIT),
    )(x_nhwc, w_taps, b)
    return out.reshape(B, Ho, Wo, Cout)


def bn_then_maxpool(x_nhwc, gamma, beta):
    """nn.BatchNorm2d -> nn.MaxPool2d(2,2) fused; input NHWC f32, output bf16."""
    B, H, W, C = x_nhwc.shape
    Ho, Wo = H // 2, W // 2
    M = B * Ho * Wo
    taps = [x_nhwc[:, i::2, j::2, :].reshape(M, C) for i in range(2) for j in range(2)]
    out = pl.pallas_call(
        _bn_then_pool_kernel,
        out_shape=jax.ShapeDtypeStruct((M, C), jnp.bfloat16),
        grid=(1,),
        in_specs=[pl.BlockSpec((M, C), lambda i: (0, 0))] * 4
                 + [pl.BlockSpec((1, C), lambda i: (0, 0))] * 2,
        out_specs=pl.BlockSpec((M, C), lambda i: (0, 0)),
        compiler_params=pltpu.CompilerParams(
            dimension_semantics=("arbitrary",), vmem_limit_bytes=VMEM_LIMIT),
    )(*taps, gamma, beta)
    return out.reshape(B, Ho, Wo, C)


def mlp_head(x, w1, b1, w2, b2, w3, b3):
    """Fused fc1+SELU, fc2+SELU, fc3 (N padded to 128); all weights VMEM-resident."""
    B, K = x.shape
    N = w3.shape[1]
    tm = _row_tile(B, cap=256)
    out = pl.pallas_call(
        _mlp_kernel,
        out_shape=jax.ShapeDtypeStruct((B, N), jnp.float32),
        grid=(B // tm,),
        in_specs=[
            pl.BlockSpec((tm, K), lambda i: (i, 0)),
            pl.BlockSpec(w1.shape, lambda i: (0, 0)),
            pl.BlockSpec(b1.shape, lambda i: (0, 0)),
            pl.BlockSpec(w2.shape, lambda i: (0, 0)),
            pl.BlockSpec(b2.shape, lambda i: (0, 0)),
            pl.BlockSpec(w3.shape, lambda i: (0, 0)),
            pl.BlockSpec(b3.shape, lambda i: (0, 0)),
        ],
        out_specs=pl.BlockSpec((tm, N), lambda i: (i, 0)),
        compiler_params=pltpu.CompilerParams(
            dimension_semantics=("parallel",), vmem_limit_bytes=VMEM_LIMIT),
    )(x, w1, b1, w2, b2, w3, b3)
    return out


# ----------------------------------------------------------------------------
# Full forward (matches MNISTConvNet.forward)
# ----------------------------------------------------------------------------
def mnist_convnet_forward(x_nchw, pp):
    B = x_nchw.shape[0]
    x = jnp.transpose(x_nchw, (0, 2, 3, 1)).astype(jnp.bfloat16)   # NCHW -> NHWC
    x = conv1_relu(x, pp["conv1_w"], pp["conv1_b"])                # (B,24,24,64) bf16
    x = maxpool_then_bn(x, pp["bn1_g"], pp["bn1_b"])               # (B,12,12,64) f32
    x = conv2_relu(x, pp["conv2_w"], pp["conv2_b"])                # (B, 8, 8,64) f32
    x = bn_then_maxpool(x, pp["bn2_g"], pp["bn2_b"])               # (B, 4, 4,64) bf16
    # NHWC flatten; fc1 columns were pre-permuted to this order (no transpose needed)
    x = x.reshape(B, -1)                                           # (B, 1024)
    logits = mlp_head(x, pp["fc1_w"], pp["fc1_b"], pp["fc2_w"], pp["fc2_b"],
                      pp["fc3_w"], pp["fc3_b"])                    # (B, 128) f32
    return logits[:, :10]


# ----------------------------------------------------------------------------
# Params: torch-layout init + one-time (outside jit) repack for the kernels
# ----------------------------------------------------------------------------
def init_params(key, nChannels=1, ndf=64, k=5, w_out=4, h_out=4, nClasses=10):
    ks = jax.random.split(key, 14)
    n = lambda kk, shape, s: (s * jax.random.normal(kk, shape)).astype(jnp.float32)
    return {
        "conv1_w": n(ks[0], (ndf, nChannels, k, k), 0.1),
        "conv1_b": n(ks[1], (ndf,), 0.01),
        "bn1_g":   (1.0 + n(ks[2], (ndf,), 0.05)),
        "bn1_b":   n(ks[3], (ndf,), 0.05),
        "conv2_w": n(ks[4], (ndf, ndf, k, k), 0.02),
        "conv2_b": n(ks[5], (ndf,), 0.01),
        "bn2_g":   (1.0 + n(ks[6], (ndf,), 0.05)),
        "bn2_b":   n(ks[7], (ndf,), 0.05),
        "fc1_w":   n(ks[8], (384, ndf * w_out * h_out), 0.02),
        "fc1_b":   n(ks[9], (384,), 0.01),
        "fc2_w":   n(ks[10], (192, 384), 0.02),
        "fc2_b":   n(ks[11], (192,), 0.01),
        "fc3_w":   n(ks[12], (nClasses, 192), 0.02),
        "fc3_b":   n(ks[13], (nClasses,), 0.01),
    }


def prepare_params(p, ndf=64, k=5, w_out=4, h_out=4):
    """One-time host-side repack: pre-transpose/permute/pad weights, cast matmul
    operands to bf16 (keep biases / BN affine in f32)."""
    kk = k * k
    # conv1: (64,1,5,5) -> (25,64) [tap-major], pad K to 32
    c1 = p["conv1_w"].reshape(ndf, kk).T
    c1 = jnp.pad(c1, ((0, 32 - kk), (0, 0))).astype(jnp.bfloat16)
    # conv2: (Cout,Cin,5,5) -> (25, Cin, Cout) tap-major
    c2 = jnp.transpose(p["conv2_w"], (2, 3, 1, 0)).reshape(kk, ndf, ndf).astype(jnp.bfloat16)
    # fc1: permute input columns from NCHW-flatten (c*16+h*4+w) to NHWC-flatten (h*256+w*64+c)
    w1 = (p["fc1_w"].reshape(384, ndf, h_out, w_out)
          .transpose(0, 2, 3, 1).reshape(384, ndf * h_out * w_out).T)
    # fc3: transpose and pad N=10 -> 128 lanes
    n_cls = p["fc3_w"].shape[0]
    w3 = jnp.pad(p["fc3_w"].T, ((0, 0), (0, 128 - n_cls)))
    b3 = jnp.pad(p["fc3_b"], (0, 128 - n_cls))
    f32 = jnp.float32
    return {
        "conv1_w": c1, "conv1_b": p["conv1_b"].reshape(1, ndf).astype(f32),
        "bn1_g": p["bn1_g"].reshape(1, ndf).astype(f32),
        "bn1_b": p["bn1_b"].reshape(1, ndf).astype(f32),
        "conv2_w": c2, "conv2_b": p["conv2_b"].reshape(1, ndf).astype(f32),
        "bn2_g": p["bn2_g"].reshape(1, ndf).astype(f32),
        "bn2_b": p["bn2_b"].reshape(1, ndf).astype(f32),
        "fc1_w": w1.astype(jnp.bfloat16), "fc1_b": p["fc1_b"].reshape(1, 384).astype(f32),
        "fc2_w": p["fc2_w"].T.astype(jnp.bfloat16), "fc2_b": p["fc2_b"].reshape(1, 192).astype(f32),
        "fc3_w": w3.astype(jnp.bfloat16), "fc3_b": b3.reshape(1, 128).astype(f32),
    }


if __name__ == "__main__":
    key = jax.random.PRNGKey(0)
    pkey, xkey = jax.random.split(key)
    params = init_params(pkey)
    pp = prepare_params(params)          # one-time repack, outside jit
    # Input must be 28x28 so View(-1, 64*4*4) is consistent:
    # 28 -(conv5)-> 24 -(pool2)-> 12 -(conv5)-> 8 -(pool2)-> 4.
    x = jax.random.normal(xkey, (2, 1, 28, 28), dtype=jnp.float32)
    fwd = jax.jit(mnist_convnet_forward)
    out = jax.block_until_ready(fwd(x, pp))
    assert out.shape == (2, 10) and out.dtype == jnp.float32
    assert bool(jnp.all(jnp.isfinite(out)))
    print("KERNEL_OK")
</pallas_src>

<mosaic_0001>
module attributes {stable_mosaic.version = 11 : i64} {
  func.func @_matmul_bias_relu_kernel(%arg0: i32, %arg1: memref<384x32xbf16, #tpu.memory_space<vmem>>, %arg2: memref<32x64xbf16, #tpu.memory_space<vmem>>, %arg3: memref<1x64xf32, #tpu.memory_space<vmem>>, %arg4: memref<384x64xbf16, #tpu.memory_space<vmem>>) attributes {dimension_semantics = [#tpu.dimension_semantics<parallel>], iteration_bounds = array<i64: 3>, scalar_prefetch = 0 : i64, scratch_operands = 0 : i64, tpu.core_type = #tpu.core_type<tc>, window_params = [{transform_indices = @transform_0, window_bounds = array<i64: 384, 32>}, {pipeline_mode = #tpu.pipeline_mode<synchronous>, transform_indices = @transform_1, window_bounds = array<i64: 32, 64>}, {pipeline_mode = #tpu.pipeline_mode<synchronous>, transform_indices = @transform_2, window_bounds = array<i64: 1, 64>}, {transform_indices = @transform_3, window_bounds = array<i64: 384, 64>}]} {
    %c0 = arith.constant 0 : index
    %c0_0 = arith.constant 0 : index
    %0 = vector.load %arg1[%c0, %c0_0] : memref<384x32xbf16, #tpu.memory_space<vmem>>, vector<384x32xbf16>
    %c0_1 = arith.constant 0 : index
    %c0_2 = arith.constant 0 : index
    %1 = vector.load %arg2[%c0_1, %c0_2] : memref<32x64xbf16, #tpu.memory_space<vmem>>, vector<32x64xbf16>
    %cst = arith.constant dense<0.000000e+00> : vector<384x64xf32>
    %2 = tpu.matmul %0, %1, %cst {dimension_numbers = #tpu.dot_dimension_numbers<[1], [0], [0], [1], [0, 0, 1, 1], [], []>} : vector<384x32xbf16>, vector<32x64xbf16>, vector<384x64xf32> -> vector<384x64xf32>
    %c0_3 = arith.constant 0 : index
    %c0_4 = arith.constant 0 : index
    %3 = vector.load %arg3[%c0_3, %c0_4] : memref<1x64xf32, #tpu.memory_space<vmem>>, vector<1x64xf32>
    %4 = vector.broadcast %3 : vector<1x64xf32> to vector<384x64xf32>
    %5 = arith.addf %2, %4 : vector<384x64xf32>
    %cst_5 = arith.constant 0.000000e+00 : f32
    %6 = vector.broadcast %cst_5 : f32 to vector<384x64xf32>
    %7 = arith.maximumf %5, %6 : vector<384x64xf32>
    %8 = arith.truncf %7 : vector<384x64xf32> to vector<384x64xbf16>
    %c0_6 = arith.constant 0 : index
    %c0_7 = arith.constant 0 : index
    %9 = vector.load %arg4[%c0_6, %c0_7] : memref<384x64xbf16, #tpu.memory_space<vmem>>, vector<384x64xbf16>
    tpu.vector_store %arg4[%c0_6, %c0_7], %8 {strides = array<i32>} : memref<384x64xbf16, #tpu.memory_space<vmem>>, vector<384x64xbf16>,
    return
  }
  func.func @transform_0(%arg0: i32) -> (i32, i32) {
    %c0_i32 = arith.constant 0 : i32
    %c0_i32_0 = arith.constant 0 : i32
    return %arg0, %c0_i32 : i32, i32
  }
  func.func @transform_1(%arg0: i32) -> (i32, i32) {
    %c0_i32 = arith.constant 0 : i32
    %c0_i32_0 = arith.constant 0 : i32
    %c0_i32_1 = arith.constant 0 : i32
    return %c0_i32, %c0_i32_0 : i32, i32
  }
  func.func @transform_2(%arg0: i32) -> (i32, i32) {
    %c0_i32 = arith.constant 0 : i32
    %c0_i32_0 = arith.constant 0 : i32
    %c0_i32_1 = arith.constant 0 : i32
    return %c0_i32, %c0_i32_0 : i32, i32
  }
  func.func @transform_3(%arg0: i32) -> (i32, i32) {
    %c0_i32 = arith.constant 0 : i32
    %c0_i32_0 = arith.constant 0 : i32
    return %arg0, %c0_i32 : i32, i32
  }
}

module attributes {stable_mosaic.version = 11 : i64} {
  func.func @_pool_then_bn_kernel(%arg0: i32, %arg1: memref<288x64xbf16, #tpu.memory_space<vmem>>, %arg2: memref<288x64xbf16, #tpu.memory_space<vmem>>, %arg3: memref<288x64xbf16, #tpu.memory_space<vmem>>, %arg4: memref<288x64xbf16, #tpu.memory_space<vmem>>, %arg5: memref<1x64xf32, #tpu.memory_space<vmem>>, %arg6: memref<1x64xf32, #tpu.memory_space<vmem>>, %arg7: memref<288x64xf32, #tpu.memory_space<vmem>>) attributes {dimension_semantics = [#tpu.dimension_semantics<arbitrary>], iteration_bounds = array<i64: 1>, scalar_prefetch = 0 : i64, scratch_operands = 0 : i64, tpu.core_type = #tpu.core_type<tc>, window_params = [{pipeline_mode = #tpu.pipeline_mode<synchronous>, transform_indices = @transform_0, window_bounds = array<i64: 288, 64>}, {pipeline_mode = #tpu.pipeline_mode<synchronous>, transform_indices = @transform_1, window_bounds = array<i64: 288, 64>}, {pipeline_mode = #tpu.pipeline_mode<synchronous>, transform_indices = @transform_2, window_bounds = array<i64: 288, 64>}, {pipeline_mode = #tpu.pipeline_mode<synchronous>, transform_indices = @transform_3, window_bounds = array<i64: 288, 64>}, {pipeline_mode = #tpu.pipeline_mode<synchronous>, transform_indices = @transform_4, window_bounds = array<i64: 1, 64>}, {pipeline_mode = #tpu.pipeline_mode<synchronous>, transform_indices = @transform_5, window_bounds = array<i64: 1, 64>}, {pipeline_mode = #tpu.pipeline_mode<synchronous>, transform_indices = @transform_6, window_bounds = array<i64: 288, 64>}]} {
    %c0 = arith.constant 0 : index
    %c0_0 = arith.constant 0 : index
    %0 = vector.load %arg1[%c0, %c0_0] : memref<288x64xbf16, #tpu.memory_space<vmem>>, vector<288x64xbf16>
    %c0_1 = arith.constant 0 : index
    %c0_2 = arith.constant 0 : index
    %1 = vector.load %arg2[%c0_1, %c0_2] : memref<288x64xbf16, #tpu.memory_space<vmem>>, vector<288x64xbf16>
    %2 = arith.maximumf %0, %1 : vector<288x64xbf16>
    %c0_3 = arith.constant 0 : index
    %c0_4 = arith.constant 0 : index
    %3 = vector.load %arg3[%c0_3, %c0_4] : memref<288x64xbf16, #tpu.memory_space<vmem>>, vector<288x64xbf16>
    %c0_5 = arith.constant 0 : index
    %c0_6 = arith.constant 0 : index
    %4 = vector.load %arg4[%c0_5, %c0_6] : memref<288x64xbf16, #tpu.memory_space<vmem>>, vector<288x64xbf16>
    %5 = arith.maximumf %3, %4 : vector<288x64xbf16>
    %6 = arith.maximumf %2, %5 : vector<288x64xbf16>
    %7 = arith.extf %6 : vector<288x64xbf16> to vector<288x64xf32>
    %cst = arith.constant dense<0.000000e+00> : vector<64xf32>
    %8 = vector.multi_reduction <add>, %7, %cst [0] : vector<288x64xf32> to vector<64xf32>
    %9 = vector.shape_cast %8 : vector<64xf32> to vector<1x64xf32>
    %cst_7 = arith.constant 2.880000e+02 : f32
    %10 = vector.broadcast %cst_7 : f32 to vector<1x64xf32>
    %11 = arith.divf %9, %10 : vector<1x64xf32>
    %12 = vector.broadcast %11 : vector<1x64xf32> to vector<288x64xf32>
    %13 = arith.subf %7, %12 : vector<288x64xf32>
    %14 = arith.mulf %13, %13 : vector<288x64xf32>
    %cst_8 = arith.constant dense<0.000000e+00> : vector<64xf32>
    %15 = vector.multi_reduction <add>, %14, %cst_8 [0] : vector<288x64xf32> to vector<64xf32>
    %16 = vector.shape_cast %15 : vector<64xf32> to vector<1x64xf32>
    %cst_9 = arith.constant 2.880000e+02 : f32
    %17 = vector.broadcast %cst_9 : f32 to vector<1x64xf32>
    %18 = arith.divf %16, %17 : vector<1x64xf32>
    %cst_10 = arith.constant 9.99999974E-6 : f32
    %19 = vector.broadcast %cst_10 : f32 to vector<1x64xf32>
    %20 = arith.addf %18, %19 : vector<1x64xf32>
    %21 = math.rsqrt %20 : vector<1x64xf32>
    %c0_11 = arith.constant 0 : index
    %c0_12 = arith.constant 0 : index
    %22 = vector.load %arg5[%c0_11, %c0_12] : memref<1x64xf32, #tpu.memory_space<vmem>>, vector<1x64xf32>
    %23 = arith.mulf %21, %22 : vector<1x64xf32>
    %24 = vector.broadcast %11 : vector<1x64xf32> to vector<288x64xf32>
    %25 = arith.subf %7, %24 : vector<288x64xf32>
    %26 = vector.broadcast %23 : vector<1x64xf32> to vector<288x64xf32>
    %27 = arith.mulf %25, %26 : vector<288x64xf32>
    %c0_13 = arith.constant 0 : index
    %c0_14 = arith.constant 0 : index
    %28 = vector.load %arg6[%c0_13, %c0_14] : memref<1x64xf32, #tpu.memory_space<vmem>>, vector<1x64xf32>
    %29 = vector.broadcast %28 : vector<1x64xf32> to vector<288x64xf32>
    %30 = arith.addf %27, %29 : vector<288x64xf32>
    %c0_15 = arith.constant 0 : index
    %c0_16 = arith.constant 0 : index
    %31 = vector.load %arg7[%c0_15, %c0_16] : memref<288x64xf32, #tpu.memory_space<vmem>>, vector<288x64xf32>
    tpu.vector_store %arg7[%c0_15, %c0_16], %30 {strides = array<i32>} : memref<288x64xf32, #tpu.memory_space<vmem>>, vector<288x64xf32>,
    return
  }
  func.func @transform_0(%arg0: i32) -> (i32, i32) {
    %c0_i32 = arith.constant 0 : i32
    %c0_i32_0 = arith.constant 0 : i32
    %c0_i32_1 = arith.constant 0 : i32
    return %c0_i32, %c0_i32_0 : i32, i32
  }
  func.func @transform_1(%arg0: i32) -> (i32, i32) {
    %c0_i32 = arith.constant 0 : i32
    %c0_i32_0 = arith.constant 0 : i32
    %c0_i32_1 = arith.constant 0 : i32
    return %c0_i32, %c0_i32_0 : i32, i32
  }
  func.func @transform_2(%arg0: i32) -> (i32, i32) {
    %c0_i32 = arith.constant 0 : i32
    %c0_i32_0 = arith.constant 0 : i32
    %c0_i32_1 = arith.constant 0 : i32
    return %c0_i32, %c0_i32_0 : i32, i32
  }
  func.func @transform_3(%arg0: i32) -> (i32, i32) {
    %c0_i32 = arith.constant 0 : i32
    %c0_i32_0 = arith.constant 0 : i32
    %c0_i32_1 = arith.constant 0 : i32
    return %c0_i32, %c0_i32_0 : i32, i32
  }
  func.func @transform_4(%arg0: i32) -> (i32, i32) {
    %c0_i32 = arith.constant 0 : i32
    %c0_i32_0 = arith.constant 0 : i32
    %c0_i32_1 = arith.constant 0 : i32
    return %c0_i32, %c0_i32_0 : i32, i32
  }
  func.func @transform_5(%arg0: i32) -> (i32, i32) {
    %c0_i32 = arith.constant 0 : i32
    %c0_i32_0 = arith.constant 0 : i32
    %c0_i32_1 = arith.constant 0 : i32
    return %c0_i32, %c0_i32_0 : i32, i32
  }
  func.func @transform_6(%arg0: i32) -> (i32, i32) {
    %c0_i32 = arith.constant 0 : i32
    %c0_i32_0 = arith.constant 0 : i32
    %c0_i32_1 = arith.constant 0 : i32
    return %c0_i32, %c0_i32_0 : i32, i32
  }
}

module attributes {stable_mosaic.version = 11 : i64} {
  func.func @_conv2_relu_kernel(%arg0: i32, %arg1: memref<2x12x12x64xf32, #tpu.memory_space<vmem>>, %arg2: memref<25x64x64xbf16, #tpu.memory_space<vmem>>, %arg3: memref<1x64xf32, #tpu.memory_space<vmem>>, %arg4: memref<128x64xf32, #tpu.memory_space<vmem>>) attributes {dimension_semantics = [#tpu.dimension_semantics<parallel>], iteration_bounds = array<i64: 1>, scalar_prefetch = 0 : i64, scratch_operands = 0 : i64, tpu.core_type = #tpu.core_type<tc>, window_params = [{transform_indices = @transform_0, window_bounds = array<i64: 2, 12, 12, 64>}, {pipeline_mode = #tpu.pipeline_mode<synchronous>, transform_indices = @transform_1, window_bounds = array<i64: 25, 64, 64>}, {pipeline_mode = #tpu.pipeline_mode<synchronous>, transform_indices = @transform_2, window_bounds = array<i64: 1, 64>}, {transform_indices = @transform_3, window_bounds = array<i64: 128, 64>}]} {
    %cst = arith.constant 0.000000e+00 : f32
    %0 = vector.broadcast %cst : f32 to vector<128x64xf32>
    %c0 = arith.constant 0 : index
    %c0_0 = arith.constant 0 : index
    %c0_1 = arith.constant 0 : index
    %c0_2 = arith.constant 0 : index
    %1 = vector.load %arg1[%c0, %c0_0, %c0_1, %c0_2] : memref<2x12x12x64xf32, #tpu.memory_space<vmem>>, vector<2x8x8x64xf32>
    %2 = vector.shape_cast %1 : vector<2x8x8x64xf32> to vector<128x64xf32>
    %3 = arith.truncf %2 : vector<128x64xf32> to vector<128x64xbf16>
    %c0_3 = arith.constant 0 : index
    %c0_4 = arith.constant 0 : index
    %c0_5 = arith.constant 0 : index
    %4 = vector.load %arg2[%c0_3, %c0_4, %c0_5] : memref<25x64x64xbf16, #tpu.memory_space<vmem>>, vector<1x64x64xbf16>
    %5 = vector.shape_cast %4 : vector<1x64x64xbf16> to vector<64x64xbf16>
    %cst_6 = arith.constant dense<0.000000e+00> : vector<128x64xf32>
    %6 = tpu.matmul %3, %5, %cst_6 {dimension_numbers = #tpu.dot_dimension_numbers<[1], [0], [0], [1], [0, 0, 1, 1], [], []>} : vector<128x64xbf16>, vector<64x64xbf16>, vector<128x64xf32> -> vector<128x64xf32>
    %7 = arith.addf %0, %6 : vector<128x64xf32>
    %c0_7 = arith.constant 0 : index
    %c0_8 = arith.constant 0 : index
    %c1 = arith.constant 1 : index
    %c0_9 = arith.constant 0 : index
    %8 = vector.load %arg1[%c0_7, %c0_8, %c1, %c0_9] : memref<2x12x12x64xf32, #tpu.memory_space<vmem>>, vector<2x8x8x64xf32>
    %9 = vector.shape_cast %8 : vector<2x8x8x64xf32> to vector<128x64xf32>
    %10 = arith.truncf %9 : vector<128x64xf32> to vector<128x64xbf16>
    %c1_10 = arith.constant 1 : index
    %c0_11 = arith.constant 0 : index
    %c0_12 = arith.constant 0 : index
    %11 = vector.load %arg2[%c1_10, %c0_11, %c0_12] : memref<25x64x64xbf16, #tpu.memory_space<vmem>>, vector<1x64x64xbf16>
    %12 = vector.shape_cast %11 : vector<1x64x64xbf16> to vector<64x64xbf16>
    %cst_13 = arith.constant dense<0.000000e+00> : vector<128x64xf32>
    %13 = tpu.matmul %10, %12, %cst_13 {dimension_numbers = #tpu.dot_dimension_numbers<[1], [0], [0], [1], [0, 0, 1, 1], [], []>} : vector<128x64xbf16>, vector<64x64xbf16>, vector<128x64xf32> -> vector<128x64xf32>
    %14 = arith.addf %7, %13 : vector<128x64xf32>
    %c0_14 = arith.constant 0 : index
    %c0_15 = arith.constant 0 : index
    %c2 = arith.constant 2 : index
    %c0_16 = arith.constant 0 : index
    %15 = vector.load %arg1[%c0_14, %c0_15, %c2, %c0_16] : memref<2x12x12x64xf32, #tpu.memory_space<vmem>>, vector<2x8x8x64xf32>
    %16 = vector.shape_cast %15 : vector<2x8x8x64xf32> to vector<128x64xf32>
    %17 = arith.truncf %16 : vector<128x64xf32> to vector<128x64xbf16>
    %c2_17 = arith.constant 2 : index
    %c0_18 = arith.constant 0 : index
    %c0_19 = arith.constant 0 : index
    %18 = vector.load %arg2[%c2_17, %c0_18, %c0_19] : memref<25x64x64xbf16, #tpu.memory_space<vmem>>, vector<1x64x64xbf16>
    %19 = vector.shape_cast %18 : vector<1x64x64xbf16> to vector<64x64xbf16>
    %cst_20 = arith.constant dense<0.000000e+00> : vector<128x64xf32>
    %20 = tpu.matmul %17, %19, %cst_20 {dimension_numbers = #tpu.dot_dimension_numbers<[1], [0], [0], [1], [0, 0, 1, 1], [], []>} : vector<128x64xbf16>, vector<64x64xbf16>, vector<128x64xf32> -> vector<128x64xf32>
    %21 = arith.addf %14, %20 : vector<128x64xf32>
    %c0_21 = arith.constant 0 : index
    %c0_22 = arith.constant 0 : index
    %c3 = arith.constant 3 : index
    %c0_23 = arith.constant 0 : index
    %22 = vector.load %arg1[%c0_21, %c0_22, %c3, %c0_23] : memref<2x12x12x64xf32, #tpu.memory_space<vmem>>, vector<2x8x8x64xf32>
    %23 = vector.shape_cast %22 : vector<2x8x8x64xf32> to vector<128x64xf32>
    %24 = arith.truncf %23 : vector<128x64xf32> to vector<128x64xbf16>
    %c3_24 = arith.constant 3 : index
    %c0_25 = arith.constant 0 : index
    %c0_26 = arith.constant 0 : index
    %25 = vector.load %arg2[%c3_24, %c0_25, %c0_26] : memref<25x64x64xbf16, #tpu.memory_space<vmem>>, vector<1x64x64xbf16>
    %26 = vector.shape_cast %25 : vector<1x64x64xbf16> to vector<64x64xbf16>
    %cst_27 = arith.constant dense<0.000000e+00> : vector<128x64xf32>
    %27 = tpu.matmul %24, %26, %cst_27 {dimension_numbers = #tpu.dot_dimension_numbers<[1], [0], [0], [1], [0, 0, 1, 1], [], []>} : vector<128x64xbf16>, vector<64x64xbf16>, vector<128x64xf32> -> vector<128x64xf32>
    %28 = arith.addf %21, %27 : vector<128x64xf32>
    %c0_28 = arith.constant 0 : index
    %c0_29 = arith.constant 0 : index
    %c4 = arith.constant 4 : index
    %c0_30 = arith.constant 0 : index
    %29 = vector.load %arg1[%c0_28, %c0_29, %c4, %c0_30] : memref<2x12x12x64xf32, #tpu.memory_space<vmem>>, vector<2x8x8x64xf32>
    %30 = vector.shape_cast %29 : vector<2x8x8x64xf32> to vector<128x64xf32>
    %31 = arith.truncf %30 : vector<128x64xf32> to vector<128x64xbf16>
    %c4_31 = arith.constant 4 : index
    %c0_32 = arith.constant 0 : index
    %c0_33 = arith.constant 0 : index
    %32 = vector.load %arg2[%c4_31, %c0_32, %c0_33] : memref<25x64x64xbf16, #tpu.memory_space<vmem>>, vector<1x64x64xbf16>
    %33 = vector.shape_cast %32 : vector<1x64x64xbf16> to vector<64x64xbf16>
    %cst_34 = arith.constant dense<0.000000e+00> : vector<128x64xf32>
    %34 = tpu.matmul %31, %33, %cst_34 {dimension_numbers = #tpu.dot_dimension_numbers<[1], [0], [0], [1], [0, 0, 1, 1], [], []>} : vector<128x64xbf16>, vector<64x64xbf16>, vector<128x64xf32> -> vector<128x64xf32>
    %35 = arith.addf %28, %34 : vector<128x64xf32>
    %c0_35 = arith.constant 0 : index
    %c1_36 = arith.constant 1 : index
    %c0_37 = arith.constant 0 : index
    %c0_38 = arith.constant 0 : index
    %36 = vector.load %arg1[%c0_35, %c1_36, %c0_37, %c0_38] : memref<2x12x12x64xf32, #tpu.memory_space<vmem>>, vector<2x8x8x64xf32>
    %37 = vector.shape_cast %36 : vector<2x8x8x64xf32> to vector<128x64xf32>
    %38 = arith.truncf %37 : vector<128x64xf32> to vector<128x64xbf16>
    %c5 = arith.constant 5 : index
    %c0_39 = arith.constant 0 : index
    %c0_40 = arith.constant 0 : index
    %39 = vector.load %arg2[%c5, %c0_39, %c0_40] : memref<25x64x64xbf16, #tpu.memory_space<vmem>>, vector<1x64x64xbf16>
    %40 = vector.shape_cast %39 : vector<1x64x64xbf16> to vector<64x64xbf16>
    %cst_41 = arith.constant dense<0.000000e+00> : vector<128x64xf32>
    %41 = tpu.matmul %38, %40, %cst_41 {dimension_numbers = #tpu.dot_dimension_numbers<[1], [0], [0], [1], [0, 0, 1, 1], [], []>} : vector<128x64xbf16>, vector<64x64xbf16>, vector<128x64xf32> -> vector<128x64xf32>
    %42 = arith.addf %35, %41 : vector<128x64xf32>
    %c0_42 = arith.constant 0 : index
    %c1_43 = arith.constant 1 : index
    %c1_44 = arith.constant 1 : index
    %c0_45 = arith.constant 0 : index
    %43 = vector.load %arg1[%c0_42, %c1_43, %c1_44, %c0_45] : memref<2x12x12x64xf32, #tpu.memory_space<vmem>>, vector<2x8x8x64xf32>
    %44 = vector.shape_cast %43 : vector<2x8x8x64xf32> to vector<128x64xf32>
    %45 = arith.truncf %44 : vector<128x64xf32> to vector<128x64xbf16>
    %c6 = arith.constant 6 : index
    %c0_46 = arith.constant 0 : index
    %c0_47 = arith.constant 0 : index
    %46 = vector.load %arg2[%c6, %c0_46, %c0_47] : memref<25x64x64xbf16, #tpu.memory_space<vmem>>, vector<1x64x64xbf16>
    %47 = vector.shape_cast %46 : vector<1x64x64xbf16> to vector<64x64xbf16>
    %cst_48 = arith.constant dense<0.000000e+00> : vector<128x64xf32>
    %48 = tpu.matmul %45, %47, %cst_48 {dimension_numbers = #tpu.dot_dimension_numbers<[1], [0], [0], [1], [0, 0, 1, 1], [], []>} : vector<128x64xbf16>, vector<64x64xbf16>, vector<128x64xf32> -> vector<128x64xf32>
    %49 = arith.addf %42, %48 : vector<128x64xf32>
    %c0_49 = arith.constant 0 : index
    %c1_50 = arith.constant 1 : index
    %c2_51 = arith.constant 2 : index
    %c0_52 = arith.constant 0 : index
    %50 = vector.load %arg1[%c0_49, %c1_50, %c2_51, %c0_52] : memref<2x12x12x64xf32, #tpu.memory_space<vmem>>, vector<2x8x8x64xf32>
    %51 = vector.shape_cast %50 : vector<2x8x8x64xf32> to vector<128x64xf32>
    %52 = arith.truncf %51 : vector<128x64xf32> to vector<128x64xbf16>
    %c7 = arith.constant 7 : index
    %c0_53 = arith.constant 0 : index
    %c0_54 = arith.constant 0 : index
    %53 = vector.load %arg2[%c7, %c0_53, %c0_54] : memref<25x64x64xbf16, #tpu.memory_space<vmem>>, vector<1x64x64xbf16>
    %54 = vector.shape_cast %53 : vector<1x64x64xbf16> to vector<64x64xbf16>
    %cst_55 = arith.constant dense<0.000000e+00> : vector<128x64xf32>
    %55 = tpu.matmul %52, %54, %cst_55 {dimension_numbers = #tpu.dot_dimension_numbers<[1], [0], [0], [1], [0, 0, 1, 1], [], []>} : vector<128x64xbf16>, vector<64x64xbf16>, vector<128x64xf32> -> vector<128x64xf32>
    %56 = arith.addf %49, %55 : vector<128x64xf32>
    %c0_56 = arith.constant 0 : index
    %c1_57 = arith.constant 1 : index
    %c3_58 = arith.constant 3 : index
    %c0_59 = arith.constant 0 : index
    %57 = vector.load %arg1[%c0_56, %c1_57, %c3_58, %c0_59] : memref<2x12x12x64xf32, #tpu.memory_space<vmem>>, vector<2x8x8x64xf32>
    %58 = vector.shape_cast %57 : vector<2x8x8x64xf32> to vector<128x64xf32>
    %59 = arith.truncf %58 : vector<128x64xf32> to vector<128x64xbf16>
    %c8 = arith.constant 8 : index
    %c0_60 = arith.constant 0 : index
    %c0_61 = arith.constant 0 : index
    %60 = vector.load %arg2[%c8, %c0_60, %c0_61] : memref<25x64x64xbf16, #tpu.memory_space<vmem>>, vector<1x64x64xbf16>
    %61 = vector.shape_cast %60 : vector<1x64x64xbf16> to vector<64x64xbf16>
    %cst_62 = arith.constant dense<0.000000e+00> : vector<128x64xf32>
    %62 = tpu.matmul %59, %61, %cst_62 {dimension_numbers = #tpu.dot_dimension_numbers<[1], [0], [0], [1], [0, 0, 1, 1], [], []>} : vector<128x64xbf16>, vector<64x64xbf16>, vector<128x64xf32> -> vector<128x64xf32>
    %63 = arith.addf %56, %62 : vector<128x64xf32>
    %c0_63 = arith.constant 0 : index
    %c1_64 = arith.constant 1 : index
    %c4_65 = arith.constant 4 : index
    %c0_66 = arith.constant 0 : index
    %64 = vector.load %arg1[%c0_63, %c1_64, %c4_65, %c0_66] : memref<2x12x12x64xf32, #tpu.memory_space<vmem>>, vector<2x8x8x64xf32>
    %65 = vector.shape_cast %64 : vector<2x8x8x64xf32> to vector<128x64xf32>
    %66 = arith.truncf %65 : vector<128x64xf32> to vector<128x64xbf16>
    %c9 = arith.constant 9 : index
    %c0_67 = arith.constant 0 : index
    %c0_68 = arith.constant 0 : index
    %67 = vector.load %arg2[%c9, %c0_67, %c0_68] : memref<25x64x64xbf16, #tpu.memory_space<vmem>>, vector<1x64x64xbf16>
    %68 = vector.shape_cast %67 : vector<1x64x64xbf16> to vector<64x64xbf16>
    %cst_69 = arith.constant dense<0.000000e+00> : vector<128x64xf32>
    %69 = tpu.matmul %66, %68, %cst_69 {dimension_numbers = #tpu.dot_dimension_numbers<[1], [0], [0], [1], [0, 0, 1, 1], [], []>} : vector<128x64xbf16>, vector<64x64xbf16>, vector<128x64xf32> -> vector<128x64xf32>
    %70 = arith.addf %63, %69 : vector<128x64xf32>
    %c0_70 = arith.constant 0 : index
    %c2_71 = arith.constant 2 : index
    %c0_72 = arith.constant 0 : index
    %c0_73 = arith.constant 0 : index
    %71 = vector.load %arg1[%c0_70, %c2_71, %c0_72, %c0_73] : memref<2x12x12x64xf32, #tpu.memory_space<vmem>>, vector<2x8x8x64xf32>
    %72 = vector.shape_cast %71 : vector<2x8x8x64xf32> to vector<128x64xf32>
    %73 = arith.truncf %72 : vector<128x64xf32> to vector<128x64xbf16>
    %c10 = arith.constant 10 : index
    %c0_74 = arith.constant 0 : index
    %c0_75 = arith.constant 0 : index
    %74 = vector.load %arg2[%c10, %c0_74, %c0_75] : memref<25x64x64xbf16, #tpu.memory_space<vmem>>, vector<1x64x64xbf16>
    %75 = vector.shape_cast %74 : vector<1x64x64xbf16> to vector<64x64xbf16>
    %cst_76 = arith.constant dense<0.000000e+00> : vector<128x64xf32>
    %76 = tpu.matmul %73, %75, %cst_76 {dimension_numbers = #tpu.dot_dimension_numbers<[1], [0], [0], [1], [0, 0, 1, 1], [], []>} : vector<128x64xbf16>, vector<64x64xbf16>, vector<128x64xf32> -> vector<128x64xf32>
    %77 = arith.addf %70, %76 : vector<128x64xf32>
    %c0_77 = arith.constant 0 : index
    %c2_78 = arith.constant 2 : index
    %c1_79 = arith.constant 1 : index
    %c0_80 = arith.constant 0 : index
    %78 = vector.load %arg1[%c0_77, %c2_78, %c1_79, %c0_80] : memref<2x12x12x64xf32, #tpu.memory_space<vmem>>, vector<2x8x8x64xf32>
    %79 = vector.shape_cast %78 : vector<2x8x8x64xf32> to vector<128x64xf32>
    %80 = arith.truncf %79 : vector<128x64xf32> to vector<128x64xbf16>
    %c11 = arith.constant 11 : index
    %c0_81 = arith.constant 0 : index
    %c0_82 = arith.constant 0 : index
    %81 = vector.load %arg2[%c11, %c0_81, %c0_82] : memref<25x64x64xbf16, #tpu.memory_space<vmem>>, vector<1x64x64xbf16>
    %82 = vector.shape_cast %81 : vector<1x64x64xbf16> to vector<64x64xbf16>
    %cst_83 = arith.constant dense<0.000000e+00> : vector<128x64xf32>
    %83 = tpu.matmul %80, %82, %cst_83 {dimension_numbers = #tpu.dot_dimension_numbers<[1], [0], [0], [1], [0, 0, 1, 1], [], []>} : vector<128x64xbf16>, vector<64x64xbf16>, vector<128x64xf32> -> vector<128x64xf32>
    %84 = arith.addf %77, %83 : vector<128x64xf32>
    %c0_84 = arith.constant 0 : index
    %c2_85 = arith.constant 2 : index
    %c2_86 = arith.constant 2 : index
    %c0_87 = arith.constant 0 : index
    %85 = vector.load %arg1[%c0_84, %c2_85, %c2_86, %c0_87] : memref<2x12x12x64xf32, #tpu.memory_space<vmem>>, vector<2x8x8x64xf32>
    %86 = vector.shape_cast %85 : vector<2x8x8x64xf32> to vector<128x64xf32>
    %87 = arith.truncf %86 : vector<128x64xf32> to vector<128x64xbf16>
    %c12 = arith.constant 12 : index
    %c0_88 = arith.constant 0 : index
    %c0_89 = arith.constant 0 : index
    %88 = vector.load %arg2[%c12, %c0_88, %c0_89] : memref<25x64x64xbf16, #tpu.memory_space<vmem>>, vector<1x64x64xbf16>
    %89 = vector.shape_cast %88 : vector<1x64x64xbf16> to vector<64x64xbf16>
    %cst_90 = arith.constant dense<0.000000e+00> : vector<128x64xf32>
    %90 = tpu.matmul %87, %89, %cst_90 {dimension_numbers = #tpu.dot_dimension_numbers<[1], [0], [0], [1], [0, 0, 1, 1], [], []>} : vector<128x64xbf16>, vector<64x64xbf16>, vector<128x64xf32> -> vector<128x64xf32>
    %91 = arith.addf %84, %90 : vector<128x64xf32>
    %c0_91 = arith.constant 0 : index
    %c2_92 = arith.constant 2 : index
    %c3_93 = arith.constant 3 : index
    %c0_94 = arith.constant 0 : index
    %92 = vector.load %arg1[%c0_91, %c2_92, %c3_93, %c0_94] : memref<2x12x12x64xf32, #tpu.memory_space<vmem>>, vector<2x8x8x64xf32>
    %93 = vector.shape_cast %92 : vector<2x8x8x64xf32> to vector<128x64xf32>
    %94 = arith.truncf %93 : vector<128x64xf32> to vector<128x64xbf16>
    %c13 = arith.constant 13 : index
    %c0_95 = arith.constant 0 : index
    %c0_96 = arith.constant 0 : index
    %95 = vector.load %arg2[%c13, %c0_95, %c0_96] : memref<25x64x64xbf16, #tpu.memory_space<vmem>>, vector<1x64x64xbf16>
    %96 = vector.shape_cast %95 : vector<1x64x64xbf16> to vector<64x64xbf16>
    %cst_97 = arith.constant dense<0.000000e+00> : vector<128x64xf32>
    %97 = tpu.matmul %94, %96, %cst_97 {dimension_numbers = #tpu.dot_dimension_numbers<[1], [0], [0], [1], [0, 0, 1, 1], [], []>} : vector<128x64xbf16>, vector<64x64xbf16>, vector<128x64xf32> -> vector<128x64xf32>
    %98 = arith.addf %91, %97 : vector<128x64xf32>
    %c0_98 = arith.constant 0 : index
    %c2_99 = arith.constant 2 : index
    %c4_100 = arith.constant 4 : index
    %c0_101 = arith.constant 0 : index
    %99 = vector.load %arg1[%c0_98, %c2_99, %c4_100, %c0_101] : memref<2x12x12x64xf32, #tpu.memory_space<vmem>>, vector<2x8x8x64xf32>
    %100 = vector.shape_cast %99 : vector<2x8x8x64xf32> to vector<128x64xf32>
    %101 = arith.truncf %100 : vector<128x64xf32> to vector<128x64xbf16>
    %c14 = arith.constant 14 : index
    %c0_102 = arith.constant 0 : index
    %c0_103 = arith.constant 0 : index
    %102 = vector.load %arg2[%c14, %c0_102, %c0_103] : memref<25x64x64xbf16, #tpu.memory_space<vmem>>, vector<1x64x64xbf16>
    %103 = vector.shape_cast %102 : vector<1x64x64xbf16> to vector<64x64xbf16>
    %cst_104 = arith.constant dense<0.000000e+00> : vector<128x64xf32>
    %104 = tpu.matmul %101, %103, %cst_104 {dimension_numbers = #tpu.dot_dimension_numbers<[1], [0], [0], [1], [0, 0, 1, 1], [], []>} : vector<128x64xbf16>, vector<64x64xbf16>, vector<128x64xf32> -> vector<128x64xf32>
    %105 = arith.addf %98, %104 : vector<128x64xf32>
    %c0_105 = arith.constant 0 : index
    %c3_106 = arith.constant 3 : index
    %c0_107 = arith.constant 0 : index
    %c0_108 = arith.constant 0 : index
    %106 = vector.load %arg1[%c0_105, %c3_106, %c0_107, %c0_108] : memref<2x12x12x64xf32, #tpu.memory_space<vmem>>, vector<2x8x8x64xf32>
    %107 = vector.shape_cast %106 : vector<2x8x8x64xf32> to vector<128x64xf32>
    %108 = arith.truncf %107 : vector<128x64xf32> to vector<128x64xbf16>
    %c15 = arith.constant 15 : index
    %c0_109 = arith.constant 0 : index
    %c0_110 = arith.constant 0 : index
    %109 = vector.load %arg2[%c15, %c0_109, %c0_110] : memref<25x64x64xbf16, #tpu.memory_space<vmem>>, vector<1x64x64xbf16>
    %110 = vector.shape_cast %109 : vector<1x64x64xbf16> to vector<64x64xbf16>
    %cst_111 = arith.constant dense<0.000000e+00> : vector<128x64xf32>
    %111 = tpu.matmul %108, %110, %cst_111 {dimension_numbers = #tpu.dot_dimension_numbers<[1], [0], [0], [1], [0, 0, 1, 1], [], []>} : vector<128x64xbf16>, vector<64x64xbf16>, vector<128x64xf32> -> vector<128x64xf32>
    %112 = arith.addf %105, %111 : vector<128x64xf32>
    %c0_112 = arith.constant 0 : index
    %c3_113 = arith.constant 3 : index
    %c1_114 = arith.constant 1 : index
    %c0_115 = arith.constant 0 : index
    %113 = vector.load %arg1[%c0_112, %c3_113, %c1_114, %c0_115] : memref<2x12x12x64xf32, #tpu.memory_space<vmem>>, vector<2x8x8x64xf32>
    %114 = vector.shape_cast %113 : vector<2x8x8x64xf32> to vector<128x64xf32>
    %115 = arith.truncf %114 : vector<128x64xf32> to vector<128x64xbf16>
    %c16 = arith.constant 16 : index
    %c0_116 = arith.constant 0 : index
    %c0_117 = arith.constant 0 : index
    %116 = vector.load %arg2[%c16, %c0_116, %c0_117] : memref<25x64x64xbf16, #tpu.memory_space<vmem>>, vector<1x64x64xbf16>
    %117 = vector.shape_cast %116 : vector<1x64x64xbf16> to vector<64x64xbf16>
    %cst_118 = arith.constant dense<0.000000e+00> : vector<128x64xf32>
    %118 = tpu.matmul %115, %117, %cst_118 {dimension_numbers = #tpu.dot_dimension_numbers<[1], [0], [0], [1], [0, 0, 1, 1], [], []>} : vector<128x64xbf16>, vector<64x64xbf16>, vector<128x64xf32> -> vector<128x64xf32>
    %119 = arith.addf %112, %118 : vector<128x64xf32>
    %c0_119 = arith.constant 0 : index
    %c3_120 = arith.constant 3 : index
    %c2_121 = arith.constant 2 : index
    %c0_122 = arith.constant 0 : index
    %120 = vector.load %arg1[%c0_119, %c3_120, %c2_121, %c0_122] : memref<2x12x12x64xf32, #tpu.memory_space<vmem>>, vector<2x8x8x64xf32>
    %121 = vector.shape_cast %120 : vector<2x8x8x64xf32> to vector<128x64xf32>
    %122 = arith.truncf %121 : vector<128x64xf32> to vector<128x64xbf16>
    %c17 = arith.constant 17 : index
    %c0_123 = arith.constant 0 : index
    %c0_124 = arith.constant 0 : index
    %123 = vector.load %arg2[%c17, %c0_123, %c0_124] : memref<25x64x64xbf16, #tpu.memory_space<vmem>>, vector<1x64x64xbf16>
    %124 = vector.shape_cast %123 : vector<1x64x64xbf16> to vector<64x64xbf16>
    %cst_125 = arith.constant dense<0.000000e+00> : vector<128x64xf32>
    %125 = tpu.matmul %122, %124, %cst_125 {dimension_numbers = #tpu.dot_dimension_numbers<[1], [0], [0], [1], [0, 0, 1, 1], [], []>} : vector<128x64xbf16>, vector<64x64xbf16>, vector<128x64xf32> -> vector<128x64xf32>
    %126 = arith.addf %119, %125 : vector<128x64xf32>
    %c0_126 = arith.constant 0 : index
    %c3_127 = arith.constant 3 : index
    %c3_128 = arith.constant 3 : index
    %c0_129 = arith.constant 0 : index
    %127 = vector.load %arg1[%c0_126, %c3_127, %c3_128, %c0_129] : memref<2x12x12x64xf32, #tpu.memory_space<vmem>>, vector<2x8x8x64xf32>
    %128 = vector.shape_cast %127 : vector<2x8x8x64xf32> to vector<128x64xf32>
    %129 = arith.truncf %128 : vector<128x64xf32> to vector<128x64xbf16>
    %c18 = arith.constant 18 : index
    %c0_130 = arith.constant 0 : index
    %c0_131 = arith.constant 0 : index
    %130 = vector.load %arg2[%c18, %c0_130, %c0_131] : memref<25x64x64xbf16, #tpu.memory_space<vmem>>, vector<1x64x64xbf16>
    %131 = vector.shape_cast %130 : vector<1x64x64xbf16> to vector<64x64xbf16>
    %cst_132 = arith.constant dense<0.000000e+00> : vector<128x64xf32>
    %132 = tpu.matmul %129, %131, %cst_132 {dimension_numbers = #tpu.dot_dimension_numbers<[1], [0], [0], [1], [0, 0, 1, 1], [], []>} : vector<128x64xbf16>, vector<64x64xbf16>, vector<128x64xf32> -> vector<128x64xf32>
    %133 = arith.addf %126, %132 : vector<128x64xf32>
    %c0_133 = arith.constant 0 : index
    %c3_134 = arith.constant 3 : index
    %c4_135 = arith.constant 4 : index
    %c0_136 = arith.constant 0 : index
    %134 = vector.load %arg1[%c0_133, %c3_134, %c4_135, %c0_136] : memref<2x12x12x64xf32, #tpu.memory_space<vmem>>, vector<2x8x8x64xf32>
    %135 = vector.shape_cast %134 : vector<2x8x8x64xf32> to vector<128x64xf32>
    %136 = arith.truncf %135 : vector<128x64xf32> to vector<128x64xbf16>
    %c19 = arith.constant 19 : index
    %c0_137 = arith.constant 0 : index
    %c0_138 = arith.constant 0 : index
    %137 = vector.load %arg2[%c19, %c0_137, %c0_138] : memref<25x64x64xbf16, #tpu.memory_space<vmem>>, vector<1x64x64xbf16>
    %138 = vector.shape_cast %137 : vector<1x64x64xbf16> to vector<64x64xbf16>
    %cst_139 = arith.constant dense<0.000000e+00> : vector<128x64xf32>
    %139 = tpu.matmul %136, %138, %cst_139 {dimension_numbers = #tpu.dot_dimension_numbers<[1], [0], [0], [1], [0, 0, 1, 1], [], []>} : vector<128x64xbf16>, vector<64x64xbf16>, vector<128x64xf32> -> vector<128x64xf32>
    %140 = arith.addf %133, %139 : vector<128x64xf32>
    %c0_140 = arith.constant 0 : index
    %c4_141 = arith.constant 4 : index
    %c0_142 = arith.constant 0 : index
    %c0_143 = arith.constant 0 : index
    %141 = vector.load %arg1[%c0_140, %c4_141, %c0_142, %c0_143] : memref<2x12x12x64xf32, #tpu.memory_space<vmem>>, vector<2x8x8x64xf32>
    %142 = vector.shape_cast %141 : vector<2x8x8x64xf32> to vector<128x64xf32>
    %143 = arith.truncf %142 : vector<128x64xf32> to vector<128x64xbf16>
    %c20 = arith.constant 20 : index
    %c0_144 = arith.constant 0 : index
    %c0_145 = arith.constant 0 : index
    %144 = vector.load %arg2[%c20, %c0_144, %c0_145] : memref<25x64x64xbf16, #tpu.memory_space<vmem>>, vector<1x64x64xbf16>
    %145 = vector.shape_cast %144 : vector<1x64x64xbf16> to vector<64x64xbf16>
    %cst_146 = arith.constant dense<0.000000e+00> : vector<128x64xf32>
    %146 = tpu.matmul %143, %145, %cst_146 {dimension_numbers = #tpu.dot_dimension_numbers<[1], [0], [0], [1], [0, 0, 1, 1], [], []>} : vector<128x64xbf16>, vector<64x64xbf16>, vector<128x64xf32> -> vector<128x64xf32>
    %147 = arith.addf %140, %146 : vector<128x64xf32>
    %c0_147 = arith.constant 0 : index
    %c4_148 = arith.constant 4 : index
    %c1_149 = arith.constant 1 : index
    %c0_150 = arith.constant 0 : index
    %148 = vector.load %arg1[%c0_147, %c4_148, %c1_149, %c0_150] : memref<2x12x12x64xf32, #tpu.memory_space<vmem>>, vector<2x8x8x64xf32>
    %149 = vector.shape_cast %148 : vector<2x8x8x64xf32> to vector<128x64xf32>
    %150 = arith.truncf %149 : vector<128x64xf32> to vector<128x64xbf16>
    %c21 = arith.constant 21 : index
    %c0_151 = arith.constant 0 : index
    %c0_152 = arith.constant 0 : index
    %151 = vector.load %arg2[%c21, %c0_151, %c0_152] : memref<25x64x64xbf16, #tpu.memory_space<vmem>>, vector<1x64x64xbf16>
    %152 = vector.shape_cast %151 : vector<1x64x64xbf16> to vector<64x64xbf16>
    %cst_153 = arith.constant dense<0.000000e+00> : vector<128x64xf32>
    %153 = tpu.matmul %150, %152, %cst_153 {dimension_numbers = #tpu.dot_dimension_numbers<[1], [0], [0], [1], [0, 0, 1, 1], [], []>} : vector<128x64xbf16>, vector<64x64xbf16>, vector<128x64xf32> -> vector<128x64xf32>
    %154 = arith.addf %147, %153 : vector<128x64xf32>
    %c0_154 = arith.constant 0 : index
    %c4_155 = arith.constant 4 : index
    %c2_156 = arith.constant 2 : index
    %c0_157 = arith.constant 0 : index
    %155 = vector.load %arg1[%c0_154, %c4_155, %c2_156, %c0_157] : memref<2x12x12x64xf32, #tpu.memory_space<vmem>>, vector<2x8x8x64xf32>
    %156 = vector.shape_cast %155 : vector<2x8x8x64xf32> to vector<128x64xf32>
    %157 = arith.truncf %156 : vector<128x64xf32> to vector<128x64xbf16>
    %c22 = arith.constant 22 : index
    %c0_158 = arith.constant 0 : index
    %c0_159 = arith.constant 0 : index
    %158 = vector.load %arg2[%c22, %c0_158, %c0_159] : memref<25x64x64xbf16, #tpu.memory_space<vmem>>, vector<1x64x64xbf16>
    %159 = vector.shape_cast %158 : vector<1x64x64xbf16> to vector<64x64xbf16>
    %cst_160 = arith.constant dense<0.000000e+00> : vector<128x64xf32>
    %160 = tpu.matmul %157, %159, %cst_160 {dimension_numbers = #tpu.dot_dimension_numbers<[1], [0], [0], [1], [0, 0, 1, 1], [], []>} : vector<128x64xbf16>, vector<64x64xbf16>, vector<128x64xf32> -> vector<128x64xf32>
    %161 = arith.addf %154, %160 : vector<128x64xf32>
    %c0_161 = arith.constant 0 : index
    %c4_162 = arith.constant 4 : index
    %c3_163 = arith.constant 3 : index
    %c0_164 = arith.constant 0 : index
    %162 = vector.load %arg1[%c0_161, %c4_162, %c3_163, %c0_164] : memref<2x12x12x64xf32, #tpu.memory_space<vmem>>, vector<2x8x8x64xf32>
    %163 = vector.shape_cast %162 : vector<2x8x8x64xf32> to vector<128x64xf32>
    %164 = arith.truncf %163 : vector<128x64xf32> to vector<128x64xbf16>
    %c23 = arith.constant 23 : index
    %c0_165 = arith.constant 0 : index
    %c0_166 = arith.constant 0 : index
    %165 = vector.load %arg2[%c23, %c0_165, %c0_166] : memref<25x64x64xbf16, #tpu.memory_space<vmem>>, vector<1x64x64xbf16>
    %166 = vector.shape_cast %165 : vector<1x64x64xbf16> to vector<64x64xbf16>
    %cst_167 = arith.constant dense<0.000000e+00> : vector<128x64xf32>
    %167 = tpu.matmul %164, %166, %cst_167 {dimension_numbers = #tpu.dot_dimension_numbers<[1], [0], [0], [1], [0, 0, 1, 1], [], []>} : vector<128x64xbf16>, vector<64x64xbf16>, vector<128x64xf32> -> vector<128x64xf32>
    %168 = arith.addf %161, %167 : vector<128x64xf32>
    %c0_168 = arith.constant 0 : index
    %c4_169 = arith.constant 4 : index
    %c4_170 = arith.constant 4 : index
    %c0_171 = arith.constant 0 : index
    %169 = vector.load %arg1[%c0_168, %c4_169, %c4_170, %c0_171] : memref<2x12x12x64xf32, #tpu.memory_space<vmem>>, vector<2x8x8x64xf32>
    %170 = vector.shape_cast %169 : vector<2x8x8x64xf32> to vector<128x64xf32>
    %171 = arith.truncf %170 : vector<128x64xf32> to vector<128x64xbf16>
    %c24 = arith.constant 24 : index
    %c0_172 = arith.constant 0 : index
    %c0_173 = arith.constant 0 : index
    %172 = vector.load %arg2[%c24, %c0_172, %c0_173] : memref<25x64x64xbf16, #tpu.memory_space<vmem>>, vector<1x64x64xbf16>
    %173 = vector.shape_cast %172 : vector<1x64x64xbf16> to vector<64x64xbf16>
    %cst_174 = arith.constant dense<0.000000e+00> : vector<128x64xf32>
    %174 = tpu.matmul %171, %173, %cst_174 {dimension_numbers = #tpu.dot_dimension_numbers<[1], [0], [0], [1], [0, 0, 1, 1], [], []>} : vector<128x64xbf16>, vector<64x64xbf16>, vector<128x64xf32> -> vector<128x64xf32>
    %175 = arith.addf %168, %174 : vector<128x64xf32>
    %c0_175 = arith.constant 0 : index
    %c0_176 = arith.constant 0 : index
    %176 = vector.load %arg3[%c0_175, %c0_176] : memref<1x64xf32, #tpu.memory_space<vmem>>, vector<1x64xf32>
    %177 = vector.broadcast %176 : vector<1x64xf32> to vector<128x64xf32>
    %178 = arith.addf %175, %177 : vector<128x64xf32>
    %cst_177 = arith.constant 0.000000e+00 : f32
    %179 = vector.broadcast %cst_177 : f32 to vector<128x64xf32>
    %180 = arith.maximumf %178, %179 : vector<128x64xf32>
    %c0_178 = arith.constant 0 : index
    %c0_179 = arith.constant 0 : index
    %181 = vector.load %arg4[%c0_178, %c0_179] : memref<128x64xf32, #tpu.memory_space<vmem>>, vector<128x64xf32>
    tpu.vector_store %arg4[%c0_178, %c0_179], %180 {strides = array<i32>} : memref<128x64xf32, #tpu.memory_space<vmem>>, vector<128x64xf32>,
    return
  }
  func.func @transform_0(%arg0: i32) -> (i32, i32, i32, i32) {
    %c0_i32 = arith.constant 0 : i32
    %c0_i32_0 = arith.constant 0 : i32
    %c0_i32_1 = arith.constant 0 : i32
    %c0_i32_2 = arith.constant 0 : i32
    return %arg0, %c0_i32, %c0_i32_0, %c0_i32_1 : i32, i32, i32, i32
  }
  func.func @transform_1(%arg0: i32) -> (i32, i32, i32) {
    %c0_i32 = arith.constant 0 : i32
    %c0_i32_0 = arith.constant 0 : i32
    %c0_i32_1 = arith.constant 0 : i32
    %c0_i32_2 = arith.constant 0 : i32
    return %c0_i32, %c0_i32_0, %c0_i32_1 : i32, i32, i32
  }
  func.func @transform_2(%arg0: i32) -> (i32, i32) {
    %c0_i32 = arith.constant 0 : i32
    %c0_i32_0 = arith.constant 0 : i32
    %c0_i32_1 = arith.constant 0 : i32
    return %c0_i32, %c0_i32_0 : i32, i32
  }
  func.func @transform_3(%arg0: i32) -> (i32, i32) {
    %c0_i32 = arith.constant 0 : i32
    %c0_i32_0 = arith.constant 0 : i32
    return %arg0, %c0_i32 : i32, i32
  }
}

module attributes {stable_mosaic.version = 11 : i64} {
  func.func @_bn_then_pool_kernel(%arg0: i32, %arg1: memref<32x64xf32, #tpu.memory_space<vmem>>, %arg2: memref<32x64xf32, #tpu.memory_space<vmem>>, %arg3: memref<32x64xf32, #tpu.memory_space<vmem>>, %arg4: memref<32x64xf32, #tpu.memory_space<vmem>>, %arg5: memref<1x64xf32, #tpu.memory_space<vmem>>, %arg6: memref<1x64xf32, #tpu.memory_space<vmem>>, %arg7: memref<32x64xbf16, #tpu.memory_space<vmem>>) attributes {dimension_semantics = [#tpu.dimension_semantics<arbitrary>], iteration_bounds = array<i64: 1>, scalar_prefetch = 0 : i64, scratch_operands = 0 : i64, tpu.core_type = #tpu.core_type<tc>, window_params = [{pipeline_mode = #tpu.pipeline_mode<synchronous>, transform_indices = @transform_0, window_bounds = array<i64: 32, 64>}, {pipeline_mode = #tpu.pipeline_mode<synchronous>, transform_indices = @transform_1, window_bounds = array<i64: 32, 64>}, {pipeline_mode = #tpu.pipeline_mode<synchronous>, transform_indices = @transform_2, window_bounds = array<i64: 32, 64>}, {pipeline_mode = #tpu.pipeline_mode<synchronous>, transform_indices = @transform_3, window_bounds = array<i64: 32, 64>}, {pipeline_mode = #tpu.pipeline_mode<synchronous>, transform_indices = @transform_4, window_bounds = array<i64: 1, 64>}, {pipeline_mode = #tpu.pipeline_mode<synchronous>, transform_indices = @transform_5, window_bounds = array<i64: 1, 64>}, {pipeline_mode = #tpu.pipeline_mode<synchronous>, transform_indices = @transform_6, window_bounds = array<i64: 32, 64>}]} {
    %c0 = arith.constant 0 : index
    %c0_0 = arith.constant 0 : index
    %0 = vector.load %arg1[%c0, %c0_0] : memref<32x64xf32, #tpu.memory_space<vmem>>, vector<32x64xf32>
    %c0_1 = arith.constant 0 : index
    %c0_2 = arith.constant 0 : index
    %1 = vector.load %arg2[%c0_1, %c0_2] : memref<32x64xf32, #tpu.memory_space<vmem>>, vector<32x64xf32>
    %c0_3 = arith.constant 0 : index
    %c0_4 = arith.constant 0 : index
    %2 = vector.load %arg3[%c0_3, %c0_4] : memref<32x64xf32, #tpu.memory_space<vmem>>, vector<32x64xf32>
    %c0_5 = arith.constant 0 : index
    %c0_6 = arith.constant 0 : index
    %3 = vector.load %arg4[%c0_5, %c0_6] : memref<32x64xf32, #tpu.memory_space<vmem>>, vector<32x64xf32>
    %cst = arith.constant dense<0.000000e+00> : vector<64xf32>
    %4 = vector.multi_reduction <add>, %0, %cst [0] : vector<32x64xf32> to vector<64xf32>
    %5 = vector.shape_cast %4 : vector<64xf32> to vector<1x64xf32>
    %cst_7 = arith.constant dense<0.000000e+00> : vector<64xf32>
    %6 = vector.multi_reduction <add>, %1, %cst_7 [0] : vector<32x64xf32> to vector<64xf32>
    %7 = vector.shape_cast %6 : vector<64xf32> to vector<1x64xf32>
    %8 = arith.addf %5, %7 : vector<1x64xf32>
    %cst_8 = arith.constant dense<0.000000e+00> : vector<64xf32>
    %9 = vector.multi_reduction <add>, %2, %cst_8 [0] : vector<32x64xf32> to vector<64xf32>
    %10 = vector.shape_cast %9 : vector<64xf32> to vector<1x64xf32>
    %11 = arith.addf %8, %10 : vector<1x64xf32>
    %cst_9 = arith.constant dense<0.000000e+00> : vector<64xf32>
    %12 = vector.multi_reduction <add>, %3, %cst_9 [0] : vector<32x64xf32> to vector<64xf32>
    %13 = vector.shape_cast %12 : vector<64xf32> to vector<1x64xf32>
    %14 = arith.addf %11, %13 : vector<1x64xf32>
    %cst_10 = arith.constant 1.280000e+02 : f32
    %15 = vector.broadcast %cst_10 : f32 to vector<1x64xf32>
    %16 = arith.divf %14, %15 : vector<1x64xf32>
    %17 = vector.broadcast %16 : vector<1x64xf32> to vector<32x64xf32>
    %18 = arith.subf %0, %17 : vector<32x64xf32>
    %19 = arith.mulf %18, %18 : vector<32x64xf32>
    %cst_11 = arith.constant dense<0.000000e+00> : vector<64xf32>
    %20 = vector.multi_reduction <add>, %19, %cst_11 [0] : vector<32x64xf32> to vector<64xf32>
    %21 = vector.shape_cast %20 : vector<64xf32> to vector<1x64xf32>
    %22 = vector.broadcast %16 : vector<1x64xf32> to vector<32x64xf32>
    %23 = arith.subf %1, %22 : vector<32x64xf32>
    %24 = arith.mulf %23, %23 : vector<32x64xf32>
    %cst_12 = arith.constant dense<0.000000e+00> : vector<64xf32>
    %25 = vector.multi_reduction <add>, %24, %cst_12 [0] : vector<32x64xf32> to vector<64xf32>
    %26 = vector.shape_cast %25 : vector<64xf32> to vector<1x64xf32>
    %27 = arith.addf %21, %26 : vector<1x64xf32>
    %28 = vector.broadcast %16 : vector<1x64xf32> to vector<32x64xf32>
    %29 = arith.subf %2, %28 : vector<32x64xf32>
    %30 = arith.mulf %29, %29 : vector<32x64xf32>
    %cst_13 = arith.constant dense<0.000000e+00> : vector<64xf32>
    %31 = vector.multi_reduction <add>, %30, %cst_13 [0] : vector<32x64xf32> to vector<64xf32>
    %32 = vector.shape_cast %31 : vector<64xf32> to vector<1x64xf32>
    %33 = arith.addf %27, %32 : vector<1x64xf32>
    %34 = vector.broadcast %16 : vector<1x64xf32> to vector<32x64xf32>
    %35 = arith.subf %3, %34 : vector<32x64xf32>
    %36 = arith.mulf %35, %35 : vector<32x64xf32>
    %cst_14 = arith.constant dense<0.000000e+00> : vector<64xf32>
    %37 = vector.multi_reduction <add>, %36, %cst_14 [0] : vector<32x64xf32> to vector<64xf32>
    %38 = vector.shape_cast %37 : vector<64xf32> to vector<1x64xf32>
    %39 = arith.addf %33, %38 : vector<1x64xf32>
    %cst_15 = arith.constant 1.280000e+02 : f32
    %40 = vector.broadcast %cst_15 : f32 to vector<1x64xf32>
    %41 = arith.divf %39, %40 : vector<1x64xf32>
    %cst_16 = arith.constant 9.99999974E-6 : f32
    %42 = vector.broadcast %cst_16 : f32 to vector<1x64xf32>
    %43 = arith.addf %41, %42 : vector<1x64xf32>
    %44 = math.rsqrt %43 : vector<1x64xf32>
    %c0_17 = arith.constant 0 : index
    %c0_18 = arith.constant 0 : index
    %45 = vector.load %arg5[%c0_17, %c0_18] : memref<1x64xf32, #tpu.memory_space<vmem>>, vector<1x64xf32>
    %46 = arith.mulf %44, %45 : vector<1x64xf32>
    %c0_19 = arith.constant 0 : index
    %c0_20 = arith.constant 0 : index
    %47 = vector.load %arg6[%c0_19, %c0_20] : memref<1x64xf32, #tpu.memory_space<vmem>>, vector<1x64xf32>
    %48 = arith.mulf %16, %46 : vector<1x64xf32>
    %49 = arith.subf %47, %48 : vector<1x64xf32>
    %50 = vector.broadcast %46 : vector<1x64xf32> to vector<32x64xf32>
    %51 = arith.mulf %0, %50 : vector<32x64xf32>
    %52 = vector.broadcast %49 : vector<1x64xf32> to vector<32x64xf32>
    %53 = arith.addf %51, %52 : vector<32x64xf32>
    %54 = vector.broadcast %46 : vector<1x64xf32> to vector<32x64xf32>
    %55 = arith.mulf %1, %54 : vector<32x64xf32>
    %56 = vector.broadcast %49 : vector<1x64xf32> to vector<32x64xf32>
    %57 = arith.addf %55, %56 : vector<32x64xf32>
    %58 = vector.broadcast %46 : vector<1x64xf32> to vector<32x64xf32>
    %59 = arith.mulf %2, %58 : vector<32x64xf32>
    %60 = vector.broadcast %49 : vector<1x64xf32> to vector<32x64xf32>
    %61 = arith.addf %59, %60 : vector<32x64xf32>
    %62 = vector.broadcast %46 : vector<1x64xf32> to vector<32x64xf32>
    %63 = arith.mulf %3, %62 : vector<32x64xf32>
    %64 = vector.broadcast %49 : vector<1x64xf32> to vector<32x64xf32>
    %65 = arith.addf %63, %64 : vector<32x64xf32>
    %66 = arith.maximumf %53, %57 : vector<32x64xf32>
    %67 = arith.maximumf %61, %65 : vector<32x64xf32>
    %68 = arith.maximumf %66, %67 : vector<32x64xf32>
    %69 = arith.truncf %68 : vector<32x64xf32> to vector<32x64xbf16>
    %c0_21 = arith.constant 0 : index
    %c0_22 = arith.constant 0 : index
    %70 = vector.load %arg7[%c0_21, %c0_22] : memref<32x64xbf16, #tpu.memory_space<vmem>>, vector<32x64xbf16>
    tpu.vector_store %arg7[%c0_21, %c0_22], %69 {strides = array<i32>} : memref<32x64xbf16, #tpu.memory_space<vmem>>, vector<32x64xbf16>,
    return
  }
  func.func @transform_0(%arg0: i32) -> (i32, i32) {
    %c0_i32 = arith.constant 0 : i32
    %c0_i32_0 = arith.constant 0 : i32
    %c0_i32_1 = arith.constant 0 : i32
    return %c0_i32, %c0_i32_0 : i32, i32
  }
  func.func @transform_1(%arg0: i32) -> (i32, i32) {
    %c0_i32 = arith.constant 0 : i32
    %c0_i32_0 = arith.constant 0 : i32
    %c0_i32_1 = arith.constant 0 : i32
    return %c0_i32, %c0_i32_0 : i32, i32
  }
  func.func @transform_2(%arg0: i32) -> (i32, i32) {
    %c0_i32 = arith.constant 0 : i32
    %c0_i32_0 = arith.constant 0 : i32
    %c0_i32_1 = arith.constant 0 : i32
    return %c0_i32, %c0_i32_0 : i32, i32
  }
  func.func @transform_3(%arg0: i32) -> (i32, i32) {
    %c0_i32 = arith.constant 0 : i32
    %c0_i32_0 = arith.constant 0 : i32
    %c0_i32_1 = arith.constant 0 : i32
    return %c0_i32, %c0_i32_0 : i32, i32
  }
  func.func @transform_4(%arg0: i32) -> (i32, i32) {
    %c0_i32 = arith.constant 0 : i32
    %c0_i32_0 = arith.constant 0 : i32
    %c0_i32_1 = arith.constant 0 : i32
    return %c0_i32, %c0_i32_0 : i32, i32
  }
  func.func @transform_5(%arg0: i32) -> (i32, i32) {
    %c0_i32 = arith.constant 0 : i32
    %c0_i32_0 = arith.constant 0 : i32
    %c0_i32_1 = arith.constant 0 : i32
    return %c0_i32, %c0_i32_0 : i32, i32
  }
  func.func @transform_6(%arg0: i32) -> (i32, i32) {
    %c0_i32 = arith.constant 0 : i32
    %c0_i32_0 = arith.constant 0 : i32
    %c0_i32_1 = arith.constant 0 : i32
    return %c0_i32, %c0_i32_0 : i32, i32
  }
}

module attributes {stable_mosaic.version = 11 : i64} {
  func.func @_mlp_kernel(%arg0: i32, %arg1: memref<2x1024xbf16, #tpu.memory_space<vmem>>, %arg2: memref<1024x384xbf16, #tpu.memory_space<vmem>>, %arg3: memref<1x384xf32, #tpu.memory_space<vmem>>, %arg4: memref<384x192xbf16, #tpu.memory_space<vmem>>, %arg5: memref<1x192xf32, #tpu.memory_space<vmem>>, %arg6: memref<192x128xbf16, #tpu.memory_space<vmem>>, %arg7: memref<1x128xf32, #tpu.memory_space<vmem>>, %arg8: memref<2x128xf32, #tpu.memory_space<vmem>>) attributes {dimension_semantics = [#tpu.dimension_semantics<parallel>], iteration_bounds = array<i64: 1>, scalar_prefetch = 0 : i64, scratch_operands = 0 : i64, tpu.core_type = #tpu.core_type<tc>, window_params = [{transform_indices = @transform_0, window_bounds = array<i64: 2, 1024>}, {pipeline_mode = #tpu.pipeline_mode<synchronous>, transform_indices = @transform_1, window_bounds = array<i64: 1024, 384>}, {pipeline_mode = #tpu.pipeline_mode<synchronous>, transform_indices = @transform_2, window_bounds = array<i64: 1, 384>}, {pipeline_mode = #tpu.pipeline_mode<synchronous>, transform_indices = @transform_3, window_bounds = array<i64: 384, 192>}, {pipeline_mode = #tpu.pipeline_mode<synchronous>, transform_indices = @transform_4, window_bounds = array<i64: 1, 192>}, {pipeline_mode = #tpu.pipeline_mode<synchronous>, transform_indices = @transform_5, window_bounds = array<i64: 192, 128>}, {pipeline_mode = #tpu.pipeline_mode<synchronous>, transform_indices = @transform_6, window_bounds = array<i64: 1, 128>}, {transform_indices = @transform_7, window_bounds = array<i64: 2, 128>}]} {
    %c0 = arith.constant 0 : index
    %c0_0 = arith.constant 0 : index
    %0 = vector.load %arg1[%c0, %c0_0] : memref<2x1024xbf16, #tpu.memory_space<vmem>>, vector<2x1024xbf16>
    %c0_1 = arith.constant 0 : index
    %c0_2 = arith.constant 0 : index
    %1 = vector.load %arg2[%c0_1, %c0_2] : memref<1024x384xbf16, #tpu.memory_space<vmem>>, vector<1024x384xbf16>
    %cst = arith.constant dense<0.000000e+00> : vector<2x384xf32>
    %2 = tpu.matmul %0, %1, %cst {dimension_numbers = #tpu.dot_dimension_numbers<[1], [0], [0], [1], [0, 0, 1, 1], [], []>} : vector<2x1024xbf16>, vector<1024x384xbf16>, vector<2x384xf32> -> vector<2x384xf32>
    %c0_3 = arith.constant 0 : index
    %c0_4 = arith.constant 0 : index
    %3 = vector.load %arg3[%c0_3, %c0_4] : memref<1x384xf32, #tpu.memory_space<vmem>>, vector<1x384xf32>
    %4 = vector.broadcast %3 : vector<1x384xf32> to vector<2x384xf32>
    %5 = arith.addf %2, %4 : vector<2x384xf32>
    %cst_5 = arith.constant 0.000000e+00 : f32
    %6 = vector.broadcast %cst_5 : f32 to vector<2x384xf32>
    %7 = arith.cmpf ogt, %5, %6 : vector<2x384xf32>
    %cst_6 = arith.constant 0.000000e+00 : f32
    %8 = vector.broadcast %cst_6 : f32 to vector<2x384xf32>
    %9 = arith.minimumf %5, %8 : vector<2x384xf32>
    %10 = math.exp %9 : vector<2x384xf32>
    %cst_7 = arith.constant 1.000000e+00 : f32
    %11 = vector.broadcast %cst_7 : f32 to vector<2x384xf32>
    %12 = arith.subf %10, %11 : vector<2x384xf32>
    %cst_8 = arith.constant 1.67326319 : f32
    %13 = vector.broadcast %cst_8 : f32 to vector<2x384xf32>
    %14 = arith.mulf %13, %12 : vector<2x384xf32>
    %15 = arith.select %7, %5, %14 : vector<2x384xi1>, vector<2x384xf32>
    %cst_9 = arith.constant 1.05070102 : f32
    %16 = vector.broadcast %cst_9 : f32 to vector<2x384xf32>
    %17 = arith.mulf %16, %15 : vector<2x384xf32>
    %18 = arith.truncf %17 : vector<2x384xf32> to vector<2x384xbf16>
    %c0_10 = arith.constant 0 : index
    %c0_11 = arith.constant 0 : index
    %19 = vector.load %arg4[%c0_10, %c0_11] : memref<384x192xbf16, #tpu.memory_space<vmem>>, vector<384x192xbf16>
    %cst_12 = arith.constant dense<0.000000e+00> : vector<2x192xf32>
    %20 = tpu.matmul %18, %19, %cst_12 {dimension_numbers = #tpu.dot_dimension_numbers<[1], [0], [0], [1], [0, 0, 1, 1], [], []>} : vector<2x384xbf16>, vector<384x192xbf16>, vector<2x192xf32> -> vector<2x192xf32>
    %c0_13 = arith.constant 0 : index
    %c0_14 = arith.constant 0 : index
    %21 = vector.load %arg5[%c0_13, %c0_14] : memref<1x192xf32, #tpu.memory_space<vmem>>, vector<1x192xf32>
    %22 = vector.broadcast %21 : vector<1x192xf32> to vector<2x192xf32>
    %23 = arith.addf %20, %22 : vector<2x192xf32>
    %cst_15 = arith.constant 0.000000e+00 : f32
    %24 = vector.broadcast %cst_15 : f32 to vector<2x192xf32>
    %25 = arith.cmpf ogt, %23, %24 : vector<2x192xf32>
    %cst_16 = arith.constant 0.000000e+00 : f32
    %26 = vector.broadcast %cst_16 : f32 to vector<2x192xf32>
    %27 = arith.minimumf %23, %26 : vector<2x192xf32>
    %28 = math.exp %27 : vector<2x192xf32>
    %cst_17 = arith.constant 1.000000e+00 : f32
    %29 = vector.broadcast %cst_17 : f32 to vector<2x192xf32>
    %30 = arith.subf %28, %29 : vector<2x192xf32>
    %cst_18 = arith.constant 1.67326319 : f32
    %31 = vector.broadcast %cst_18 : f32 to vector<2x192xf32>
    %32 = arith.mulf %31, %30 : vector<2x192xf32>
    %33 = arith.select %25, %23, %32 : vector<2x192xi1>, vector<2x192xf32>
    %cst_19 = arith.constant 1.05070102 : f32
    %34 = vector.broadcast %cst_19 : f32 to vector<2x192xf32>
    %35 = arith.mulf %34, %33 : vector<2x192xf32>
    %36 = arith.truncf %35 : vector<2x192xf32> to vector<2x192xbf16>
    %c0_20 = arith.constant 0 : index
    %c0_21 = arith.constant 0 : index
    %37 = vector.load %arg6[%c0_20, %c0_21] : memref<192x128xbf16, #tpu.memory_space<vmem>>, vector<192x128xbf16>
    %cst_22 = arith.constant dense<0.000000e+00> : vector<2x128xf32>
    %38 = tpu.matmul %36, %37, %cst_22 {dimension_numbers = #tpu.dot_dimension_numbers<[1], [0], [0], [1], [0, 0, 1, 1], [], []>} : vector<2x192xbf16>, vector<192x128xbf16>, vector<2x128xf32> -> vector<2x128xf32>
    %c0_23 = arith.constant 0 : index
    %c0_24 = arith.constant 0 : index
    %39 = vector.load %arg7[%c0_23, %c0_24] : memref<1x128xf32, #tpu.memory_space<vmem>>, vector<1x128xf32>
    %40 = vector.broadcast %39 : vector<1x128xf32> to vector<2x128xf32>
    %41 = arith.addf %38, %40 : vector<2x128xf32>
    %c0_25 = arith.constant 0 : index
    %c0_26 = arith.constant 0 : index
    %42 = vector.load %arg8[%c0_25, %c0_26] : memref<2x128xf32, #tpu.memory_space<vmem>>, vector<2x128xf32>
    tpu.vector_store %arg8[%c0_25, %c0_26], %41 {strides = array<i32>} : memref<2x128xf32, #tpu.memory_space<vmem>>, vector<2x128xf32>,
    return
  }
  func.func @transform_0(%arg0: i32) -> (i32, i32) {
    %c0_i32 = arith.constant 0 : i32
    %c0_i32_0 = arith.constant 0 : i32
    return %arg0, %c0_i32 : i32, i32
  }
  func.func @transform_1(%arg0: i32) -> (i32, i32) {
    %c0_i32 = arith.constant 0 : i32
    %c0_i32_0 = arith.constant 0 : i32
    %c0_i32_1 = arith.constant 0 : i32
    return %c0_i32, %c0_i32_0 : i32, i32
  }
  func.func @transform_2(%arg0: i32) -> (i32, i32) {
    %c0_i32 = arith.constant 0 : i32
    %c0_i32_0 = arith.constant 0 : i32
    %c0_i32_1 = arith.constant 0 : i32
    return %c0_i32, %c0_i32_0 : i32, i32
  }
  func.func @transform_3(%arg0: i32) -> (i32, i32) {
    %c0_i32 = arith.constant 0 : i32
    %c0_i32_0 = arith.constant 0 : i32
    %c0_i32_1 = arith.constant 0 : i32
    return %c0_i32, %c0_i32_0 : i32, i32
  }
  func.func @transform_4(%arg0: i32) -> (i32, i32) {
    %c0_i32 = arith.constant 0 : i32
    %c0_i32_0 = arith.constant 0 : i32
    %c0_i32_1 = arith.constant 0 : i32
    return %c0_i32, %c0_i32_0 : i32, i32
  }
  func.func @transform_5(%arg0: i32) -> (i32, i32) {
    %c0_i32 = arith.constant 0 : i32
    %c0_i32_0 = arith.constant 0 : i32
    %c0_i32_1 = arith.constant 0 : i32
    return %c0_i32, %c0_i32_0 : i32, i32
  }
  func.func @transform_6(%arg0: i32) -> (i32, i32) {
    %c0_i32 = arith.constant 0 : i32
    %c0_i32_0 = arith.constant 0 : i32
    %c0_i32_1 = arith.constant 0 : i32
    return %c0_i32, %c0_i32_0 : i32, i32
  }
  func.func @transform_7(%arg0: i32) -> (i32, i32) {
    %c0_i32 = arith.constant 0 : i32
    %c0_i32_0 = arith.constant 0 : i32
    return %arg0, %c0_i32 : i32, i32
  }
}

</mosaic_0001>

<bundles_post_ra>
// kernel: mnist_convnet_forward.5
= control target key start
LH: loop header
LB: loop body
LE: loop exit
PB: predicated region body
PF: predicated region fallthrough
CT: control target
= control target key end

     0   :  { %s1309_s12 = smov 0   ;;  %s1540_s0 = inlined_call_operand.vmem [shape: bf16[1152,32], index: 0, kind: input, shape index: {}]   ;;  %s1541_s1 = inlined_call_operand.vmem [shape: bf16[32,64], index: 1, kind: input, shape index: {}]   ;;  %s1542_s2 = inlined_call_operand.vmem [shape: f32[1,64], index: 2, kind: input, shape index: {}]   ;;  %s1543_s3 = inlined_call_operand.vmem [shape: bf16[1152,64], index: 3, kind: output, shape index: {}]  }
   0x1 LB: > { %s1009_s13 = sadd.s32 4294967295, %s1287_s12   ;;  %p1013_p0 = scmp.ge.s32.totalorder %s1287_s12, 1  ;;  %s1287_s12 = sphi %s1309_s12, %s13_s12  }
   0x2   : > { %p138_p1 = scmp.lt.s32.totalorder %s1287_s12, 4 }
   0x4   : > { %p139_p2 = pnand %p1013_p0, %p138_p1 }
   0x5   : > { %s162_s16 = smul.u32 (!%p139_p2), 48, %s1009_s13 }
   0x6   : > { %142 = sbr.rel (%p139_p2) target bundleno = 267 (0x10b), region = 32 }
   0x7   : > { %p163_p3 = scmp.lt.s32.totalorder (!%p139_p2), %s162_s16, 143 }
   0xb   : > { %v1255_v0 = vld [vmem:[%s1541_s1 + $0x8] sm:$0xff]   ;;  %v1256_v1 = vld [vmem:[%s1541_s1] sm:$0xff]   ;;  %s1545_s16 = smov (!%p163_p3, %s162_s16), 143  ;;  %vm366_vm0 = vcmask 261120   ;;  %vm904_vm1 = vcmask 519168  }
   0xc   : > { %1191 = vmatprep.subr.bf16.mxu0 %v1255_v0  ;;  %1243 = vmatprep.subr.bf16.mxu1 %v1255_v0  ;;  %s1014_s19 = sshll.u32 %s1545_s16, 2  ;;  %v1384_v26 = vld [vmem:[%s1542_s2] ss:$0 sm:$0xff] }
   0xd   : > { %1192 = vmatpush3.bf16.msra.mxu0 %v1255_v0  ;;  %1245 = vmatpush3.bf16.msra.mxu1 %v1255_v0  ;;  %s1331_s22 = scalar_lea.vmem %s1540_s0, %s1014_s19  ;;  %s1394_s27 = scalar_lea.vmem %s1543_s3, %s1014_s19 }
   0xe   : > { %1193 = vmatprep.subr.bf16.mxu0 %v1256_v1  ;;  %1244 = vmatprep.subr.bf16.mxu1 %v1256_v1  ;;  %v1257_v2 = vld [vmem:[%s1331_s22] sm:$0xff]   ;;  %v1259_v4 = vld [vmem:[%s1331_s22 + $0x8] sm:$0xff]   ;;  %v1261_v6 = vld [vmem:[%s1331_s22 + $0x10] sm:$0xff]  }
   0xf   : > { %v1258_v3 = vld [vmem:[%s1331_s22 + $0x60] sm:$0xff]   ;;  %1195 = vmatprep.mubr.msk.bf16.mxu0 %vm366_vm0, %v1257_v2  ;;  %v1260_v5 = vld [vmem:[%s1331_s22 + $0x68] sm:$0xff]   ;;  %v1262_v7 = vld [vmem:[%s1331_s22 + $0x70] sm:$0xff]  }
  0x10   : > { %1219 = vmatprep.mubr.msk.bf16.mxu1 %vm366_vm0, %v1258_v3  ;;  %v1263_v8 = vld [vmem:[%s1331_s22 + $0x18] sm:$0xff]   ;;  %v1265_v10 = vld [vmem:[%s1331_s22 + $0x20] sm:$0xff]   ;;  %v1267_v12 = vld [vmem:[%s1331_s22 + $0x28] sm:$0xff]  }
  0x11   : > { %1194 = vmatpush3.bf16.msra.mxu0 %v1256_v1  ;;  %1246 = vmatpush3.bf16.msra.mxu1 %v1256_v1  ;;  %v1264_v9 = vld [vmem:[%s1331_s22 + $0x78] sm:$0xff]   ;;  %v1266_v11 = vld [vmem:[%s1331_s22 + $0x80] sm:$0xff]   ;;  %v1268_v13 = vld [vmem:[%s1331_s22 + $0x88] sm:$0xff]  }
  0x12   : > { %v1269_v14 = vld [vmem:[%s1331_s22 + $0x30] sm:$0xff]   ;;  %v1271_v16 = vld [vmem:[%s1331_s22 + $0x38] sm:$0xff]   ;;  %v1273_v18 = vld [vmem:[%s1331_s22 + $0x40] sm:$0xff]  }
  0x13   : > { %v1270_v15 = vld [vmem:[%s1331_s22 + $0x90] sm:$0xff]   ;;  %v1272_v17 = vld [vmem:[%s1331_s22 + $0x98] sm:$0xff]   ;;  %v1274_v19 = vld [vmem:[%s1331_s22 + $0xa0] sm:$0xff]  }
  0x14   : > { %1196 = vmatmul.mubr.msk.bf16.vlgmr.msra.gmra.mxu0 %vm366_vm0, %v1259_v4  ;;  %1220 = vmatmul.mubr.msk.bf16.vlgmr.msra.gmra.mxu1 %vm366_vm0, %v1260_v5  ;;  %v1275_v20 = vld [vmem:[%s1331_s22 + $0x48] sm:$0xff]   ;;  %v1277_v22 = vld [vmem:[%s1331_s22 + $0x50] sm:$0xff]   ;;  %v1279_v24 = vld [vmem:[%s1331_s22 + $0x58] sm:$0xff]  }
  0x15   : > { %1199 = vmatprep.mubr.msk.bf16.mxu0 %vm366_vm0, %v1261_v6  ;;  %1223 = vmatprep.mubr.msk.bf16.mxu1 %vm366_vm0, %v1262_v7  ;;  %v1276_v21 = vld [vmem:[%s1331_s22 + $0xa8] sm:$0xff]   ;;  %v1278_v23 = vld [vmem:[%s1331_s22 + $0xb0] sm:$0xff]   ;;  %v1280_v25 = vld [vmem:[%s1331_s22 + $0xb8] sm:$0xff]  }
  0x1c   : > { %1200 = vmatmul.mubr.msk.bf16.gmra.mxu0 %vm366_vm0, %v1263_v8  ;;  %1224 = vmatmul.mubr.msk.bf16.gmra.mxu1 %vm366_vm0, %v1264_v9 }
  0x1d   : > { %1203 = vmatprep.mubr.msk.bf16.mxu0 %vm366_vm0, %v1265_v10  ;;  %1227 = vmatprep.mubr.msk.bf16.mxu1 %vm366_vm0, %v1266_v11 }
  0x24   : > { %1204 = vmatmul.mubr.msk.bf16.gmra.mxu0 %vm366_vm0, %v1267_v12  ;;  %1228 = vmatmul.mubr.msk.bf16.gmra.mxu1 %vm366_vm0, %v1268_v13 }
  0x25   : > { %1207 = vmatprep.mubr.msk.bf16.mxu0 %vm366_vm0, %v1269_v14  ;;  %1231 = vmatprep.mubr.msk.bf16.mxu1 %vm366_vm0, %v1270_v15 }
  0x2c   : > { %1208 = vmatmul.mubr.msk.bf16.gmra.mxu0 %vm366_vm0, %v1271_v16  ;;  %1232 = vmatmul.mubr.msk.bf16.gmra.mxu1 %vm366_vm0, %v1272_v17 }
  0x2d   : > { %1211 = vmatprep.mubr.msk.bf16.mxu0 %vm366_vm0, %v1273_v18  ;;  %1235 = vmatprep.mubr.msk.bf16.mxu1 %vm366_vm0, %v1274_v19 }
  0x34   : > { %1212 = vmatmul.mubr.msk.bf16.gmra.mxu0 %vm366_vm0, %v1275_v20  ;;  %1236 = vmatmul.mubr.msk.bf16.gmra.mxu1 %vm366_vm0, %v1276_v21 }
  0x35   : > { %1215 = vmatprep.mubr.msk.bf16.mxu0 %vm366_vm0, %v1277_v22  ;;  %1239 = vmatprep.mubr.msk.bf16.mxu1 %vm366_vm0, %v1278_v23 }
  0x3c   : > { %1216 = vmatmul.mubr.msk.bf16.gmra.mxu0 %vm366_vm0, %v1279_v24  ;;  %1240 = vmatmul.mubr.msk.bf16.gmra.mxu1 %vm366_vm0, %v1280_v25 }
  0xd4   : > { %v1197_v27 = vpop.f32.mrf.mxu0  ;;  %v1221_v29 = vpop.f32.mrf.mxu1 }
  0xd5   : > { %v482_v28 = vadd.f32 %v1197_v27, %v1384_v26  ;;  %v578_v30 = vadd.f32 %v1221_v29, %v1384_v26 }
  0xd6   : > { %v473_v31 = vpop.f32.mrf.mxu0  ;;  %v569_v34 = vpop.f32.mrf.mxu1 }
  0xd7   : > { %v666_v32 = vmax.f32 %v482_v28, 0.0  ;;  %v474_v33 = vadd.f32 %v1384_v26, %v473_v31  ;;  %v690_v35 = vmax.f32 %v578_v30, 0.0  ;;  %v570_v36 = vadd.f32 %v1384_v26, %v569_v34 }
  0xd8   : > { %v1198_v37 = vpop.f32.mrf.mxu0  ;;  %v1222_v41 = vpop.f32.mrf.mxu1 }
  0xd9   : > { %v1119_v38 = vpack.c.bf16 %v666_v32, %v666_v32  ;;  %v664_v39 = vmax.f32 %v474_v33, 0.0  ;;  %v485_v40 = vadd.f32 %v1198_v37, %v1384_v26  ;;  %v1143_v42 = vpack.c.bf16 %v690_v35, %v690_v35 }
  0xda   : > { %v688_v43 = vmax.f32 %v570_v36, 0.0  ;;  %v581_v44 = vadd.f32 %v1222_v41, %v1384_v26  ;;  %v476_v45 = vpop.f32.mrf.mxu0  ;;  %v572_v49 = vpop.f32.mrf.mxu1 }
  0xdb   : > { %907 = vst.msk [vmem:[%s1394_s27 + $0x8] sm:$0xf] %vm904_vm1, %v1119_v38  ;;  %v1117_v46 = vpack.c.bf16 %v664_v39, %v664_v39  ;;  %v667_v47 = vmax.f32 %v485_v40, 0.0  ;;  %v477_v48 = vadd.f32 %v1384_v26, %v476_v45  ;;  %931 = vst.msk [vmem:[%s1394_s27 + $0x68] sm:$0xf] %vm904_vm1, %v1143_v42  ;;  %v573_v52 = vadd.f32 %v1384_v26, %v572_v49 }
  0xdc   : > { %v1141_v50 = vpack.c.bf16 %v688_v43, %v688_v43  ;;  %v691_v51 = vmax.f32 %v581_v44, 0.0  ;;  %v1201_v53 = vpop.f32.mrf.mxu0  ;;  %v1225_v57 = vpop.f32.mrf.mxu1 }
  0xdd   : > { %905 = vst.msk [vmem:[%s1394_s27] sm:$0xf] %vm904_vm1, %v1117_v46  ;;  %v1120_v54 = vpack.c.bf16 %v667_v47, %v667_v47  ;;  %v665_v55 = vmax.f32 %v477_v48, 0.0  ;;  %v498_v56 = vadd.f32 %v1201_v53, %v1384_v26  ;;  %v689_v59 = vmax.f32 %v573_v52, 0.0 }
  0xde   : > { %929 = vst.msk [vmem:[%s1394_s27 + $0x60] sm:$0xf] %vm904_vm1, %v1141_v50  ;;  %v1144_v58 = vpack.c.bf16 %v691_v51, %v691_v51  ;;  %v594_v60 = vadd.f32 %v1225_v57, %v1384_v26  ;;  %v489_v61 = vpop.f32.mrf.mxu0  ;;  %v585_v1 = vpop.f32.mrf.mxu1 }
  0xdf   : > { %908 = vst.msk [vmem:[%s1394_s27 + $0xc] sm:$0xf] %vm904_vm1, %v1120_v54  ;;  %v1118_v62 = vpack.c.bf16 %v665_v55, %v665_v55  ;;  %v670_v63 = vmax.f32 %v498_v56, 0.0  ;;  %v490_v0 = vadd.f32 %v1384_v26, %v489_v61  ;;  %v1142_v2 = vpack.c.bf16 %v689_v59, %v689_v59 }
  0xe0   : > { %932 = vst.msk [vmem:[%s1394_s27 + $0x6c] sm:$0xf] %vm904_vm1, %v1144_v58  ;;  %v694_v3 = vmax.f32 %v594_v60, 0.0  ;;  %v586_v4 = vadd.f32 %v1384_v26, %v585_v1  ;;  %v1202_v5 = vpop.f32.mrf.mxu0  ;;  %v1226_v9 = vpop.f32.mrf.mxu1 }
  0xe1   : > { %906 = vst.msk [vmem:[%s1394_s27 + $0x4] sm:$0xf] %vm904_vm1, %v1118_v62  ;;  %v1123_v6 = vpack.c.bf16 %v670_v63, %v670_v63  ;;  %v668_v7 = vmax.f32 %v490_v0, 0.0  ;;  %v501_v8 = vadd.f32 %v1202_v5, %v1384_v26  ;;  %930 = vst.msk [vmem:[%s1394_s27 + $0x64] sm:$0xf] %vm904_vm1, %v1142_v2  ;;  %v597_v12 = vadd.f32 %v1226_v9, %v1384_v26 }
  0xe2   : > { %v1147_v10 = vpack.c.bf16 %v694_v3, %v694_v3  ;;  %v692_v11 = vmax.f32 %v586_v4, 0.0  ;;  %v492_v13 = vpop.f32.mrf.mxu0  ;;  %v588_v17 = vpop.f32.mrf.mxu1 }
  0xe3   : > { %911 = vst.msk [vmem:[%s1394_s27 + $0x18] sm:$0xf] %vm904_vm1, %v1123_v6  ;;  %v1121_v14 = vpack.c.bf16 %v668_v7, %v668_v7  ;;  %v671_v15 = vmax.f32 %v501_v8, 0.0  ;;  %v493_v16 = vadd.f32 %v1384_v26, %v492_v13  ;;  %v695_v19 = vmax.f32 %v597_v12, 0.0 }
  0xe4   : > { %935 = vst.msk [vmem:[%s1394_s27 + $0x78] sm:$0xf] %vm904_vm1, %v1147_v10  ;;  %v1145_v18 = vpack.c.bf16 %v692_v11, %v692_v11  ;;  %v589_v20 = vadd.f32 %v1384_v26, %v588_v17  ;;  %v1205_v21 = vpop.f32.mrf.mxu0  ;;  %v1229_v25 = vpop.f32.mrf.mxu1 }
  0xe5   : > { %909 = vst.msk [vmem:[%s1394_s27 + $0x10] sm:$0xf] %vm904_vm1, %v1121_v14  ;;  %v1124_v22 = vpack.c.bf16 %v671_v15, %v671_v15  ;;  %v669_v23 = vmax.f32 %v493_v16, 0.0  ;;  %v514_v24 = vadd.f32 %v1205_v21, %v1384_v26  ;;  %v1148_v27 = vpack.c.bf16 %v695_v19, %v695_v19 }
  0xe6   : > { %933 = vst.msk [vmem:[%s1394_s27 + $0x70] sm:$0xf] %vm904_vm1, %v1145_v18  ;;  %v693_v28 = vmax.f32 %v589_v20, 0.0  ;;  %v610_v29 = vadd.f32 %v1229_v25, %v1384_v26  ;;  %v505_v30 = vpop.f32.mrf.mxu0  ;;  %v601_v34 = vpop.f32.mrf.mxu1 }
  0xe7   : > { %912 = vst.msk [vmem:[%s1394_s27 + $0x1c] sm:$0xf] %vm904_vm1, %v1124_v22  ;;  %v1122_v31 = vpack.c.bf16 %v669_v23, %v669_v23  ;;  %v674_v32 = vmax.f32 %v514_v24, 0.0  ;;  %v506_v33 = vadd.f32 %v1384_v26, %v505_v30  ;;  %936 = vst.msk [vmem:[%s1394_s27 + $0x7c] sm:$0xf] %vm904_vm1, %v1148_v27  ;;  %v602_v37 = vadd.f32 %v1384_v26, %v601_v34 }
  0xe8   : > { %v1146_v35 = vpack.c.bf16 %v693_v28, %v693_v28  ;;  %v698_v36 = vmax.f32 %v610_v29, 0.0  ;;  %v1206_v38 = vpop.f32.mrf.mxu0  ;;  %v1230_v42 = vpop.f32.mrf.mxu1 }
  0xe9   : > { %910 = vst.msk [vmem:[%s1394_s27 + $0x14] sm:$0xf] %vm904_vm1, %v1122_v31  ;;  %v1127_v39 = vpack.c.bf16 %v674_v32, %v674_v32  ;;  %v672_v40 = vmax.f32 %v506_v33, 0.0  ;;  %v517_v41 = vadd.f32 %v1206_v38, %v1384_v26  ;;  %v696_v44 = vmax.f32 %v602_v37, 0.0 }
  0xea   : > { %934 = vst.msk [vmem:[%s1394_s27 + $0x74] sm:$0xf] %vm904_vm1, %v1146_v35  ;;  %v1151_v43 = vpack.c.bf16 %v698_v36, %v698_v36  ;;  %v613_v45 = vadd.f32 %v1230_v42, %v1384_v26  ;;  %v508_v46 = vpop.f32.mrf.mxu0  ;;  %v604_v50 = vpop.f32.mrf.mxu1 }
  0xeb   : > { %915 = vst.msk [vmem:[%s1394_s27 + $0x28] sm:$0xf] %vm904_vm1, %v1127_v39  ;;  %v1125_v47 = vpack.c.bf16 %v672_v40, %v672_v40  ;;  %v675_v48 = vmax.f32 %v517_v41, 0.0  ;;  %v509_v49 = vadd.f32 %v1384_v26, %v508_v46  ;;  %v1149_v51 = vpack.c.bf16 %v696_v44, %v696_v44 }
  0xec   : > { %939 = vst.msk [vmem:[%s1394_s27 + $0x88] sm:$0xf] %vm904_vm1, %v1151_v43  ;;  %v699_v52 = vmax.f32 %v613_v45, 0.0  ;;  %v605_v53 = vadd.f32 %v1384_v26, %v604_v50  ;;  %v1209_v54 = vpop.f32.mrf.mxu0  ;;  %v1233_v58 = vpop.f32.mrf.mxu1 }
  0xed   : > { %913 = vst.msk [vmem:[%s1394_s27 + $0x20] sm:$0xf] %vm904_vm1, %v1125_v47  ;;  %v1128_v55 = vpack.c.bf16 %v675_v48, %v675_v48  ;;  %v673_v56 = vmax.f32 %v509_v49, 0.0  ;;  %v530_v57 = vadd.f32 %v1209_v54, %v1384_v26  ;;  %937 = vst.msk [vmem:[%s1394_s27 + $0x80] sm:$0xf] %vm904_vm1, %v1149_v51  ;;  %v626_v61 = vadd.f32 %v1233_v58, %v1384_v26 }
  0xee   : > { %v1152_v59 = vpack.c.bf16 %v699_v52, %v699_v52  ;;  %v697_v60 = vmax.f32 %v605_v53, 0.0  ;;  %v521_v62 = vpop.f32.mrf.mxu0  ;;  %v617_v2 = vpop.f32.mrf.mxu1 }
  0xef   : > { %916 = vst.msk [vmem:[%s1394_s27 + $0x2c] sm:$0xf] %vm904_vm1, %v1128_v55  ;;  %v1126_v63 = vpack.c.bf16 %v673_v56, %v673_v56  ;;  %v678_v0 = vmax.f32 %v530_v57, 0.0  ;;  %v522_v1 = vadd.f32 %v1384_v26, %v521_v62  ;;  %v702_v4 = vmax.f32 %v626_v61, 0.0 }
  0xf0   : > { %940 = vst.msk [vmem:[%s1394_s27 + $0x8c] sm:$0xf] %vm904_vm1, %v1152_v59  ;;  %v1150_v3 = vpack.c.bf16 %v697_v60, %v697_v60  ;;  %v618_v5 = vadd.f32 %v1384_v26, %v617_v2  ;;  %v1210_v6 = vpop.f32.mrf.mxu0  ;;  %v1234_v10 = vpop.f32.mrf.mxu1 }
  0xf1   : > { %914 = vst.msk [vmem:[%s1394_s27 + $0x24] sm:$0xf] %vm904_vm1, %v1126_v63  ;;  %v1131_v7 = vpack.c.bf16 %v678_v0, %v678_v0  ;;  %v676_v8 = vmax.f32 %v522_v1, 0.0  ;;  %v533_v9 = vadd.f32 %v1210_v6, %v1384_v26  ;;  %v1155_v11 = vpack.c.bf16 %v702_v4, %v702_v4 }
  0xf2   : > { %938 = vst.msk [vmem:[%s1394_s27 + $0x84] sm:$0xf] %vm904_vm1, %v1150_v3  ;;  %v700_v12 = vmax.f32 %v618_v5, 0.0  ;;  %v629_v13 = vadd.f32 %v1234_v10, %v1384_v26  ;;  %v524_v14 = vpop.f32.mrf.mxu0  ;;  %v620_v18 = vpop.f32.mrf.mxu1 }
  0xf3   : > { %919 = vst.msk [vmem:[%s1394_s27 + $0x38] sm:$0xf] %vm904_vm1, %v1131_v7  ;;  %v1129_v15 = vpack.c.bf16 %v676_v8, %v676_v8  ;;  %v679_v16 = vmax.f32 %v533_v9, 0.0  ;;  %v525_v17 = vadd.f32 %v1384_v26, %v524_v14  ;;  %943 = vst.msk [vmem:[%s1394_s27 + $0x98] sm:$0xf] %vm904_vm1, %v1155_v11  ;;  %v621_v21 = vadd.f32 %v1384_v26, %v620_v18 }
  0xf4   : > { %v1153_v19 = vpack.c.bf16 %v700_v12, %v700_v12  ;;  %v703_v20 = vmax.f32 %v629_v13, 0.0  ;;  %v1213_v22 = vpop.f32.mrf.mxu0  ;;  %v1237_v27 = vpop.f32.mrf.mxu1 }
  0xf5   : > { %917 = vst.msk [vmem:[%s1394_s27 + $0x30] sm:$0xf] %vm904_vm1, %v1129_v15  ;;  %v1132_v23 = vpack.c.bf16 %v679_v16, %v679_v16  ;;  %v677_v24 = vmax.f32 %v525_v17, 0.0  ;;  %v546_v25 = vadd.f32 %v1213_v22, %v1384_v26  ;;  %v701_v29 = vmax.f32 %v621_v21, 0.0 }
  0xf6   : > { %941 = vst.msk [vmem:[%s1394_s27 + $0x90] sm:$0xf] %vm904_vm1, %v1153_v19  ;;  %v1156_v28 = vpack.c.bf16 %v703_v20, %v703_v20  ;;  %v642_v30 = vadd.f32 %v1237_v27, %v1384_v26  ;;  %v537_v31 = vpop.f32.mrf.mxu0  ;;  %v633_v35 = vpop.f32.mrf.mxu1 }
  0xf7   : > { %920 = vst.msk [vmem:[%s1394_s27 + $0x3c] sm:$0xf] %vm904_vm1, %v1132_v23  ;;  %v1130_v32 = vpack.c.bf16 %v677_v24, %v677_v24  ;;  %v682_v33 = vmax.f32 %v546_v25, 0.0  ;;  %v538_v34 = vadd.f32 %v1384_v26, %v537_v31  ;;  %v1154_v36 = vpack.c.bf16 %v701_v29, %v701_v29 }
  0xf8   : > { %944 = vst.msk [vmem:[%s1394_s27 + $0x9c] sm:$0xf] %vm904_vm1, %v1156_v28  ;;  %v706_v37 = vmax.f32 %v642_v30, 0.0  ;;  %v634_v38 = vadd.f32 %v1384_v26, %v633_v35  ;;  %v1214_v39 = vpop.f32.mrf.mxu0  ;;  %v1238_v43 = vpop.f32.mrf.mxu1 }
  0xf9   : > { %918 = vst.msk [vmem:[%s1394_s27 + $0x34] sm:$0xf] %vm904_vm1, %v1130_v32  ;;  %v1135_v40 = vpack.c.bf16 %v682_v33, %v682_v33  ;;  %v680_v41 = vmax.f32 %v538_v34, 0.0  ;;  %v549_v42 = vadd.f32 %v1214_v39, %v1384_v26  ;;  %942 = vst.msk [vmem:[%s1394_s27 + $0x94] sm:$0xf] %vm904_vm1, %v1154_v36  ;;  %v645_v46 = vadd.f32 %v1238_v43, %v1384_v26 }
  0xfa   : > { %v1159_v44 = vpack.c.bf16 %v706_v37, %v706_v37  ;;  %v704_v45 = vmax.f32 %v634_v38, 0.0  ;;  %v540_v47 = vpop.f32.mrf.mxu0  ;;  %v636_v51 = vpop.f32.mrf.mxu1 }
  0xfb   : > { %923 = vst.msk [vmem:[%s1394_s27 + $0x48] sm:$0xf] %vm904_vm1, %v1135_v40  ;;  %v1133_v48 = vpack.c.bf16 %v680_v41, %v680_v41  ;;  %v683_v49 = vmax.f32 %v549_v42, 0.0  ;;  %v541_v50 = vadd.f32 %v1384_v26, %v540_v47  ;;  %v707_v53 = vmax.f32 %v645_v46, 0.0 }
  0xfc   : > { %947 = vst.msk [vmem:[%s1394_s27 + $0xa8] sm:$0xf] %vm904_vm1, %v1159_v44  ;;  %v1157_v52 = vpack.c.bf16 %v704_v45, %v704_v45  ;;  %v637_v54 = vadd.f32 %v1384_v26, %v636_v51  ;;  %v1217_v55 = vpop.f32.mrf.mxu0  ;;  %v1241_v59 = vpop.f32.mrf.mxu1 }
  0xfd   : > { %921 = vst.msk [vmem:[%s1394_s27 + $0x40] sm:$0xf] %vm904_vm1, %v1133_v48  ;;  %v1136_v56 = vpack.c.bf16 %v683_v49, %v683_v49  ;;  %v681_v57 = vmax.f32 %v541_v50, 0.0  ;;  %v562_v58 = vadd.f32 %v1217_v55, %v1384_v26  ;;  %v1160_v60 = vpack.c.bf16 %v707_v53, %v707_v53 }
  0xfe   : > { %945 = vst.msk [vmem:[%s1394_s27 + $0xa0] sm:$0xf] %vm904_vm1, %v1157_v52  ;;  %v705_v61 = vmax.f32 %v637_v54, 0.0  ;;  %v658_v62 = vadd.f32 %v1241_v59, %v1384_v26  ;;  %v553_v63 = vpop.f32.mrf.mxu0  ;;  %v649_v3 = vpop.f32.mrf.mxu1 }
  0xff   : > { %924 = vst.msk [vmem:[%s1394_s27 + $0x4c] sm:$0xf] %vm904_vm1, %v1136_v56  ;;  %v1134_v0 = vpack.c.bf16 %v681_v57, %v681_v57  ;;  %v686_v1 = vmax.f32 %v562_v58, 0.0  ;;  %v554_v2 = vadd.f32 %v1384_v26, %v553_v63  ;;  %948 = vst.msk [vmem:[%s1394_s27 + $0xac] sm:$0xf] %vm904_vm1, %v1160_v60  ;;  %v650_v6 = vadd.f32 %v1384_v26, %v649_v3 }
 0x100   : > { %v1158_v4 = vpack.c.bf16 %v705_v61, %v705_v61  ;;  %v710_v5 = vmax.f32 %v658_v62, 0.0  ;;  %v1218_v7 = vpop.f32.mrf.mxu0  ;;  %v1242_v11 = vpop.f32.mrf.mxu1 }
 0x101   : > { %922 = vst.msk [vmem:[%s1394_s27 + $0x44] sm:$0xf] %vm904_vm1, %v1134_v0  ;;  %v1139_v8 = vpack.c.bf16 %v686_v1, %v686_v1  ;;  %v684_v9 = vmax.f32 %v554_v2, 0.0  ;;  %v565_v10 = vadd.f32 %v1218_v7, %v1384_v26  ;;  %v708_v13 = vmax.f32 %v650_v6, 0.0 }
 0x102   : > { %946 = vst.msk [vmem:[%s1394_s27 + $0xa4] sm:$0xf] %vm904_vm1, %v1158_v4  ;;  %v1163_v12 = vpack.c.bf16 %v710_v5, %v710_v5  ;;  %v661_v14 = vadd.f32 %v1242_v11, %v1384_v26  ;;  %v556_v15 = vpop.f32.mrf.mxu0  ;;  %v652_v19 = vpop.f32.mrf.mxu1 }
 0x103   : > { %927 = vst.msk [vmem:[%s1394_s27 + $0x58] sm:$0xf] %vm904_vm1, %v1139_v8  ;;  %v1137_v16 = vpack.c.bf16 %v684_v9, %v684_v9  ;;  %v687_v17 = vmax.f32 %v565_v10, 0.0  ;;  %v557_v18 = vadd.f32 %v1384_v26, %v556_v15  ;;  %v1161_v20 = vpack.c.bf16 %v708_v13, %v708_v13 }
 0x104   : > { %951 = vst.msk [vmem:[%s1394_s27 + $0xb8] sm:$0xf] %vm904_vm1, %v1163_v12  ;;  %v711_v21 = vmax.f32 %v661_v14, 0.0  ;;  %v653_v22 = vadd.f32 %v1384_v26, %v652_v19 }
 0x105   : > { %925 = vst.msk [vmem:[%s1394_s27 + $0x50] sm:$0xf] %vm904_vm1, %v1137_v16  ;;  %v1140_v23 = vpack.c.bf16 %v687_v17, %v687_v17  ;;  %v685_v24 = vmax.f32 %v557_v18, 0.0  ;;  %949 = vst.msk [vmem:[%s1394_s27 + $0xb0] sm:$0xf] %vm904_vm1, %v1161_v20 }
 0x106   : > { %v1164_v25 = vpack.c.bf16 %v711_v21, %v711_v21  ;;  %v709_v27 = vmax.f32 %v653_v22, 0.0 }
 0x107   : > { %928 = vst.msk [vmem:[%s1394_s27 + $0x5c] sm:$0xf] %vm904_vm1, %v1140_v23  ;;  %v1138_v28 = vpack.c.bf16 %v685_v24, %v685_v24 }
 0x108   : > { %952 = vst.msk [vmem:[%s1394_s27 + $0xbc] sm:$0xf] %vm904_vm1, %v1164_v25  ;;  %v1162_v29 = vpack.c.bf16 %v709_v27, %v709_v27 }
 0x109   : > { %926 = vst.msk [vmem:[%s1394_s27 + $0x54] sm:$0xf] %vm904_vm1, %v1138_v28 }
 0x10a   : > { %950 = vst.msk [vmem:[%s1394_s27 + $0xb4] sm:$0xf] %vm904_vm1, %v1162_v29 }
 0x10b PF: > { %s13_s12 = sadd.s32 1, %s1287_s12  }
 0x10c   : > { %p10_p4 = scmp.ge.s32.totalorder %s13_s12, 5  }
 0x10e   :  { %12 = sbr.rel (!%p10_p4) target bundleno = 1 (0x1), region = 62 }

// kernel: mnist_convnet_forward.6
= control target key start
LH: loop header
LB: loop body
LE: loop exit
PB: predicated region body
PF: predicated region fallthrough
CT: control target
= control target key end

     0   :  { %vm311_vm0 = vcmask 523264   ;;  %s1906_s0 = inlined_call_operand.vmem [shape: bf16[288,64], index: 0, kind: input, shape index: {}]   ;;  %s1907_s1 = inlined_call_operand.vmem [shape: bf16[288,64], index: 1, kind: input, shape index: {}]   ;;  %s1908_s2 = inlined_call_operand.vmem [shape: bf16[288,64], index: 2, kind: input, shape index: {}]   ;;  %s1909_s3 = inlined_call_operand.vmem [shape: bf16[288,64], index: 3, kind: input, shape index: {}]   ;;  %s1910_s4 = inlined_call_operand.vmem [shape: f32[1,64], index: 4, kind: input, shape index: {}]   ;;  %s1911_s5 = inlined_call_operand.vmem [shape: f32[1,64], index: 5, kind: input, shape index: {}]   ;;  %s1912_s6 = inlined_call_operand.vmem [shape: f32[288,64], index: 6, kind: output, shape index: {}]  }
   0x1   :  { %v56_v0 = vld [vmem:[%s1906_s0 + $0x84] sm:$0xf]  ;;  %v57_v1 = vld [vmem:[%s1906_s0 + $0x88] sm:$0xf]  ;;  %v58_v2 = vld [vmem:[%s1906_s0 + $0x8c] sm:$0xf] }
   0x2   :  { %v92_v3 = vld [vmem:[%s1907_s1 + $0x84] sm:$0xf]  ;;  %v93_v4 = vld [vmem:[%s1907_s1 + $0x88] sm:$0xf]  ;;  %v94_v5 = vld [vmem:[%s1907_s1 + $0x8c] sm:$0xf] }
   0x3   :  { %v128_v6 = vmax.bf16 %v92_v3, %v56_v0  ;;  %v129_v7 = vmax.bf16 %v93_v4, %v57_v1  ;;  %v130_v8 = vmax.bf16 %v94_v5, %v58_v2  ;;  %v164_v9 = vld [vmem:[%s1908_s2 + $0x84] sm:$0xf]  ;;  %v165_v10 = vld [vmem:[%s1908_s2 + $0x88] sm:$0xf]  ;;  %v166_v11 = vld [vmem:[%s1908_s2 + $0x8c] sm:$0xf] }
   0x4   :  { %v23_v12 = vld [vmem:[%s1906_s0] sm:$0xf]  ;;  %v24_v13 = vld [vmem:[%s1906_s0 + $0x4] sm:$0xf]  ;;  %v201_v15 = vld [vmem:[%s1909_s3 + $0x88] sm:$0xf] }
   0x5   :  { %v200_v14 = vld [vmem:[%s1909_s3 + $0x84] sm:$0xf]  ;;  %v202_v16 = vld [vmem:[%s1909_s3 + $0x8c] sm:$0xf]  ;;  %v25_v17 = vld [vmem:[%s1906_s0 + $0x8] sm:$0xf]  ;;  %v237_v22 = vmax.bf16 %v201_v15, %v165_v10 }
   0x6   :  { %v59_v18 = vld [vmem:[%s1907_s1] sm:$0xf]  ;;  %v60_v19 = vld [vmem:[%s1907_s1 + $0x4] sm:$0xf]  ;;  %v236_v21 = vmax.bf16 %v200_v14, %v164_v9  ;;  %v238_v23 = vmax.bf16 %v202_v16, %v166_v11  ;;  %v26_v24 = vld [vmem:[%s1906_s0 + $0xc] sm:$0xf] }
   0x7   :  { %v131_v20 = vld [vmem:[%s1908_s2] sm:$0xf]  ;;  %v132_v25 = vld [vmem:[%s1908_s2 + $0x4] sm:$0xf]  ;;  %v61_v28 = vld [vmem:[%s1907_s1 + $0x8] sm:$0xf]  ;;  %v95_v35 = vmax.bf16 %v59_v18, %v23_v12  ;;  %v96_v36 = vmax.bf16 %v60_v19, %v24_v13  ;;  %v816_v51 = vmax.bf16 %v237_v22, %v129_v7 }
   0x8   :  { %v167_v26 = vld [vmem:[%s1909_s3] sm:$0xf]  ;;  %v168_v27 = vld [vmem:[%s1909_s3 + $0x4] sm:$0xf]  ;;  %v133_v29 = vld [vmem:[%s1908_s2 + $0x8] sm:$0xf]  ;;  %v97_v40 = vmax.bf16 %v61_v28, %v25_v17  ;;  %v805_v47 = vmax.bf16 %v236_v21, %v128_v6  ;;  %v818_v52 = vmax.bf16 %v238_v23, %v130_v8 }
   0x9   :  { %v169_v30 = vld [vmem:[%s1909_s3 + $0x8] sm:$0xf]  ;;  %v62_v31 = vld [vmem:[%s1907_s1 + $0xc] sm:$0xf]  ;;  %v27_v34 = vld [vmem:[%s1906_s0 + $0x10] sm:$0xf]  ;;  %v203_v37 = vmax.bf16 %v167_v26, %v131_v20  ;;  %v204_v38 = vmax.bf16 %v168_v27, %v132_v25 }
   0xa   :  { %v134_v32 = vld [vmem:[%s1908_s2 + $0xc] sm:$0xf]  ;;  %v63_v39 = vld [vmem:[%s1907_s1 + $0x10] sm:$0xf]  ;;  %v205_v43 = vmax.bf16 %v169_v30, %v133_v29  ;;  %v28_v44 = vld [vmem:[%s1906_s0 + $0x14] sm:$0xf]  ;;  %v98_v45 = vmax.bf16 %v62_v31, %v26_v24 }
   0xb   :  { %v170_v33 = vld [vmem:[%s1909_s3 + $0xc] sm:$0xf]  ;;  %v135_v41 = vld [vmem:[%s1908_s2 + $0x10] sm:$0xf]  ;;  %v64_v48 = vld [vmem:[%s1907_s1 + $0x14] sm:$0xf]  ;;  %v99_v55 = vmax.bf16 %v63_v39, %v27_v34  ;;  %v826_v57 = vmax.bf16 %v203_v37, %v95_v35  ;;  %v828_v58 = vmax.bf16 %v204_v38, %v96_v36 }
   0xc   :  { %v171_v42 = vld [vmem:[%s1909_s3 + $0x10] sm:$0xf]  ;;  %v206_v46 = vmax.bf16 %v170_v33, %v134_v32  ;;  %v136_v49 = vld [vmem:[%s1908_s2 + $0x14] sm:$0xf]  ;;  %v29_v53 = vld [vmem:[%s1906_s0 + $0x18] sm:$0xf]  ;;  %v836_v61 = vmax.bf16 %v205_v43, %v97_v40  ;;  %v100_v0 = vmax.bf16 %v64_v48, %v28_v44 }
   0xd   :  { %v172_v50 = vld [vmem:[%s1909_s3 + $0x14] sm:$0xf]  ;;  %v65_v54 = vld [vmem:[%s1907_s1 + $0x18] sm:$0xf]  ;;  %v207_v56 = vmax.bf16 %v171_v42, %v135_v41  ;;  %v30_v62 = vld [vmem:[%s1906_s0 + $0x1c] sm:$0xf]  ;;  %v275_v12 = vunpack.c.l.bf16 %v826_v57  ;;  %v276_v13 = vunpack.c.l.bf16 %v828_v58 }
   0xe   :  { %v137_v59 = vld [vmem:[%s1908_s2 + $0x18] sm:$0xf]  ;;  %v31_v63 = vld [vmem:[%s1906_s0 + $0x20] sm:$0xf]  ;;  %v208_v1 = vmax.bf16 %v172_v50, %v136_v49  ;;  %v844_v2 = vmax.bf16 %v206_v46, %v98_v45  ;;  %v66_v3 = vld [vmem:[%s1907_s1 + $0x1c] sm:$0xf]  ;;  %v101_v4 = vmax.bf16 %v65_v54, %v29_v53  ;;  %v277_v14 = vunpack.c.l.bf16 %v836_v61 }
   0xf   :  { %v173_v60 = vld [vmem:[%s1909_s3 + $0x18] sm:$0xf]  ;;  %v138_v5 = vld [vmem:[%s1908_s2 + $0x1c] sm:$0xf]  ;;  %v67_v7 = vld [vmem:[%s1907_s1 + $0x20] sm:$0xf]  ;;  %v864_v11 = vmax.bf16 %v207_v56, %v99_v55  ;;  %v102_v17 = vmax.bf16 %v66_v3, %v30_v62 }
  0x10   :  { %v174_v6 = vld [vmem:[%s1909_s3 + $0x1c] sm:$0xf]  ;;  %v139_v8 = vld [vmem:[%s1908_s2 + $0x20] sm:$0xf]  ;;  %v209_v10 = vmax.bf16 %v173_v60, %v137_v59  ;;  %v32_v15 = vld [vmem:[%s1906_s0 + $0x24] sm:$0xf]  ;;  %v875_v19 = vmax.bf16 %v208_v1, %v100_v0  ;;  %v278_v20 = vunpack.c.l.bf16 %v844_v2  ;;  %v103_v21 = vmax.bf16 %v67_v7, %v31_v63 }
  0x11   :  { %v175_v9 = vld [vmem:[%s1909_s3 + $0x20] sm:$0xf]  ;;  %v68_v16 = vld [vmem:[%s1907_s1 + $0x24] sm:$0xf]  ;;  %v210_v18 = vmax.bf16 %v174_v6, %v138_v5  ;;  %v33_v25 = vld [vmem:[%s1906_s0 + $0x28] sm:$0xf]  ;;  %v279_v28 = vunpack.c.l.bf16 %v864_v11 }
  0x12   :  { %v140_v22 = vld [vmem:[%s1908_s2 + $0x24] sm:$0xf]  ;;  %v211_v24 = vmax.bf16 %v175_v9, %v139_v8  ;;  %v69_v26 = vld [vmem:[%s1907_s1 + $0x28] sm:$0xf]  ;;  %v890_v27 = vmax.bf16 %v209_v10, %v101_v4  ;;  %v312_v29 = vsel %vm311_vm0, %v275_v12, 0.0  ;;  %v313_v30 = vsel %vm311_vm0, %v276_v13, 0.0 }
  0x13   :  { %v176_v23 = vld [vmem:[%s1909_s3 + $0x24] sm:$0xf]  ;;  %v104_v31 = vmax.bf16 %v68_v16, %v32_v15  ;;  %v141_v32 = vld [vmem:[%s1908_s2 + $0x28] sm:$0xf]  ;;  %v314_v34 = vadd.f32 %v313_v30, %v312_v29  ;;  %v315_v35 = vsel %vm311_vm0, %v277_v14, 0.0  ;;  %v914_v39 = vmax.bf16 %v210_v18, %v102_v17 }
  0x14   :  { %v177_v33 = vld [vmem:[%s1909_s3 + $0x28] sm:$0xf]  ;;  %v34_v36 = vld [vmem:[%s1906_s0 + $0x2c] sm:$0xf]  ;;  %v212_v38 = vmax.bf16 %v176_v23, %v140_v22  ;;  %v280_v40 = vunpack.c.l.bf16 %v875_v19  ;;  %v317_v41 = vsel %vm311_vm0, %v278_v20, 0.0  ;;  %v105_v42 = vmax.bf16 %v69_v26, %v33_v25 }
  0x15   :  { %v70_v37 = vld [vmem:[%s1907_s1 + $0x2c] sm:$0xf]  ;;  %v316_v45 = vadd.f32 %v315_v35, %v314_v34  ;;  %v35_v46 = vld [vmem:[%s1906_s0 + $0x30] sm:$0xf]  ;;  %v213_v49 = vmax.bf16 %v177_v33, %v141_v32  ;;  %v932_v50 = vmax.bf16 %v211_v24, %v103_v21  ;;  %v1931_v53 = vunpack.c.l.bf16 %v890_v27  ;;  %v36_v62 = vld [vmem:[%s1906_s0 + $0x34] sm:$0xf] }
  0x16   :  { %v142_v43 = vld [vmem:[%s1908_s2 + $0x2c] sm:$0xf]  ;;  %v71_v48 = vld [vmem:[%s1907_s1 + $0x30] sm:$0xf]  ;;  %v319_v54 = vsel %vm311_vm0, %v279_v28, 0.0  ;;  %v106_v55 = vmax.bf16 %v70_v37, %v34_v36  ;;  %v950_v1 = vmax.bf16 %v212_v38, %v104_v31  ;;  %v1929_v3 = vunpack.c.l.bf16 %v914_v39 }
  0x17   :  { %v178_v44 = vld [vmem:[%s1909_s3 + $0x2c] sm:$0xf]  ;;  %v143_v56 = vld [vmem:[%s1908_s2 + $0x30] sm:$0xf]  ;;  %v318_v60 = vadd.f32 %v317_v41, %v316_v45  ;;  %v72_v63 = vld [vmem:[%s1907_s1 + $0x34] sm:$0xf]  ;;  %v107_v5 = vmax.bf16 %v71_v48, %v35_v46  ;;  %v968_v16 = vmax.bf16 %v213_v49, %v105_v42  ;;  %v1928_v17 = vunpack.c.l.bf16 %v932_v50 }
  0x18   :  { %v179_v59 = vld [vmem:[%s1909_s3 + $0x30] sm:$0xf]  ;;  %v214_v0 = vmax.bf16 %v178_v44, %v142_v43  ;;  %v321_v4 = vsel %vm311_vm0, %v280_v40, 0.0  ;;  %v144_v6 = vld [vmem:[%s1908_s2 + $0x34] sm:$0xf]  ;;  %v323_v18 = vsel %vm311_vm0, %v1931_v53, 0.0  ;;  %v108_v21 = vmax.bf16 %v72_v63, %v36_v62 }
  0x19   :  { %v180_v7 = vld [vmem:[%s1909_s3 + $0x34] sm:$0xf]  ;;  %v320_v8 = vadd.f32 %v319_v54, %v318_v60  ;;  %v37_v9 = vld [vmem:[%s1906_s0 + $0x38] sm:$0xf]  ;;  %v215_v15 = vmax.bf16 %v179_v59, %v143_v56  ;;  %v38_v25 = vld [vmem:[%s1906_s0 + $0x3c] sm:$0xf]  ;;  %v1926_v31 = vunpack.c.l.bf16 %v950_v1  ;;  %v1924_v43 = vunpack.c.l.bf16 %v968_v16 }
  0x1a   :  { %v73_v10 = vld [vmem:[%s1907_s1 + $0x38] sm:$0xf]  ;;  %v74_v26 = vld [vmem:[%s1907_s1 + $0x3c] sm:$0xf]  ;;  %v216_v29 = vmax.bf16 %v180_v7, %v144_v6  ;;  %v986_v30 = vmax.bf16 %v214_v0, %v106_v55  ;;  %v325_v32 = vsel %vm311_vm0, %v1929_v3, 0.0  ;;  %v327_v44 = vsel %vm311_vm0, %v1928_v17, 0.0 }
  0x1b   :  { %v145_v22 = vld [vmem:[%s1908_s2 + $0x38] sm:$0xf]  ;;  %v322_v24 = vadd.f32 %v321_v4, %v320_v8  ;;  %v109_v33 = vmax.bf16 %v73_v10, %v37_v9  ;;  %v146_v34 = vld [vmem:[%s1908_s2 + $0x3c] sm:$0xf]  ;;  %v39_v37 = vld [vmem:[%s1906_s0 + $0x40] sm:$0xf]  ;;  %v1004_v42 = vmax.bf16 %v215_v15, %v107_v5  ;;  %v110_v45 = vmax.bf16 %v74_v26, %v38_v25 }
  0x1c   :  { %v181_v23 = vld [vmem:[%s1909_s3 + $0x38] sm:$0xf]  ;;  %v182_v35 = vld [vmem:[%s1909_s3 + $0x3c] sm:$0xf]  ;;  %v75_v38 = vld [vmem:[%s1907_s1 + $0x40] sm:$0xf]  ;;  %v1022_v59 = vmax.bf16 %v216_v29, %v108_v21  ;;  %v1922_v60 = vunpack.c.l.bf16 %v986_v30  ;;  %v1937_v11 = vunpack.c.l.bf16 %v890_v27 }
  0x1d   :  { %v324_v36 = vadd.f32 %v323_v18, %v322_v24  ;;  %v217_v41 = vmax.bf16 %v181_v23, %v145_v22  ;;  %v147_v46 = vld [vmem:[%s1908_s2 + $0x40] sm:$0xf]  ;;  %v40_v54 = vld [vmem:[%s1906_s0 + $0x44] sm:$0xf]  ;;  %v218_v56 = vmax.bf16 %v182_v35, %v146_v34  ;;  %v329_v62 = vsel %vm311_vm0, %v1926_v31, 0.0 }
  0x1e   :  { %v183_v48 = vld [vmem:[%s1909_s3 + $0x40] sm:$0xf]  ;;  %v76_v55 = vld [vmem:[%s1907_s1 + $0x44] sm:$0xf]  ;;  %v111_v63 = vmax.bf16 %v75_v38, %v39_v37  ;;  %v41_v6 = vld [vmem:[%s1906_s0 + $0x48] sm:$0xf]  ;;  %v1920_v10 = vunpack.c.l.bf16 %v1004_v42 }
  0x1f   :  { %v326_v49 = vadd.f32 %v325_v32, %v324_v36  ;;  %v148_v0 = vld [vmem:[%s1908_s2 + $0x44] sm:$0xf]  ;;  %v77_v7 = vld [vmem:[%s1907_s1 + $0x48] sm:$0xf]  ;;  %v219_v8 = vmax.bf16 %v183_v48, %v147_v46  ;;  %v1040_v9 = vmax.bf16 %v217_v41, %v109_v33  ;;  %v331_v15 = vsel %vm311_vm0, %v1924_v43, 0.0 }
  0x20   :  { %v184_v4 = vld [vmem:[%s1909_s3 + $0x44] sm:$0xf]  ;;  %v112_v18 = vmax.bf16 %v76_v55, %v40_v54  ;;  %v149_v21 = vld [vmem:[%s1908_s2 + $0x48] sm:$0xf]  ;;  %v42_v24 = vld [vmem:[%s1906_s0 + $0x4c] sm:$0xf]  ;;  %v1058_v29 = vmax.bf16 %v218_v56, %v110_v45  ;;  %v1918_v32 = vunpack.c.l.bf16 %v1022_v59  ;;  %v113_v34 = vmax.bf16 %v77_v7, %v41_v6 }
  0x21   :  { %v328_v5 = vadd.f32 %v327_v44, %v326_v49  ;;  %v185_v22 = vld [vmem:[%s1909_s3 + $0x48] sm:$0xf]  ;;  %v78_v25 = vld [vmem:[%s1907_s1 + $0x4c] sm:$0xf]  ;;  %v220_v26 = vmax.bf16 %v184_v4, %v148_v0  ;;  %v333_v33 = vsel %vm311_vm0, %v1922_v60, 0.0  ;;  %v1076_v45 = vmax.bf16 %v219_v8, %v111_v63 }
  0x22   :  { %v150_v35 = vld [vmem:[%s1908_s2 + $0x4c] sm:$0xf]  ;;  %v43_v38 = vld [vmem:[%s1906_s0 + $0x50] sm:$0xf]  ;;  %v221_v44 = vmax.bf16 %v185_v22, %v149_v21  ;;  %v1916_v46 = vunpack.c.l.bf16 %v1040_v9  ;;  %v335_v48 = vsel %vm311_vm0, %v1920_v10, 0.0  ;;  %v114_v49 = vmax.bf16 %v78_v25, %v42_v24 }
  0x23   :  { %v330_v23 = vadd.f32 %v329_v62, %v328_v5  ;;  %v186_v36 = vld [vmem:[%s1909_s3 + $0x4c] sm:$0xf]  ;;  %v79_v41 = vld [vmem:[%s1907_s1 + $0x50] sm:$0xf]  ;;  %v44_v62 = vld [vmem:[%s1906_s0 + $0x54] sm:$0xf]  ;;  %v1094_v4 = vmax.bf16 %v220_v26, %v112_v18  ;;  %v1914_v5 = vunpack.c.l.bf16 %v1058_v29  ;;  %v1913_v25 = vunpack.c.l.bf16 %v1076_v45 }
  0x24   :  { %v151_v54 = vld [vmem:[%s1908_s2 + $0x50] sm:$0xf]  ;;  %v80_v63 = vld [vmem:[%s1907_s1 + $0x54] sm:$0xf]  ;;  %v222_v0 = vmax.bf16 %v186_v36, %v150_v35  ;;  %v337_v6 = vsel %vm311_vm0, %v1918_v32, 0.0  ;;  %v115_v7 = vmax.bf16 %v79_v41, %v43_v38  ;;  %v1112_v24 = vmax.bf16 %v221_v44, %v113_v34 }
  0x25   :  { %v332_v37 = vadd.f32 %v331_v15, %v330_v23  ;;  %v187_v55 = vld [vmem:[%s1909_s3 + $0x50] sm:$0xf]  ;;  %v152_v8 = vld [vmem:[%s1908_s2 + $0x54] sm:$0xf]  ;;  %v45_v18 = vld [vmem:[%s1906_s0 + $0x58] sm:$0xf] }
  0x26   :  { %v188_v15 = vld [vmem:[%s1909_s3 + $0x54] sm:$0xf]  ;;  %v81_v22 = vld [vmem:[%s1907_s1 + $0x58] sm:$0xf]  ;;  %v223_v23 = vmax.bf16 %v187_v55, %v151_v54  ;;  %v339_v26 = vsel %vm311_vm0, %v1916_v46, 0.0  ;;  %v1130_v44 = vmax.bf16 %v222_v0, %v114_v49  ;;  %v341_v54 = vsel %vm311_vm0, %v1914_v5, 0.0 }
  0x27   :  { %v334_v56 = vadd.f32 %v333_v33, %v332_v37  ;;  %v116_v33 = vmax.bf16 %v80_v63, %v44_v62  ;;  %v153_v35 = vld [vmem:[%s1908_s2 + $0x58] sm:$0xf]  ;;  %v46_v34 = vld [vmem:[%s1906_s0 + $0x5c] sm:$0xf]  ;;  %v224_v41 = vmax.bf16 %v188_v15, %v152_v8  ;;  %v117_v55 = vmax.bf16 %v81_v22, %v45_v18  ;;  %v47_v49 = vld [vmem:[%s1906_s0 + $0x60] sm:$0xf] }
  0x28   :  { %v189_v36 = vld [vmem:[%s1909_s3 + $0x58] sm:$0xf]  ;;  %v82_v38 = vld [vmem:[%s1907_s1 + $0x5c] sm:$0xf]  ;;  %v83_v0 = vld [vmem:[%s1907_s1 + $0x60] sm:$0xf]  ;;  %v1148_v8 = vmax.bf16 %v223_v23, %v115_v7  ;;  %v1917_v15 = vunpack.c.l.bf16 %v1112_v24 }
  0x29   :  { %v336_v21 = vadd.f32 %v335_v48, %v334_v56  ;;  %v1915_v48 = vunpack.c.l.bf16 %v1094_v4  ;;  %v154_v56 = vld [vmem:[%s1908_s2 + $0x5c] sm:$0xf]  ;;  %v118_v18 = vmax.bf16 %v82_v38, %v46_v34  ;;  %v155_v22 = vld [vmem:[%s1908_s2 + $0x60] sm:$0xf]  ;;  %v48_v7 = vld [vmem:[%s1906_s0 + $0x64] sm:$0xf]  ;;  %v1919_v34 = vunpack.c.l.bf16 %v1130_v44 }
  0x2a   :  { %v190_v62 = vld [vmem:[%s1909_s3 + $0x5c] sm:$0xf]  ;;  %v84_v23 = vld [vmem:[%s1907_s1 + $0x64] sm:$0xf] }
  0x2b   :  { %v338_v37 = vadd.f32 %v337_v6, %v336_v21  ;;  %v225_v6 = vmax.bf16 %v189_v36, %v153_v35  ;;  %v343_v21 = vsel %vm311_vm0, %v1913_v25, 0.0  ;;  %v226_v35 = vmax.bf16 %v190_v62, %v154_v56 }
  0x2c   :  { %v1166_v36 = vmax.bf16 %v224_v41, %v116_v33  ;;  %v345_v38 = vsel %vm311_vm0, %v1915_v48, 0.0  ;;  %v119_v25 = vmax.bf16 %v83_v0, %v47_v49  ;;  %v49_v33 = vld [vmem:[%s1906_s0 + $0x68] sm:$0xf]  ;;  %v1921_v49 = vunpack.c.l.bf16 %v1148_v8 }
  0x2d   :  { %v340_v63 = vadd.f32 %v339_v26, %v338_v37  ;;  %v191_v26 = vld [vmem:[%s1909_s3 + $0x60] sm:$0xf]  ;;  %v85_v41 = vld [vmem:[%s1907_s1 + $0x68] sm:$0xf]  ;;  %v1184_v62 = vmax.bf16 %v225_v6, %v117_v55  ;;  %v347_v0 = vsel %vm311_vm0, %v1917_v15, 0.0  ;;  %v120_v48 = vmax.bf16 %v84_v23, %v48_v7 }
  0x2e   :  { %v227_v56 = vmax.bf16 %v191_v26, %v155_v22  ;;  %v50_v55 = vld [vmem:[%s1906_s0 + $0x6c] sm:$0xf]  ;;  %v1202_v26 = vmax.bf16 %v226_v35, %v118_v18  ;;  %v1923_v7 = vunpack.c.l.bf16 %v1166_v36  ;;  %v349_v23 = vsel %vm311_vm0, %v1919_v34, 0.0  ;;  %v51_v18 = vld [vmem:[%s1906_s0 + $0x70] sm:$0xf] }
  0x2f   :  { %v342_v37 = vadd.f32 %v341_v54, %v340_v63  ;;  %v156_v54 = vld [vmem:[%s1908_s2 + $0x64] sm:$0xf]  ;;  %v86_v6 = vld [vmem:[%s1907_s1 + $0x6c] sm:$0xf]  ;;  %v121_v15 = vmax.bf16 %v85_v41, %v49_v33  ;;  %v87_v35 = vld [vmem:[%s1907_s1 + $0x70] sm:$0xf]  ;;  %v1925_v33 = vunpack.c.l.bf16 %v1184_v62 }
  0x30   :  { %v192_v63 = vld [vmem:[%s1909_s3 + $0x64] sm:$0xf]  ;;  %v351_v41 = vsel %vm311_vm0, %v1921_v49, 0.0  ;;  %v122_v34 = vmax.bf16 %v86_v6, %v50_v55  ;;  %v1927_v55 = vunpack.c.l.bf16 %v1202_v26  ;;  %v353_v6 = vsel %vm311_vm0, %v1923_v7, 0.0 }
  0x31   :  { %v344_v5 = vadd.f32 %v343_v21, %v342_v37  ;;  %v157_v21 = vld [vmem:[%s1908_s2 + $0x68] sm:$0xf]  ;;  %v228_v22 = vmax.bf16 %v192_v63, %v156_v54  ;;  %v1220_v63 = vmax.bf16 %v227_v56, %v119_v25  ;;  %v52_v25 = vld [vmem:[%s1906_s0 + $0x74] sm:$0xf]  ;;  %v123_v49 = vmax.bf16 %v87_v35, %v51_v18 }
  0x32   :  { %v193_v37 = vld [vmem:[%s1909_s3 + $0x68] sm:$0xf]  ;;  %v88_v56 = vld [vmem:[%s1907_s1 + $0x74] sm:$0xf]  ;;  %v355_v35 = vsel %vm311_vm0, %v1925_v33, 0.0 }
  0x33   :  { %v346_v46 = vadd.f32 %v345_v38, %v344_v5  ;;  %v158_v5 = vld [vmem:[%s1908_s2 + $0x6c] sm:$0xf]  ;;  %v229_v54 = vmax.bf16 %v193_v37, %v157_v21  ;;  %v1238_v37 = vmax.bf16 %v228_v22, %v120_v48  ;;  %v53_v48 = vld [vmem:[%s1906_s0 + $0x78] sm:$0xf]  ;;  %v1930_v18 = vunpack.c.l.bf16 %v1220_v63 }
  0x34   :  { %v194_v38 = vld [vmem:[%s1909_s3 + $0x6c] sm:$0xf]  ;;  %v89_v22 = vld [vmem:[%s1907_s1 + $0x78] sm:$0xf]  ;;  %v124_v7 = vmax.bf16 %v88_v56, %v52_v25  ;;  %v357_v56 = vsel %vm311_vm0, %v1927_v55, 0.0 }
  0x35   :  { %v348_v32 = vadd.f32 %v347_v0, %v346_v46  ;;  %v159_v46 = vld [vmem:[%s1908_s2 + $0x70] sm:$0xf]  ;;  %v230_v21 = vmax.bf16 %v194_v38, %v158_v5  ;;  %v1256_v38 = vmax.bf16 %v229_v54, %v121_v15  ;;  %v54_v15 = vld [vmem:[%s1906_s0 + $0x7c] sm:$0xf]  ;;  %v300_v25 = vunpack.c.l.bf16 %v1238_v37 }
  0x36   :  { %v195_v0 = vld [vmem:[%s1909_s3 + $0x70] sm:$0xf]  ;;  %v90_v54 = vld [vmem:[%s1907_s1 + $0x7c] sm:$0xf]  ;;  %v125_v33 = vmax.bf16 %v89_v22, %v53_v48  ;;  %v359_v22 = vsel %vm311_vm0, %v1930_v18, 0.0 }
  0x37   :  { %v350_v10 = vadd.f32 %v349_v23, %v348_v32  ;;  %v160_v32 = vld [vmem:[%s1908_s2 + $0x74] sm:$0xf]  ;;  %v231_v5 = vmax.bf16 %v195_v0, %v159_v46  ;;  %v1274_v0 = vmax.bf16 %v230_v21, %v122_v34  ;;  %v55_v34 = vld [vmem:[%s1906_s0 + $0x80] sm:$0xf]  ;;  %v301_v48 = vunpack.c.l.bf16 %v1256_v38 }
  0x38   :  { %v196_v23 = vld [vmem:[%s1909_s3 + $0x74] sm:$0xf]  ;;  %v91_v21 = vld [vmem:[%s1907_s1 + $0x80] sm:$0xf]  ;;  %v126_v55 = vmax.bf16 %v90_v54, %v54_v15 }
  0x39   :  { %v352_v60 = vadd.f32 %v351_v41, %v350_v10  ;;  %v161_v10 = vld [vmem:[%s1908_s2 + $0x78] sm:$0xf]  ;;  %v232_v46 = vmax.bf16 %v196_v23, %v160_v32  ;;  %v1292_v23 = vmax.bf16 %v231_v5, %v123_v49  ;;  %v302_v49 = vunpack.c.l.bf16 %v1274_v0 }
  0x3a   :  { %v197_v41 = vld [vmem:[%s1909_s3 + $0x78] sm:$0xf]  ;;  %v361_v5 = vsel %vm311_vm0, %v300_v25, 0.0 }
  0x3b   :  { %v354_v43 = vadd.f32 %v353_v6, %v352_v60  ;;  %v162_v60 = vld [vmem:[%s1908_s2 + $0x7c] sm:$0xf]  ;;  %v233_v32 = vmax.bf16 %v197_v41, %v161_v10  ;;  %v1304_v10 = vmax.bf16 %v232_v46, %v124_v7  ;;  %v127_v41 = vmax.bf16 %v91_v21, %v55_v34 }
  0x3c   :  { %v198_v6 = vld [vmem:[%s1909_s3 + $0x7c] sm:$0xf]  ;;  %v1936_v53 = vunpack.c.l.bf16 %v1292_v23  ;;  %v1956_v38 = vunpack.c.l.bf16 %v1292_v23 }
  0x3d   :  { %v356_v31 = vadd.f32 %v355_v35, %v354_v43  ;;  %v163_v43 = vld [vmem:[%s1908_s2 + $0x80] sm:$0xf]  ;;  %v234_v3 = vmax.bf16 %v198_v6, %v162_v60  ;;  %v1310_v18 = vmax.bf16 %v233_v32, %v125_v33  ;;  %v1935_v46 = vunpack.c.l.bf16 %v1304_v10 }
  0x3e   :  { %v199_v35 = vld [vmem:[%s1909_s3 + $0x80] sm:$0xf]  ;;  %v365_v60 = vsel %vm311_vm0, %v302_v49, 0.0  ;;  %v367_v34 = vsel %vm311_vm0, %v1936_v53, 0.0  ;;  %v1957_v0 = vunpack.c.l.bf16 %v1304_v10 }
  0x3f   :  { %v358_v17 = vadd.f32 %v357_v56, %v356_v31  ;;  %v235_v54 = vmax.bf16 %v199_v35, %v163_v43  ;;  %v363_v31 = vsel %vm311_vm0, %v301_v48, 0.0  ;;  %v1316_v7 = vmax.bf16 %v234_v3, %v126_v55 }
  0x40   :  { %v1934_v33 = vunpack.c.l.bf16 %v1310_v18  ;;  %v369_v3 = vsel %vm311_vm0, %v1935_v46, 0.0  ;;  %v1958_v23 = vunpack.c.l.bf16 %v1310_v18 }
  0x41   :  { %v360_v15 = vadd.f32 %v359_v22, %v358_v17  ;;  %v1322_v17 = vmax.bf16 %v235_v54, %v127_v41  ;;  %v1933_v32 = vunpack.c.l.bf16 %v1316_v7  ;;  %v309_v54 = vunpack.c.l.bf16 %v816_v51 }
  0x42   :  { %v371_v43 = vsel %vm311_vm0, %v1934_v33, 0.0  ;;  %v1959_v10 = vunpack.c.l.bf16 %v1316_v7 }
  0x43   :  { %v362_v56 = vadd.f32 %v361_v5, %v360_v15  ;;  %v1932_v22 = vunpack.c.l.bf16 %v1322_v17  ;;  %v308_v5 = vunpack.c.l.bf16 %v805_v47  ;;  %v373_v41 = vsel %vm311_vm0, %v1933_v32, 0.0 }
  0x44   :  { %v1960_v18 = vunpack.c.l.bf16 %v1322_v17 }
  0x45   :  { %v364_v6 = vadd.f32 %v363_v31, %v362_v56  ;;  %v375_v31 = vsel %vm311_vm0, %v1932_v22, 0.0 }
  0x47   :  { %v366_v21 = vadd.f32 %v365_v60, %v364_v6  ;;  %v310_v60 = vunpack.c.l.bf16 %v818_v52  ;;  %v377_v6 = vsel %vm311_vm0, %v308_v5, 0.0 }
  0x49   :  { %v368_v55 = vadd.f32 %v367_v34, %v366_v21  ;;  %v379_v21 = vsel %vm311_vm0, %v309_v54, 0.0 }
  0x4b   :  { %v370_v35 = vadd.f32 %v369_v3, %v368_v55  ;;  %v381_v55 = vsel %vm311_vm0, %v310_v60, 0.0 }
  0x4d   :  { %v372_v15 = vadd.f32 %v371_v43, %v370_v35 }
  0x4f   :  { %v374_v56 = vadd.f32 %v373_v41, %v372_v15 }
  0x51   :  { %v376_v34 = vadd.f32 %v375_v31, %v374_v56 }
  0x53   :  { %v378_v3 = vadd.f32 %v377_v6, %v376_v34 }
  0x55   :  { %v380_v43 = vadd.f32 %v379_v21, %v378_v3  ;;  %v1939_v3 = vunpack.c.l.bf16 %v932_v50  ;;  %v1941_v50 = vunpack.c.l.bf16 %v968_v16  ;;  %v1943_v16 = vunpack.c.l.bf16 %v1004_v42 }
  0x56   :  { %v1945_v42 = vunpack.c.l.bf16 %v1040_v9  ;;  %v1947_v9 = vunpack.c.l.bf16 %v1076_v45  ;;  %v1949_v45 = vunpack.c.l.bf16 %v1112_v24  ;;  %v1951_v24 = vunpack.c.l.bf16 %v1148_v8 }
  0x57   :  { %v382_v35 = vadd.f32 %v381_v55, %v380_v43  ;;  %v1953_v8 = vunpack.c.l.bf16 %v1184_v62  ;;  %v1955_v62 = vunpack.c.l.bf16 %v1220_v63 }
  0x59   :  { %v383_v22 = vrot.slane %v382_v35, 4 }
  0x5b   :  { %v384_v41 = vadd.f32 %v383_v22, %v382_v35 }
  0x5d   :  { %v385_v15 = vrot.slane %v384_v41, 2 }
  0x5f   :  { %v386_v32 = vadd.f32 %v385_v15, %v384_v41 }
  0x61   :  { %v387_v33 = vrot.slane %v386_v32, 1 }
  0x63   :  { %v388_v46 = vadd.f32 %v387_v33, %v386_v32 }
  0x65   :  { %v1354_v53 = vmul.f32 0.0034722222, %v388_v46 }
  0x67   :  { %v1359_v31 = vsub.f32 %v275_v12, %v1354_v53  ;;  %v1364_v56 = vsub.f32 %v276_v13, %v1354_v53  ;;  %v1369_v22 = vsub.f32 %v277_v14, %v1354_v53  ;;  %v1374_v46 = vsub.f32 %v278_v20, %v1354_v53 }
  0x68   :  { %v1379_v57 = vsub.f32 %v279_v28, %v1354_v53  ;;  %v1390_v2 = vsub.f32 %v280_v40, %v1354_v53  ;;  %v1397_v14 = vsub.f32 %v1937_v11, %v1354_v53  ;;  %v1938_v40 = vunpack.c.l.bf16 %v914_v39 }
  0x69   :  { %v427_v58 = vmul.f32 %v1359_v31, %v1359_v31  ;;  %v428_v12 = vmul.f32 %v1364_v56, %v1364_v56  ;;  %v429_v61 = vmul.f32 %v1369_v22, %v1369_v22  ;;  %v430_v13 = vmul.f32 %v1374_v46, %v1374_v46 }
  0x6a   :  { %v431_v20 = vmul.f32 %v1379_v57, %v1379_v57  ;;  %v1407_v6 = vsub.f32 %v1938_v40, %v1354_v53  ;;  %v432_v27 = vmul.f32 %v1390_v2, %v1390_v2  ;;  %v1415_v55 = vsub.f32 %v1939_v3, %v1354_v53 }
  0x6b   :  { %v463_v28 = vsel %vm311_vm0, %v427_v58, 0.0  ;;  %v464_v33 = vsel %vm311_vm0, %v428_v12, 0.0  ;;  %v466_v32 = vsel %vm311_vm0, %v429_v61, 0.0  ;;  %v468_v34 = vsel %vm311_vm0, %v430_v13, 0.0 }
  0x6c   :  { %v465_v19 = vadd.f32 %v464_v33, %v463_v28  ;;  %v433_v43 = vmul.f32 %v1397_v14, %v1397_v14  ;;  %v470_v35 = vsel %vm311_vm0, %v431_v20, 0.0  ;;  %v1940_v39 = vunpack.c.l.bf16 %v950_v1 }
  0x6d   :  { %v434_v58 = vmul.f32 %v1407_v6, %v1407_v6  ;;  %v472_v12 = vsel %vm311_vm0, %v432_v27, 0.0  ;;  %v1431_v13 = vsub.f32 %v1941_v50, %v1354_v53  ;;  %v435_v11 = vmul.f32 %v1415_v55, %v1415_v55 }
  0x6e   :  { %v467_v21 = vadd.f32 %v466_v32, %v465_v19  ;;  %v1423_v15 = vsub.f32 %v1940_v39, %v1354_v53  ;;  %v474_v20 = vsel %vm311_vm0, %v433_v43, 0.0  ;;  %v1942_v1 = vunpack.c.l.bf16 %v986_v30 }
  0x6f   :  { %v476_v19 = vsel %vm311_vm0, %v434_v58, 0.0  ;;  %v1447_v27 = vsub.f32 %v1943_v16, %v1354_v53  ;;  %v1944_v30 = vunpack.c.l.bf16 %v1022_v59  ;;  %v1463_v58 = vsub.f32 %v1945_v42, %v1354_v53 }
  0x70   :  { %v469_v41 = vadd.f32 %v468_v34, %v467_v21  ;;  %v1439_v33 = vsub.f32 %v1942_v1, %v1354_v53  ;;  %v436_v32 = vmul.f32 %v1423_v15, %v1423_v15  ;;  %v437_v34 = vmul.f32 %v1431_v13, %v1431_v13 }
  0x71   :  { %v478_v21 = vsel %vm311_vm0, %v435_v11, 0.0  ;;  %v1455_v43 = vsub.f32 %v1944_v30, %v1354_v53  ;;  %v1946_v59 = vunpack.c.l.bf16 %v1058_v29  ;;  %v1948_v29 = vunpack.c.l.bf16 %v1094_v4 }
  0x72   :  { %v471_v61 = vadd.f32 %v470_v35, %v469_v41  ;;  %v438_v35 = vmul.f32 %v1439_v33, %v1439_v33  ;;  %v480_v41 = vsel %vm311_vm0, %v436_v32, 0.0  ;;  %v1479_v32 = vsub.f32 %v1947_v9, %v1354_v53 }
  0x73   :  { %v1471_v11 = vsub.f32 %v1946_v59, %v1354_v53  ;;  %v1950_v4 = vunpack.c.l.bf16 %v1130_v44  ;;  %v1952_v44 = vunpack.c.l.bf16 %v1166_v36  ;;  %v1954_v36 = vunpack.c.l.bf16 %v1202_v26 }
  0x74   :  { %v473_v28 = vadd.f32 %v472_v12, %v471_v61  ;;  %v439_v12 = vmul.f32 %v1447_v27, %v1447_v27  ;;  %v482_v61 = vsel %vm311_vm0, %v437_v34, 0.0  ;;  %v1487_v34 = vsub.f32 %v1948_v29, %v1354_v53 }
  0x75   :  { %v1551_v26 = vsub.f32 %v300_v25, %v1354_v53  ;;  %v1559_v63 = vsub.f32 %v301_v48, %v1354_v53  ;;  %v1567_v37 = vsub.f32 %v302_v49, %v1354_v53  ;;  %v1575_v48 = vsub.f32 %v1956_v38, %v1354_v53 }
  0x76   :  { %v475_v40 = vadd.f32 %v474_v20, %v473_v28  ;;  %v440_v20 = vmul.f32 %v1455_v43, %v1455_v43  ;;  %v484_v28 = vsel %vm311_vm0, %v438_v35, 0.0  ;;  %v1495_v35 = vsub.f32 %v1949_v45, %v1354_v53 }
  0x77   :  { %v452_v25 = vmul.f32 %v1551_v26, %v1551_v26  ;;  %v1583_v49 = vsub.f32 %v1957_v0, %v1354_v53  ;;  %v1615_v7 = vsub.f32 %v308_v5, %v1354_v53  ;;  %v1623_v17 = vsub.f32 %v309_v54, %v1354_v53 }
  0x78   :  { %v477_v3 = vadd.f32 %v476_v19, %v475_v40  ;;  %v441_v19 = vmul.f32 %v1463_v58, %v1463_v58  ;;  %v486_v40 = vsel %vm311_vm0, %v439_v12, 0.0  ;;  %v1503_v12 = vsub.f32 %v1950_v4, %v1354_v53 }
  0x79   :  { %v1631_v47 = vsub.f32 %v310_v60, %v1354_v53  ;;  %v460_v5 = vmul.f32 %v1615_v7, %v1615_v7  ;;  %v461_v51 = vmul.f32 %v1623_v17, %v1623_v17 }
  0x7a   :  { %v479_v39 = vadd.f32 %v478_v21, %v477_v3  ;;  %v442_v21 = vmul.f32 %v1471_v11, %v1471_v11  ;;  %v488_v3 = vsel %vm311_vm0, %v440_v20, 0.0  ;;  %v1511_v20 = vsub.f32 %v1951_v24, %v1354_v53 }
  0x7c   :  { %v481_v50 = vadd.f32 %v480_v41, %v479_v39  ;;  %v443_v41 = vmul.f32 %v1479_v32, %v1479_v32  ;;  %v490_v39 = vsel %vm311_vm0, %v441_v19, 0.0  ;;  %v1519_v19 = vsub.f32 %v1952_v44, %v1354_v53 }
  0x7e   :  { %v483_v1 = vadd.f32 %v482_v61, %v481_v50  ;;  %v444_v61 = vmul.f32 %v1487_v34, %v1487_v34  ;;  %v492_v50 = vsel %vm311_vm0, %v442_v21, 0.0  ;;  %v1527_v21 = vsub.f32 %v1953_v8, %v1354_v53 }
  0x80   :  { %v485_v16 = vadd.f32 %v484_v28, %v483_v1  ;;  %v445_v28 = vmul.f32 %v1495_v35, %v1495_v35  ;;  %v494_v1 = vsel %vm311_vm0, %v443_v41, 0.0  ;;  %v1535_v41 = vsub.f32 %v1954_v36, %v1354_v53 }
  0x81   :  { %v454_v36 = vmul.f32 %v1567_v37, %v1567_v37 }
  0x82   :  { %v487_v30 = vadd.f32 %v486_v40, %v485_v16  ;;  %v446_v40 = vmul.f32 %v1503_v12, %v1503_v12  ;;  %v496_v16 = vsel %vm311_vm0, %v444_v61, 0.0  ;;  %v1543_v61 = vsub.f32 %v1955_v62, %v1354_v53 }
  0x83   :  { %v455_v62 = vmul.f32 %v1575_v48, %v1575_v48 }
  0x84   :  { %v489_v42 = vadd.f32 %v488_v3, %v487_v30  ;;  %v447_v3 = vmul.f32 %v1511_v20, %v1511_v20  ;;  %v498_v30 = vsel %vm311_vm0, %v445_v28, 0.0  ;;  %v450_v28 = vmul.f32 %v1535_v41, %v1535_v41 }
  0x85   :  { %v451_v44 = vmul.f32 %v1543_v61, %v1543_v61 }
  0x86   :  { %v491_v59 = vadd.f32 %v490_v39, %v489_v42  ;;  %v448_v39 = vmul.f32 %v1519_v19, %v1519_v19  ;;  %v500_v42 = vsel %vm311_vm0, %v446_v40, 0.0 }
  0x88   :  { %v493_v9 = vadd.f32 %v492_v50, %v491_v59  ;;  %v449_v50 = vmul.f32 %v1527_v21, %v1527_v21  ;;  %v502_v59 = vsel %vm311_vm0, %v447_v3, 0.0  ;;  %v453_v3 = vmul.f32 %v1559_v63, %v1559_v63 }
  0x8a   :  { %v495_v29 = vadd.f32 %v494_v1, %v493_v9  ;;  %v504_v1 = vsel %vm311_vm0, %v448_v39, 0.0  ;;  %v506_v40 = vsel %vm311_vm0, %v449_v50, 0.0  ;;  %v512_v39 = vsel %vm311_vm0, %v452_v25, 0.0 }
  0x8b   :  { %v514_v50 = vsel %vm311_vm0, %v453_v3, 0.0 }
  0x8c   :  { %v497_v45 = vadd.f32 %v496_v16, %v495_v29  ;;  %v508_v29 = vsel %vm311_vm0, %v450_v28, 0.0  ;;  %v456_v28 = vmul.f32 %v1583_v49, %v1583_v49 }
  0x8e   :  { %v499_v4 = vadd.f32 %v498_v30, %v497_v45  ;;  %v510_v30 = vsel %vm311_vm0, %v451_v44, 0.0  ;;  %v1607_v44 = vsub.f32 %v1960_v18, %v1354_v53 }
  0x90   :  { %v501_v24 = vadd.f32 %v500_v42, %v499_v4  ;;  %v1591_v4 = vsub.f32 %v1958_v23, %v1354_v53  ;;  %v459_v3 = vmul.f32 %v1607_v44, %v1607_v44  ;;  %v528_v23 = vsel %vm311_vm0, %v460_v5, 0.0 }
  0x92   :  { %v503_v9 = vadd.f32 %v502_v59, %v501_v24  ;;  %v1599_v24 = vsub.f32 %v1959_v10, %v1354_v53  ;;  %v526_v54 = vsel %vm311_vm0, %v459_v3, 0.0  ;;  %v530_v53 = vsel %vm311_vm0, %v461_v51, 0.0 }
  0x94   :  { %v505_v16 = vadd.f32 %v504_v1, %v503_v9  ;;  %v516_v1 = vsel %vm311_vm0, %v454_v36, 0.0 }
  0x96   :  { %v507_v8 = vadd.f32 %v506_v40, %v505_v16  ;;  %v457_v40 = vmul.f32 %v1591_v4, %v1591_v4  ;;  %v518_v16 = vsel %vm311_vm0, %v455_v62, 0.0 }
  0x98   :  { %v509_v45 = vadd.f32 %v508_v29, %v507_v8  ;;  %v458_v29 = vmul.f32 %v1599_v24, %v1599_v24  ;;  %v520_v8 = vsel %vm311_vm0, %v456_v28, 0.0 }
  0x9a   :  { %v511_v42 = vadd.f32 %v510_v30, %v509_v45  ;;  %v522_v30 = vsel %vm311_vm0, %v457_v40, 0.0  ;;  %v524_v0 = vsel %vm311_vm0, %v458_v29, 0.0  ;;  %v545_v29 = vlaneseq }
  0x9c   :  { %v513_v59 = vadd.f32 %v512_v39, %v511_v42  ;;  %v462_v42 = vmul.f32 %v1631_v47, %v1631_v47 }
  0x9e   :  { %v515_v9 = vadd.f32 %v514_v50, %v513_v59  ;;  %v532_v62 = vsel %vm311_vm0, %v462_v42, 0.0 }
  0xa0   :  { %v517_v25 = vadd.f32 %v516_v1, %v515_v9 }
  0xa2   :  { %v519_v38 = vadd.f32 %v518_v16, %v517_v25 }
  0xa4   :  { %v521_v45 = vadd.f32 %v520_v8, %v519_v38  ;;  %v546_v8 = vshrl.u32 %v545_v29, 7  ;;  %v543_v38 = vld [vmem:[%s1910_s4] sm:$0x1] }
  0xa6   :  { %v523_v36 = vadd.f32 %v522_v30, %v521_v45  ;;  %v547_v3 = vsub.s32 0, %v546_v8 }
  0xa8   :  { %v525_v39 = vadd.f32 %v524_v0, %v523_v36  ;;  %v1652_v0 = vld [vmem:[%s1911_s5] ss:$0 sm:$0xff] }
  0xaa   :  { %v527_v52 = vadd.f32 %v526_v54, %v525_v39 }
  0xac   :  { %v529_v60 = vadd.f32 %v528_v23, %v527_v52 }
  0xae   :  { %v531_v50 = vadd.f32 %v530_v53, %v529_v60 }
  0xb0   :  { %v533_v59 = vadd.f32 %v532_v62, %v531_v50 }
  0xb2   :  { %v534_v10 = vrot.slane %v533_v59, 4 }
  0xb4   :  { %v535_v28 = vadd.f32 %v534_v10, %v533_v59 }
  0xb6   :  { %v536_v1 = vrot.slane %v535_v28, 2 }
  0xb8   :  { %v537_v9 = vadd.f32 %v536_v1, %v535_v28 }
  0xba   :  { %v538_v18 = vrot.slane %v537_v9, 1 }
  0xbc   :  { %v539_v40 = vadd.f32 %v538_v18, %v537_v9 }
  0xbe   :  { %v540_v16 = vmul.f32 0.0034722222, %v539_v40 }
  0xc0   :  { %v541_v25 = vadd.f32 1e-05, %v540_v16 }
  0xc2   :  { %669 = vrsqrt.f32 %v541_v25 }
  0xcf   :  { %v670_v30 = vpop.eup %669 }
  0xd0   :  { %v544_v45 = vmul.f32 %v670_v30, %v543_v38 }
  0xd2   :  { %v1647_v5 = vrot.slane %v544_v45, %v547_v3 }
  0xd4   :  { %v549_v36 = vmul.f32 %v1647_v5, %v1359_v31  ;;  %v550_v51 = vmul.f32 %v1647_v5, %v1364_v56  ;;  %v551_v54 = vmul.f32 %v1647_v5, %v1369_v22  ;;  %v552_v39 = vmul.f32 %v1647_v5, %v1374_v46 }
  0xd5   :  { %v553_v42 = vmul.f32 %v1647_v5, %v1379_v57  ;;  %v554_v23 = vmul.f32 %v1647_v5, %v1390_v2  ;;  %v555_v52 = vmul.f32 %v1647_v5, %v1397_v14  ;;  %v556_v31 = vmul.f32 %v1647_v5, %v1407_v6 }
  0xd6   :  { %v592_v56 = vadd.f32 %v1652_v0, %v549_v36  ;;  %v593_v53 = vadd.f32 %v1652_v0, %v550_v51  ;;  %v594_v22 = vadd.f32 %v1652_v0, %v551_v54  ;;  %v595_v46 = vadd.f32 %v1652_v0, %v552_v39 }
  0xd7   :  { %v596_v60 = vadd.f32 %v1652_v0, %v553_v42  ;;  %v597_v57 = vadd.f32 %v1652_v0, %v554_v23  ;;  %v598_v2 = vadd.f32 %v1652_v0, %v555_v52  ;;  %v599_v62 = vadd.f32 %v1652_v0, %v556_v31 }
  0xd8   :  { %628 = vst.msk [vmem:[%s1912_s6] sm:$0xff] %vm311_vm0, %v592_v56  ;;  %629 = vst.msk [vmem:[%s1912_s6 + $0x8] sm:$0xff] %vm311_vm0, %v593_v53  ;;  %v557_v14 = vmul.f32 %v1647_v5, %v1415_v55  ;;  %v558_v6 = vmul.f32 %v1647_v5, %v1423_v15  ;;  %v559_v50 = vmul.f32 %v1647_v5, %v1431_v13 }
  0xd9   :  { %630 = vst.msk [vmem:[%s1912_s6 + $0x10] sm:$0xff] %vm311_vm0, %v594_v22  ;;  %631 = vst.msk [vmem:[%s1912_s6 + $0x18] sm:$0xff] %vm311_vm0, %v595_v46  ;;  %v560_v59 = vmul.f32 %v1647_v5, %v1439_v33  ;;  %v561_v55 = vmul.f32 %v1647_v5, %v1447_v27  ;;  %v562_v15 = vmul.f32 %v1647_v5, %v1455_v43 }
  0xda   :  { %632 = vst.msk [vmem:[%s1912_s6 + $0x20] sm:$0xff] %vm311_vm0, %v596_v60  ;;  %633 = vst.msk [vmem:[%s1912_s6 + $0x28] sm:$0xff] %vm311_vm0, %v597_v57  ;;  %v563_v13 = vmul.f32 %v1647_v5, %v1463_v58  ;;  %v564_v33 = vmul.f32 %v1647_v5, %v1471_v11  ;;  %v600_v10 = vadd.f32 %v1652_v0, %v557_v14 }
  0xdb   :  { %634 = vst.msk [vmem:[%s1912_s6 + $0x30] sm:$0xff] %vm311_vm0, %v598_v2  ;;  %635 = vst.msk [vmem:[%s1912_s6 + $0x38] sm:$0xff] %vm311_vm0, %v599_v62  ;;  %v601_v28 = vadd.f32 %v1652_v0, %v558_v6  ;;  %v602_v1 = vadd.f32 %v1652_v0, %v559_v50  ;;  %v603_v9 = vadd.f32 %v1652_v0, %v560_v59 }
  0xdc   :  { %v604_v18 = vadd.f32 %v1652_v0, %v561_v55  ;;  %v605_v27 = vadd.f32 %v1652_v0, %v562_v15  ;;  %v606_v43 = vadd.f32 %v1652_v0, %v563_v13  ;;  %v607_v40 = vadd.f32 %v1652_v0, %v564_v33  ;;  %636 = vst.msk [vmem:[%s1912_s6 + $0x40] sm:$0xff] %vm311_vm0, %v600_v10 }
  0xdd   :  { %637 = vst.msk [vmem:[%s1912_s6 + $0x48] sm:$0xff] %vm311_vm0, %v601_v28  ;;  %638 = vst.msk [vmem:[%s1912_s6 + $0x50] sm:$0xff] %vm311_vm0, %v602_v1  ;;  %v565_v58 = vmul.f32 %v1647_v5, %v1479_v32  ;;  %v566_v11 = vmul.f32 %v1647_v5, %v1487_v34  ;;  %v567_v16 = vmul.f32 %v1647_v5, %v1495_v35 }
  0xde   :  { %639 = vst.msk [vmem:[%s1912_s6 + $0x58] sm:$0xff] %vm311_vm0, %v603_v9  ;;  %v568_v25 = vmul.f32 %v1647_v5, %v1503_v12  ;;  %640 = vst.msk [vmem:[%s1912_s6 + $0x60] sm:$0xff] %vm311_vm0, %v604_v18  ;;  %v569_v32 = vmul.f32 %v1647_v5, %v1511_v20  ;;  %v570_v34 = vmul.f32 %v1647_v5, %v1519_v19 }
  0xdf   :  { %641 = vst.msk [vmem:[%s1912_s6 + $0x68] sm:$0xff] %vm311_vm0, %v605_v27  ;;  %642 = vst.msk [vmem:[%s1912_s6 + $0x70] sm:$0xff] %vm311_vm0, %v606_v43  ;;  %v571_v35 = vmul.f32 %v1647_v5, %v1527_v21  ;;  %v572_v12 = vmul.f32 %v1647_v5, %v1535_v41  ;;  %v608_v29 = vadd.f32 %v1652_v0, %v565_v58 }
  0xe0   :  { %643 = vst.msk [vmem:[%s1912_s6 + $0x78] sm:$0xff] %vm311_vm0, %v607_v40  ;;  %v609_v8 = vadd.f32 %v1652_v0, %v566_v11  ;;  %v610_v38 = vadd.f32 %v1652_v0, %v567_v16  ;;  %v611_v3 = vadd.f32 %v1652_v0, %v568_v25  ;;  %v612_v30 = vadd.f32 %v1652_v0, %v569_v32 }
  0xe1   :  { %v613_v20 = vadd.f32 %v1652_v0, %v570_v34  ;;  %v614_v19 = vadd.f32 %v1652_v0, %v571_v35  ;;  %v615_v45 = vadd.f32 %v1652_v0, %v572_v12  ;;  %644 = vst.msk [vmem:[%s1912_s6 + $0x80] sm:$0xff] %vm311_vm0, %v608_v29  ;;  %v573_v21 = vmul.f32 %v1647_v5, %v1543_v61 }
  0xe2   :  { %645 = vst.msk [vmem:[%s1912_s6 + $0x88] sm:$0xff] %vm311_vm0, %v609_v8  ;;  %646 = vst.msk [vmem:[%s1912_s6 + $0x90] sm:$0xff] %vm311_vm0, %v610_v38  ;;  %v574_v41 = vmul.f32 %v1647_v5, %v1551_v26  ;;  %v575_v36 = vmul.f32 %v1647_v5, %v1559_v63  ;;  %v576_v51 = vmul.f32 %v1647_v5, %v1567_v37 }
  0xe3   :  { %647 = vst.msk [vmem:[%s1912_s6 + $0x98] sm:$0xff] %vm311_vm0, %v611_v3  ;;  %648 = vst.msk [vmem:[%s1912_s6 + $0xa0] sm:$0xff] %vm311_vm0, %v612_v30  ;;  %v577_v61 = vmul.f32 %v1647_v5, %v1575_v48  ;;  %v578_v26 = vmul.f32 %v1647_v5, %v1583_v49  ;;  %v579_v63 = vmul.f32 %v1647_v5, %v1591_v4 }
  0xe4   :  { %649 = vst.msk [vmem:[%s1912_s6 + $0xa8] sm:$0xff] %vm311_vm0, %v613_v20  ;;  %650 = vst.msk [vmem:[%s1912_s6 + $0xb0] sm:$0xff] %vm311_vm0, %v614_v19  ;;  %v580_v37 = vmul.f32 %v1647_v5, %v1599_v24  ;;  %v616_v54 = vadd.f32 %v1652_v0, %v573_v21  ;;  %v617_v39 = vadd.f32 %v1652_v0, %v574_v41 }
  0xe5   :  { %651 = vst.msk [vmem:[%s1912_s6 + $0xb8] sm:$0xff] %vm311_vm0, %v615_v45  ;;  %v618_v42 = vadd.f32 %v1652_v0, %v575_v36  ;;  %v619_v23 = vadd.f32 %v1652_v0, %v576_v51  ;;  %v620_v52 = vadd.f32 %v1652_v0, %v577_v61  ;;  %v621_v48 = vadd.f32 %v1652_v0, %v578_v26 }
  0xe6   :  { %v622_v49 = vadd.f32 %v1652_v0, %v579_v63  ;;  %v623_v31 = vadd.f32 %v1652_v0, %v580_v37  ;;  %652 = vst.msk [vmem:[%s1912_s6 + $0xc0] sm:$0xff] %vm311_vm0, %v616_v54  ;;  %653 = vst.msk [vmem:[%s1912_s6 + $0xc8] sm:$0xff] %vm311_vm0, %v617_v39  ;;  %v581_v4 = vmul.f32 %v1647_v5, %v1607_v44 }
  0xe7   :  { %654 = vst.msk [vmem:[%s1912_s6 + $0xd0] sm:$0xff] %vm311_vm0, %v618_v42  ;;  %655 = vst.msk [vmem:[%s1912_s6 + $0xd8] sm:$0xff] %vm311_vm0, %v619_v23  ;;  %v582_v24 = vmul.f32 %v1647_v5, %v1615_v7  ;;  %v583_v56 = vmul.f32 %v1647_v5, %v1623_v17  ;;  %v584_v53 = vmul.f32 %v1647_v5, %v1631_v47 }
  0xe8   :  { %656 = vst.msk [vmem:[%s1912_s6 + $0xe0] sm:$0xff] %vm311_vm0, %v620_v52  ;;  %657 = vst.msk [vmem:[%s1912_s6 + $0xe8] sm:$0xff] %vm311_vm0, %v621_v48  ;;  %v624_v44 = vadd.f32 %v1652_v0, %v581_v4 }
  0xe9   :  { %658 = vst.msk [vmem:[%s1912_s6 + $0xf0] sm:$0xff] %vm311_vm0, %v622_v49  ;;  %659 = vst.msk [vmem:[%s1912_s6 + $0xf8] sm:$0xff] %vm311_vm0, %v623_v31  ;;  %v625_v7 = vadd.f32 %v1652_v0, %v582_v24  ;;  %v626_v17 = vadd.f32 %v1652_v0, %v583_v56  ;;  %v627_v47 = vadd.f32 %v1652_v0, %v584_v53 }
  0xea   :  { %660 = vst.msk [vmem:[%s1912_s6 + $0x100] sm:$0xff] %vm311_vm0, %v624_v44 }
  0xeb   :  { %661 = vst.msk [vmem:[%s1912_s6 + $0x108] sm:$0xff] %vm311_vm0, %v625_v7  ;;  %662 = vst.msk [vmem:[%s1912_s6 + $0x110] sm:$0xff] %vm311_vm0, %v626_v17 }
  0xec   :  { %663 = vst.msk [vmem:[%s1912_s6 + $0x118] sm:$0xff] %vm311_vm0, %v627_v47 }

// kernel: mnist_convnet_forward.8
= control target key start
LH: loop header
LB: loop body
LE: loop exit
PB: predicated region body
PF: predicated region fallthrough
CT: control target
= control target key end

     0   :  { %vm39_vm0 = vcmask 523264   ;;  %vm262_vm1 = vcmask 519168   ;;  %s517_s0 = inlined_call_operand.vmem [shape: f32[32,64], index: 0, kind: input, shape index: {}]   ;;  %s518_s1 = inlined_call_operand.vmem [shape: f32[32,64], index: 1, kind: input, shape index: {}]   ;;  %s519_s2 = inlined_call_operand.vmem [shape: f32[32,64], index: 2, kind: input, shape index: {}]   ;;  %s520_s3 = inlined_call_operand.vmem [shape: f32[32,64], index: 3, kind: input, shape index: {}]   ;;  %s521_s4 = inlined_call_operand.vmem [shape: f32[1,64], index: 4, kind: input, shape index: {}]   ;;  %s522_s5 = inlined_call_operand.vmem [shape: f32[1,64], index: 5, kind: input, shape index: {}]   ;;  %s523_s6 = inlined_call_operand.vmem [shape: bf16[32,64], index: 6, kind: output, shape index: {}]  }
   0x1   :  { %v319_v0 = vld [vmem:[%s517_s0] sm:$0xff]  ;;  %v324_v1 = vld [vmem:[%s517_s0 + $0x8] sm:$0xff]  ;;  %v329_v2 = vld [vmem:[%s517_s0 + $0x10] sm:$0xff] }
   0x2   :  { %v334_v3 = vld [vmem:[%s517_s0 + $0x18] sm:$0xff]  ;;  %v339_v4 = vld [vmem:[%s518_s1] sm:$0xff]  ;;  %v344_v5 = vld [vmem:[%s518_s1 + $0x8] sm:$0xff]  ;;  %v40_v6 = vsel %vm39_vm0, %v319_v0, 0.0  ;;  %v41_v7 = vsel %vm39_vm0, %v324_v1, 0.0  ;;  %v43_v8 = vsel %vm39_vm0, %v329_v2, 0.0 }
   0x3   :  { %v355_v9 = vld [vmem:[%s518_s1 + $0x10] sm:$0xff]  ;;  %v360_v10 = vld [vmem:[%s518_s1 + $0x18] sm:$0xff]  ;;  %v365_v11 = vld [vmem:[%s519_s2] sm:$0xff]  ;;  %v42_v12 = vadd.f32 %v41_v7, %v40_v6  ;;  %v53_v13 = vsel %vm39_vm0, %v339_v4, 0.0  ;;  %v54_v14 = vsel %vm39_vm0, %v344_v5, 0.0  ;;  %v45_v18 = vsel %vm39_vm0, %v334_v3, 0.0 }
   0x4   :  { %v374_v15 = vld [vmem:[%s519_s2 + $0x8] sm:$0xff]  ;;  %v379_v16 = vld [vmem:[%s519_s2 + $0x10] sm:$0xff]  ;;  %v384_v17 = vld [vmem:[%s519_s2 + $0x18] sm:$0xff]  ;;  %v55_v19 = vadd.f32 %v54_v14, %v53_v13  ;;  %v56_v20 = vsel %vm39_vm0, %v355_v9, 0.0  ;;  %v67_v21 = vsel %vm39_vm0, %v365_v11, 0.0  ;;  %v58_v26 = vsel %vm39_vm0, %v360_v10, 0.0 }
   0x5   :  { %v395_v22 = vld [vmem:[%s520_s3] sm:$0xff]  ;;  %v400_v23 = vld [vmem:[%s520_s3 + $0x8] sm:$0xff]  ;;  %v405_v24 = vld [vmem:[%s520_s3 + $0x10] sm:$0xff]  ;;  %v44_v25 = vadd.f32 %v43_v8, %v42_v12  ;;  %v68_v27 = vsel %vm39_vm0, %v374_v15, 0.0  ;;  %v70_v28 = vsel %vm39_vm0, %v379_v16, 0.0  ;;  %v72_v35 = vsel %vm39_vm0, %v384_v17, 0.0 }
   0x6   :  { %v416_v29 = vld [vmem:[%s520_s3 + $0x18] sm:$0xff]  ;;  %v57_v30 = vadd.f32 %v56_v20, %v55_v19  ;;  %v69_v31 = vadd.f32 %v68_v27, %v67_v21  ;;  %v81_v32 = vsel %vm39_vm0, %v395_v22, 0.0  ;;  %v82_v33 = vsel %vm39_vm0, %v400_v23, 0.0 }
   0x7   :  { %v46_v34 = vadd.f32 %v45_v18, %v44_v25  ;;  %v83_v36 = vadd.f32 %v82_v33, %v81_v32  ;;  %v84_v37 = vsel %vm39_vm0, %v405_v24, 0.0  ;;  %v86_v40 = vsel %vm39_vm0, %v416_v29, 0.0 }
   0x8   :  { %v59_v38 = vadd.f32 %v58_v26, %v57_v30  ;;  %v71_v39 = vadd.f32 %v70_v28, %v69_v31 }
   0x9   :  { %v47_v41 = vrot.slane %v46_v34, 4  ;;  %v85_v42 = vadd.f32 %v84_v37, %v83_v36 }
   0xa   :  { %v60_v43 = vrot.slane %v59_v38, 4  ;;  %v73_v44 = vadd.f32 %v72_v35, %v71_v39 }
   0xb   :  { %v48_v45 = vadd.f32 %v47_v41, %v46_v34  ;;  %v87_v46 = vadd.f32 %v86_v40, %v85_v42 }
   0xc   :  { %v61_v47 = vadd.f32 %v60_v43, %v59_v38  ;;  %v74_v48 = vrot.slane %v73_v44, 4 }
   0xd   :  { %v49_v49 = vrot.slane %v48_v45, 2  ;;  %v88_v50 = vrot.slane %v87_v46, 4 }
   0xe   :  { %v62_v51 = vrot.slane %v61_v47, 2  ;;  %v75_v52 = vadd.f32 %v74_v48, %v73_v44 }
   0xf   :  { %v50_v53 = vadd.f32 %v49_v49, %v48_v45  ;;  %v89_v54 = vadd.f32 %v88_v50, %v87_v46 }
  0x10   :  { %v63_v55 = vadd.f32 %v62_v51, %v61_v47  ;;  %v76_v56 = vrot.slane %v75_v52, 2 }
  0x11   :  { %v51_v57 = vrot.slane %v50_v53, 1  ;;  %v90_v58 = vrot.slane %v89_v54, 2 }
  0x12   :  { %v64_v59 = vrot.slane %v63_v55, 1  ;;  %v77_v60 = vadd.f32 %v76_v56, %v75_v52 }
  0x13   :  { %v52_v61 = vadd.f32 %v51_v57, %v50_v53  ;;  %v91_v62 = vadd.f32 %v90_v58, %v89_v54 }
  0x14   :  { %v65_v63 = vadd.f32 %v64_v59, %v63_v55  ;;  %v78_v6 = vrot.slane %v77_v60, 1 }
  0x15   :  { %v92_v7 = vrot.slane %v91_v62, 1 }
  0x16   :  { %v66_v8 = vadd.f32 %v65_v63, %v52_v61  ;;  %v79_v12 = vadd.f32 %v78_v6, %v77_v60 }
  0x17   :  { %v93_v13 = vadd.f32 %v92_v7, %v91_v62 }
  0x18   :  { %v80_v14 = vadd.f32 %v79_v12, %v66_v8 }
  0x1a   :  { %v94_v18 = vadd.f32 %v93_v13, %v80_v14 }
  0x1c   :  { %v428_v19 = vmul.f32 0.0078125, %v94_v18 }
  0x1e   :  { %v97_v20 = vsub.f32 %v319_v0, %v428_v19  ;;  %v98_v21 = vsub.f32 %v324_v1, %v428_v19  ;;  %v99_v25 = vsub.f32 %v329_v2, %v428_v19  ;;  %v100_v26 = vsub.f32 %v334_v3, %v428_v19 }
  0x1f   :  { %v118_v27 = vsub.f32 %v339_v4, %v428_v19  ;;  %v119_v28 = vsub.f32 %v344_v5, %v428_v19  ;;  %v120_v30 = vsub.f32 %v355_v9, %v428_v19  ;;  %v121_v31 = vsub.f32 %v360_v10, %v428_v19 }
  0x20   :  { %v101_v32 = vmul.f32 %v97_v20, %v97_v20  ;;  %v102_v33 = vmul.f32 %v98_v21, %v98_v21  ;;  %v103_v34 = vmul.f32 %v99_v25, %v99_v25  ;;  %v104_v35 = vmul.f32 %v100_v26, %v100_v26 }
  0x21   :  { %v122_v36 = vmul.f32 %v118_v27, %v118_v27  ;;  %v123_v37 = vmul.f32 %v119_v28, %v119_v28  ;;  %v124_v38 = vmul.f32 %v120_v30, %v120_v30  ;;  %v125_v39 = vmul.f32 %v121_v31, %v121_v31 }
  0x22   :  { %v105_v40 = vsel %vm39_vm0, %v101_v32, 0.0  ;;  %v106_v41 = vsel %vm39_vm0, %v102_v33, 0.0  ;;  %v108_v42 = vsel %vm39_vm0, %v103_v34, 0.0  ;;  %v110_v43 = vsel %vm39_vm0, %v104_v35, 0.0 }
  0x23   :  { %v107_v44 = vadd.f32 %v106_v41, %v105_v40  ;;  %v126_v45 = vsel %vm39_vm0, %v122_v36, 0.0  ;;  %v127_v46 = vsel %vm39_vm0, %v123_v37, 0.0  ;;  %v129_v47 = vsel %vm39_vm0, %v124_v38, 0.0 }
  0x24   :  { %v128_v48 = vadd.f32 %v127_v46, %v126_v45  ;;  %v131_v49 = vsel %vm39_vm0, %v125_v39, 0.0  ;;  %v140_v50 = vsub.f32 %v365_v11, %v428_v19  ;;  %v141_v51 = vsub.f32 %v374_v15, %v428_v19 }
  0x25   :  { %v109_v52 = vadd.f32 %v108_v42, %v107_v44  ;;  %v142_v53 = vsub.f32 %v379_v16, %v428_v19  ;;  %v143_v54 = vsub.f32 %v384_v17, %v428_v19  ;;  %v162_v55 = vsub.f32 %v395_v22, %v428_v19 }
  0x26   :  { %v130_v56 = vadd.f32 %v129_v47, %v128_v48  ;;  %v144_v57 = vmul.f32 %v140_v50, %v140_v50  ;;  %v145_v58 = vmul.f32 %v141_v51, %v141_v51  ;;  %v163_v59 = vsub.f32 %v400_v23, %v428_v19 }
  0x27   :  { %v111_v60 = vadd.f32 %v110_v43, %v109_v52  ;;  %v146_v61 = vmul.f32 %v142_v53, %v142_v53  ;;  %v147_v62 = vmul.f32 %v143_v54, %v143_v54  ;;  %v164_v63 = vsub.f32 %v405_v24, %v428_v19 }
  0x28   :  { %v132_v6 = vadd.f32 %v131_v49, %v130_v56  ;;  %v148_v7 = vsel %vm39_vm0, %v144_v57, 0.0  ;;  %v149_v8 = vsel %vm39_vm0, %v145_v58, 0.0  ;;  %v165_v12 = vsub.f32 %v416_v29, %v428_v19 }
  0x29   :  { %v112_v13 = vrot.slane %v111_v60, 4  ;;  %v150_v14 = vadd.f32 %v149_v8, %v148_v7  ;;  %v151_v18 = vsel %vm39_vm0, %v146_v61, 0.0  ;;  %v153_v20 = vsel %vm39_vm0, %v147_v62, 0.0 }
  0x2a   :  { %v133_v21 = vrot.slane %v132_v6, 4  ;;  %v166_v25 = vmul.f32 %v162_v55, %v162_v55  ;;  %v167_v26 = vmul.f32 %v163_v59, %v163_v59  ;;  %v168_v27 = vmul.f32 %v164_v63, %v164_v63 }
  0x2b   :  { %v113_v28 = vadd.f32 %v112_v13, %v111_v60  ;;  %v152_v30 = vadd.f32 %v151_v18, %v150_v14  ;;  %v169_v31 = vmul.f32 %v165_v12, %v165_v12  ;;  %v192_v8 = vlaneseq  ;;  %v187_v13 = vld [vmem:[%s521_s4] sm:$0x1] }
  0x2c   :  { %v134_v32 = vadd.f32 %v133_v21, %v132_v6  ;;  %v170_v33 = vsel %vm39_vm0, %v166_v25, 0.0  ;;  %v171_v34 = vsel %vm39_vm0, %v167_v26, 0.0  ;;  %v173_v35 = vsel %vm39_vm0, %v168_v27, 0.0  ;;  %v189_v21 = vld [vmem:[%s522_s5] sm:$0x1] }
  0x2d   :  { %v114_v36 = vrot.slane %v113_v28, 2  ;;  %v154_v37 = vadd.f32 %v153_v20, %v152_v30  ;;  %v172_v38 = vadd.f32 %v171_v34, %v170_v33  ;;  %v175_v40 = vsel %vm39_vm0, %v169_v31, 0.0 }
  0x2e   :  { %v135_v39 = vrot.slane %v134_v32, 2  ;;  %v193_v12 = vshrl.u32 %v192_v8, 7 }
  0x2f   :  { %v115_v41 = vadd.f32 %v114_v36, %v113_v28  ;;  %v155_v42 = vrot.slane %v154_v37, 4  ;;  %v174_v43 = vadd.f32 %v173_v35, %v172_v38 }
  0x30   :  { %v136_v44 = vadd.f32 %v135_v39, %v134_v32  ;;  %v194_v14 = vsub.s32 0, %v193_v12 }
  0x31   :  { %v116_v45 = vrot.slane %v115_v41, 1  ;;  %v156_v46 = vadd.f32 %v155_v42, %v154_v37  ;;  %v176_v47 = vadd.f32 %v175_v40, %v174_v43 }
  0x32   :  { %v137_v48 = vrot.slane %v136_v44, 1 }
  0x33   :  { %v117_v49 = vadd.f32 %v116_v45, %v115_v41  ;;  %v157_v50 = vrot.slane %v156_v46, 2  ;;  %v177_v51 = vrot.slane %v176_v47, 4 }
  0x34   :  { %v138_v52 = vadd.f32 %v137_v48, %v136_v44 }
  0x35   :  { %v158_v53 = vadd.f32 %v157_v50, %v156_v46  ;;  %v178_v54 = vadd.f32 %v177_v51, %v176_v47 }
  0x36   :  { %v139_v55 = vadd.f32 %v138_v52, %v117_v49 }
  0x37   :  { %v159_v56 = vrot.slane %v158_v53, 1  ;;  %v179_v57 = vrot.slane %v178_v54, 2 }
  0x39   :  { %v160_v58 = vadd.f32 %v159_v56, %v158_v53  ;;  %v180_v59 = vadd.f32 %v179_v57, %v178_v54 }
  0x3b   :  { %v161_v60 = vadd.f32 %v160_v58, %v139_v55  ;;  %v181_v61 = vrot.slane %v180_v59, 1 }
  0x3d   :  { %v182_v62 = vadd.f32 %v181_v61, %v180_v59 }
  0x3f   :  { %v183_v63 = vadd.f32 %v182_v62, %v161_v60 }
  0x41   :  { %v184_v6 = vmul.f32 0.0078125, %v183_v63 }
  0x43   :  { %v185_v7 = vadd.f32 1e-05, %v184_v6 }
  0x45   :  { %279 = vrsqrt.f32 %v185_v7 }
  0x52   :  { %v280_v18 = vpop.eup %279 }
  0x53   :  { %v188_v20 = vmul.f32 %v280_v18, %v187_v13 }
  0x55   :  { %v190_v25 = vmul.f32 %v188_v20, %v428_v19  ;;  %v195_v26 = vrot.slane %v188_v20, %v194_v14 }
  0x57   :  { %v191_v27 = vsub.f32 %v189_v21, %v190_v25  ;;  %v196_v28 = vmul.f32 %v195_v26, %v319_v0  ;;  %v210_v30 = vmul.f32 %v195_v26, %v339_v4  ;;  %v218_v31 = vmul.f32 %v195_v26, %v365_v11 }
  0x58   :  { %v226_v32 = vmul.f32 %v195_v26, %v395_v22  ;;  %v197_v33 = vmul.f32 %v195_v26, %v324_v1  ;;  %v211_v34 = vmul.f32 %v195_v26, %v344_v5  ;;  %v219_v35 = vmul.f32 %v195_v26, %v374_v15 }
  0x59   :  { %v204_v36 = vrot.slane %v191_v27, %v194_v14  ;;  %v227_v19 = vmul.f32 %v195_v26, %v400_v23  ;;  %v198_v37 = vmul.f32 %v195_v26, %v329_v2  ;;  %v212_v0 = vmul.f32 %v195_v26, %v355_v9 }
  0x5a   :  { %v220_v4 = vmul.f32 %v195_v26, %v379_v16  ;;  %v228_v11 = vmul.f32 %v195_v26, %v405_v24  ;;  %v199_v22 = vmul.f32 %v195_v26, %v334_v3  ;;  %v213_v38 = vmul.f32 %v195_v26, %v360_v10 }
  0x5b   :  { %v206_v1 = vadd.f32 %v204_v36, %v196_v28  ;;  %v214_v39 = vadd.f32 %v210_v30, %v204_v36  ;;  %v222_v5 = vadd.f32 %v218_v31, %v204_v36  ;;  %v230_v40 = vadd.f32 %v226_v32, %v204_v36 }
  0x5c   :  { %v207_v15 = vadd.f32 %v204_v36, %v197_v33  ;;  %v215_v41 = vadd.f32 %v211_v34, %v204_v36  ;;  %v223_v42 = vadd.f32 %v219_v35, %v204_v36  ;;  %v231_v23 = vadd.f32 %v227_v19, %v204_v36 }
  0x5d   :  { %v234_v43 = vmax.f32 %v206_v1, %v214_v39  ;;  %v238_v2 = vmax.f32 %v222_v5, %v230_v40  ;;  %v208_v44 = vadd.f32 %v204_v36, %v198_v37  ;;  %v216_v9 = vadd.f32 %v212_v0, %v204_v36 }
  0x5e   :  { %v235_v45 = vmax.f32 %v207_v15, %v215_v41  ;;  %v239_v16 = vmax.f32 %v223_v42, %v231_v23  ;;  %v224_v46 = vadd.f32 %v220_v4, %v204_v36  ;;  %v232_v24 = vadd.f32 %v228_v11, %v204_v36 }
  0x5f   :  { %v242_v47 = vmax.f32 %v234_v43, %v238_v2  ;;  %v236_v3 = vmax.f32 %v208_v44, %v216_v9  ;;  %v209_v48 = vadd.f32 %v204_v36, %v199_v22  ;;  %v217_v10 = vadd.f32 %v213_v38, %v204_v36 }
  0x60   :  { %v243_v49 = vmax.f32 %v235_v45, %v239_v16  ;;  %v240_v50 = vmax.f32 %v224_v46, %v232_v24  ;;  %v221_v51 = vmul.f32 %v195_v26, %v384_v17  ;;  %v229_v52 = vmul.f32 %v195_v26, %v416_v29 }
  0x61   :  { %v275_v53 = vpack.c.bf16 %v242_v47, %v242_v47  ;;  %v237_v54 = vmax.f32 %v209_v48, %v217_v10 }
  0x62   :  { %v276_v55 = vpack.c.bf16 %v243_v49, %v243_v49  ;;  %v244_v56 = vmax.f32 %v236_v3, %v240_v50  ;;  %v225_v57 = vadd.f32 %v221_v51, %v204_v36  ;;  %v233_v58 = vadd.f32 %v229_v52, %v204_v36 }
  0x63   :  { %263 = vst.msk [vmem:[%s523_s6] sm:$0xf] %vm262_vm1, %v275_v53 }
  0x64   :  { %264 = vst.msk [vmem:[%s523_s6 + $0x4] sm:$0xf] %vm262_vm1, %v276_v55  ;;  %v277_v59 = vpack.c.bf16 %v244_v56, %v244_v56  ;;  %v241_v17 = vmax.f32 %v225_v57, %v233_v58 }
  0x66   :  { %265 = vst.msk [vmem:[%s523_s6 + $0x8] sm:$0xf] %vm262_vm1, %v277_v59  ;;  %v245_v29 = vmax.f32 %v237_v54, %v241_v17 }
  0x68   :  { %v278_v60 = vpack.c.bf16 %v245_v29, %v245_v29 }
  0x6a   :  { %266 = vst.msk [vmem:[%s523_s6 + $0xc] sm:$0xf] %vm262_vm1, %v278_v60 }

// kernel: mnist_convnet_forward.9
= control target key start
LH: loop header
LB: loop body
LE: loop exit
PB: predicated region body
PF: predicated region fallthrough
CT: control target
= control target key end

     0   :  { %v287_v36 = vlaneseq  ;;  %v3020_v37 = vmov 1966171168   ;;  %s3901_s0 = inlined_call_operand.vmem [shape: bf16[2,1024], index: 0, kind: input, shape index: {}]   ;;  %s3902_s1 = inlined_call_operand.vmem [shape: bf16[1024,384], index: 1, kind: input, shape index: {}]   ;;  %s3903_s2 = inlined_call_operand.vmem [shape: f32[1,384], index: 2, kind: input, shape index: {}]   ;;  %s3904_s3 = inlined_call_operand.vmem [shape: bf16[384,192], index: 3, kind: input, shape index: {}]   ;;  %s3905_s4 = inlined_call_operand.vmem [shape: f32[1,192], index: 4, kind: input, shape index: {}]   ;;  %s3906_s5 = inlined_call_operand.vmem [shape: bf16[192,128], index: 5, kind: input, shape index: {}]   ;;  %s3907_s6 = inlined_call_operand.vmem [shape: f32[1,128], index: 6, kind: input, shape index: {}]   ;;  %s3908_s7 = inlined_call_operand.hbm [shape: f32[2,128], index: 7, kind: output, shape index: {}]  }
   0x1   :  { %v2647_v0 = vld [vmem:[%s3902_s1 + $0xac] ss:$12 sps:$4 sm:$0xff]   ;;  %v2651_v2 = vld [vmem:[%s3902_s1 + $0xa8] ss:$12 sps:$4 sm:$0xff]   ;;  %v2657_v6 = vld [vmem:[%s3902_s1 + $0x90] ss:$12 sps:$4 sm:$0xff]   ;;  %v305_v38 = vunpack.c.l.s4 %v3020_v37 }
   0x2   :  { %v2649_v1 = vld [vmem:[%s3902_s1 + $0x22c] ss:$12 sps:$4 sm:$0xff]   ;;  %1384 = vmatprep.subr.bf16.mxu0 %v2647_v0  ;;  %v2652_v3 = vld [vmem:[%s3902_s1 + $0x228] ss:$12 sps:$4 sm:$0xff]   ;;  %v2658_v7 = vld [vmem:[%s3902_s1 + $0x210] ss:$12 sps:$4 sm:$0xff]  }
   0x3   :  { %1425 = vmatprep.subr.bf16.mxu1 %v2649_v1  ;;  %v2653_v4 = vld [vmem:[%s3902_s1 + $0x94] ss:$12 sps:$4 sm:$0xff]   ;;  %1385 = vmatpush1.bf16.msra.mxu0 %v2651_v2  ;;  %v2659_v8 = vld [vmem:[%s3902_s1 + $0x7c] ss:$12 sps:$4 sm:$0xff]   ;;  %v2663_v10 = vld [vmem:[%s3902_s1 + $0x78] ss:$12 sps:$4 sm:$0xff]   ;;  %v306_v43 = vunpack.c.0.s8 %v305_v38 }
   0x4   :  { %1426 = vmatpush1.bf16.msra.mxu1 %v2652_v3  ;;  %v2655_v5 = vld [vmem:[%s3902_s1 + $0x214] ss:$12 sps:$4 sm:$0xff]   ;;  %1386 = vmatprep.subr.bf16.mxu0 %v2653_v4  ;;  %v2661_v9 = vld [vmem:[%s3902_s1 + $0x1fc] ss:$12 sps:$4 sm:$0xff]   ;;  %v2664_v11 = vld [vmem:[%s3902_s1 + $0x1f8] ss:$12 sps:$4 sm:$0xff]  }
   0x5   :  { %1427 = vmatprep.subr.bf16.mxu1 %v2655_v5  ;;  %v2665_v12 = vld [vmem:[%s3902_s1 + $0x64] ss:$12 sps:$4 sm:$0xff]   ;;  %v2669_v14 = vld [vmem:[%s3902_s1 + $0x60] ss:$12 sps:$4 sm:$0xff]   ;;  %v2675_v18 = vld [vmem:[%s3902_s1 + $0x48] ss:$12 sps:$4 sm:$0xff]  }
   0x6   :  { %v2667_v13 = vld [vmem:[%s3902_s1 + $0x1e4] ss:$12 sps:$4 sm:$0xff]   ;;  %v2670_v15 = vld [vmem:[%s3902_s1 + $0x1e0] ss:$12 sps:$4 sm:$0xff]   ;;  %v2676_v19 = vld [vmem:[%s3902_s1 + $0x1c8] ss:$12 sps:$4 sm:$0xff]  }
   0x7   :  { %1387 = vmatpush1.bf16.msra.mxu0 %v2657_v6  ;;  %v2671_v16 = vld [vmem:[%s3902_s1 + $0x4c] ss:$12 sps:$4 sm:$0xff]   ;;  %v2677_v20 = vld [vmem:[%s3902_s1 + $0x34] ss:$12 sps:$4 sm:$0xff]   ;;  %v2681_v22 = vld [vmem:[%s3902_s1 + $0x30] ss:$12 sps:$4 sm:$0xff]  }
   0x8   :  { %1428 = vmatpush1.bf16.msra.mxu1 %v2658_v7  ;;  %1388 = vmatprep.subr.bf16.mxu0 %v2659_v8  ;;  %v2673_v17 = vld [vmem:[%s3902_s1 + $0x1cc] ss:$12 sps:$4 sm:$0xff]   ;;  %v2679_v21 = vld [vmem:[%s3902_s1 + $0x1b4] ss:$12 sps:$4 sm:$0xff]   ;;  %v2682_v23 = vld [vmem:[%s3902_s1 + $0x1b0] ss:$12 sps:$4 sm:$0xff]  }
   0x9   :  { %1429 = vmatprep.subr.bf16.mxu1 %v2661_v9  ;;  %v2683_v24 = vld [vmem:[%s3902_s1 + $0x1c] ss:$12 sps:$4 sm:$0xff]   ;;  %v2687_v26 = vld [vmem:[%s3902_s1 + $0x18] ss:$12 sps:$4 sm:$0xff]   ;;  %v2693_v30 = vld [vmem:[%s3902_s1] ss:$12 sps:$4 sm:$0xff]  }
   0xa   :  { %v2685_v25 = vld [vmem:[%s3902_s1 + $0x19c] ss:$12 sps:$4 sm:$0xff]   ;;  %v2688_v27 = vld [vmem:[%s3902_s1 + $0x198] ss:$12 sps:$4 sm:$0xff]   ;;  %v2694_v31 = vld [vmem:[%s3902_s1 + $0x180] ss:$12 sps:$4 sm:$0xff]  }
   0xb   :  { %1389 = vmatpush1.bf16.msra.mxu0 %v2663_v10  ;;  %v2689_v28 = vld [vmem:[%s3902_s1 + $0x4] ss:$12 sps:$4 sm:$0xff]   ;;  %v2695_v32 = vld [vmem:[%s3902_s1 + $0x16c] ss:$12 sps:$4 sm:$0xff]   ;;  %v2699_v34 = vld [vmem:[%s3902_s1 + $0x168] ss:$12 sps:$4 sm:$0xff]  }
   0xc   :  { %1430 = vmatpush1.bf16.msra.mxu1 %v2664_v11  ;;  %1390 = vmatprep.subr.bf16.mxu0 %v2665_v12  ;;  %v2691_v29 = vld [vmem:[%s3902_s1 + $0x184] ss:$12 sps:$4 sm:$0xff]   ;;  %v2697_v33 = vld [vmem:[%s3902_s1 + $0x2ec] ss:$12 sps:$4 sm:$0xff]   ;;  %v2700_v35 = vld [vmem:[%s3902_s1 + $0x2e8] ss:$12 sps:$4 sm:$0xff]  }
   0xd   :  { %1431 = vmatprep.subr.bf16.mxu1 %v2667_v13  ;;  %v2701_v39 = vld [vmem:[%s3902_s1 + $0x154] ss:$12 sps:$4 sm:$0xff]   ;;  %v2705_v41 = vld [vmem:[%s3902_s1 + $0x150] ss:$12 sps:$4 sm:$0xff]   ;;  %v3180_v42 = vshrl.u32 %v287_v36, 7 }
   0xe   :  { %v2703_v40 = vld [vmem:[%s3902_s1 + $0x2d4] ss:$12 sps:$4 sm:$0xff]   ;;  %v2706_v44 = vld [vmem:[%s3902_s1 + $0x2d0] ss:$12 sps:$4 sm:$0xff]   ;;  %v2711_v47 = vld [vmem:[%s3902_s1 + $0x138] ss:$12 sps:$4 sm:$0xff]  }
   0xf   :  { %1391 = vmatpush1.bf16.msra.mxu0 %v2669_v14  ;;  %v2707_v45 = vld [vmem:[%s3902_s1 + $0x13c] ss:$12 sps:$4 sm:$0xff]   ;;  %v2712_v48 = vld [vmem:[%s3902_s1 + $0x2b8] ss:$12 sps:$4 sm:$0xff]   ;;  %v309_v49 = vsub.s32 %v306_v43, %v3180_v42  ;;  %v2717_v53 = vld [vmem:[%s3902_s1 + $0x120] ss:$12 sps:$4 sm:$0xff]  }
  0x10   :  { %1432 = vmatpush1.bf16.msra.mxu1 %v2670_v15  ;;  %1392 = vmatprep.subr.bf16.mxu0 %v2671_v16  ;;  %v2709_v46 = vld [vmem:[%s3902_s1 + $0x2bc] ss:$12 sps:$4 sm:$0xff]   ;;  %v2713_v50 = vld [vmem:[%s3902_s1 + $0x124] ss:$12 sps:$4 sm:$0xff]   ;;  %v2718_v56 = vld [vmem:[%s3902_s1 + $0x2a0] ss:$12 sps:$4 sm:$0xff]  }
  0x11   :  { %1433 = vmatprep.subr.bf16.mxu1 %v2673_v17  ;;  %v2715_v51 = vld [vmem:[%s3902_s1 + $0x2a4] ss:$12 sps:$4 sm:$0xff]   ;;  %v2719_v57 = vld [vmem:[%s3902_s1 + $0x10c] ss:$12 sps:$4 sm:$0xff]   ;;  %v2723_v61 = vld [vmem:[%s3902_s1 + $0x108] ss:$12 sps:$4 sm:$0xff]  }
  0x12   :  { %v28_v52 = vld [vmem:[%s3901_s0] sm:$0xff]  ;;  %v2721_v58 = vld [vmem:[%s3902_s1 + $0x28c] ss:$12 sps:$4 sm:$0xff]   ;;  %v2724_v0 = vld [vmem:[%s3902_s1 + $0x288] ss:$12 sps:$4 sm:$0xff]  }
  0x13   :  { %1393 = vmatpush1.bf16.msra.mxu0 %v2675_v18  ;;  %v310_v54 = vrot.slane %v28_v52, %v309_v49  ;;  %v303_v55 = vcombine.high %v28_v52, %v28_v52  ;;  %v2725_v1 = vld [vmem:[%s3902_s1 + $0xf4] ss:$12 sps:$4 sm:$0xff]   ;;  %v2729_v4 = vld [vmem:[%s3902_s1 + $0xf0] ss:$12 sps:$4 sm:$0xff]   ;;  %v2735_v8 = vld [vmem:[%s3902_s1 + $0xd8] ss:$12 sps:$4 sm:$0xff]  }
  0x14   :  { %1434 = vmatpush1.bf16.msra.mxu1 %v2676_v19  ;;  %1394 = vmatprep.subr.bf16.mxu0 %v2677_v20  ;;  %v2727_v2 = vld [vmem:[%s3902_s1 + $0x274] ss:$12 sps:$4 sm:$0xff]   ;;  %v2730_v5 = vld [vmem:[%s3902_s1 + $0x270] ss:$12 sps:$4 sm:$0xff]   ;;  %v2736_v9 = vld [vmem:[%s3902_s1 + $0x258] ss:$12 sps:$4 sm:$0xff]  }
  0x15   :  { %1435 = vmatprep.subr.bf16.mxu1 %v2679_v21  ;;  %v318_v59 = vcombine.high %v310_v54, %v310_v54  ;;  %v317_v60 = vrot.slane %v303_v55, %v309_v49  ;;  %v2731_v6 = vld [vmem:[%s3902_s1 + $0xdc] ss:$12 sps:$4 sm:$0xff]   ;;  %v2737_v10 = vld [vmem:[%s3902_s1 + $0xc4] ss:$12 sps:$4 sm:$0xff]   ;;  %v2741_v13 = vld [vmem:[%s3902_s1 + $0xc0] ss:$12 sps:$4 sm:$0xff]   ;;  %v3268_v14 = vrot.slane %v310_v54, %v309_v49 }
  0x16   :  { %v2733_v7 = vld [vmem:[%s3902_s1 + $0x25c] ss:$12 sps:$4 sm:$0xff]   ;;  %v2739_v11 = vld [vmem:[%s3902_s1 + $0x244] ss:$12 sps:$4 sm:$0xff]   ;;  %v2742_v15 = vld [vmem:[%s3902_s1 + $0x240] ss:$12 sps:$4 sm:$0xff]  }
  0x17   :  { %1395 = vmatpush1.bf16.msra.mxu0 %v2681_v22  ;;  %v3222_v62 = vrot.slane %v318_v59, %v309_v49  ;;  %v3224_v63 = vrot.slane %v317_v60, %v309_v49  ;;  %v319_v12 = vcombine.high %v317_v60, %v317_v60  ;;  %v2745_v16 = vld [vmem:[%s3902_s1 + $0x3ac] ss:$12 sps:$4 sm:$0xff]   ;;  %v3283_v19 = vcombine.high %v3268_v14, %v3268_v14  ;;  %v2743_v20 = vld [vmem:[%s3902_s1 + $0x3a8] ss:$12 sps:$4 sm:$0xff]   ;;  %v2776_v43 = vld [vmem:[%s3902_s1 + $0x4b0] ss:$12 sps:$4 sm:$0xff]  }
  0x18   :  { %1436 = vmatpush1.bf16.msra.mxu1 %v2682_v23  ;;  %1396 = vmatprep.subr.bf16.mxu0 %v2683_v24  ;;  %v2748_v17 = vld [vmem:[%s3902_s1 + $0x52c] ss:$12 sps:$4 sm:$0xff]   ;;  %v2746_v21 = vld [vmem:[%s3902_s1 + $0x528] ss:$12 sps:$4 sm:$0xff]   ;;  %v2800_v59 = vld [vmem:[%s3902_s1 + $0x5d0] ss:$12 sps:$4 sm:$0xff]  }
  0x19   :  { %1437 = vmatprep.subr.bf16.mxu1 %v2685_v25  ;;  %v3237_v3 = vcombine.high %v3222_v62, %v3222_v62  ;;  %1416 = vmatprep.mubr.bf16.mxu0 %v3222_v62  ;;  %v3279_v18 = vrot.slane %v319_v12, %v309_v49  ;;  %v2751_v22 = vld [vmem:[%s3902_s1 + $0x394] ss:$12 sps:$4 sm:$0xff]   ;;  %v2749_v25 = vld [vmem:[%s3902_s1 + $0x390] ss:$12 sps:$4 sm:$0xff]   ;;  %v2772_v36 = vld [vmem:[%s3902_s1 + $0x4cc] ss:$12 sps:$4 sm:$0xff]  }
  0x1a   :  { %v2754_v23 = vld [vmem:[%s3902_s1 + $0x514] ss:$12 sps:$4 sm:$0xff]   ;;  %v2790_v49 = vld [vmem:[%s3902_s1 + $0x484] ss:$12 sps:$4 sm:$0xff]   ;;  %v2793_v52 = vld [vmem:[%s3902_s1 + $0x46c] ss:$12 sps:$4 sm:$0xff]  }
  0x1b   :  { %1397 = vmatpush1.bf16.msra.mxu0 %v2687_v26  ;;  %1457 = vmatprep.mubr.bf16.mxu1 %v3237_v3  ;;  %v3299_v24 = vcombine.high %v3279_v18, %v3279_v18  ;;  %v2752_v26 = vld [vmem:[%s3902_s1 + $0x510] ss:$12 sps:$4 sm:$0xff]   ;;  %v2767_v37 = vld [vmem:[%s3902_s1 + $0x348] ss:$12 sps:$4 sm:$0xff]  }
  0x1c   :  { %1438 = vmatpush1.bf16.msra.mxu1 %v2688_v27  ;;  %1398 = vmatprep.subr.bf16.mxu0 %v2689_v28  ;;  %v2757_v27 = vld [vmem:[%s3902_s1 + $0x37c] ss:$12 sps:$4 sm:$0xff]   ;;  %v2826_v12 = vld [vmem:[%s3902_s1 + $0x574] ss:$12 sps:$4 sm:$0xff]  }
  0x1d   :  { %1439 = vmatprep.subr.bf16.mxu1 %v2691_v29  ;;  %v2760_v28 = vld [vmem:[%s3902_s1 + $0x4fc] ss:$12 sps:$4 sm:$0xff]   ;;  %v2755_v29 = vld [vmem:[%s3902_s1 + $0x378] ss:$12 sps:$4 sm:$0xff]  }
  0x1e   :  { %v2770_v38 = vld [vmem:[%s3902_s1 + $0x4c8] ss:$12 sps:$4 sm:$0xff]  }
  0x1f   :  { %1399 = vmatpush1.bf16.msra.mxu0 %v2693_v30  ;;  %v2758_v30 = vld [vmem:[%s3902_s1 + $0x4f8] ss:$12 sps:$4 sm:$0xff]   ;;  %v2791_v54 = vld [vmem:[%s3902_s1 + $0x468] ss:$12 sps:$4 sm:$0xff]  }
  0x20   :  { %1440 = vmatpush1.bf16.msra.mxu1 %v2694_v31  ;;  %1400 = vmatprep.subr.bf16.mxu0 %v2695_v32  ;;  %v2763_v31 = vld [vmem:[%s3902_s1 + $0x364] ss:$12 sps:$4 sm:$0xff]   ;;  %v2794_v55 = vld [vmem:[%s3902_s1 + $0x5e8] ss:$12 sps:$4 sm:$0xff]  }
  0x21   :  { %1441 = vmatprep.subr.bf16.mxu1 %v2697_v33  ;;  %v2766_v32 = vld [vmem:[%s3902_s1 + $0x4e4] ss:$12 sps:$4 sm:$0xff]   ;;  %v2761_v33 = vld [vmem:[%s3902_s1 + $0x360] ss:$12 sps:$4 sm:$0xff]   ;;  %v2805_v60 = vld [vmem:[%s3902_s1 + $0x43c] ss:$12 sps:$4 sm:$0xff]  }
  0x23   :  { %1401 = vmatpush2.bf16.msra.mxu0 %v2699_v34  ;;  %v2764_v34 = vld [vmem:[%s3902_s1 + $0x4e0] ss:$12 sps:$4 sm:$0xff]  }
  0x24   :  { %1442 = vmatpush2.bf16.msra.mxu1 %v2700_v35  ;;  %1402 = vmatprep.subr.bf16.mxu0 %v2701_v39  ;;  %v2769_v35 = vld [vmem:[%s3902_s1 + $0x34c] ss:$12 sps:$4 sm:$0xff]   ;;  %v2775_v39 = vld [vmem:[%s3902_s1 + $0x334] ss:$12 sps:$4 sm:$0xff]  }
  0x25   :  { %1443 = vmatprep.subr.bf16.mxu1 %v2703_v40  ;;  %v2778_v40 = vld [vmem:[%s3902_s1 + $0x4b4] ss:$12 sps:$4 sm:$0xff]  }
  0x27   :  { %1403 = vmatpush2.bf16.msra.mxu0 %v2705_v41  ;;  %v2773_v41 = vld [vmem:[%s3902_s1 + $0x330] ss:$12 sps:$4 sm:$0xff]  }
  0x28   :  { %1444 = vmatpush2.bf16.msra.mxu1 %v2706_v44  ;;  %1404 = vmatprep.subr.bf16.mxu0 %v2707_v45  ;;  %v2781_v44 = vld [vmem:[%s3902_s1 + $0x31c] ss:$12 sps:$4 sm:$0xff]  }
  0x29   :  { %1445 = vmatprep.subr.bf16.mxu1 %v2709_v46  ;;  %v2784_v45 = vld [vmem:[%s3902_s1 + $0x49c] ss:$12 sps:$4 sm:$0xff]   ;;  %v2779_v46 = vld [vmem:[%s3902_s1 + $0x318] ss:$12 sps:$4 sm:$0xff]  }
  0x2b   :  { %1405 = vmatpush2.bf16.msra.mxu0 %v2711_v47  ;;  %v2782_v47 = vld [vmem:[%s3902_s1 + $0x498] ss:$12 sps:$4 sm:$0xff]  }
  0x2c   :  { %1446 = vmatpush2.bf16.msra.mxu1 %v2712_v48  ;;  %1406 = vmatprep.subr.bf16.mxu0 %v2713_v50  ;;  %v2787_v48 = vld [vmem:[%s3902_s1 + $0x304] ss:$12 sps:$4 sm:$0xff]   ;;  %v2785_v50 = vld [vmem:[%s3902_s1 + $0x300] ss:$12 sps:$4 sm:$0xff]  }
  0x2d   :  { %1447 = vmatprep.subr.bf16.mxu1 %v2715_v51  ;;  %v2788_v51 = vld [vmem:[%s3902_s1 + $0x480] ss:$12 sps:$4 sm:$0xff]  }
  0x2f   :  { %1407 = vmatpush2.bf16.msra.mxu0 %v2717_v53  ;;  %v2796_v53 = vld [vmem:[%s3902_s1 + $0x5ec] ss:$12 sps:$4 sm:$0xff]  }
  0x30   :  { %1448 = vmatpush2.bf16.msra.mxu1 %v2718_v56  ;;  %1408 = vmatprep.subr.bf16.mxu0 %v2719_v57  ;;  %v2799_v56 = vld [vmem:[%s3902_s1 + $0x454] ss:$12 sps:$4 sm:$0xff]  }
  0x31   :  { %1449 = vmatprep.subr.bf16.mxu1 %v2721_v58  ;;  %v2802_v57 = vld [vmem:[%s3902_s1 + $0x5d4] ss:$12 sps:$4 sm:$0xff]   ;;  %v2797_v58 = vld [vmem:[%s3902_s1 + $0x450] ss:$12 sps:$4 sm:$0xff]  }
  0x33   :  { %1409 = vmatpush2.bf16.msra.mxu0 %v2723_v61  ;;  %v2808_v61 = vld [vmem:[%s3902_s1 + $0x5bc] ss:$12 sps:$4 sm:$0xff]  }
  0x34   :  { %1450 = vmatpush2.bf16.msra.mxu1 %v2724_v0  ;;  %1410 = vmatprep.subr.bf16.mxu0 %v2725_v1  ;;  %v2803_v0 = vld [vmem:[%s3902_s1 + $0x438] ss:$12 sps:$4 sm:$0xff]  }
  0x35   :  { %1451 = vmatprep.subr.bf16.mxu1 %v2727_v2  ;;  %v2806_v1 = vld [vmem:[%s3902_s1 + $0x5b8] ss:$12 sps:$4 sm:$0xff]  }
  0x36   :  { %v2811_v2 = vld [vmem:[%s3902_s1 + $0x424] ss:$12 sps:$4 sm:$0xff]  }
  0x37   :  { %1411 = vmatpush2.bf16.msra.mxu0 %v2729_v4  ;;  %v2814_v4 = vld [vmem:[%s3902_s1 + $0x5a4] ss:$12 sps:$4 sm:$0xff]  }
  0x38   :  { %1452 = vmatpush2.bf16.msra.mxu1 %v2730_v5  ;;  %1412 = vmatprep.subr.bf16.mxu0 %v2731_v6  ;;  %v2809_v5 = vld [vmem:[%s3902_s1 + $0x420] ss:$12 sps:$4 sm:$0xff]  }
  0x39   :  { %1453 = vmatprep.subr.bf16.mxu1 %v2733_v7  ;;  %v2812_v6 = vld [vmem:[%s3902_s1 + $0x5a0] ss:$12 sps:$4 sm:$0xff]  }
  0x3a   :  { %v2817_v7 = vld [vmem:[%s3902_s1 + $0x40c] ss:$12 sps:$4 sm:$0xff]  }
  0x3b   :  { %1413 = vmatpush2.bf16.msra.mxu0 %v2735_v8  ;;  %v2820_v8 = vld [vmem:[%s3902_s1 + $0x58c] ss:$12 sps:$4 sm:$0xff]  }
  0x3c   :  { %1454 = vmatpush2.bf16.msra.mxu1 %v2736_v9  ;;  %1414 = vmatprep.subr.bf16.mxu0 %v2737_v10  ;;  %v2815_v9 = vld [vmem:[%s3902_s1 + $0x408] ss:$12 sps:$4 sm:$0xff]  }
  0x3d   :  { %1455 = vmatprep.subr.bf16.mxu1 %v2739_v11  ;;  %v2818_v10 = vld [vmem:[%s3902_s1 + $0x588] ss:$12 sps:$4 sm:$0xff]  }
  0x3e   :  { %v2823_v11 = vld [vmem:[%s3902_s1 + $0x3f4] ss:$12 sps:$4 sm:$0xff]  }
  0x3f   :  { %1415 = vmatpush2.bf16.msra.mxu0 %v2741_v13  ;;  %v2821_v13 = vld [vmem:[%s3902_s1 + $0x3f0] ss:$12 sps:$4 sm:$0xff]  }
  0x40   :  { %1456 = vmatpush2.bf16.msra.mxu1 %v2742_v15  ;;  %1466 = vmatprep.subr.bf16.mxu0 %v2745_v16  ;;  %v2824_v15 = vld [vmem:[%s3902_s1 + $0x570] ss:$12 sps:$4 sm:$0xff]  }
  0x41   :  { %1507 = vmatprep.subr.bf16.mxu1 %v2748_v17  ;;  %v2829_v16 = vld [vmem:[%s3902_s1 + $0x3dc] ss:$12 sps:$4 sm:$0xff]  }
  0x42   :  { %1417 = vmatmul.mubr.bf16.vlgmr.msra.gmra.mxu0 %v3268_v14  ;;  %v2832_v17 = vld [vmem:[%s3902_s1 + $0x55c] ss:$12 sps:$4 sm:$0xff]  }
  0x43   :  { %1458 = vmatmul.mubr.bf16.vlgmr.msra.gmra.mxu1 %v3283_v19  ;;  %1467 = vmatpush1.bf16.msra.mxu0 %v2743_v20  ;;  %v2827_v20 = vld [vmem:[%s3902_s1 + $0x3d8] ss:$12 sps:$4 sm:$0xff]  }
  0x44   :  { %1508 = vmatpush1.bf16.msra.mxu1 %v2746_v21  ;;  %1468 = vmatprep.subr.bf16.mxu0 %v2751_v22  ;;  %v2830_v21 = vld [vmem:[%s3902_s1 + $0x558] ss:$12 sps:$4 sm:$0xff]  }
  0x45   :  { %1509 = vmatprep.subr.bf16.mxu1 %v2754_v23  ;;  %1498 = vmatprep.mubr.bf16.mxu0 %v3279_v18  ;;  %v2835_v22 = vld [vmem:[%s3902_s1 + $0x3c4] ss:$12 sps:$4 sm:$0xff]  }
  0x46   :  { %1539 = vmatprep.mubr.bf16.mxu1 %v3299_v24  ;;  %v2838_v23 = vld [vmem:[%s3902_s1 + $0x544] ss:$12 sps:$4 sm:$0xff]  }
  0x47   :  { %1469 = vmatpush1.bf16.msra.mxu0 %v2749_v25  ;;  %v2833_v25 = vld [vmem:[%s3902_s1 + $0x3c0] ss:$12 sps:$4 sm:$0xff]  }
  0x48   :  { %1510 = vmatpush1.bf16.msra.mxu1 %v2752_v26  ;;  %1470 = vmatprep.subr.bf16.mxu0 %v2757_v27  ;;  %v2836_v26 = vld [vmem:[%s3902_s1 + $0x540] ss:$12 sps:$4 sm:$0xff]   ;;  %v2840_v27 = vld [vmem:[%s3902_s1 + $0x170] ss:$12 sps:$4 sm:$0xff]  }
  0x49   :  { %1511 = vmatprep.subr.bf16.mxu1 %v2760_v28  ;;  %v2841_v28 = vld [vmem:[%s3902_s1 + $0x2f0] ss:$12 sps:$4 sm:$0xff]  }
  0x4b   :  { %1471 = vmatpush1.bf16.msra.mxu0 %v2755_v29  ;;  %v2842_v29 = vld [vmem:[%s3902_s1 + $0xb0] ss:$12 sps:$4 sm:$0xff]  }
  0x4c   :  { %1512 = vmatpush1.bf16.msra.mxu1 %v2758_v30  ;;  %1472 = vmatprep.subr.bf16.mxu0 %v2763_v31  ;;  %v3490_v30 = vcombine.high %v3224_v63, %v3224_v63  ;;  %v2843_v31 = vld [vmem:[%s3902_s1 + $0x230] ss:$12 sps:$4 sm:$0xff]  }
  0x4d   :  { %1513 = vmatprep.subr.bf16.mxu1 %v2766_v32  ;;  %v2844_v32 = vld [vmem:[%s3902_s1 + $0x158] ss:$12 sps:$4 sm:$0xff]  }
  0x4f   :  { %1473 = vmatpush1.bf16.msra.mxu0 %v2761_v33  ;;  %v2845_v33 = vld [vmem:[%s3902_s1 + $0x2d8] ss:$12 sps:$4 sm:$0xff]  }
  0x50   :  { %1514 = vmatpush1.bf16.msra.mxu1 %v2764_v34  ;;  %1474 = vmatprep.subr.bf16.mxu0 %v2769_v35  ;;  %v2846_v34 = vld [vmem:[%s3902_s1 + $0x98] ss:$12 sps:$4 sm:$0xff]  }
  0x51   :  { %1515 = vmatprep.subr.bf16.mxu1 %v2772_v36  ;;  %v2847_v35 = vld [vmem:[%s3902_s1 + $0x218] ss:$12 sps:$4 sm:$0xff]   ;;  %v2848_v36 = vld [vmem:[%s3902_s1 + $0x140] ss:$12 sps:$4 sm:$0xff]  }
  0x53   :  { %1475 = vmatpush1.bf16.msra.mxu0 %v2767_v37  ;;  %v2849_v37 = vld [vmem:[%s3902_s1 + $0x2c0] ss:$12 sps:$4 sm:$0xff]  }
  0x54   :  { %1516 = vmatpush1.bf16.msra.mxu1 %v2770_v38  ;;  %1476 = vmatprep.subr.bf16.mxu0 %v2775_v39  ;;  %v2850_v38 = vld [vmem:[%s3902_s1 + $0x80] ss:$12 sps:$4 sm:$0xff]  }
  0x55   :  { %1517 = vmatprep.subr.bf16.mxu1 %v2778_v40  ;;  %v2851_v39 = vld [vmem:[%s3902_s1 + $0x200] ss:$12 sps:$4 sm:$0xff]   ;;  %v2852_v40 = vld [vmem:[%s3902_s1 + $0x128] ss:$12 sps:$4 sm:$0xff]  }
  0x57   :  { %1477 = vmatpush1.bf16.msra.mxu0 %v2773_v41  ;;  %v2853_v41 = vld [vmem:[%s3902_s1 + $0x2a8] ss:$12 sps:$4 sm:$0xff]  }
  0x58   :  { %1518 = vmatpush1.bf16.msra.mxu1 %v2776_v43  ;;  %1478 = vmatprep.subr.bf16.mxu0 %v2781_v44  ;;  %v2856_v43 = vld [vmem:[%s3902_s1 + $0x110] ss:$12 sps:$4 sm:$0xff]  }
  0x59   :  { %1519 = vmatprep.subr.bf16.mxu1 %v2784_v45  ;;  %v2857_v44 = vld [vmem:[%s3902_s1 + $0x290] ss:$12 sps:$4 sm:$0xff]  }
  0x5a   :  { %v2858_v45 = vld [vmem:[%s3902_s1 + $0x50] ss:$12 sps:$4 sm:$0xff]  }
  0x5b   :  { %1479 = vmatpush1.bf16.msra.mxu0 %v2779_v46  ;;  %v2859_v46 = vld [vmem:[%s3902_s1 + $0x1d0] ss:$12 sps:$4 sm:$0xff]  }
  0x5c   :  { %1520 = vmatpush1.bf16.msra.mxu1 %v2782_v47  ;;  %1480 = vmatprep.subr.bf16.mxu0 %v2787_v48  ;;  %v2860_v47 = vld [vmem:[%s3902_s1 + $0xf8] ss:$12 sps:$4 sm:$0xff]  }
  0x5d   :  { %1521 = vmatprep.subr.bf16.mxu1 %v2790_v49  ;;  %v2861_v48 = vld [vmem:[%s3902_s1 + $0x278] ss:$12 sps:$4 sm:$0xff]  }
  0x5e   :  { %v2862_v49 = vld [vmem:[%s3902_s1 + $0x38] ss:$12 sps:$4 sm:$0xff]  }
  0x5f   :  { %1481 = vmatpush1.bf16.msra.mxu0 %v2785_v50  ;;  %v2863_v50 = vld [vmem:[%s3902_s1 + $0x1b8] ss:$12 sps:$4 sm:$0xff]  }
  0x60   :  { %1522 = vmatpush1.bf16.msra.mxu1 %v2788_v51  ;;  %1482 = vmatprep.subr.bf16.mxu0 %v2793_v52  ;;  %v2864_v51 = vld [vmem:[%s3902_s1 + $0xe0] ss:$12 sps:$4 sm:$0xff]  }
  0x61   :  { %1523 = vmatprep.subr.bf16.mxu1 %v2796_v53  ;;  %v2865_v52 = vld [vmem:[%s3902_s1 + $0x260] ss:$12 sps:$4 sm:$0xff]  }
  0x62   :  { %v2866_v53 = vld [vmem:[%s3902_s1 + $0x20] ss:$12 sps:$4 sm:$0xff]  }
  0x63   :  { %1483 = vmatpush2.bf16.msra.mxu0 %v2791_v54  ;;  %v2867_v54 = vld [vmem:[%s3902_s1 + $0x1a0] ss:$12 sps:$4 sm:$0xff]  }
  0x64   :  { %1524 = vmatpush2.bf16.msra.mxu1 %v2794_v55  ;;  %1484 = vmatprep.subr.bf16.mxu0 %v2799_v56  ;;  %v2868_v55 = vld [vmem:[%s3902_s1 + $0xc8] ss:$12 sps:$4 sm:$0xff]  }
  0x65   :  { %1525 = vmatprep.subr.bf16.mxu1 %v2802_v57  ;;  %v2869_v56 = vld [vmem:[%s3902_s1 + $0x248] ss:$12 sps:$4 sm:$0xff]  }
  0x66   :  { %v2870_v57 = vld [vmem:[%s3902_s1 + $0x8] ss:$12 sps:$4 sm:$0xff]  }
  0x67   :  { %1485 = vmatpush2.bf16.msra.mxu0 %v2797_v58  ;;  %v2871_v58 = vld [vmem:[%s3902_s1 + $0x188] ss:$12 sps:$4 sm:$0xff]  }
  0x68   :  { %1526 = vmatpush2.bf16.msra.mxu1 %v2800_v59  ;;  %1486 = vmatprep.subr.bf16.mxu0 %v2805_v60  ;;  %v2872_v59 = vld [vmem:[%s3902_s1 + $0x470] ss:$12 sps:$4 sm:$0xff]  }
  0x69   :  { %1527 = vmatprep.subr.bf16.mxu1 %v2808_v61  ;;  %v2873_v60 = vld [vmem:[%s3902_s1 + $0x5f0] ss:$12 sps:$4 sm:$0xff]  }
  0x6a   :  { %v2874_v61 = vld [vmem:[%s3902_s1 + $0x3b0] ss:$12 sps:$4 sm:$0xff]  }
  0x6b   :  { %1487 = vmatpush2.bf16.msra.mxu0 %v2803_v0  ;;  %v2875_v0 = vld [vmem:[%s3902_s1 + $0x530] ss:$12 sps:$4 sm:$0xff]  }
  0x6c   :  { %1528 = vmatpush2.bf16.msra.mxu1 %v2806_v1  ;;  %1488 = vmatprep.subr.bf16.mxu0 %v2811_v2  ;;  %v2876_v1 = vld [vmem:[%s3902_s1 + $0x458] ss:$12 sps:$4 sm:$0xff]  }
  0x6d   :  { %1529 = vmatprep.subr.bf16.mxu1 %v2814_v4  ;;  %v2877_v2 = vld [vmem:[%s3902_s1 + $0x5d8] ss:$12 sps:$4 sm:$0xff]  }
  0x6e   :  { %v2878_v4 = vld [vmem:[%s3902_s1 + $0x398] ss:$12 sps:$4 sm:$0xff]  }
  0x6f   :  { %1489 = vmatpush2.bf16.msra.mxu0 %v2809_v5  ;;  %v2879_v5 = vld [vmem:[%s3902_s1 + $0x518] ss:$12 sps:$4 sm:$0xff]  }
  0x70   :  { %1530 = vmatpush2.bf16.msra.mxu1 %v2812_v6  ;;  %1490 = vmatprep.subr.bf16.mxu0 %v2817_v7  ;;  %v2880_v6 = vld [vmem:[%s3902_s1 + $0x440] ss:$12 sps:$4 sm:$0xff]  }
  0x71   :  { %1531 = vmatprep.subr.bf16.mxu1 %v2820_v8  ;;  %v2881_v7 = vld [vmem:[%s3902_s1 + $0x5c0] ss:$12 sps:$4 sm:$0xff]  }
  0x72   :  { %v2882_v8 = vld [vmem:[%s3902_s1 + $0x380] ss:$12 sps:$4 sm:$0xff]  }
  0x73   :  { %1491 = vmatpush2.bf16.msra.mxu0 %v2815_v9  ;;  %v2885_v9 = vld [vmem:[%s3902_s1 + $0x5a8] ss:$12 sps:$4 sm:$0xff]  }
  0x74   :  { %1532 = vmatpush2.bf16.msra.mxu1 %v2818_v10  ;;  %1492 = vmatprep.subr.bf16.mxu0 %v2823_v11  ;;  %v2886_v10 = vld [vmem:[%s3902_s1 + $0x368] ss:$12 sps:$4 sm:$0xff]   ;;  %v2889_v11 = vld [vmem:[%s3902_s1 + $0x590] ss:$12 sps:$4 sm:$0xff]  }
  0x75   :  { %1533 = vmatprep.subr.bf16.mxu1 %v2826_v12  ;;  %v2890_v12 = vld [vmem:[%s3902_s1 + $0x350] ss:$12 sps:$4 sm:$0xff]  }
  0x77   :  { %1493 = vmatpush2.bf16.msra.mxu0 %v2821_v13  ;;  %v2891_v13 = vld [vmem:[%s3902_s1 + $0x4d0] ss:$12 sps:$4 sm:$0xff]  }
  0x78   :  { %1534 = vmatpush2.bf16.msra.mxu1 %v2824_v15  ;;  %1494 = vmatprep.subr.bf16.mxu0 %v2829_v16  ;;  %v2892_v15 = vld [vmem:[%s3902_s1 + $0x3f8] ss:$12 sps:$4 sm:$0xff]  }
  0x79   :  { %1535 = vmatprep.subr.bf16.mxu1 %v2832_v17  ;;  %v2893_v16 = vld [vmem:[%s3902_s1 + $0x578] ss:$12 sps:$4 sm:$0xff]  }
  0x7b   :  { %1495 = vmatpush2.bf16.msra.mxu0 %v2827_v20 }
  0x7c   :  { %1536 = vmatpush2.bf16.msra.mxu1 %v2830_v21  ;;  %1496 = vmatprep.subr.bf16.mxu0 %v2835_v22 }
  0x7d   :  { %1537 = vmatprep.subr.bf16.mxu1 %v2838_v23 }
  0x7f   :  { %1497 = vmatpush2.bf16.msra.mxu0 %v2833_v25 }
  0x80   :  { %1538 = vmatpush2.bf16.msra.mxu1 %v2836_v26  ;;  %2556 = vmatprep.subr.bf16.mxu0 %v2840_v27 }
  0x81   :  { %2578 = vmatprep.subr.bf16.mxu1 %v2841_v28 }
  0x82   :  { %1499 = vmatmul.mubr.bf16.vlgmr.msra.gmra.mxu0 %v3224_v63 }
  0x83   :  { %1540 = vmatmul.mubr.bf16.vlgmr.msra.gmra.mxu1 %v3490_v30  ;;  %2557 = vmatpush3.bf16.msra.mxu0 %v2842_v29 }
  0x84   :  { %2579 = vmatpush3.bf16.msra.mxu1 %v2843_v31  ;;  %2558 = vmatprep.subr.bf16.mxu0 %v2844_v32 }
  0x85   :  { %2580 = vmatprep.subr.bf16.mxu1 %v2845_v33  ;;  %1580 = vmatprep.mubr.bf16.mxu0 %v3222_v62  ;;  %v2854_v62 = vld [vmem:[%s3902_s1 + $0x68] ss:$12 sps:$4 sm:$0xff]  }
  0x86   :  { %1620 = vmatprep.mubr.bf16.mxu1 %v3237_v3  ;;  %v2855_v3 = vld [vmem:[%s3902_s1 + $0x1e8] ss:$12 sps:$4 sm:$0xff]  }
  0x87   :  { %2559 = vmatpush3.bf16.msra.mxu0 %v2846_v34 }
  0x88   :  { %2581 = vmatpush3.bf16.msra.mxu1 %v2847_v35  ;;  %2560 = vmatprep.subr.bf16.mxu0 %v2848_v36 }
  0x89   :  { %2582 = vmatprep.subr.bf16.mxu1 %v2849_v37 }
  0x8b   :  { %2561 = vmatpush3.bf16.msra.mxu0 %v2850_v38 }
  0x8c   :  { %2583 = vmatpush3.bf16.msra.mxu1 %v2851_v39  ;;  %2562 = vmatprep.subr.bf16.mxu0 %v2852_v40 }
  0x8d   :  { %2584 = vmatprep.subr.bf16.mxu1 %v2853_v41 }
  0x8f   :  { %2563 = vmatpush3.bf16.msra.mxu0 %v2854_v62 }
  0x90   :  { %2585 = vmatpush3.bf16.msra.mxu1 %v2855_v3  ;;  %2564 = vmatprep.subr.bf16.mxu0 %v2856_v43 }
  0x91   :  { %2586 = vmatprep.subr.bf16.mxu1 %v2857_v44 }
  0x93   :  { %2565 = vmatpush3.bf16.msra.mxu0 %v2858_v45 }
  0x94   :  { %2587 = vmatpush3.bf16.msra.mxu1 %v2859_v46  ;;  %2566 = vmatprep.subr.bf16.mxu0 %v2860_v47 }
  0x95   :  { %2588 = vmatprep.subr.bf16.mxu1 %v2861_v48 }
  0x97   :  { %2567 = vmatpush3.bf16.msra.mxu0 %v2862_v49 }
  0x98   :  { %2589 = vmatpush3.bf16.msra.mxu1 %v2863_v50  ;;  %2568 = vmatprep.subr.bf16.mxu0 %v2864_v51 }
  0x99   :  { %2590 = vmatprep.subr.bf16.mxu1 %v2865_v52 }
  0x9b   :  { %2569 = vmatpush3.bf16.msra.mxu0 %v2866_v53 }
  0x9c   :  { %2591 = vmatpush3.bf16.msra.mxu1 %v2867_v54  ;;  %2570 = vmatprep.subr.bf16.mxu0 %v2868_v55 }
  0x9d   :  { %2592 = vmatprep.subr.bf16.mxu1 %v2869_v56 }
  0x9f   :  { %2571 = vmatpush3.bf16.msra.mxu0 %v2870_v57 }
  0xa0   :  { %2593 = vmatpush3.bf16.msra.mxu1 %v2871_v58  ;;  %2600 = vmatprep.subr.bf16.mxu0 %v2872_v59 }
  0xa1   :  { %2622 = vmatprep.subr.bf16.mxu1 %v2873_v60 }
  0xa2   :  { %1581 = vmatmul.mubr.bf16.vlgmr.msra.gmra.mxu0 %v3268_v14  ;;  %v2883_v14 = vld [vmem:[%s3902_s1 + $0x500] ss:$12 sps:$4 sm:$0xff]  }
  0xa3   :  { %1621 = vmatmul.mubr.bf16.vlgmr.msra.gmra.mxu1 %v3283_v19  ;;  %2601 = vmatpush3.bf16.msra.mxu0 %v2874_v61  ;;  %v2884_v19 = vld [vmem:[%s3902_s1 + $0x428] ss:$12 sps:$4 sm:$0xff]  }
  0xa4   :  { %2623 = vmatpush3.bf16.msra.mxu1 %v2875_v0  ;;  %2602 = vmatprep.subr.bf16.mxu0 %v2876_v1 }
  0xa5   :  { %2624 = vmatprep.subr.bf16.mxu1 %v2877_v2  ;;  %1660 = vmatprep.mubr.bf16.mxu0 %v3279_v18  ;;  %v2887_v18 = vld [vmem:[%s3902_s1 + $0x4e8] ss:$12 sps:$4 sm:$0xff]  }
  0xa6   :  { %1700 = vmatprep.mubr.bf16.mxu1 %v3299_v24  ;;  %v2888_v24 = vld [vmem:[%s3902_s1 + $0x410] ss:$12 sps:$4 sm:$0xff]  }
  0xa7   :  { %2603 = vmatpush3.bf16.msra.mxu0 %v2878_v4 }
  0xa8   :  { %2625 = vmatpush3.bf16.msra.mxu1 %v2879_v5  ;;  %2604 = vmatprep.subr.bf16.mxu0 %v2880_v6 }
  0xa9   :  { %2626 = vmatprep.subr.bf16.mxu1 %v2881_v7 }
  0xab   :  { %2605 = vmatpush3.bf16.msra.mxu0 %v2882_v8 }
  0xac   :  { %2627 = vmatpush3.bf16.msra.mxu1 %v2883_v14  ;;  %2606 = vmatprep.subr.bf16.mxu0 %v2884_v19 }
  0xad   :  { %2628 = vmatprep.subr.bf16.mxu1 %v2885_v9 }
  0xaf   :  { %2607 = vmatpush3.bf16.msra.mxu0 %v2886_v10 }
  0xb0   :  { %2629 = vmatpush3.bf16.msra.mxu1 %v2887_v18  ;;  %2608 = vmatprep.subr.bf16.mxu0 %v2888_v24 }
  0xb1   :  { %2630 = vmatprep.subr.bf16.mxu1 %v2889_v11 }
  0xb2   :  { %12 = vsyncpa [#allocation3], 0  ;;  %v2894_v17 = vld [vmem:[%s3902_s1 + $0x338] ss:$12 sps:$4 sm:$0xff]   ;;  %v2896_v21 = vld [vmem:[%s3902_s1 + $0x3e0] ss:$12 sps:$4 sm:$0xff]  }
  0xb3   :  { %2609 = vmatpush3.bf16.msra.mxu0 %v2890_v12  ;;  %v2895_v20 = vld [vmem:[%s3902_s1 + $0x4b8] ss:$12 sps:$4 sm:$0xff]   ;;  %v2897_v22 = vld [vmem:[%s3902_s1 + $0x560] ss:$12 sps:$4 sm:$0xff]   ;;  %v2900_v26 = vld [vmem:[%s3902_s1 + $0x3c8] ss:$12 sps:$4 sm:$0xff]  }
  0xb4   :  { %2631 = vmatpush3.bf16.msra.mxu1 %v2891_v13  ;;  %2610 = vmatprep.subr.bf16.mxu0 %v2892_v15  ;;  %v2898_v23 = vld [vmem:[%s3902_s1 + $0x320] ss:$12 sps:$4 sm:$0xff]   ;;  %v2901_v27 = vld [vmem:[%s3902_s1 + $0x548] ss:$12 sps:$4 sm:$0xff]   ;;  %v2904_v32 = vld [vmem:[%s3904_s3 + $0x70] ss:$8 sps:$4 sm:$0xff]  }
  0xb5   :  { %2632 = vmatprep.subr.bf16.mxu1 %v2893_v16  ;;  %v2899_v25 = vld [vmem:[%s3902_s1 + $0x4a0] ss:$12 sps:$4 sm:$0xff]   ;;  %v2902_v28 = vld [vmem:[%s3902_s1 + $0x308] ss:$12 sps:$4 sm:$0xff]   ;;  %v2910_v36 = vld [vmem:[%s3904_s3 + $0x50] ss:$8 sps:$4 sm:$0xff]  }
  0xb6   :  { %v2903_v29 = vld [vmem:[%s3902_s1 + $0x488] ss:$12 sps:$4 sm:$0xff]   ;;  %v2909_v33 = vld [vmem:[%s3904_s3 + $0x64] ss:$8 sps:$4 sm:$0xff]   ;;  %v2916_v38 = vld [vmem:[%s3904_s3 + $0x30] ss:$8 sps:$4 sm:$0xff]  }
  0xb7   :  { %2611 = vmatpush3.bf16.msra.mxu0 %v2894_v17  ;;  %v2906_v31 = vld [vmem:[%s3904_s3 + $0x74] ss:$8 sps:$4 sm:$0xff]   ;;  %v2907_v34 = vld [vmem:[%s3904_s3 + $0x60] ss:$8 sps:$4 sm:$0xff]   ;;  %v2921_v39 = vld [vmem:[%s3904_s3 + $0x24] ss:$8 sps:$4 sm:$0xff]  }
  0xb8   :  { %2633 = vmatpush3.bf16.msra.mxu1 %v2895_v20  ;;  %2612 = vmatprep.subr.bf16.mxu0 %v2896_v21  ;;  %v2912_v35 = vld [vmem:[%s3904_s3 + $0x54] ss:$8 sps:$4 sm:$0xff]   ;;  %v2919_v40 = vld [vmem:[%s3904_s3 + $0x20] ss:$8 sps:$4 sm:$0xff]   ;;  %v2922_v62 = vld [vmem:[%s3904_s3 + $0x10] ss:$8 sps:$4 sm:$0xff]  }
  0xb9   :  { %2634 = vmatprep.subr.bf16.mxu1 %v2897_v22  ;;  %v2918_v37 = vld [vmem:[%s3904_s3 + $0x34] ss:$8 sps:$4 sm:$0xff]   ;;  %v2927_v3 = vld [vmem:[%s3904_s3 + $0x4] ss:$8 sps:$4 sm:$0xff]   ;;  %v2925_v43 = vld [vmem:[%s3904_s3] ss:$8 sps:$4 sm:$0xff]  }
  0xba   :  { %v2924_v41 = vld [vmem:[%s3904_s3 + $0x14] ss:$8 sps:$4 sm:$0xff]   ;;  %v2928_v45 = vld [vmem:[%s3904_s3 + $0xf0] ss:$8 sps:$4 sm:$0xff]   ;;  %v2933_v46 = vld [vmem:[%s3904_s3 + $0xe4] ss:$8 sps:$4 sm:$0xff]  }
  0xbb   :  { %2613 = vmatpush3.bf16.msra.mxu0 %v2898_v23  ;;  %v2930_v44 = vld [vmem:[%s3904_s3 + $0xf4] ss:$8 sps:$4 sm:$0xff]   ;;  %v2931_v47 = vld [vmem:[%s3904_s3 + $0xe0] ss:$8 sps:$4 sm:$0xff]   ;;  %v2934_v49 = vld [vmem:[%s3904_s3 + $0xd0] ss:$8 sps:$4 sm:$0xff]  }
  0xbc   :  { %2635 = vmatpush3.bf16.msra.mxu1 %v2899_v25  ;;  %2614 = vmatprep.subr.bf16.mxu0 %v2900_v26  ;;  %v2936_v48 = vld [vmem:[%s3904_s3 + $0xd4] ss:$8 sps:$4 sm:$0xff]   ;;  %v2939_v50 = vld [vmem:[%s3904_s3 + $0xc4] ss:$8 sps:$4 sm:$0xff]   ;;  %v2937_v51 = vld [vmem:[%s3904_s3 + $0xc0] ss:$8 sps:$4 sm:$0xff]  }
  0xbd   :  { %2636 = vmatprep.subr.bf16.mxu1 %v2901_v27  ;;  %v2942_v52 = vld [vmem:[%s3904_s3 + $0xb4] ss:$8 sps:$4 sm:$0xff]   ;;  %v2940_v53 = vld [vmem:[%s3904_s3 + $0xb0] ss:$8 sps:$4 sm:$0xff]   ;;  %v2945_v54 = vld [vmem:[%s3904_s3 + $0xa4] ss:$8 sps:$4 sm:$0xff]  }
  0xbe   :  { %v2943_v55 = vld [vmem:[%s3904_s3 + $0xa0] ss:$8 sps:$4 sm:$0xff]   ;;  %v2948_v56 = vld [vmem:[%s3904_s3 + $0x94] ss:$8 sps:$4 sm:$0xff]   ;;  %v2946_v57 = vld [vmem:[%s3904_s3 + $0x90] ss:$8 sps:$4 sm:$0xff]  }
  0xbf   :  { %2615 = vmatpush3.bf16.msra.mxu0 %v2902_v28  ;;  %v2951_v58 = vld [vmem:[%s3904_s3 + $0x84] ss:$8 sps:$4 sm:$0xff]   ;;  %v2949_v59 = vld [vmem:[%s3904_s3 + $0x80] ss:$8 sps:$4 sm:$0xff]   ;;  %v2954_v2 = vld [vmem:[%s3904_s3 + $0x174] ss:$8 sps:$4 sm:$0xff]  }
  0xc0   :  { %2637 = vmatpush3.bf16.msra.mxu1 %v2903_v29  ;;  %2035 = vmatprep.subr.bf16.mxu0 %v2906_v31  ;;  %v2952_v4 = vld [vmem:[%s3904_s3 + $0x170] ss:$8 sps:$4 sm:$0xff]   ;;  %v2957_v14 = vld [vmem:[%s3904_s3 + $0x164] ss:$8 sps:$4 sm:$0xff]   ;;  %v2955_v19 = vld [vmem:[%s3904_s3 + $0x160] ss:$8 sps:$4 sm:$0xff]  }
  0xc1   :  { %2076 = vmatprep.subr.bf16.mxu1 %v2954_v2  ;;  %v2960_v9 = vld [vmem:[%s3904_s3 + $0x154] ss:$8 sps:$4 sm:$0xff]   ;;  %v2958_v10 = vld [vmem:[%s3904_s3 + $0x150] ss:$8 sps:$4 sm:$0xff]   ;;  %v2963_v18 = vld [vmem:[%s3904_s3 + $0x144] ss:$8 sps:$4 sm:$0xff]  }
  0xc2   :  { %1661 = vmatmul.mubr.bf16.vlgmr.msra.gmra.mxu0 %v3224_v63  ;;  %v2915_v63 = vld [vmem:[%s3904_s3 + $0x44] ss:$8 sps:$4 sm:$0xff]   ;;  %v2961_v24 = vld [vmem:[%s3904_s3 + $0x140] ss:$8 sps:$4 sm:$0xff]   ;;  %v2966_v11 = vld [vmem:[%s3904_s3 + $0x134] ss:$8 sps:$4 sm:$0xff]  }
  0xc3   :  { %1701 = vmatmul.mubr.bf16.vlgmr.msra.gmra.mxu1 %v3490_v30  ;;  %2036 = vmatpush1.bf16.msra.mxu0 %v2904_v32  ;;  %v2913_v30 = vld [vmem:[%s3904_s3 + $0x40] ss:$8 sps:$4 sm:$0xff]   ;;  %v2964_v12 = vld [vmem:[%s3904_s3 + $0x130] ss:$8 sps:$4 sm:$0xff]   ;;  %v2969_v13 = vld [vmem:[%s3904_s3 + $0x124] ss:$8 sps:$4 sm:$0xff]  }
  0xc4   :  { %2037 = vmatprep.subr.bf16.mxu0 %v2909_v33  ;;  %2077 = vmatpush1.bf16.msra.mxu1 %v2952_v4  ;;  %v2967_v15 = vld [vmem:[%s3904_s3 + $0x120] ss:$8 sps:$4 sm:$0xff]   ;;  %v2972_v16 = vld [vmem:[%s3904_s3 + $0x114] ss:$8 sps:$4 sm:$0xff]   ;;  %v2970_v17 = vld [vmem:[%s3904_s3 + $0x110] ss:$8 sps:$4 sm:$0xff]  }
  0xc5   :  { %2078 = vmatprep.subr.bf16.mxu1 %v2957_v14  ;;  %v2975_v20 = vld [vmem:[%s3904_s3 + $0x104] ss:$8 sps:$4 sm:$0xff]   ;;  %v2973_v21 = vld [vmem:[%s3904_s3 + $0x100] ss:$8 sps:$4 sm:$0xff]   ;;  %v3021_v22 = vmov 0   ;;  %v289_v23 = vsub.s32 0, %v3180_v42 }
  0xc6   :  { %2108 = vmatprep.mubr.bf16.mxu1 %v3021_v22  ;;  %v285_v25 = vld [vmem:[%s3903_s2] sm:$0x7]  ;;  %v293_v26 = vsub.s32 1, %v3180_v42  ;;  %vm2238_vm5 = vcmask 523264   ;;  %s3022_s27 = smov [#allocation2]  }
  0xc7   :  { %2038 = vmatpush1.bf16.msra.mxu0 %v2907_v34  ;;  %v290_v27 = vrot.slane %v285_v25, %v289_v23  ;;  %s2289_s2 = sshll.u32 %s3022_s27, 4  ;;  %s2290_s2 = int_to_ptr.vmem [resolvable:$true] %s2289_s2 }
  0xc8   :  { %2039 = vmatprep.subr.bf16.mxu0 %v2912_v35  ;;  %2079 = vmatpush1.bf16.msra.mxu1 %v2955_v19  ;;  %v294_v28 = vrot.slane %v285_v25, %v293_v26  ;;  %s2998_s3 = scalar_lea.vmem %s2290_s2, 32  ;;  %p3003_p1 = scmp.lt.s32.totalorder %s2290_s2, %s2290_s2 }
  0xc9   :  { %2080 = vmatprep.subr.bf16.mxu1 %v2960_v9  ;;  %p2999_p0 = scmp.ne.s32.totalorder %s2290_s2, %s2998_s3  ;;  %p3004_p2 = scmp.lt.s32.totalorder %s2998_s3, %s2998_s3 }
  0xcb   :  { %2040 = vmatpush1.bf16.msra.mxu0 %v2910_v36  ;;  %p3005_p3 = por %p3004_p2, %p3003_p1 }
  0xcc   :  { %2041 = vmatprep.subr.bf16.mxu0 %v2915_v63  ;;  %2081 = vmatpush1.bf16.msra.mxu1 %v2958_v10 }
  0xcd   :  { %2082 = vmatprep.subr.bf16.mxu1 %v2963_v18  ;;  %p3006_p4 = pnand %p3005_p3, %p2999_p0 }
  0xcf   :  { %2042 = vmatpush1.bf16.msra.mxu0 %v2913_v30 }
  0xd0   :  { %2043 = vmatprep.subr.bf16.mxu0 %v2918_v37  ;;  %2083 = vmatpush1.bf16.msra.mxu1 %v2961_v24 }
  0xd1   :  { %2084 = vmatprep.subr.bf16.mxu1 %v2966_v11 }
  0xd3   :  { %2044 = vmatpush1.bf16.msra.mxu0 %v2916_v38 }
  0xd4   :  { %2045 = vmatprep.subr.bf16.mxu0 %v2921_v39  ;;  %2085 = vmatpush1.bf16.msra.mxu1 %v2964_v12 }
  0xd5   :  { %2086 = vmatprep.subr.bf16.mxu1 %v2969_v13 }
  0xd7   :  { %2046 = vmatpush1.bf16.msra.mxu0 %v2919_v40 }
  0xd8   :  { %2047 = vmatprep.subr.bf16.mxu0 %v2924_v41  ;;  %2087 = vmatpush1.bf16.msra.mxu1 %v2967_v15 }
  0xd9   :  { %2088 = vmatprep.subr.bf16.mxu1 %v2972_v16 }
  0xdb   :  { %2048 = vmatpush1.bf16.msra.mxu0 %v2922_v62 }
  0xdc   :  { %2049 = vmatprep.subr.bf16.mxu0 %v2927_v3  ;;  %2089 = vmatpush1.bf16.msra.mxu1 %v2970_v17 }
  0xdd   :  { %2090 = vmatprep.subr.bf16.mxu1 %v2975_v20 }
  0xdf   :  { %2050 = vmatpush1.bf16.msra.mxu0 %v2925_v43 }
  0xe0   :  { %2051 = vmatprep.subr.bf16.mxu0 %v2930_v44  ;;  %2091 = vmatpush1.bf16.msra.mxu1 %v2973_v21 }
  0xe1   :  { %2242 = vmatprep.subr.bf16.mxu1 %v3021_v22 }
  0xe3   :  { %2052 = vmatpush2.bf16.msra.mxu0 %v2928_v45 }
  0xe4   :  { %2053 = vmatprep.subr.bf16.mxu0 %v2933_v46 }
  0xe7   :  { %2054 = vmatpush2.bf16.msra.mxu0 %v2931_v47 }
  0xe8   :  { %2055 = vmatprep.subr.bf16.mxu0 %v2936_v48 }
  0xeb   :  { %2056 = vmatpush2.bf16.msra.mxu0 %v2934_v49 }
  0xec   :  { %2057 = vmatprep.subr.bf16.mxu0 %v2939_v50 }
  0xef   :  { %2058 = vmatpush2.bf16.msra.mxu0 %v2937_v51 }
  0xf0   :  { %2059 = vmatprep.subr.bf16.mxu0 %v2942_v52 }
  0xf3   :  { %2060 = vmatpush2.bf16.msra.mxu0 %v2940_v53 }
  0xf4   :  { %2061 = vmatprep.subr.bf16.mxu0 %v2945_v54 }
  0xf7   :  { %2062 = vmatpush2.bf16.msra.mxu0 %v2943_v55 }
  0xf8   :  { %2063 = vmatprep.subr.bf16.mxu0 %v2948_v56 }
  0xfb   :  { %2064 = vmatpush2.bf16.msra.mxu0 %v2946_v57 }
  0xfc   :  { %2065 = vmatprep.subr.bf16.mxu0 %v2951_v58 }
  0xff   :  { %2066 = vmatpush2.bf16.msra.mxu0 %v2949_v59 }
 0x102   :  { %v1418_v60 = vpop.f32.mrf.mxu0 }
 0x103   :  { %v1459_v61 = vpop.f32.mrf.mxu1  ;;  %v1419_v29 = vadd.f32 %v1418_v60, %v290_v27 }
 0x104   :  { %v1420_v0 = vpop.f32.mrf.mxu0 }
 0x105   :  { %v1461_v1 = vpop.f32.mrf.mxu1  ;;  %v1421_v31 = vadd.f32 %v1420_v0, %v294_v28  ;;  %v1460_v32 = vadd.f32 %v1459_v61, %v1419_v29 }
 0x106   :  { %v1422_v5 = vpop.f32.mrf.mxu0 }
 0x107   :  { %v1463_v6 = vpop.f32.mrf.mxu1  ;;  %v1462_v35 = vadd.f32 %v1461_v1, %v1421_v31 }
 0x108   :  { %v1423_v7 = vpop.f32.mrf.mxu0  ;;  %v297_v6 = vsub.s32 2, %v3180_v42 }
 0x109   :  { %v1464_v8 = vpop.f32.mrf.mxu1 }
 0x10a   :  { %v298_v7 = vrot.slane %v285_v25, %v297_v6 }
 0x142   :  { %v1500_v33 = vpop.f32.mrf.mxu0 }
 0x143   :  { %v1541_v34 = vpop.f32.mrf.mxu1  ;;  %v1501_v36 = vadd.f32 %v1500_v33, %v1460_v32 }
 0x144   :  { %v1502_v63 = vpop.f32.mrf.mxu0 }
 0x145   :  { %v1543_v30 = vpop.f32.mrf.mxu1  ;;  %v1542_v37 = vadd.f32 %v1541_v34, %v1501_v36  ;;  %v1503_v38 = vadd.f32 %v1502_v63, %v1462_v35  ;;  %v2976_v36 = vld [vmem:[%s3906_s5 + $0x38] sm:$0xff]   ;;  %v2977_v63 = vld [vmem:[%s3906_s5 + $0x30] sm:$0xff]  }
 0x146   :  { %v1504_v39 = vpop.f32.mrf.mxu0 }
 0x147   :  { %v1545_v40 = vpop.f32.mrf.mxu1  ;;  %v1711_v41 = vmin.f32 %v1542_v37, 0.0  ;;  %v1544_v62 = vadd.f32 %v1543_v30, %v1503_v38  ;;  %vm1708_vm0 = vcmp.gt.f32.partialorder %v1542_v37, 0.0  ;;  %v2978_v30 = vld [vmem:[%s3906_s5 + $0x28] sm:$0xff]   ;;  %v2980_v38 = vld [vmem:[%s3906_s5 + $0x18] sm:$0xff]   ;;  %v2981_v39 = vld [vmem:[%s3906_s5 + $0x10] sm:$0xff]  }
 0x148   :  { %v1505_v3 = vpop.f32.mrf.mxu0  ;;  %v2982_v40 = vld [vmem:[%s3906_s5 + $0x8] sm:$0xff]  }
 0x149   :  { %v1546_v43 = vpop.f32.mrf.mxu1  ;;  %v1714_v44 = vmul.f32 1.442695, %v1711_v41  ;;  %v1712_v45 = vmin.f32 %v1544_v62, 0.0  ;;  %vm1709_vm1 = vcmp.gt.f32.partialorder %v1544_v62, 0.0  ;;  %v2983_v41 = vld [vmem:[%s3906_s5] sm:$0xff]   ;;  %v2985_v3 = vld [vmem:[%s3906_s5 + $0x50] sm:$0xff]  }
 0x14a   :  { %v2986_v43 = vld [vmem:[%s3906_s5 + $0x48] sm:$0xff]  }
 0x14b   :  { %2988 = vpow2.f32 %v1714_v44  ;;  %v1716_v46 = vmul.f32 1.442695, %v1712_v45  ;;  %v2987_v44 = vld [vmem:[%s3906_s5 + $0x40] sm:$0xff]  }
 0x14d   :  { %2990 = vpow2.f32 %v1716_v46 }
 0x158   :  { %v2989_v47 = vpop.eup %2988 }
 0x159   :  { %v2489_v48 = vadd.f32 -1.0, %v2989_v47 }
 0x15a   :  { %v2991_v49 = vpop.eup %2990 }
 0x15b   :  { %v1723_v50 = vmul.f32 1.6732632, %v2489_v48  ;;  %v2490_v51 = vadd.f32 -1.0, %v2991_v49  ;;  %v1783_v49 = vld [vmem:[%s3905_s4] sm:$0x3] }
 0x15d   :  { %v1726_v52 = vsel %vm1708_vm0, %v1542_v37, %v1723_v50  ;;  %v1724_v53 = vmul.f32 1.6732632, %v2490_v51  ;;  %v2979_v37 = vld [vmem:[%s3906_s5 + $0x20] sm:$0xff]   ;;  %v1788_v50 = vrot.slane %v1783_v49, %v289_v23  ;;  %v1792_v51 = vrot.slane %v1783_v49, %v293_v26 }
 0x15e   :  { %v1729_v54 = vmul.f32 1.050701, %v1726_v52 }
 0x15f   :  { %v1727_v55 = vsel %vm1709_vm1, %v1544_v62, %v1724_v53  ;;  %v2984_v62 = vld [vmem:[%s3906_s5 + $0x58] sm:$0xff]  }
 0x160   :  { %v1730_v56 = vmul.f32 1.050701, %v1727_v55  ;;  %v1732_v60 = vpack.c.bf16 %v1729_v54, %v1729_v54 }
 0x162   :  { %v2572_v57 = vpop.f32.mrf.mxu0  ;;  %v1733_v59 = vpack.c.bf16 %v1730_v56, %v1730_v56 }
 0x163   :  { %v2594_v58 = vpop.f32.mrf.mxu1 }
 0x164   :  { %v2573_v61 = vpop.f32.mrf.mxu0  ;;  %2067 = vmatprep.mubr.bf16.mxu0 %v1733_v59 }
 0x165   :  { %v2595_v0 = vpop.f32.mrf.mxu1  ;;  %2068 = vmatmul.mubr.bf16.vlgmr.msra.gmra.mxu0 %v1732_v60  ;;  %v2574_v8 = vadd.f32 %v2573_v61, %v2572_v57 }
 0x166   :  { %v2575_v1 = vpop.f32.mrf.mxu0  ;;  %v2596_v19 = vadd.f32 %v2595_v0, %v2594_v58 }
 0x167   :  { %v2597_v2 = vpop.f32.mrf.mxu1  ;;  %v1583_v14 = vadd.f32 %v2574_v8, %v298_v7 }
 0x168   :  { %v2576_v4 = vpop.f32.mrf.mxu0 }
 0x169   :  { %v2598_v5 = vpop.f32.mrf.mxu1  ;;  %v1623_v11 = vadd.f32 %v2596_v19, %v1583_v14 }
 0x182   :  { %v2616_v9 = vpop.f32.mrf.mxu0 }
 0x183   :  { %v2638_v10 = vpop.f32.mrf.mxu1 }
 0x184   :  { %v2617_v18 = vpop.f32.mrf.mxu0 }
 0x185   :  { %v2639_v24 = vpop.f32.mrf.mxu1  ;;  %v2618_v12 = vadd.f32 %v2617_v18, %v2616_v9  ;;  %v2542_v9 = vld [vmem:[%s3907_s6] ss:$0 sm:$0xff] }
 0x186   :  { %v2619_v13 = vpop.f32.mrf.mxu0  ;;  %v2640_v17 = vadd.f32 %v2639_v24, %v2638_v10 }
 0x187   :  { %v2641_v15 = vpop.f32.mrf.mxu1  ;;  %v1663_v16 = vadd.f32 %v2618_v12, %v1623_v11 }
 0x188   :  { %v2620_v20 = vpop.f32.mrf.mxu0 }
 0x189   :  { %v2642_v21 = vpop.f32.mrf.mxu1  ;;  %v1703_v27 = vadd.f32 %v2640_v17, %v1663_v16 }
 0x18b   :  { %v1713_v28 = vmin.f32 %v1703_v27, 0.0  ;;  %vm1710_vm2 = vcmp.gt.f32.partialorder %v1703_v27, 0.0 }
 0x18d   :  { %v1718_v29 = vmul.f32 1.442695, %v1713_v28 }
 0x18f   :  { %2992 = vpow2.f32 %v1718_v29 }
 0x19c   :  { %v2993_v25 = vpop.eup %2992 }
 0x19d   :  { %v2491_v31 = vadd.f32 -1.0, %v2993_v25 }
 0x19f   :  { %v1725_v32 = vmul.f32 1.6732632, %v2491_v31 }
 0x1a1   :  { %v1728_v33 = vsel %vm1710_vm2, %v1703_v27, %v1725_v32 }
 0x1a2   :  { %v1731_v34 = vmul.f32 1.050701, %v1728_v33 }
 0x1a4   :  { %v1734_v35 = vpack.c.bf16 %v1731_v34, %v1731_v34 }
 0x1a6   :  { %2109 = vmatmul.mubr.bf16.vlgmr.msra.gmra.mxu1 %v1734_v35 }
 0x1a7   :  { %2243 = vmatpush1.bf16.msra.mxu1 %v2976_v36 }
 0x1a8   :  { %2244 = vmatprep.subr.bf16.mxu1 %v3021_v22 }
 0x1ab   :  { %2245 = vmatpush1.bf16.msra.mxu1 %v2977_v63 }
 0x1ac   :  { %2246 = vmatprep.subr.bf16.mxu1 %v3021_v22 }
 0x1af   :  { %2247 = vmatpush1.bf16.msra.mxu1 %v2978_v30 }
 0x1b0   :  { %2248 = vmatprep.subr.bf16.mxu1 %v3021_v22 }
 0x1b3   :  { %2249 = vmatpush1.bf16.msra.mxu1 %v2979_v37 }
 0x1b4   :  { %2250 = vmatprep.subr.bf16.mxu1 %v3021_v22 }
 0x1b7   :  { %2251 = vmatpush1.bf16.msra.mxu1 %v2980_v38 }
 0x1b8   :  { %2252 = vmatprep.subr.bf16.mxu1 %v3021_v22 }
 0x1bb   :  { %2253 = vmatpush1.bf16.msra.mxu1 %v2981_v39 }
 0x1bc   :  { %2254 = vmatprep.subr.bf16.mxu1 %v3021_v22 }
 0x1bf   :  { %2255 = vmatpush1.bf16.msra.mxu1 %v2982_v40 }
 0x1c0   :  { %2256 = vmatprep.subr.bf16.mxu1 %v3021_v22 }
 0x1c3   :  { %2257 = vmatpush1.bf16.msra.mxu1 %v2983_v41 }
 0x1c4   :  { %2266 = vmatprep.subr.bf16.mxu1 %v3021_v22 }
 0x1c7   :  { %2267 = vmatpush2.bf16.msra.mxu1 %v2984_v62 }
 0x1c8   :  { %2268 = vmatprep.subr.bf16.mxu1 %v3021_v22 }
 0x1cb   :  { %2269 = vmatpush2.bf16.msra.mxu1 %v2985_v3 }
 0x1cc   :  { %2270 = vmatprep.subr.bf16.mxu1 %v3021_v22 }
 0x1cf   :  { %2271 = vmatpush2.bf16.msra.mxu1 %v2986_v43 }
 0x1d0   :  { %2272 = vmatprep.subr.bf16.mxu1 %v3021_v22 }
 0x1d3   :  { %2273 = vmatpush2.bf16.msra.mxu1 %v2987_v44 }
 0x225   :  { %v2069_v45 = vpop.f32.mrf.mxu0 }
 0x226   :  { %v2070_v22 = vadd.f32 %v2069_v45, %v1788_v50 }
 0x227   :  { %v2071_v46 = vpop.f32.mrf.mxu0 }
 0x228   :  { %v2072_v53 = vadd.f32 %v2071_v46, %v1792_v51 }
 0x229   :  { %v2073_v47 = vpop.f32.mrf.mxu0 }
 0x22b   :  { %v2074_v48 = vpop.f32.mrf.mxu0 }
 0x266   :  { %v2110_v52 = vpop.f32.mrf.mxu1 }
 0x267   :  { %v2111_v54 = vadd.f32 %v2110_v52, %v2070_v22 }
 0x268   :  { %v2112_v55 = vpop.f32.mrf.mxu1 }
 0x269   :  { %v2119_v56 = vmin.f32 %v2111_v54, 0.0  ;;  %v2113_v57 = vadd.f32 %v2112_v55, %v2072_v53  ;;  %vm2117_vm3 = vcmp.gt.f32.partialorder %v2111_v54, 0.0 }
 0x26a   :  { %v2114_v58 = vpop.f32.mrf.mxu1 }
 0x26b   :  { %v2121_v59 = vmul.f32 1.442695, %v2119_v56  ;;  %v2120_v60 = vmin.f32 %v2113_v57, 0.0  ;;  %vm2118_vm4 = vcmp.gt.f32.partialorder %v2113_v57, 0.0 }
 0x26c   :  { %v2115_v61 = vpop.f32.mrf.mxu1 }
 0x26d   :  { %2994 = vpow2.f32 %v2121_v59  ;;  %v2123_v0 = vmul.f32 1.442695, %v2120_v60 }
 0x26f   :  { %2996 = vpow2.f32 %v2123_v0 }
 0x27a   :  { %v2995_v1 = vpop.eup %2994 }
 0x27b   :  { %v2540_v2 = vadd.f32 -1.0, %v2995_v1 }
 0x27c   :  { %v2997_v23 = vpop.eup %2996 }
 0x27d   :  { %v2127_v4 = vmul.f32 1.6732632, %v2540_v2  ;;  %v2541_v42 = vadd.f32 -1.0, %v2997_v23 }
 0x27f   :  { %v2129_v26 = vsel %vm2117_vm3, %v2111_v54, %v2127_v4  ;;  %v2128_v5 = vmul.f32 1.6732632, %v2541_v42 }
 0x280   :  { %v2131_v6 = vmul.f32 1.050701, %v2129_v26 }
 0x281   :  { %v2130_v7 = vsel %vm2118_vm4, %v2113_v57, %v2128_v5 }
 0x282   :  { %v2132_v8 = vmul.f32 1.050701, %v2130_v7  ;;  %v2133_v19 = vpack.c.bf16 %v2131_v6, %v2131_v6 }
 0x284   :  { %v2134_v14 = vpack.c.bf16 %v2132_v8, %v2132_v8 }
 0x286   :  { %2555 = vmatprep.mubr.msk.bf16.mxu1 %vm2238_vm5, %v2134_v14 }
 0x287   :  { %2275 = vmatmul.mubr.bf16.vlgmr.msra.gmra.mxu1 %v2133_v19 }
 0x347   :  { %v2276_v10 = vpop.f32.mrf.mxu1 }
 0x348   :  { %v2277_v18 = vadd.f32 %v2542_v9, %v2276_v10 }
 0x349   :  { %v2278_v24 = vpop.f32.mrf.mxu1 }
 0x34a   :  { %2282 = vst [vmem:[#allocation2] sm:$0x3] %v2277_v18 }
 0x34b   :  { %v2279_v11 = vpop.f32.mrf.mxu1 }
 0x34c   :  { %3009 = shalt.err (!%p3006_p4)
}
 0x34d   :  { %2292 = dma.vmem_to_hbm [thread:$0]  %s2290_s2, 32, %s3908_s7, [#allocation3]   ;;  %v2280_v12 = vpop.f32.mrf.mxu1 }
 0x34e   :  { %3018 = dma.done.wait [#allocation3], 32  }
 0x34f   :  { %3019 = vsyncadd [#allocation3], 4294967264 }
 0x350   :  { %2296 = vsyncpa [#allocation3], 1 }

// kernel: mnist_convnet_forward.7
= control target key start
LH: loop header
LB: loop body
LE: loop exit
PB: predicated region body
PF: predicated region fallthrough
CT: control target
= control target key end

     0   :  { %vm104_vm0 = vcmask 523264   ;;  %s9251_s1 = inlined_call_operand.vmem [shape: bf16[25,64,64], index: 1, kind: input, shape index: {}]   ;;  %s9252_s0 = inlined_call_operand.vmem [shape: f32[2,12,12,64], index: 0, kind: input, shape index: {}]   ;;  %s9253_s2 = inlined_call_operand.vmem [shape: f32[1,64], index: 2, kind: input, shape index: {}]   ;;  %s9254_s3 = inlined_call_operand.vmem [shape: f32[128,64], index: 3, kind: output, shape index: {}]  }
   0x1   :  { %v6617_v0 = vld [vmem:[%s9251_s1 + $0x38] sm:$0xff]   ;;  %v6618_v1 = vld [vmem:[%s9251_s1 + $0x30] sm:$0xff]   ;;  %v6619_v2 = vld [vmem:[%s9251_s1 + $0x28] sm:$0xff]  }
   0x2   :  { %6009 = vmatprep.subr.bf16.mxu0 %v6617_v0  ;;  %6609 = vmatprep.subr.bf16.mxu1 %v6617_v0  ;;  %v47_v3 = vld [vmem:[%s9252_s0 + $0x1] sm:$0xff]  ;;  %v6752_v4 = vld [vmem:[%s9252_s0 + $0x11] sm:$0xff] }
   0x3   :  { %6010 = vmatpush3.bf16.msra.mxu0 %v6617_v0  ;;  %6613 = vmatpush3.bf16.msra.mxu1 %v6617_v0  ;;  %v55_v5 = vld [vmem:[%s9252_s0 + $0xc1] sm:$0xff]  ;;  %v63_v6 = vpack.c.bf16 %v6752_v4, %v47_v3  ;;  %v6761_v7 = vld [vmem:[%s9252_s0 + $0xd1] sm:$0xff] }
   0x4   :  { %6011 = vmatprep.subr.bf16.mxu0 %v6618_v1  ;;  %6610 = vmatprep.subr.bf16.mxu1 %v6618_v1  ;;  %v6766_v8 = vld [vmem:[%s9252_s0 + $0x21] sm:$0xff]  ;;  %v67_v9 = vpack.c.bf16 %v6761_v7, %v55_v5  ;;  %v6784_v14 = vld [vmem:[%s9252_s0 + $0x31] sm:$0xff] }
   0x5   :  { %v6772_v10 = vld [vmem:[%s9252_s0 + $0xe1] sm:$0xff]  ;;  %6017 = vmatprep.mubr.msk.bf16.mxu0 %vm104_vm0, %v63_v6  ;;  %v6791_v15 = vld [vmem:[%s9252_s0 + $0xf1] sm:$0xff]  ;;  %v64_v28 = vpack.c.bf16 %v6784_v14, %v6766_v8 }
   0x6   :  { %v6620_v12 = vld [vmem:[%s9251_s1 + $0x20] sm:$0xff]   ;;  %6025 = vmatprep.mubr.msk.bf16.mxu1 %vm104_vm0, %v67_v9  ;;  %v6621_v16 = vld [vmem:[%s9251_s1 + $0x18] sm:$0xff]   ;;  %v68_v29 = vpack.c.bf16 %v6791_v15, %v6772_v10  ;;  %v6623_v30 = vld [vmem:[%s9251_s1 + $0x10] sm:$0xff]  }
   0x7   :  { %6012 = vmatpush3.bf16.msra.mxu0 %v6618_v1  ;;  %6614 = vmatpush3.bf16.msra.mxu1 %v6618_v1  ;;  %v6799_v17 = vld [vmem:[%s9252_s0 + $0x41] sm:$0xff]  ;;  %v6622_v18 = vld [vmem:[%s9251_s1 + $0x58] sm:$0xff]   ;;  %v6624_v31 = vld [vmem:[%s9251_s1 + $0x50] sm:$0xff]  }
   0x8   :  { %6013 = vmatprep.subr.bf16.mxu0 %v6619_v2  ;;  %6611 = vmatprep.subr.bf16.mxu1 %v6619_v2  ;;  %v6807_v19 = vld [vmem:[%s9252_s0 + $0x51] sm:$0xff]  ;;  %v6812_v20 = vld [vmem:[%s9252_s0 + $0x101] sm:$0xff] }
   0x9   :  { %v6819_v22 = vld [vmem:[%s9252_s0 + $0x111] sm:$0xff]  ;;  %v6824_v23 = vld [vmem:[%s9252_s0 + $0x61] sm:$0xff]  ;;  %v65_v32 = vpack.c.bf16 %v6807_v19, %v6799_v17 }
   0xa   :  { %v6829_v24 = vld [vmem:[%s9252_s0 + $0x121] sm:$0xff]  ;;  %v69_v33 = vpack.c.bf16 %v6819_v22, %v6812_v20  ;;  %v6856_v34 = vld [vmem:[%s9252_s0 + $0x71] sm:$0xff] }
   0xb   :  { %6014 = vmatpush3.bf16.msra.mxu0 %v6619_v2  ;;  %6615 = vmatpush3.bf16.msra.mxu1 %v6619_v2  ;;  %v6861_v35 = vld [vmem:[%s9252_s0 + $0x131] sm:$0xff]  ;;  %v6625_v36 = vld [vmem:[%s9251_s1 + $0x8] sm:$0xff]   ;;  %v15_v40 = vld [vmem:[%s9252_s0] sm:$0xff]  ;;  %v66_v43 = vpack.c.bf16 %v6856_v34, %v6824_v23 }
   0xc   :  { %6015 = vmatprep.subr.bf16.mxu0 %v6620_v12  ;;  %6612 = vmatprep.subr.bf16.mxu1 %v6620_v12  ;;  %v6626_v37 = vld [vmem:[%s9251_s1 + $0x48] sm:$0xff]   ;;  %v6872_v38 = vld [vmem:[%s9252_s0 + $0x12] sm:$0xff]  ;;  %v70_v44 = vpack.c.bf16 %v6861_v35, %v6829_v24  ;;  %v6627_v48 = vld [vmem:[%s9251_s1] sm:$0xff]  }
   0xd   :  { %v6877_v39 = vld [vmem:[%s9252_s0 + $0x22] sm:$0xff]  ;;  %v6889_v42 = vld [vmem:[%s9252_s0 + $0x10] sm:$0xff]  ;;  %v6629_v58 = vld [vmem:[%s9251_s1 + $0x78] sm:$0xff]  }
   0xe   :  { %v371_v45 = vld [vmem:[%s9252_s0 + $0x2] sm:$0xff]  ;;  %v6901_v46 = vld [vmem:[%s9252_s0 + $0x32] sm:$0xff]  ;;  %v31_v53 = vpack.c.bf16 %v6889_v42, %v15_v40 }
   0xf   :  { %6016 = vmatpush3.bf16.msra.mxu0 %v6620_v12  ;;  %6616 = vmatpush3.bf16.msra.mxu1 %v6620_v12  ;;  %v6906_v47 = vld [vmem:[%s9252_s0 + $0x42] sm:$0xff]  ;;  %v6919_v51 = vld [vmem:[%s9252_s0 + $0x52] sm:$0xff]  ;;  %v387_v54 = vpack.c.bf16 %v6872_v38, %v371_v45  ;;  %v6978_v2 = vpack.c.bf16 %v6901_v46, %v6877_v39 }
  0x10   :  { %6033 = vmatprep.subr.bf16.mxu1 %v6621_v16  ;;  %6057 = vmatprep.subr.bf16.mxu0 %v6622_v18  ;;  %v6628_v49 = vld [vmem:[%s9251_s1 + $0x40] sm:$0xff]   ;;  %v6940_v57 = vld [vmem:[%s9252_s0 + $0x30] sm:$0xff]  ;;  %v6630_v59 = vld [vmem:[%s9251_s1 + $0x98] sm:$0xff]   ;;  %v6986_v5 = vpack.c.bf16 %v6919_v51, %v6906_v47 }
  0x11   :  { %v6924_v52 = vld [vmem:[%s9252_s0 + $0x62] sm:$0xff]  ;;  %v6956_v61 = vld [vmem:[%s9252_s0 + $0xd2] sm:$0xff]  ;;  %9300 = vst [vmem:[#allocation4_spill] sm:$0xff] %v6978_v2 }
  0x12   :  { %6018 = vmatmul.mubr.msk.bf16.vlgmr.msra.gmra.mxu0 %vm104_vm0, %v64_v28  ;;  %6026 = vmatmul.mubr.msk.bf16.vlgmr.msra.gmra.mxu1 %vm104_vm0, %v68_v29  ;;  %v6935_v56 = vld [vmem:[%s9252_s0 + $0x20] sm:$0xff]  ;;  %9298 = vst [vmem:[#allocation2_spill] sm:$0xff] %v6956_v61  ;;  %v6968_v63 = vld [vmem:[%s9252_s0 + $0x50] sm:$0xff]  ;;  %9302 = vst [vmem:[#allocation6_spill] sm:$0xff] %v6986_v5 }
  0x13   :  { %6034 = vmatpush3.bf16.msra.mxu1 %v6621_v16  ;;  %6058 = vmatpush3.bf16.msra.mxu0 %v6622_v18  ;;  %v6951_v60 = vld [vmem:[%s9252_s0 + $0x40] sm:$0xff]  ;;  %v6974_v1 = vpack.c.bf16 %v6940_v57, %v6935_v56  ;;  %v6631_v6 = vld [vmem:[%s9251_s1 + $0x70] sm:$0xff]  }
  0x14   :  { %6035 = vmatprep.subr.bf16.mxu1 %v6623_v30  ;;  %6059 = vmatprep.subr.bf16.mxu0 %v6624_v31  ;;  %v6961_v62 = vld [vmem:[%s9252_s0 + $0xe2] sm:$0xff]  ;;  %v6982_v3 = vpack.c.bf16 %v6968_v63, %v6951_v60  ;;  %v6994_v9 = vld [vmem:[%s9252_s0 + $0xf2] sm:$0xff] }
  0x15   :  { %6021 = vmatprep.mubr.msk.bf16.mxu0 %vm104_vm0, %v65_v32  ;;  %6029 = vmatprep.mubr.msk.bf16.mxu1 %vm104_vm0, %v69_v33  ;;  %9299 = vst [vmem:[#allocation3_spill] sm:$0xff] %v6974_v1  ;;  %9303 = vst [vmem:[#allocation7_spill] sm:$0xff] %v6994_v9  ;;  %v6999_v12 = vld [vmem:[%s9252_s0 + $0x102] sm:$0xff]  ;;  %v7009_v18 = vld [vmem:[%s9252_s0 + $0x70] sm:$0xff] }
  0x16   :  { %9301 = vst [vmem:[#allocation5_spill] sm:$0xff] %v6982_v3  ;;  %9304 = vst [vmem:[#allocation8_spill] sm:$0xff] %v6999_v12  ;;  %v7004_v16 = vld [vmem:[%s9252_s0 + $0x60] sm:$0xff]  ;;  %v7014_v28 = vld [vmem:[%s9252_s0 + $0x72] sm:$0xff] }
  0x17   :  { %6036 = vmatpush3.bf16.msra.mxu1 %v6623_v30  ;;  %6060 = vmatpush3.bf16.msra.mxu0 %v6624_v31  ;;  %v6632_v29 = vld [vmem:[%s9251_s1 + $0x90] sm:$0xff]   ;;  %v7027_v31 = vld [vmem:[%s9252_s0 + $0x122] sm:$0xff]  ;;  %v7060_v45 = vpack.c.bf16 %v7009_v18, %v7004_v16 }
  0x18   :  { %6037 = vmatprep.subr.bf16.mxu1 %v6625_v36  ;;  %6061 = vmatprep.subr.bf16.mxu0 %v6626_v37  ;;  %v7022_v30 = vld [vmem:[%s9252_s0 + $0x112] sm:$0xff]  ;;  %9306 = vst [vmem:[#allocation10_spill] sm:$0xff] %v7027_v31  ;;  %v23_v33 = vld [vmem:[%s9252_s0 + $0xc0] sm:$0xff] }
  0x19   :  { %9305 = vst [vmem:[#allocation9_spill] sm:$0xff] %v7022_v30  ;;  %v379_v40 = vld [vmem:[%s9252_s0 + $0xc2] sm:$0xff]  ;;  %9307 = vst [vmem:[#allocation11_spill] sm:$0xff] %v7060_v45  ;;  %v7134_v27 = vld [vmem:[%s9252_s0 + $0x110] sm:$0xff]  ;;  %v7156_v55 = vpack.c.bf16 %v7022_v30, %v6999_v12 }
  0x1a   :  { %6022 = vmatmul.mubr.msk.bf16.gmra.mxu0 %vm104_vm0, %v66_v43  ;;  %6030 = vmatmul.mubr.msk.bf16.gmra.mxu1 %vm104_vm0, %v70_v44  ;;  %v6633_v43 = vld [vmem:[%s9251_s1 + $0x68] sm:$0xff]   ;;  %v7086_v32 = vld [vmem:[%s9252_s0 + $0xe0] sm:$0xff]  ;;  %v7161_v25 = vld [vmem:[%s9252_s0 + $0xd4] sm:$0xff] }
  0x1b   :  { %6038 = vmatpush3.bf16.msra.mxu1 %v6625_v36  ;;  %6062 = vmatpush3.bf16.msra.mxu0 %v6626_v37  ;;  %v7043_v37 = vld [vmem:[%s9252_s0 + $0xd0] sm:$0xff]  ;;  %v6634_v44 = vld [vmem:[%s9251_s1 + $0x88] sm:$0xff]   ;;  %v6635_v36 = vld [vmem:[%s9251_s1 + $0x60] sm:$0xff]   ;;  %9317 = vst [vmem:[#allocation21_spill] sm:$0xff] %v7156_v55 }
  0x1c   :  { %6039 = vmatprep.subr.bf16.mxu1 %v6627_v48  ;;  %6063 = vmatprep.subr.bf16.mxu0 %v6628_v49  ;;  %v7118_v0 = vld [vmem:[%s9252_s0 + $0x64] sm:$0xff]  ;;  %v7178_v11 = vld [vmem:[%s9252_s0 + $0x130] sm:$0xff] }
  0x1d   :  { %6041 = vmatprep.mubr.msk.bf16.mxu1 %vm104_vm0, %v31_v53  ;;  %6065 = vmatprep.mubr.msk.bf16.mxu0 %vm104_vm0, %v387_v54  ;;  %v7074_v53 = vld [vmem:[%s9252_s0 + $0x24] sm:$0xff]  ;;  %v35_v54 = vpack.c.bf16 %v7043_v37, %v23_v33 }
  0x1e   :  { %9310 = vst [vmem:[#allocation14_spill] sm:$0xff] %v7074_v53  ;;  %v7099_v33 = vld [vmem:[%s9252_s0 + $0x44] sm:$0xff] }
  0x1f   :  { %6040 = vmatpush3.bf16.msra.mxu1 %v6627_v48  ;;  %6064 = vmatpush3.bf16.msra.mxu0 %v6628_v49  ;;  %v7064_v48 = vpack.c.bf16 %v7014_v28, %v6924_v52  ;;  %v7069_v49 = vld [vmem:[%s9252_s0 + $0x14] sm:$0xff]  ;;  %9312 = vst [vmem:[#allocation16_spill] sm:$0xff] %v7099_v33  ;;  %v7127_v50 = vld [vmem:[%s9252_s0 + $0x100] sm:$0xff] }
  0x20   :  { %6081 = vmatprep.subr.bf16.mxu1 %v6629_v58  ;;  %6105 = vmatprep.subr.bf16.mxu0 %v6630_v59  ;;  %9309 = vst [vmem:[#allocation13_spill] sm:$0xff] %v7069_v49  ;;  %v7166_v13 = vld [vmem:[%s9252_s0 + $0xe4] sm:$0xff] }
  0x21   :  { %9308 = vst [vmem:[#allocation12_spill] sm:$0xff] %v7064_v48  ;;  %v7173_v21 = vld [vmem:[%s9252_s0 + $0x120] sm:$0xff] }
  0x22   :  { %6042 = vmatmul.mubr.msk.bf16.vlgmr.msra.gmra.mxu1 %vm104_vm0, %v6974_v1  ;;  %6066 = vmatmul.mubr.msk.bf16.vlgmr.msra.gmra.mxu0 %vm104_vm0, %v6978_v2  ;;  %v7197_v26 = vld [vmem:[%s9252_s0 + $0x104] sm:$0xff] }
  0x23   :  { %6082 = vmatpush3.bf16.msra.mxu1 %v6629_v58  ;;  %6106 = vmatpush3.bf16.msra.mxu0 %v6630_v59  ;;  %v391_v58 = vpack.c.bf16 %v6956_v61, %v379_v40  ;;  %v7108_v40 = vld [vmem:[%s9252_s0 + $0xf0] sm:$0xff]  ;;  %v7275_v30 = vld [vmem:[%s9252_s0 + $0x63] sm:$0xff] }
  0x24   :  { %6045 = vmatprep.mubr.msk.bf16.mxu1 %vm104_vm0, %v6982_v3  ;;  %6069 = vmatprep.mubr.msk.bf16.mxu0 %vm104_vm0, %v6986_v5  ;;  %v7113_v59 = vld [vmem:[%s9252_s0 + $0x54] sm:$0xff]  ;;  %v7144_v41 = vpack.c.bf16 %v7108_v40, %v7086_v32  ;;  %v759_v5 = vld [vmem:[%s9252_s0 + $0x4] sm:$0xff] }
  0x25   :  { %6083 = vmatprep.subr.bf16.mxu1 %v6631_v6  ;;  %6107 = vmatprep.subr.bf16.mxu0 %v6632_v29  ;;  %9313 = vst [vmem:[#allocation17_spill] sm:$0xff] %v7113_v59  ;;  %v775_v1 = vpack.c.bf16 %v7069_v49, %v759_v5  ;;  %v7254_v5 = vld [vmem:[%s9252_s0 + $0x43] sm:$0xff]  ;;  %v777_v49 = vpack.c.bf16 %v7113_v59, %v7099_v33  ;;  %v6640_v59 = vld [vmem:[%s9251_s1 + $0xd0] sm:$0xff]  }
  0x26   :  { %9314 = vst [vmem:[#allocation18_spill] sm:$0xff] %v7144_v41  ;;  %v573_v33 = vld [vmem:[%s9252_s0 + $0xc3] sm:$0xff] }
  0x27   :  { %6084 = vmatpush3.bf16.msra.mxu1 %v6631_v6  ;;  %6108 = vmatpush3.bf16.msra.mxu0 %v6632_v29  ;;  %v6636_v6 = vld [vmem:[%s9251_s1 + $0x80] sm:$0xff]   ;;  %v7094_v29 = vld [vmem:[%s9252_s0 + $0x34] sm:$0xff] }
  0x28   :  { %6085 = vmatprep.subr.bf16.mxu1 %v6633_v43  ;;  %6109 = vmatprep.subr.bf16.mxu0 %v6634_v44  ;;  %9311 = vst [vmem:[#allocation15_spill] sm:$0xff] %v7094_v29  ;;  %v6644_v61 = vld [vmem:[%s9251_s1 + $0xc0] sm:$0xff]  }
  0x2a   :  { %6046 = vmatmul.mubr.msk.bf16.gmra.mxu1 %vm104_vm0, %v7060_v45  ;;  %6070 = vmatmul.mubr.msk.bf16.gmra.mxu0 %vm104_vm0, %v7064_v48  ;;  %v7209_v48 = vld [vmem:[%s9252_s0 + $0x13] sm:$0xff]  ;;  %v7230_v45 = vpack.c.bf16 %v7178_v11, %v7173_v21 }
  0x2b   :  { %6049 = vmatprep.mubr.msk.bf16.mxu1 %vm104_vm0, %v35_v54  ;;  %6073 = vmatprep.mubr.msk.bf16.mxu0 %vm104_vm0, %v391_v58  ;;  %v6637_v54 = vld [vmem:[%s9251_s1 + $0xb8] sm:$0xff]  }
  0x2c   :  { %6086 = vmatpush3.bf16.msra.mxu1 %v6633_v43  ;;  %6110 = vmatpush3.bf16.msra.mxu0 %v6634_v44  ;;  %v6638_v58 = vld [vmem:[%s9251_s1 + $0xd8] sm:$0xff]   ;;  %v7148_v43 = vpack.c.bf16 %v6994_v9, %v6961_v62  ;;  %v7152_v44 = vpack.c.bf16 %v7134_v27, %v7127_v50  ;;  %9321 = vst [vmem:[#allocation25_spill] sm:$0xff] %v7230_v45  ;;  %v767_v9 = vld [vmem:[%s9252_s0 + $0xc4] sm:$0xff] }
  0x2d   :  { %6087 = vmatprep.subr.bf16.mxu1 %v6635_v36  ;;  %6111 = vmatprep.subr.bf16.mxu0 %v6636_v6 }
  0x2e   :  { %9315 = vst [vmem:[#allocation19_spill] sm:$0xff] %v7148_v43  ;;  %9316 = vst [vmem:[#allocation20_spill] sm:$0xff] %v7152_v44 }
  0x30   :  { %6088 = vmatpush3.bf16.msra.mxu1 %v6635_v36  ;;  %6112 = vmatpush3.bf16.msra.mxu0 %v6636_v6  ;;  %v7187_v36 = vld [vmem:[%s9252_s0 + $0x132] sm:$0xff] }
  0x31   :  { %6129 = vmatprep.subr.bf16.mxu1 %v6637_v54  ;;  %6153 = vmatprep.subr.bf16.mxu0 %v6638_v58  ;;  %9318 = vst [vmem:[#allocation22_spill] sm:$0xff] %v7187_v36  ;;  %v7192_v6 = vld [vmem:[%s9252_s0 + $0xf4] sm:$0xff]  ;;  %v394_v2 = vpack.c.bf16 %v7187_v36, %v7027_v31 }
  0x32   :  { %6050 = vmatmul.mubr.msk.bf16.gmra.mxu1 %vm104_vm0, %v7144_v41  ;;  %6074 = vmatmul.mubr.msk.bf16.gmra.mxu0 %vm104_vm0, %v7148_v43  ;;  %9319 = vst [vmem:[#allocation23_spill] sm:$0xff] %v7192_v6  ;;  %v565_v43 = vld [vmem:[%s9252_s0 + $0x3] sm:$0xff]  ;;  %v6639_v36 = vld [vmem:[%s9251_s1 + $0xb0] sm:$0xff]  }
  0x33   :  { %6053 = vmatprep.mubr.msk.bf16.mxu1 %vm104_vm0, %v7152_v44  ;;  %6077 = vmatprep.mubr.msk.bf16.mxu0 %vm104_vm0, %v7156_v55  ;;  %v7219_v55 = vld [vmem:[%s9252_s0 + $0x114] sm:$0xff]  ;;  %v7224_v44 = vld [vmem:[%s9252_s0 + $0x124] sm:$0xff]  ;;  %v581_v3 = vpack.c.bf16 %v7209_v48, %v565_v43 }
  0x34   :  { %9320 = vst [vmem:[#allocation24_spill] sm:$0xff] %v7219_v55  ;;  %v7242_v41 = vld [vmem:[%s9252_s0 + $0x23] sm:$0xff]  ;;  %v7249_v43 = vld [vmem:[%s9252_s0 + $0x33] sm:$0xff] }
  0x35   :  { %v7280_v31 = vld [vmem:[%s9252_s0 + $0x73] sm:$0xff] }
  0x36   :  { %v584_v12 = vpack.c.bf16 %v7280_v31, %v7275_v30 }
  0x3a   :  { %6054 = vmatmul.mubr.msk.bf16.gmra.mxu1 %vm104_vm0, %v7230_v45  ;;  %6078 = vmatmul.mubr.msk.bf16.gmra.mxu0 %vm104_vm0, %v394_v2  ;;  %v7259_v2 = vld [vmem:[%s9252_s0 + $0x53] sm:$0xff] }
  0x3b   :  { %6089 = vmatprep.mubr.msk.bf16.mxu1 %vm104_vm0, %v581_v3  ;;  %6113 = vmatprep.mubr.msk.bf16.mxu0 %vm104_vm0, %v775_v1  ;;  %v582_v3 = vpack.c.bf16 %v7249_v43, %v7242_v41  ;;  %v776_v1 = vpack.c.bf16 %v7094_v29, %v7074_v53  ;;  %v583_v45 = vpack.c.bf16 %v7259_v2, %v7254_v5  ;;  %v7285_v29 = vld [vmem:[%s9252_s0 + $0x74] sm:$0xff] }
  0x3c   :  { %v7298_v53 = vld [vmem:[%s9252_s0 + $0xd3] sm:$0xff] }
  0x42   :  { %6090 = vmatmul.mubr.msk.bf16.vlgmr.msra.gmra.mxu1 %vm104_vm0, %v582_v3  ;;  %6114 = vmatmul.mubr.msk.bf16.vlgmr.msra.gmra.mxu0 %vm104_vm0, %v776_v1  ;;  %v6641_v3 = vld [vmem:[%s9251_s1 + $0xa8] sm:$0xff]  }
  0x43   :  { %6130 = vmatpush3.bf16.msra.mxu1 %v6637_v54  ;;  %6154 = vmatpush3.bf16.msra.mxu0 %v6638_v58  ;;  %v6642_v1 = vld [vmem:[%s9251_s1 + $0xc8] sm:$0xff]   ;;  %v778_v54 = vpack.c.bf16 %v7285_v29, %v7118_v0  ;;  %v585_v58 = vpack.c.bf16 %v7298_v53, %v573_v33  ;;  %v7345_v33 = vld [vmem:[%s9252_s0 + $0x113] sm:$0xff] }
  0x44   :  { %6093 = vmatprep.mubr.msk.bf16.mxu1 %vm104_vm0, %v583_v45  ;;  %6117 = vmatprep.mubr.msk.bf16.mxu0 %vm104_vm0, %v777_v49  ;;  %v779_v45 = vpack.c.bf16 %v7161_v25, %v767_v9  ;;  %v6643_v49 = vld [vmem:[%s9251_s1 + $0xa0] sm:$0xff]   ;;  %v7335_v9 = vld [vmem:[%s9252_s0 + $0xf3] sm:$0xff] }
  0x45   :  { %6131 = vmatprep.subr.bf16.mxu1 %v6639_v36  ;;  %6155 = vmatprep.subr.bf16.mxu0 %v6640_v59 }
  0x47   :  { %6132 = vmatpush3.bf16.msra.mxu1 %v6639_v36  ;;  %6156 = vmatpush3.bf16.msra.mxu0 %v6640_v59  ;;  %v7328_v59 = vld [vmem:[%s9252_s0 + $0xe3] sm:$0xff]  ;;  %v6645_v36 = vld [vmem:[%s9251_s1 + $0xf8] sm:$0xff]  }
  0x48   :  { %6133 = vmatprep.subr.bf16.mxu1 %v6641_v3  ;;  %6157 = vmatprep.subr.bf16.mxu0 %v6642_v1 }
  0x4a   :  { %6094 = vmatmul.mubr.msk.bf16.gmra.mxu1 %vm104_vm0, %v584_v12  ;;  %6118 = vmatmul.mubr.msk.bf16.gmra.mxu0 %vm104_vm0, %v778_v54  ;;  %v7340_v12 = vld [vmem:[%s9252_s0 + $0x103] sm:$0xff]  ;;  %v6646_v54 = vld [vmem:[%s9251_s1 + $0x118] sm:$0xff]  }
  0x4b   :  { %6097 = vmatprep.mubr.msk.bf16.mxu1 %vm104_vm0, %v585_v58  ;;  %6121 = vmatprep.mubr.msk.bf16.mxu0 %vm104_vm0, %v779_v45  ;;  %v586_v58 = vpack.c.bf16 %v7335_v9, %v7328_v59  ;;  %v780_v45 = vpack.c.bf16 %v7192_v6, %v7166_v13  ;;  %v7368_v6 = vld [vmem:[%s9252_s0 + $0x123] sm:$0xff] }
  0x4c   :  { %6134 = vmatpush3.bf16.msra.mxu1 %v6641_v3  ;;  %6158 = vmatpush3.bf16.msra.mxu0 %v6642_v1  ;;  %v587_v3 = vpack.c.bf16 %v7345_v33, %v7340_v12  ;;  %v781_v1 = vpack.c.bf16 %v7219_v55, %v7197_v26  ;;  %v971_v55 = vpack.c.bf16 %v6951_v60, %v6940_v57  ;;  %v7416_v57 = vld [vmem:[%s9252_s0 + $0x81] sm:$0xff] }
  0x4d   :  { %6135 = vmatprep.subr.bf16.mxu1 %v6643_v49  ;;  %6159 = vmatprep.subr.bf16.mxu0 %v6644_v61  ;;  %v6649_v60 = vld [vmem:[%s9251_s1 + $0xe8] sm:$0xff]  }
  0x50   :  { %6136 = vmatpush3.bf16.msra.mxu1 %v6643_v49  ;;  %6160 = vmatpush3.bf16.msra.mxu0 %v6644_v61  ;;  %v7373_v49 = vld [vmem:[%s9252_s0 + $0x133] sm:$0xff] }
  0x51   :  { %6177 = vmatprep.subr.bf16.mxu1 %v6645_v36  ;;  %6201 = vmatprep.subr.bf16.mxu0 %v6646_v54  ;;  %v7378_v61 = vld [vmem:[%s9252_s0 + $0x134] sm:$0xff] }
  0x52   :  { %6098 = vmatmul.mubr.msk.bf16.gmra.mxu1 %vm104_vm0, %v586_v58  ;;  %6122 = vmatmul.mubr.msk.bf16.gmra.mxu0 %vm104_vm0, %v780_v45  ;;  %9322 = vst [vmem:[#allocation26_spill] sm:$0xff] %v7378_v61  ;;  %v588_v58 = vpack.c.bf16 %v7373_v49, %v7368_v6  ;;  %v782_v45 = vpack.c.bf16 %v7378_v61, %v7224_v44 }
  0x53   :  { %6101 = vmatprep.mubr.msk.bf16.mxu1 %vm104_vm0, %v587_v3  ;;  %6125 = vmatprep.mubr.msk.bf16.mxu0 %vm104_vm0, %v781_v1  ;;  %v970_v3 = vpack.c.bf16 %v6935_v56, %v6889_v42  ;;  %v9323_v1 = vpack.c.bf16 %v6766_v8, %v6752_v4  ;;  %v972_v61 = vpack.c.bf16 %v7004_v16, %v6968_v63  ;;  %v6647_v42 = vld [vmem:[%s9251_s1 + $0xf0] sm:$0xff]   ;;  %v7411_v8 = vld [vmem:[%s9252_s0 + $0x80] sm:$0xff] }
  0x54   :  { %v6648_v56 = vld [vmem:[%s9251_s1 + $0x110] sm:$0xff]   ;;  %v9324_v4 = vpack.c.bf16 %v6799_v17, %v6784_v14  ;;  %v6650_v14 = vld [vmem:[%s9251_s1 + $0x108] sm:$0xff]   ;;  %v9325_v17 = vpack.c.bf16 %v6824_v23, %v6807_v19  ;;  %v1167_v63 = vpack.c.bf16 %v7416_v57, %v6856_v34  ;;  %v974_v16 = vpack.c.bf16 %v7086_v32, %v7043_v37  ;;  %v6652_v19 = vld [vmem:[%s9251_s1 + $0x100] sm:$0xff]  }
  0x55   :  { %v9326_v23 = vpack.c.bf16 %v6772_v10, %v6761_v7  ;;  %v6653_v34 = vld [vmem:[%s9251_s1 + $0x138] sm:$0xff]   ;;  %v975_v32 = vpack.c.bf16 %v7127_v50, %v7108_v40  ;;  %v976_v7 = vpack.c.bf16 %v7173_v21, %v7134_v27  ;;  %v7461_v10 = vld [vmem:[%s9252_s0 + $0x140] sm:$0xff]  ;;  %v9327_v50 = vpack.c.bf16 %v6812_v20, %v6791_v15  ;;  %v6655_v20 = vld [vmem:[%s9251_s1 + $0x130] sm:$0xff]  }
  0x56   :  { %v7466_v37 = vld [vmem:[%s9252_s0 + $0x141] sm:$0xff]  ;;  %v9328_v21 = vpack.c.bf16 %v6829_v24, %v6819_v22  ;;  %v977_v27 = vpack.c.bf16 %v7461_v10, %v7178_v11  ;;  %v9329_v15 = vpack.c.bf16 %v6877_v39, %v6872_v38  ;;  %v1553_v11 = vpack.c.bf16 %v7254_v5, %v7249_v43  ;;  %v6656_v22 = vld [vmem:[%s9251_s1 + $0x150] sm:$0xff]   ;;  %v6662_v5 = vld [vmem:[%s9251_s1 + $0x198] sm:$0xff]  }
  0x57   :  { %v1171_v40 = vpack.c.bf16 %v7466_v37, %v6861_v35  ;;  %v1554_v24 = vpack.c.bf16 %v7275_v30, %v7259_v2  ;;  %v7504_v35 = vld [vmem:[%s9252_s0 + $0x82] sm:$0xff]  ;;  %v9330_v39 = vpack.c.bf16 %v6906_v47, %v6901_v46  ;;  %v1556_v43 = vpack.c.bf16 %v7328_v59, %v7298_v53  ;;  %v6661_v53 = vld [vmem:[%s9251_s1 + $0x178] sm:$0xff]   ;;  %v9334_v59 = vld [vmem:[#allocation8_spill] sm:$0xff] }
  0x58   :  { %v7509_v38 = vld [vmem:[%s9252_s0 + $0x83] sm:$0xff]  ;;  %v1361_v46 = vpack.c.bf16 %v7504_v35, %v7014_v28  ;;  %v1557_v2 = vpack.c.bf16 %v7340_v12, %v7335_v9 }
  0x59   :  { %v6658_v30 = vld [vmem:[%s9251_s1 + $0x148] sm:$0xff]   ;;  %v1555_v47 = vpack.c.bf16 %v7509_v38, %v7280_v31  ;;  %v9332_v28 = vld [vmem:[#allocation2_spill] sm:$0xff] }
  0x5a   :  { %6102 = vmatmul.mubr.msk.bf16.gmra.mxu1 %vm104_vm0, %v588_v58  ;;  %6126 = vmatmul.mubr.msk.bf16.gmra.mxu0 %vm104_vm0, %v782_v45  ;;  %v9333_v31 = vpack.c.bf16 %v6961_v62, %v9332_v28  ;;  %v1558_v62 = vpack.c.bf16 %v7368_v6, %v7345_v33  ;;  %v9337_v45 = vld [vmem:[#allocation10_spill] sm:$0xff]  ;;  %v7704_v28 = vld [vmem:[%s9252_s0 + $0x71] sm:$0xff] }
  0x5b   :  { %6137 = vmatprep.mubr.msk.bf16.mxu1 %vm104_vm0, %v970_v3  ;;  %6161 = vmatprep.mubr.msk.bf16.mxu0 %vm104_vm0, %v9323_v1  ;;  %v9338_v3 = vld [vmem:[#allocation9_spill] sm:$0xff]  ;;  %v7569_v6 = vld [vmem:[%s9252_s0 + $0x142] sm:$0xff] }
  0x5c   :  { %v9339_v1 = vpack.c.bf16 %v9337_v45, %v9338_v3  ;;  %v7574_v9 = vld [vmem:[%s9252_s0 + $0x143] sm:$0xff]  ;;  %v9363_v45 = vld [vmem:[#allocation12_spill] sm:$0xff] }
  0x5d   :  { %v9340_v12 = vld [vmem:[#allocation22_spill] sm:$0xff]  ;;  %v7738_v3 = vld [vmem:[%s9252_s0 + $0xf1] sm:$0xff] }
  0x5e   :  { %v1365_v33 = vpack.c.bf16 %v7569_v6, %v9340_v12  ;;  %v6674_v12 = vld [vmem:[%s9251_s1 + $0x1c8] sm:$0xff]  }
  0x62   :  { %6138 = vmatmul.mubr.msk.bf16.vlgmr.msra.gmra.mxu1 %vm104_vm0, %v971_v55  ;;  %6162 = vmatmul.mubr.msk.bf16.vlgmr.msra.gmra.mxu0 %vm104_vm0, %v9324_v4  ;;  %v973_v55 = vpack.c.bf16 %v7411_v8, %v7009_v18  ;;  %v6654_v18 = vld [vmem:[%s9251_s1 + $0x158] sm:$0xff]  }
  0x63   :  { %6178 = vmatpush3.bf16.msra.mxu1 %v6645_v36  ;;  %6202 = vmatpush3.bf16.msra.mxu0 %v6646_v54  ;;  %v6651_v36 = vld [vmem:[%s9251_s1 + $0xe0] sm:$0xff]   ;;  %v1552_v54 = vpack.c.bf16 %v7242_v41, %v7209_v48  ;;  %v6657_v41 = vld [vmem:[%s9251_s1 + $0x128] sm:$0xff]   ;;  %v9331_v48 = vpack.c.bf16 %v6924_v52, %v6919_v51  ;;  %v9342_v4 = vld [vmem:[#allocation13_spill] sm:$0xff] }
  0x64   :  { %6141 = vmatprep.mubr.msk.bf16.mxu1 %vm104_vm0, %v972_v61  ;;  %6165 = vmatprep.mubr.msk.bf16.mxu0 %vm104_vm0, %v9325_v17  ;;  %v6659_v51 = vld [vmem:[%s9251_s1 + $0x120] sm:$0xff]   ;;  %v9335_v61 = vld [vmem:[#allocation7_spill] sm:$0xff]  ;;  %v6663_v17 = vld [vmem:[%s9251_s1 + $0x170] sm:$0xff]  }
  0x65   :  { %6179 = vmatprep.subr.bf16.mxu1 %v6647_v42  ;;  %6203 = vmatprep.subr.bf16.mxu0 %v6648_v56  ;;  %v6660_v52 = vld [vmem:[%s9251_s1 + $0x140] sm:$0xff]   ;;  %v9336_v58 = vpack.c.bf16 %v9334_v59, %v9335_v61  ;;  %v7722_v59 = vld [vmem:[%s9252_s0 + $0x91] sm:$0xff] }
  0x66   :  { %v7727_v61 = vld [vmem:[%s9252_s0 + $0x92] sm:$0xff] }
  0x67   :  { %6180 = vmatpush3.bf16.msra.mxu1 %v6647_v42  ;;  %6204 = vmatpush3.bf16.msra.mxu0 %v6648_v56  ;;  %v1559_v42 = vpack.c.bf16 %v7574_v9, %v7373_v49  ;;  %v9341_v56 = vld [vmem:[#allocation14_spill] sm:$0xff]  ;;  %v6664_v49 = vld [vmem:[%s9251_s1 + $0x190] sm:$0xff]  }
  0x68   :  { %6181 = vmatprep.subr.bf16.mxu1 %v6649_v60  ;;  %6205 = vmatprep.subr.bf16.mxu0 %v6650_v14 }
  0x6a   :  { %6142 = vmatmul.mubr.msk.bf16.gmra.mxu1 %vm104_vm0, %v973_v55  ;;  %6166 = vmatmul.mubr.msk.bf16.gmra.mxu0 %vm104_vm0, %v1167_v63  ;;  %v9345_v55 = vld [vmem:[#allocation16_spill] sm:$0xff]  ;;  %v9346_v63 = vld [vmem:[#allocation15_spill] sm:$0xff] }
  0x6b   :  { %6145 = vmatprep.mubr.msk.bf16.mxu1 %vm104_vm0, %v974_v16  ;;  %6169 = vmatprep.mubr.msk.bf16.mxu0 %vm104_vm0, %v9326_v23  ;;  %v9347_v16 = vpack.c.bf16 %v9345_v55, %v9346_v63  ;;  %v7608_v23 = vld [vmem:[%s9252_s0 + $0x90] sm:$0xff]  ;;  %v7785_v55 = vld [vmem:[%s9252_s0 + $0x122] sm:$0xff] }
  0x6c   :  { %6182 = vmatpush3.bf16.msra.mxu1 %v6649_v60  ;;  %6206 = vmatpush3.bf16.msra.mxu0 %v6650_v14  ;;  %v9343_v60 = vpack.c.bf16 %v9341_v56, %v9342_v4  ;;  %v9344_v14 = vld [vmem:[#allocation3_spill] sm:$0xff]  ;;  %v6675_v4 = vld [vmem:[%s9251_s1 + $0x1a0] sm:$0xff]   ;;  %9365 = vst [vmem:[#allocation2_spill] sm:$0xff] %v7785_v55  ;;  %v7790_v63 = vld [vmem:[%s9252_s0 + $0x132] sm:$0xff] }
  0x6d   :  { %6183 = vmatprep.subr.bf16.mxu1 %v6651_v36  ;;  %6207 = vmatprep.subr.bf16.mxu0 %v6652_v19  ;;  %9366 = vst [vmem:[#allocation8_spill] sm:$0xff] %v7790_v63 }
  0x70   :  { %6184 = vmatpush3.bf16.msra.mxu1 %v6651_v36  ;;  %6208 = vmatpush3.bf16.msra.mxu0 %v6652_v19  ;;  %v9348_v36 = vld [vmem:[#allocation5_spill] sm:$0xff]  ;;  %v7603_v19 = vld [vmem:[%s9252_s0 + $0x84] sm:$0xff] }
  0x71   :  { %6225 = vmatprep.subr.bf16.mxu1 %v6653_v34  ;;  %6249 = vmatprep.subr.bf16.mxu0 %v6654_v18 }
  0x72   :  { %6146 = vmatmul.mubr.msk.bf16.gmra.mxu1 %vm104_vm0, %v975_v32  ;;  %6170 = vmatmul.mubr.msk.bf16.gmra.mxu0 %vm104_vm0, %v9327_v50  ;;  %v9351_v32 = vld [vmem:[#allocation11_spill] sm:$0xff] }
  0x73   :  { %6149 = vmatprep.mubr.msk.bf16.mxu1 %vm104_vm0, %v976_v7  ;;  %6173 = vmatprep.mubr.msk.bf16.mxu0 %vm104_vm0, %v9328_v21  ;;  %v6665_v7 = vld [vmem:[%s9251_s1 + $0x168] sm:$0xff]   ;;  %v1749_v21 = vpack.c.bf16 %v7603_v19, %v7285_v29  ;;  %v9352_v29 = vpack.c.bf16 %v7166_v13, %v7161_v25 }
  0x74   :  { %v6666_v50 = vld [vmem:[%s9251_s1 + $0x188] sm:$0xff]  }
  0x75   :  { %v9354_v13 = vld [vmem:[#allocation23_spill] sm:$0xff] }
  0x76   :  { %v9355_v25 = vpack.c.bf16 %v7197_v26, %v9354_v13  ;;  %v7666_v26 = vld [vmem:[%s9252_s0 + $0x150] sm:$0xff] }
  0x77   :  { %v7843_v13 = vld [vmem:[%s9252_s0 + $0x34] sm:$0xff] }
  0x78   :  { %9369 = vst [vmem:[#allocation10_spill] sm:$0xff] %v7843_v13 }
  0x7a   :  { %6150 = vmatmul.mubr.msk.bf16.gmra.mxu1 %vm104_vm0, %v977_v27  ;;  %6174 = vmatmul.mubr.msk.bf16.gmra.mxu0 %vm104_vm0, %v1171_v40  ;;  %v6667_v27 = vld [vmem:[%s9251_s1 + $0x160] sm:$0xff]  }
  0x7b   :  { %6185 = vmatprep.mubr.msk.bf16.mxu1 %vm104_vm0, %v9329_v15  ;;  %6209 = vmatprep.mubr.msk.bf16.mxu0 %vm104_vm0, %v1552_v54  ;;  %v6668_v40 = vld [vmem:[%s9251_s1 + $0x180] sm:$0xff]   ;;  %v6669_v54 = vld [vmem:[%s9251_s1 + $0x1b8] sm:$0xff]  }
  0x7c   :  { %v6670_v15 = vld [vmem:[%s9251_s1 + $0x1d8] sm:$0xff]  }
  0x82   :  { %6186 = vmatmul.mubr.msk.bf16.vlgmr.msra.gmra.mxu1 %vm104_vm0, %v9330_v39  ;;  %6210 = vmatmul.mubr.msk.bf16.vlgmr.msra.gmra.mxu0 %vm104_vm0, %v1553_v11  ;;  %v9356_v11 = vld [vmem:[#allocation20_spill] sm:$0xff]  ;;  %v7661_v39 = vld [vmem:[%s9252_s0 + $0x144] sm:$0xff] }
  0x83   :  { %6226 = vmatpush3.bf16.msra.mxu1 %v6653_v34  ;;  %6250 = vmatpush3.bf16.msra.mxu0 %v6654_v18  ;;  %v9349_v34 = vld [vmem:[#allocation17_spill] sm:$0xff] }
  0x84   :  { %6189 = vmatprep.mubr.msk.bf16.mxu1 %vm104_vm0, %v9331_v48  ;;  %6213 = vmatprep.mubr.msk.bf16.mxu0 %vm104_vm0, %v1554_v24  ;;  %v9350_v18 = vpack.c.bf16 %v7118_v0, %v9349_v34  ;;  %v1944_v0 = vpack.c.bf16 %v7608_v23, %v7411_v8  ;;  %v9353_v8 = vld [vmem:[#allocation18_spill] sm:$0xff]  ;;  %v9359_v24 = vld [vmem:[#allocation25_spill] sm:$0xff] }
  0x85   :  { %6227 = vmatprep.subr.bf16.mxu1 %v6655_v20  ;;  %6251 = vmatprep.subr.bf16.mxu0 %v6656_v22 }
  0x87   :  { %6228 = vmatpush3.bf16.msra.mxu1 %v6655_v20  ;;  %6252 = vmatpush3.bf16.msra.mxu0 %v6656_v22  ;;  %v9357_v20 = vld [vmem:[#allocation24_spill] sm:$0xff] }
  0x88   :  { %6229 = vmatprep.subr.bf16.mxu1 %v6657_v41  ;;  %6253 = vmatprep.subr.bf16.mxu0 %v6658_v30  ;;  %v9358_v22 = vpack.c.bf16 %v7224_v44, %v9357_v20  ;;  %v7674_v44 = vld [vmem:[%s9252_s0 + $0x31] sm:$0xff] }
  0x8a   :  { %6190 = vmatmul.mubr.msk.bf16.gmra.mxu1 %vm104_vm0, %v1361_v46  ;;  %6214 = vmatmul.mubr.msk.bf16.gmra.mxu0 %vm104_vm0, %v1555_v47  ;;  %v1948_v46 = vpack.c.bf16 %v7666_v26, %v7461_v10  ;;  %v7694_v10 = vld [vmem:[%s9252_s0 + $0x51] sm:$0xff] }
  0x8b   :  { %6193 = vmatprep.mubr.msk.bf16.mxu1 %vm104_vm0, %v9333_v31  ;;  %6217 = vmatprep.mubr.msk.bf16.mxu0 %vm104_vm0, %v1556_v43  ;;  %v9361_v43 = vld [vmem:[#allocation4_spill] sm:$0xff] }
  0x8c   :  { %6230 = vmatpush3.bf16.msra.mxu1 %v6657_v41  ;;  %6254 = vmatpush3.bf16.msra.mxu0 %v6658_v30  ;;  %v5204_v41 = vld [vmem:[%s9252_s0 + $0x21] sm:$0xff] }
  0x8d   :  { %6231 = vmatprep.subr.bf16.mxu1 %v6659_v51  ;;  %6255 = vmatprep.subr.bf16.mxu0 %v6660_v52  ;;  %v9360_v30 = vld [vmem:[#allocation26_spill] sm:$0xff]  ;;  %v2135_v47 = vpack.c.bf16 %v7674_v44, %v5204_v41 }
  0x8e   :  { %v1753_v48 = vpack.c.bf16 %v7661_v39, %v9360_v30 }
  0x90   :  { %6232 = vmatpush3.bf16.msra.mxu1 %v6659_v51  ;;  %6256 = vmatpush3.bf16.msra.mxu0 %v6660_v52  ;;  %v7689_v51 = vld [vmem:[%s9252_s0 + $0x41] sm:$0xff] }
  0x91   :  { %6273 = vmatprep.subr.bf16.mxu1 %v6661_v53  ;;  %6297 = vmatprep.subr.bf16.mxu0 %v6662_v5  ;;  %v7699_v52 = vld [vmem:[%s9252_s0 + $0x61] sm:$0xff]  ;;  %v2136_v31 = vpack.c.bf16 %v7694_v10, %v7689_v51 }
  0x92   :  { %6194 = vmatmul.mubr.msk.bf16.gmra.mxu1 %vm104_vm0, %v9336_v58  ;;  %6218 = vmatmul.mubr.msk.bf16.gmra.mxu0 %vm104_vm0, %v1557_v2  ;;  %v6672_v2 = vld [vmem:[%s9251_s1 + $0x1d0] sm:$0xff]   ;;  %v5212_v58 = vld [vmem:[%s9252_s0 + $0xe1] sm:$0xff] }
  0x93   :  { %6197 = vmatprep.mubr.msk.bf16.mxu1 %vm104_vm0, %v9339_v1  ;;  %6221 = vmatprep.mubr.msk.bf16.mxu0 %vm104_vm0, %v1558_v62  ;;  %v9362_v62 = vld [vmem:[#allocation6_spill] sm:$0xff]  ;;  %v6673_v1 = vld [vmem:[%s9251_s1 + $0x1a8] sm:$0xff]   ;;  %v2139_v56 = vpack.c.bf16 %v7738_v3, %v5212_v58 }
  0x94   :  { %v7904_v58 = vld [vmem:[%s9252_s0 + $0x64] sm:$0xff] }
  0x95   :  { %9372 = vst [vmem:[#allocation14_spill] sm:$0xff] %v7904_v58 }
  0x9a   :  { %6198 = vmatmul.mubr.msk.bf16.gmra.mxu1 %vm104_vm0, %v1365_v33  ;;  %6222 = vmatmul.mubr.msk.bf16.gmra.mxu0 %vm104_vm0, %v1559_v42  ;;  %v2138_v33 = vpack.c.bf16 %v7722_v59, %v7416_v57  ;;  %v2332_v42 = vpack.c.bf16 %v7727_v61, %v7504_v35  ;;  %v9364_v57 = vld [vmem:[#allocation19_spill] sm:$0xff] }
  0x9b   :  { %6233 = vmatprep.mubr.msk.bf16.mxu1 %vm104_vm0, %v9343_v60  ;;  %6257 = vmatprep.mubr.msk.bf16.mxu0 %vm104_vm0, %v9344_v14  ;;  %v6676_v60 = vld [vmem:[%s9251_s1 + $0x1c0] sm:$0xff]   ;;  %v7770_v14 = vld [vmem:[%s9252_s0 + $0x111] sm:$0xff] }
  0x9c   :  { %v7765_v35 = vld [vmem:[%s9252_s0 + $0x101] sm:$0xff] }
  0x9d   :  { %v2140_v34 = vpack.c.bf16 %v7770_v14, %v7765_v35 }
  0xa2   :  { %6234 = vmatmul.mubr.msk.bf16.vlgmr.msra.gmra.mxu1 %vm104_vm0, %v9347_v16  ;;  %6258 = vmatmul.mubr.msk.bf16.vlgmr.msra.gmra.mxu0 %vm104_vm0, %v9348_v36  ;;  %v7795_v16 = vld [vmem:[%s9251_s1 + $0x1f8] sm:$0xff]  }
  0xa3   :  { %6274 = vmatpush3.bf16.msra.mxu1 %v6661_v53  ;;  %6298 = vmatpush3.bf16.msra.mxu0 %v6662_v5  ;;  %v2137_v53 = vpack.c.bf16 %v7704_v28, %v7699_v52  ;;  %v6671_v5 = vld [vmem:[%s9251_s1 + $0x1b0] sm:$0xff]   ;;  %v7800_v36 = vld [vmem:[%s9251_s1 + $0x218] sm:$0xff]  }
  0xa4   :  { %6237 = vmatprep.mubr.msk.bf16.mxu1 %vm104_vm0, %v9350_v18  ;;  %6261 = vmatprep.mubr.msk.bf16.mxu0 %vm104_vm0, %v9351_v32  ;;  %v2335_v32 = vpack.c.bf16 %v7790_v63, %v7785_v55 }
  0xa5   :  { %6275 = vmatprep.subr.bf16.mxu1 %v6663_v17  ;;  %6299 = vmatprep.subr.bf16.mxu0 %v6664_v49 }
  0xa7   :  { %6276 = vmatpush3.bf16.msra.mxu1 %v6663_v17  ;;  %6300 = vmatpush3.bf16.msra.mxu0 %v6664_v49  ;;  %v7775_v17 = vld [vmem:[%s9252_s0 + $0x121] sm:$0xff]  ;;  %v7780_v49 = vld [vmem:[%s9252_s0 + $0x131] sm:$0xff] }
  0xa8   :  { %6277 = vmatprep.subr.bf16.mxu1 %v6665_v7  ;;  %6301 = vmatprep.subr.bf16.mxu0 %v6666_v50  ;;  %v2141_v18 = vpack.c.bf16 %v7780_v49, %v7775_v17 }
  0xaa   :  { %6238 = vmatmul.mubr.msk.bf16.gmra.mxu1 %vm104_vm0, %v1749_v21  ;;  %6262 = vmatmul.mubr.msk.bf16.gmra.mxu0 %vm104_vm0, %v1944_v0  ;;  %v9367_v21 = vld [vmem:[#allocation21_spill] sm:$0xff] }
  0xab   :  { %6241 = vmatprep.mubr.msk.bf16.mxu1 %vm104_vm0, %v9352_v29  ;;  %6265 = vmatprep.mubr.msk.bf16.mxu0 %vm104_vm0, %v9353_v8  ;;  %v7820_v0 = vld [vmem:[%s9252_s0 + $0x151] sm:$0xff] }
  0xac   :  { %6278 = vmatpush3.bf16.msra.mxu1 %v6665_v7  ;;  %6302 = vmatpush3.bf16.msra.mxu0 %v6666_v50  ;;  %v2142_v20 = vpack.c.bf16 %v7820_v0, %v7466_v37  ;;  %v7868_v37 = vld [vmem:[%s9252_s0 + $0x43] sm:$0xff] }
  0xad   :  { %6279 = vmatprep.subr.bf16.mxu1 %v6667_v27  ;;  %6303 = vmatprep.subr.bf16.mxu0 %v6668_v40 }
  0xb0   :  { %6280 = vmatpush3.bf16.msra.mxu1 %v6667_v27  ;;  %6304 = vmatpush3.bf16.msra.mxu0 %v6668_v40  ;;  %v7825_v27 = vld [vmem:[%s9252_s0 + $0x152] sm:$0xff]  ;;  %v5276_v40 = vld [vmem:[%s9252_s0 + $0x23] sm:$0xff] }
  0xb1   :  { %6321 = vmatprep.subr.bf16.mxu1 %v6669_v54  ;;  %6345 = vmatprep.subr.bf16.mxu0 %v6670_v15  ;;  %9368 = vst [vmem:[#allocation7_spill] sm:$0xff] %v7825_v27 }
  0xb2   :  { %6242 = vmatmul.mubr.msk.bf16.gmra.mxu1 %vm104_vm0, %v9355_v25  ;;  %6266 = vmatmul.mubr.msk.bf16.gmra.mxu0 %vm104_vm0, %v9356_v11 }
  0xb3   :  { %6245 = vmatprep.mubr.msk.bf16.mxu1 %vm104_vm0, %v9358_v22  ;;  %6269 = vmatprep.mubr.msk.bf16.mxu0 %vm104_vm0, %v9359_v24  ;;  %v2336_v22 = vpack.c.bf16 %v7825_v27, %v7569_v6  ;;  %v7875_v6 = vld [vmem:[%s9252_s0 + $0x53] sm:$0xff] }
  0xba   :  { %6246 = vmatmul.mubr.msk.bf16.gmra.mxu1 %vm104_vm0, %v1753_v48  ;;  %6270 = vmatmul.mubr.msk.bf16.gmra.mxu0 %vm104_vm0, %v1948_v46 }
  0xbb   :  { %6281 = vmatprep.mubr.msk.bf16.mxu1 %vm104_vm0, %v2135_v47  ;;  %6305 = vmatprep.mubr.msk.bf16.mxu0 %vm104_vm0, %v9361_v43  ;;  %v7880_v43 = vld [vmem:[%s9252_s0 + $0x44] sm:$0xff] }
  0xbc   :  { %9370 = vst [vmem:[#allocation9_spill] sm:$0xff] %v7880_v43 }
  0xc2   :  { %6282 = vmatmul.mubr.msk.bf16.vlgmr.msra.gmra.mxu1 %vm104_vm0, %v2136_v31  ;;  %6306 = vmatmul.mubr.msk.bf16.vlgmr.msra.gmra.mxu0 %vm104_vm0, %v9362_v62  ;;  %v7885_v31 = vld [vmem:[%s9252_s0 + $0x54] sm:$0xff] }
  0xc3   :  { %6322 = vmatpush3.bf16.msra.mxu1 %v6669_v54  ;;  %6346 = vmatpush3.bf16.msra.mxu0 %v6670_v15  ;;  %v7835_v54 = vld [vmem:[%s9252_s0 + $0x33] sm:$0xff]  ;;  %v5312_v15 = vld [vmem:[%s9252_s0 + $0x24] sm:$0xff]  ;;  %9371 = vst [vmem:[#allocation22_spill] sm:$0xff] %v7885_v31 }
  0xc4   :  { %6285 = vmatprep.mubr.msk.bf16.mxu1 %vm104_vm0, %v2137_v53  ;;  %6309 = vmatprep.mubr.msk.bf16.mxu0 %vm104_vm0, %v9363_v45  ;;  %v2523_v24 = vpack.c.bf16 %v7835_v54, %v5276_v40  ;;  %v2717_v41 = vpack.c.bf16 %v7843_v13, %v5312_v15  ;;  %v7899_v62 = vld [vmem:[%s9252_s0 + $0x73] sm:$0xff] }
  0xc5   :  { %6323 = vmatprep.subr.bf16.mxu1 %v6671_v5  ;;  %6347 = vmatprep.subr.bf16.mxu0 %v6672_v2  ;;  %v7909_v45 = vld [vmem:[%s9252_s0 + $0x74] sm:$0xff] }
  0xc6   :  { %9373 = vst [vmem:[#allocation13_spill] sm:$0xff] %v7909_v45  ;;  %v7938_v40 = vld [vmem:[%s9252_s0 + $0x93] sm:$0xff] }
  0xc7   :  { %6324 = vmatpush3.bf16.msra.mxu1 %v6671_v5  ;;  %6348 = vmatpush3.bf16.msra.mxu0 %v6672_v2  ;;  %v7894_v2 = vld [vmem:[%s9252_s0 + $0x63] sm:$0xff]  ;;  %v7943_v15 = vld [vmem:[%s9252_s0 + $0x94] sm:$0xff] }
  0xc8   :  { %6325 = vmatprep.subr.bf16.mxu1 %v6673_v1  ;;  %6349 = vmatprep.subr.bf16.mxu0 %v6674_v12  ;;  %9374 = vst [vmem:[#allocation3_spill] sm:$0xff] %v7943_v15 }
  0xca   :  { %6286 = vmatmul.mubr.msk.bf16.gmra.mxu1 %vm104_vm0, %v2138_v33  ;;  %6310 = vmatmul.mubr.msk.bf16.gmra.mxu0 %vm104_vm0, %v2332_v42  ;;  %v2524_v33 = vpack.c.bf16 %v7875_v6, %v7868_v37  ;;  %v2718_v42 = vpack.c.bf16 %v7885_v31, %v7880_v43  ;;  %v2720_v31 = vpack.c.bf16 %v7943_v15, %v7603_v19  ;;  %v6683_v19 = vld [vmem:[%s9251_s1 + $0x1e0] sm:$0xff]  }
  0xcb   :  { %6289 = vmatprep.mubr.msk.bf16.mxu1 %vm104_vm0, %v2139_v56  ;;  %6313 = vmatprep.mubr.msk.bf16.mxu0 %vm104_vm0, %v9364_v57  ;;  %v2719_v57 = vpack.c.bf16 %v7909_v45, %v7904_v58  ;;  %v2526_v58 = vpack.c.bf16 %v7938_v40, %v7509_v38 }
  0xcc   :  { %6326 = vmatpush3.bf16.msra.mxu1 %v6673_v1  ;;  %6350 = vmatpush3.bf16.msra.mxu0 %v6674_v12 }
  0xcd   :  { %6327 = vmatprep.subr.bf16.mxu1 %v6675_v4  ;;  %6351 = vmatprep.subr.bf16.mxu0 %v6676_v60 }
  0xd0   :  { %6328 = vmatpush3.bf16.msra.mxu1 %v6675_v4  ;;  %6352 = vmatpush3.bf16.msra.mxu0 %v6676_v60  ;;  %v2525_v60 = vpack.c.bf16 %v7899_v62, %v7894_v2 }
  0xd1   :  { %6369 = vmatprep.subr.bf16.mxu1 %v7795_v16  ;;  %6393 = vmatprep.subr.bf16.mxu0 %v7800_v36 }
  0xd2   :  { %v6019_v7 = vpop.f32.mrf.mxu0  ;;  %v7810_v50 = vpop.f32.mrf.mxu1  ;;  %6290 = vmatmul.mubr.msk.bf16.gmra.mxu1 %vm104_vm0, %v2140_v34  ;;  %6314 = vmatmul.mubr.msk.bf16.gmra.mxu0 %vm104_vm0, %v9367_v21  ;;  %v6679_v34 = vld [vmem:[%s9251_s1 + $0x1f0] sm:$0xff]  }
  0xd3   :  { %6293 = vmatprep.mubr.msk.bf16.mxu1 %vm104_vm0, %v2141_v18  ;;  %6317 = vmatprep.mubr.msk.bf16.mxu0 %vm104_vm0, %v2335_v32  ;;  %v6680_v18 = vld [vmem:[%s9251_s1 + $0x210] sm:$0xff]  }
  0xd4   :  { %v163_v29 = vpop.f32.mrf.mxu0  ;;  %v7830_v8 = vpop.f32.mrf.mxu1 }
  0xd6   :  { %v7845_v25 = vpop.f32.mrf.mxu0  ;;  %v7847_v11 = vpop.f32.mrf.mxu1 }
  0xd8   :  { %v7855_v30 = vpop.f32.mrf.mxu0  ;;  %v7857_v48 = vpop.f32.mrf.mxu1 }
  0xda   :  { %v7859_v46 = vpop.f32.mrf.mxu0  ;;  %v7861_v47 = vpop.f32.mrf.mxu1  ;;  %6294 = vmatmul.mubr.msk.bf16.gmra.mxu1 %vm104_vm0, %v2142_v20  ;;  %6318 = vmatmul.mubr.msk.bf16.gmra.mxu0 %vm104_vm0, %v2336_v22  ;;  %v5284_v22 = vld [vmem:[%s9252_s0 + $0xe3] sm:$0xff] }
  0xdb   :  { %6329 = vmatprep.mubr.msk.bf16.mxu1 %vm104_vm0, %v2523_v24  ;;  %6353 = vmatprep.mubr.msk.bf16.mxu0 %vm104_vm0, %v2717_v41  ;;  %v7953_v24 = vld [vmem:[%s9252_s0 + $0xf3] sm:$0xff]  ;;  %v5320_v41 = vld [vmem:[%s9252_s0 + $0xe4] sm:$0xff] }
  0xdc   :  { %v7887_v53 = vpop.f32.mrf.mxu0  ;;  %v7889_v5 = vpop.f32.mrf.mxu1  ;;  %v2527_v43 = vpack.c.bf16 %v7953_v24, %v5284_v22 }
  0xde   :  { %v7911_v1 = vpop.f32.mrf.mxu0  ;;  %v7913_v12 = vpop.f32.mrf.mxu1 }
  0xe0   :  { %v7919_v56 = vpop.f32.mrf.mxu0  ;;  %v7921_v4 = vpop.f32.mrf.mxu1 }
  0xe2   :  { %v6043_v32 = vpop.f32.mrf.mxu1  ;;  %v6067_v21 = vpop.f32.mrf.mxu0  ;;  %6330 = vmatmul.mubr.msk.bf16.vlgmr.msra.gmra.mxu1 %vm104_vm0, %v2524_v33  ;;  %6354 = vmatmul.mubr.msk.bf16.vlgmr.msra.gmra.mxu0 %vm104_vm0, %v2718_v42 }
  0xe3   :  { %v317_v20 = vadd.f32 %v6043_v32, %v6019_v7  ;;  %6370 = vmatpush3.bf16.msra.mxu1 %v7795_v16  ;;  %6394 = vmatpush3.bf16.msra.mxu0 %v7800_v36  ;;  %v7963_v16 = vld [vmem:[%s9252_s0 + $0xf4] sm:$0xff]  ;;  %v6681_v36 = vld [vmem:[%s9251_s1 + $0x1e8] sm:$0xff]  }
  0xe4   :  { %v308_v33 = vpop.f32.mrf.mxu1  ;;  %v486_v42 = vpop.f32.mrf.mxu0  ;;  %6333 = vmatprep.mubr.msk.bf16.mxu1 %vm104_vm0, %v2525_v60  ;;  %6357 = vmatprep.mubr.msk.bf16.mxu0 %vm104_vm0, %v2719_v57  ;;  %9375 = vst [vmem:[#allocation16_spill] sm:$0xff] %v7963_v16  ;;  %v6682_v7 = vld [vmem:[%s9251_s1 + $0x208] sm:$0xff]  }
  0xe5   :  { %v7971_v32 = vadd.f32 %v6067_v21, %v317_v20  ;;  %v309_v45 = vadd.f32 %v308_v33, %v163_v29  ;;  %6371 = vmatprep.subr.bf16.mxu1 %v6679_v34  ;;  %6395 = vmatprep.subr.bf16.mxu0 %v6680_v18  ;;  %v2721_v29 = vpack.c.bf16 %v7963_v16, %v5320_v41  ;;  %v8021_v41 = vld [vmem:[%s9252_s0 + $0x123] sm:$0xff] }
  0xe6   :  { %v6044_v60 = vpop.f32.mrf.mxu1  ;;  %v6068_v57 = vpop.f32.mrf.mxu0 }
  0xe7   :  { %v7978_v13 = vadd.f32 %v486_v42, %v309_v45  ;;  %v320_v27 = vadd.f32 %v6044_v60, %v7845_v25  ;;  %6372 = vmatpush3.bf16.msra.mxu1 %v6679_v34  ;;  %6396 = vmatpush3.bf16.msra.mxu0 %v6680_v18  ;;  %v6684_v25 = vld [vmem:[%s9251_s1 + $0x200] sm:$0xff]  }
  0xe8   :  { %v311_v21 = vpop.f32.mrf.mxu1  ;;  %v489_v20 = vpop.f32.mrf.mxu0  ;;  %6373 = vmatprep.subr.bf16.mxu1 %v6681_v36  ;;  %6397 = vmatprep.subr.bf16.mxu0 %v6682_v7  ;;  %v8031_v60 = vld [vmem:[%s9252_s0 + $0x124] sm:$0xff] }
  0xe9   :  { %v7982_v33 = vadd.f32 %v6068_v57, %v320_v27  ;;  %v312_v38 = vadd.f32 %v311_v21, %v7855_v30  ;;  %v7996_v27 = vld [vmem:[%s9252_s0 + $0x103] sm:$0xff]  ;;  %v8001_v30 = vld [vmem:[%s9252_s0 + $0x113] sm:$0xff]  ;;  %9378 = vst [vmem:[#allocation17_spill] sm:$0xff] %v8031_v60 }
  0xea   :  { %v6047_v45 = vpop.f32.mrf.mxu1  ;;  %v6071_v34 = vpop.f32.mrf.mxu0  ;;  %6334 = vmatmul.mubr.msk.bf16.gmra.mxu1 %vm104_vm0, %v2526_v58  ;;  %6358 = vmatmul.mubr.msk.bf16.gmra.mxu0 %vm104_vm0, %v2720_v31  ;;  %9376 = vst [vmem:[#allocation15_spill] sm:$0xff] %v8001_v30  ;;  %v8011_v31 = vld [vmem:[%s9252_s0 + $0x104] sm:$0xff]  ;;  %v8016_v58 = vld [vmem:[%s9252_s0 + $0x114] sm:$0xff] }
  0xeb   :  { %v8003_v18 = vadd.f32 %v489_v20, %v312_v38  ;;  %v333_v22 = vadd.f32 %v6047_v45, %v7859_v46  ;;  %6337 = vmatprep.mubr.msk.bf16.mxu1 %vm104_vm0, %v2527_v43  ;;  %6361 = vmatprep.mubr.msk.bf16.mxu0 %vm104_vm0, %v2721_v29  ;;  %9377 = vst [vmem:[#allocation5_spill] sm:$0xff] %v8016_v58  ;;  %v8026_v43 = vld [vmem:[%s9252_s0 + $0x133] sm:$0xff] }
  0xec   :  { %v324_v46 = vpop.f32.mrf.mxu1  ;;  %v502_v42 = vpop.f32.mrf.mxu0  ;;  %6374 = vmatpush3.bf16.msra.mxu1 %v6681_v36  ;;  %6398 = vmatpush3.bf16.msra.mxu0 %v6682_v7  ;;  %v8036_v57 = vld [vmem:[%s9252_s0 + $0x134] sm:$0xff]  ;;  %v2528_v45 = vpack.c.bf16 %v8001_v30, %v7996_v27 }
  0xed   :  { %9379 = vst [vmem:[#allocation11_spill] sm:$0xff] %v8036_v57  ;;  %v8038_v29 = vadd.f32 %v6071_v34, %v333_v22  ;;  %v325_v36 = vadd.f32 %v324_v46, %v7887_v53  ;;  %6375 = vmatprep.subr.bf16.mxu1 %v6683_v19  ;;  %6399 = vmatprep.subr.bf16.mxu0 %v6684_v25  ;;  %v8044_v7 = vld [vmem:[%s9251_s1 + $0x238] sm:$0xff]  }
  0xee   :  { %v8049_v21 = vld [vmem:[%s9251_s1 + $0x258] sm:$0xff]   ;;  %v6048_v20 = vpop.f32.mrf.mxu1  ;;  %v6072_v38 = vpop.f32.mrf.mxu0  ;;  %v2722_v53 = vpack.c.bf16 %v8016_v58, %v8011_v31  ;;  %v2529_v46 = vpack.c.bf16 %v8026_v43, %v8021_v41  ;;  %v2723_v16 = vpack.c.bf16 %v8036_v57, %v8031_v60 }
  0xef   :  { %v8055_v34 = vadd.f32 %v502_v42, %v325_v36  ;;  %v336_v22 = vadd.f32 %v6048_v20, %v7911_v1 }
  0xf0   :  { %v327_v15 = vpop.f32.mrf.mxu1  ;;  %v505_v63 = vpop.f32.mrf.mxu0  ;;  %6376 = vmatpush3.bf16.msra.mxu1 %v6683_v19  ;;  %6400 = vmatpush3.bf16.msra.mxu0 %v6684_v25 }
  0xf1   :  { %v8062_v55 = vadd.f32 %v6072_v38, %v336_v22  ;;  %v328_v30 = vadd.f32 %v327_v15, %v7919_v56  ;;  %6417 = vmatprep.subr.bf16.mxu1 %v8044_v7  ;;  %6441 = vmatprep.subr.bf16.mxu0 %v8049_v21  ;;  %v8077_v56 = vld [vmem:[%s9252_s0 + $0x153] sm:$0xff] }
  0xf2   :  { %v6051_v42 = vpop.f32.mrf.mxu1  ;;  %v6075_v1 = vpop.f32.mrf.mxu0  ;;  %6338 = vmatmul.mubr.msk.bf16.gmra.mxu1 %vm104_vm0, %v2528_v45  ;;  %6362 = vmatmul.mubr.msk.bf16.gmra.mxu0 %vm104_vm0, %v2722_v53  ;;  %v8082_v15 = vld [vmem:[%s9252_s0 + $0x154] sm:$0xff]  ;;  %v2530_v53 = vpack.c.bf16 %v8077_v56, %v7574_v9 }
  0xf3   :  { %v8069_v36 = vadd.f32 %v505_v63, %v328_v30  ;;  %v349_v20 = vadd.f32 %v6051_v42, %v7810_v50  ;;  %6341 = vmatprep.mubr.msk.bf16.mxu1 %vm104_vm0, %v2529_v46  ;;  %6365 = vmatprep.mubr.msk.bf16.mxu0 %vm104_vm0, %v2723_v16  ;;  %v5348_v63 = vld [vmem:[%s9252_s0 + $0x30] sm:$0xff]  ;;  %v8090_v50 = vld [vmem:[%s9252_s0 + $0x40] sm:$0xff]  ;;  %v2724_v22 = vpack.c.bf16 %v8082_v15, %v7661_v39 }
  0xf4   :  { %v340_v19 = vpop.f32.mrf.mxu1  ;;  %v518_v25 = vpop.f32.mrf.mxu0  ;;  %v2912_v57 = vpack.c.bf16 %v8090_v50, %v5348_v63  ;;  %v8141_v63 = vld [vmem:[%s9252_s0 + $0x81] sm:$0xff] }
  0xf5   :  { %v8092_v16 = vadd.f32 %v6075_v1, %v349_v20  ;;  %v341_v30 = vadd.f32 %v340_v19, %v7830_v8  ;;  %v3106_v1 = vpack.c.bf16 %v7689_v51, %v7674_v44  ;;  %v8118_v44 = vld [vmem:[%s9252_s0 + $0x50] sm:$0xff]  ;;  %v8123_v51 = vld [vmem:[%s9252_s0 + $0x60] sm:$0xff]  ;;  %9380 = vst [vmem:[#allocation18_spill] sm:$0xff] %v8141_v63 }
  0xf6   :  { %v6052_v38 = vpop.f32.mrf.mxu1  ;;  %v6076_v45 = vpop.f32.mrf.mxu0 }
  0xf7   :  { %v8099_v46 = vadd.f32 %v518_v25, %v341_v30  ;;  %v352_v42 = vadd.f32 %v6052_v38, %v7847_v11 }
  0xf8   :  { %v343_v20 = vpop.f32.mrf.mxu1  ;;  %v521_v60 = vpop.f32.mrf.mxu0 }
  0xf9   :  { %v8105_v8 = vadd.f32 %v6076_v45, %v352_v42  ;;  %v344_v19 = vadd.f32 %v343_v20, %v7857_v48  ;;  %v3107_v45 = vpack.c.bf16 %v7699_v52, %v7694_v10  ;;  %v6687_v10 = vld [vmem:[%s9251_s1 + $0x230] sm:$0xff]  }
  0xfa   :  { %v6055_v58 = vpop.f32.mrf.mxu1  ;;  %v6079_v9 = vpop.f32.mrf.mxu0  ;;  %6342 = vmatmul.mubr.msk.bf16.gmra.mxu1 %vm104_vm0, %v2530_v53  ;;  %6366 = vmatmul.mubr.msk.bf16.gmra.mxu0 %vm104_vm0, %v2724_v22  ;;  %v6688_v52 = vld [vmem:[%s9251_s1 + $0x250] sm:$0xff]  }
  0xfb   :  { %v8110_v39 = vadd.f32 %v521_v60, %v344_v19  ;;  %v365_v11 = vadd.f32 %v6055_v58, %v7861_v47  ;;  %6377 = vmatprep.mubr.msk.bf16.mxu1 %vm104_vm0, %v2912_v57  ;;  %6401 = vmatprep.mubr.msk.bf16.mxu0 %vm104_vm0, %v3106_v1  ;;  %v8131_v58 = vld [vmem:[%s9252_s0 + $0x70] sm:$0xff]  ;;  %v8136_v57 = vld [vmem:[%s9252_s0 + $0x80] sm:$0xff]  ;;  %v3108_v19 = vpack.c.bf16 %v8141_v63, %v7704_v28 }
  0xfc   :  { %v356_v48 = vpop.f32.mrf.mxu1  ;;  %v534_v25 = vpop.f32.mrf.mxu0  ;;  %v2914_v20 = vpack.c.bf16 %v8136_v57, %v8131_v58  ;;  %v8168_v28 = vld [vmem:[%s9252_s0 + $0xa0] sm:$0xff] }
  0xfd   :  { %v8125_v60 = vadd.f32 %v6079_v9, %v365_v11  ;;  %v357_v47 = vadd.f32 %v356_v48, %v7889_v5  ;;  %v2913_v5 = vpack.c.bf16 %v8123_v51, %v8118_v44 }
  0xfe   :  { %v6056_v30 = vpop.f32.mrf.mxu1  ;;  %v6080_v38 = vpop.f32.mrf.mxu0 }
  0xff   :  { %v8147_v53 = vadd.f32 %v534_v25, %v357_v47  ;;  %v368_v22 = vadd.f32 %v6056_v30, %v7913_v12  ;;  %v8178_v47 = vld [vmem:[%s9252_s0 + $0xa1] sm:$0xff]  ;;  %v5356_v30 = vld [vmem:[%s9252_s0 + $0xf0] sm:$0xff] }
 0x100   :  { %v359_v42 = vpop.f32.mrf.mxu1  ;;  %v537_v1 = vpop.f32.mrf.mxu0  ;;  %9381 = vst [vmem:[#allocation23_spill] sm:$0xff] %v8178_v47 }
 0x101   :  { %v8154_v9 = vadd.f32 %v6080_v38, %v368_v22  ;;  %v360_v11 = vadd.f32 %v359_v42, %v7921_v4  ;;  %v8186_v38 = vld [vmem:[%s9252_s0 + $0x100] sm:$0xff] }
 0x102   :  { %v6091_v12 = vpop.f32.mrf.mxu1  ;;  %v6115_v48 = vpop.f32.mrf.mxu0  ;;  %6378 = vmatmul.mubr.msk.bf16.vlgmr.msra.gmra.mxu1 %vm104_vm0, %v2913_v5  ;;  %6402 = vmatmul.mubr.msk.bf16.vlgmr.msra.gmra.mxu0 %vm104_vm0, %v3107_v45 }
 0x103   :  { %v8170_v4 = vadd.f32 %v537_v1, %v360_v11  ;;  %v745_v25 = vadd.f32 %v6091_v12, %v7971_v32  ;;  %6418 = vmatpush3.bf16.msra.mxu1 %v8044_v7  ;;  %6442 = vmatpush3.bf16.msra.mxu0 %v8049_v21  ;;  %v6689_v7 = vld [vmem:[%s9251_s1 + $0x228] sm:$0xff]   ;;  %v2916_v11 = vpack.c.bf16 %v8186_v38, %v5356_v30 }
 0x104   :  { %v680_v5 = vpop.f32.mrf.mxu1  ;;  %v874_v32 = vpop.f32.mrf.mxu0  ;;  %6381 = vmatprep.mubr.msk.bf16.mxu1 %vm104_vm0, %v2914_v20  ;;  %6405 = vmatprep.mubr.msk.bf16.mxu0 %vm104_vm0, %v3108_v19  ;;  %v6690_v21 = vld [vmem:[%s9251_s1 + $0x248] sm:$0xff]   ;;  %v2915_v20 = vpack.c.bf16 %v8168_v28, %v7608_v23  ;;  %v3109_v19 = vpack.c.bf16 %v8178_v47, %v7722_v59  ;;  %v6691_v59 = vld [vmem:[%s9251_s1 + $0x220] sm:$0xff]  }
 0x105   :  { %v8196_v45 = vadd.f32 %v6115_v48, %v745_v25  ;;  %v743_v22 = vadd.f32 %v680_v5, %v7978_v13  ;;  %6419 = vmatprep.subr.bf16.mxu1 %v6687_v10  ;;  %6443 = vmatprep.subr.bf16.mxu0 %v6688_v52  ;;  %v3110_v13 = vpack.c.bf16 %v7765_v35, %v7738_v3 }
 0x106   :  { %v6092_v42 = vpop.f32.mrf.mxu1  ;;  %v6116_v1 = vpop.f32.mrf.mxu0 }
 0x107   :  { %v8204_v12 = vadd.f32 %v874_v32, %v743_v22  ;;  %v746_v63 = vadd.f32 %v6092_v42, %v7982_v33  ;;  %6420 = vmatpush3.bf16.msra.mxu1 %v6687_v10  ;;  %6444 = vmatpush3.bf16.msra.mxu0 %v6688_v52  ;;  %v6692_v33 = vld [vmem:[%s9251_s1 + $0x240] sm:$0xff]  }
 0x108   :  { %v683_v48 = vpop.f32.mrf.mxu1  ;;  %v877_v25 = vpop.f32.mrf.mxu0  ;;  %6421 = vmatprep.subr.bf16.mxu1 %v6689_v7  ;;  %6445 = vmatprep.subr.bf16.mxu0 %v6690_v21  ;;  %v8243_v22 = vld [vmem:[%s9252_s0 + $0x140] sm:$0xff] }
 0x109   :  { %v8209_v5 = vadd.f32 %v6116_v1, %v746_v63  ;;  %v744_v23 = vadd.f32 %v683_v48, %v8003_v18  ;;  %v8228_v18 = vld [vmem:[%s9252_s0 + $0x110] sm:$0xff]  ;;  %v8233_v63 = vld [vmem:[%s9252_s0 + $0x120] sm:$0xff] }
 0x10a   :  { %v6095_v10 = vpop.f32.mrf.mxu1  ;;  %v6119_v52 = vpop.f32.mrf.mxu0  ;;  %6382 = vmatmul.mubr.msk.bf16.gmra.mxu1 %vm104_vm0, %v2915_v20  ;;  %6406 = vmatmul.mubr.msk.bf16.gmra.mxu0 %vm104_vm0, %v3109_v19  ;;  %v8248_v42 = vld [vmem:[%s9252_s0 + $0x141] sm:$0xff]  ;;  %v8261_v20 = vld [vmem:[%s9251_s1 + $0x298] sm:$0xff]  }
 0x10b   :  { %v8220_v3 = vadd.f32 %v877_v25, %v744_v23  ;;  %v749_v35 = vadd.f32 %v6095_v10, %v8038_v29  ;;  %6385 = vmatprep.mubr.msk.bf16.mxu1 %vm104_vm0, %v2916_v11  ;;  %6409 = vmatprep.mubr.msk.bf16.mxu0 %vm104_vm0, %v3110_v13  ;;  %v8238_v29 = vld [vmem:[%s9252_s0 + $0x130] sm:$0xff]  ;;  %v2917_v13 = vpack.c.bf16 %v8233_v63, %v8228_v18 }
 0x10c   :  { %v696_v30 = vpop.f32.mrf.mxu1  ;;  %v890_v32 = vpop.f32.mrf.mxu0  ;;  %6422 = vmatpush3.bf16.msra.mxu1 %v6689_v7  ;;  %6446 = vmatpush3.bf16.msra.mxu0 %v6690_v21  ;;  %v8256_v21 = vld [vmem:[%s9251_s1 + $0x278] sm:$0xff]   ;;  %v2918_v23 = vpack.c.bf16 %v8243_v22, %v8238_v29  ;;  %v3112_v10 = vpack.c.bf16 %v8248_v42, %v7780_v49 }
 0x10d   :  { %v8250_v1 = vadd.f32 %v6119_v52, %v749_v35  ;;  %v747_v7 = vadd.f32 %v696_v30, %v8055_v34  ;;  %6423 = vmatprep.subr.bf16.mxu1 %v6691_v59  ;;  %6447 = vmatprep.subr.bf16.mxu0 %v6692_v33  ;;  %v3111_v34 = vpack.c.bf16 %v7775_v17, %v7770_v14 }
 0x10e   :  { %v6096_v19 = vpop.f32.mrf.mxu1  ;;  %v6120_v11 = vpop.f32.mrf.mxu0 }
 0x10f   :  { %v8267_v48 = vadd.f32 %v890_v32, %v747_v7  ;;  %v750_v25 = vadd.f32 %v6096_v19, %v8062_v55 }
 0x110   :  { %v699_v52 = vpop.f32.mrf.mxu1  ;;  %v893_v35 = vpop.f32.mrf.mxu0  ;;  %6424 = vmatpush3.bf16.msra.mxu1 %v6691_v59  ;;  %6448 = vmatpush3.bf16.msra.mxu0 %v6692_v33  ;;  %v8294_v59 = vld [vmem:[%s9252_s0 + $0x161] sm:$0xff] }
 0x111   :  { %v8274_v30 = vadd.f32 %v6120_v11, %v750_v25  ;;  %v748_v47 = vadd.f32 %v699_v52, %v8069_v36  ;;  %6465 = vmatprep.subr.bf16.mxu1 %v8256_v21  ;;  %6489 = vmatprep.subr.bf16.mxu0 %v8261_v20  ;;  %v8289_v36 = vld [vmem:[%s9252_s0 + $0x160] sm:$0xff]  ;;  %v3113_v25 = vpack.c.bf16 %v8294_v59, %v7820_v0 }
 0x112   :  { %v6099_v14 = vpop.f32.mrf.mxu1  ;;  %v6123_v17 = vpop.f32.mrf.mxu0  ;;  %6386 = vmatmul.mubr.msk.bf16.gmra.mxu1 %vm104_vm0, %v2917_v13  ;;  %6410 = vmatmul.mubr.msk.bf16.gmra.mxu0 %vm104_vm0, %v3111_v34  ;;  %v2919_v34 = vpack.c.bf16 %v8289_v36, %v7666_v26 }
 0x113   :  { %v8281_v55 = vadd.f32 %v893_v35, %v748_v47  ;;  %v753_v49 = vadd.f32 %v6099_v14, %v8092_v16  ;;  %6389 = vmatprep.mubr.msk.bf16.mxu1 %vm104_vm0, %v2918_v23  ;;  %6413 = vmatprep.mubr.msk.bf16.mxu0 %vm104_vm0, %v3112_v10  ;;  %v5420_v16 = vld [vmem:[%s9252_s0 + $0x32] sm:$0xff]  ;;  %v8302_v47 = vld [vmem:[%s9252_s0 + $0x42] sm:$0xff]  ;;  %v3494_v35 = vpack.c.bf16 %v7868_v37, %v7835_v54 }
 0x114   :  { %v712_v33 = vpop.f32.mrf.mxu1  ;;  %v906_v32 = vpop.f32.mrf.mxu0  ;;  %v3300_v52 = vpack.c.bf16 %v8302_v47, %v5420_v16  ;;  %v8330_v54 = vld [vmem:[%s9252_s0 + $0x52] sm:$0xff]  ;;  %v8335_v37 = vld [vmem:[%s9252_s0 + $0x62] sm:$0xff] }
 0x115   :  { %v8304_v7 = vadd.f32 %v6123_v17, %v753_v49  ;;  %v751_v19 = vadd.f32 %v712_v33, %v8099_v46 }
 0x116   :  { %v6100_v11 = vpop.f32.mrf.mxu1  ;;  %v6124_v13 = vpop.f32.mrf.mxu0 }
 0x117   :  { %v8311_v23 = vadd.f32 %v906_v32, %v751_v19  ;;  %v754_v10 = vadd.f32 %v6100_v11, %v8105_v8  ;;  %v8343_v19 = vld [vmem:[%s9252_s0 + $0x72] sm:$0xff]  ;;  %v8348_v11 = vld [vmem:[%s9252_s0 + $0x82] sm:$0xff] }
 0x118   :  { %v715_v14 = vpop.f32.mrf.mxu1  ;;  %v909_v17 = vpop.f32.mrf.mxu0 }
 0x119   :  { %v8317_v46 = vadd.f32 %v6124_v13, %v754_v10  ;;  %v752_v49 = vadd.f32 %v715_v14, %v8110_v39  ;;  %v8353_v13 = vld [vmem:[%s9252_s0 + $0x83] sm:$0xff]  ;;  %v3495_v10 = vpack.c.bf16 %v7894_v2, %v7875_v6  ;;  %v6695_v6 = vld [vmem:[%s9251_s1 + $0x270] sm:$0xff]  }
 0x11a   :  { %v6103_v33 = vpop.f32.mrf.mxu1  ;;  %v6127_v26 = vpop.f32.mrf.mxu0  ;;  %6390 = vmatmul.mubr.msk.bf16.gmra.mxu1 %vm104_vm0, %v2919_v34  ;;  %6414 = vmatmul.mubr.msk.bf16.gmra.mxu0 %vm104_vm0, %v3113_v25  ;;  %9382 = vst [vmem:[#allocation20_spill] sm:$0xff] %v8353_v13  ;;  %v6696_v2 = vld [vmem:[%s9251_s1 + $0x290] sm:$0xff]  }
 0x11b   :  { %v8322_v0 = vadd.f32 %v909_v17, %v752_v49  ;;  %v757_v8 = vadd.f32 %v6103_v33, %v8125_v60  ;;  %6425 = vmatprep.mubr.msk.bf16.mxu1 %vm104_vm0, %v3300_v52  ;;  %6449 = vmatprep.mubr.msk.bf16.mxu0 %vm104_vm0, %v3494_v35  ;;  %v3302_v49 = vpack.c.bf16 %v8348_v11, %v8343_v19 }
 0x11c   :  { %v728_v39 = vpop.f32.mrf.mxu1  ;;  %v922_v32 = vpop.f32.mrf.mxu0  ;;  %v3496_v33 = vpack.c.bf16 %v8353_v13, %v7899_v62  ;;  %v8380_v62 = vld [vmem:[%s9252_s0 + $0xa2] sm:$0xff] }
 0x11d   :  { %v8337_v16 = vadd.f32 %v6127_v26, %v757_v8  ;;  %v755_v60 = vadd.f32 %v728_v39, %v8147_v53  ;;  %v3301_v53 = vpack.c.bf16 %v8335_v37, %v8330_v54 }
 0x11e   :  { %v6104_v34 = vpop.f32.mrf.mxu1  ;;  %v6128_v25 = vpop.f32.mrf.mxu0 }
 0x11f   :  { %v8359_v52 = vadd.f32 %v922_v32, %v755_v60  ;;  %v758_v35 = vadd.f32 %v6104_v34, %v8154_v9  ;;  %v8390_v60 = vld [vmem:[%s9252_s0 + $0xa3] sm:$0xff]  ;;  %v5428_v34 = vld [vmem:[%s9252_s0 + $0xf2] sm:$0xff] }
 0x120   :  { %v731_v14 = vpop.f32.mrf.mxu1  ;;  %v925_v17 = vpop.f32.mrf.mxu0  ;;  %9383 = vst [vmem:[#allocation24_spill] sm:$0xff] %v8390_v60 }
 0x121   :  { %v8366_v26 = vadd.f32 %v6128_v25, %v758_v35  ;;  %v756_v8 = vadd.f32 %v731_v14, %v8170_v4  ;;  %v8398_v25 = vld [vmem:[%s9252_s0 + $0x102] sm:$0xff] }
 0x122   :  { %v6139_v9 = vpop.f32.mrf.mxu1  ;;  %v6163_v39 = vpop.f32.mrf.mxu0  ;;  %6426 = vmatmul.mubr.msk.bf16.vlgmr.msra.gmra.mxu1 %vm104_vm0, %v3301_v53  ;;  %6450 = vmatmul.mubr.msk.bf16.vlgmr.msra.gmra.mxu0 %vm104_vm0, %v3495_v10 }
 0x123   :  { %v8382_v4 = vadd.f32 %v925_v17, %v756_v8  ;;  %v1134_v32 = vadd.f32 %v6139_v9, %v8196_v45  ;;  %6466 = vmatpush3.bf16.msra.mxu1 %v8256_v21  ;;  %6490 = vmatpush3.bf16.msra.mxu0 %v8261_v20  ;;  %v6697_v21 = vld [vmem:[%s9251_s1 + $0x268] sm:$0xff]   ;;  %v3304_v8 = vpack.c.bf16 %v8398_v25, %v5428_v34 }
 0x124   :  { %v1069_v53 = vpop.f32.mrf.mxu1  ;;  %v1263_v45 = vpop.f32.mrf.mxu0  ;;  %6429 = vmatprep.mubr.msk.bf16.mxu1 %vm104_vm0, %v3302_v49  ;;  %6453 = vmatprep.mubr.msk.bf16.mxu0 %vm104_vm0, %v3496_v33  ;;  %v6698_v20 = vld [vmem:[%s9251_s1 + $0x288] sm:$0xff]   ;;  %v3303_v49 = vpack.c.bf16 %v8380_v62, %v7727_v61  ;;  %v3497_v33 = vpack.c.bf16 %v8390_v60, %v7938_v40  ;;  %v6699_v40 = vld [vmem:[%s9251_s1 + $0x260] sm:$0xff]  }
 0x125   :  { %v8408_v10 = vadd.f32 %v6163_v39, %v1134_v32  ;;  %v1132_v35 = vadd.f32 %v1069_v53, %v8204_v12  ;;  %6467 = vmatprep.subr.bf16.mxu1 %v6695_v6  ;;  %6491 = vmatprep.subr.bf16.mxu0 %v6696_v2  ;;  %v3498_v12 = vpack.c.bf16 %v7996_v27, %v7953_v24 }
 0x126   :  { %v6140_v14 = vpop.f32.mrf.mxu1  ;;  %v6164_v17 = vpop.f32.mrf.mxu0 }
 0x127   :  { %v8416_v9 = vadd.f32 %v1263_v45, %v1132_v35  ;;  %v1135_v13 = vadd.f32 %v6140_v14, %v8209_v5  ;;  %6468 = vmatpush3.bf16.msra.mxu1 %v6695_v6  ;;  %6492 = vmatpush3.bf16.msra.mxu0 %v6696_v2  ;;  %v6700_v5 = vld [vmem:[%s9251_s1 + $0x280] sm:$0xff]  }
 0x128   :  { %v1072_v39 = vpop.f32.mrf.mxu1  ;;  %v1266_v32 = vpop.f32.mrf.mxu0  ;;  %6469 = vmatprep.subr.bf16.mxu1 %v6697_v21  ;;  %6493 = vmatprep.subr.bf16.mxu0 %v6698_v20  ;;  %v8445_v45 = vld [vmem:[%s9252_s0 + $0x142] sm:$0xff] }
 0x129   :  { %v8421_v53 = vadd.f32 %v6164_v17, %v1135_v13  ;;  %v1133_v61 = vadd.f32 %v1072_v39, %v8220_v3  ;;  %v8440_v3 = vld [vmem:[%s9252_s0 + $0x112] sm:$0xff] }
 0x12a   :  { %v6143_v6 = vpop.f32.mrf.mxu1  ;;  %v6167_v2 = vpop.f32.mrf.mxu0  ;;  %6430 = vmatmul.mubr.msk.bf16.gmra.mxu1 %vm104_vm0, %v3303_v49  ;;  %6454 = vmatmul.mubr.msk.bf16.gmra.mxu0 %vm104_vm0, %v3497_v33  ;;  %v9384_v33 = vld [vmem:[#allocation2_spill] sm:$0xff] }
 0x12b   :  { %v8432_v24 = vadd.f32 %v1266_v32, %v1133_v61  ;;  %v1138_v27 = vadd.f32 %v6143_v6, %v8250_v1  ;;  %6433 = vmatprep.mubr.msk.bf16.mxu1 %vm104_vm0, %v3304_v8  ;;  %6457 = vmatprep.mubr.msk.bf16.mxu0 %vm104_vm0, %v3498_v12  ;;  %v8450_v1 = vld [vmem:[%s9252_s0 + $0x143] sm:$0xff]  ;;  %v3305_v8 = vpack.c.bf16 %v9384_v33, %v8440_v3  ;;  %v9386_v61 = vld [vmem:[#allocation8_spill] sm:$0xff] }
 0x12c   :  { %v1085_v13 = vpop.f32.mrf.mxu1  ;;  %v1279_v34 = vpop.f32.mrf.mxu0  ;;  %6470 = vmatpush3.bf16.msra.mxu1 %v6697_v21  ;;  %6494 = vmatpush3.bf16.msra.mxu0 %v6698_v20  ;;  %v8458_v21 = vld [vmem:[%s9251_s1 + $0x2b8] sm:$0xff]   ;;  %v9385_v12 = vld [vmem:[#allocation15_spill] sm:$0xff]  ;;  %v3306_v6 = vpack.c.bf16 %v8445_v45, %v9386_v61 }
 0x12d   :  { %v8452_v35 = vadd.f32 %v6167_v2, %v1138_v27  ;;  %v1136_v14 = vadd.f32 %v1085_v13, %v8267_v48  ;;  %6471 = vmatprep.subr.bf16.mxu1 %v6699_v40  ;;  %6495 = vmatprep.subr.bf16.mxu0 %v6700_v5  ;;  %v8463_v20 = vld [vmem:[%s9251_s1 + $0x2d8] sm:$0xff]   ;;  %v3499_v48 = vpack.c.bf16 %v8021_v41, %v9385_v12  ;;  %v9387_v12 = vld [vmem:[#allocation7_spill] sm:$0xff] }
 0x12e   :  { %v6144_v17 = vpop.f32.mrf.mxu1  ;;  %v6168_v49 = vpop.f32.mrf.mxu0  ;;  %v3500_v2 = vpack.c.bf16 %v8450_v1, %v8026_v43 }
 0x12f   :  { %v8469_v39 = vadd.f32 %v1279_v34, %v1136_v14  ;;  %v1139_v32 = vadd.f32 %v6144_v17, %v8274_v30 }
 0x130   :  { %v1088_v27 = vpop.f32.mrf.mxu1  ;;  %v1282_v13 = vpop.f32.mrf.mxu0  ;;  %6472 = vmatpush3.bf16.msra.mxu1 %v6699_v40  ;;  %6496 = vmatpush3.bf16.msra.mxu0 %v6700_v5  ;;  %v8496_v40 = vld [vmem:[%s9252_s0 + $0x163] sm:$0xff] }
 0x131   :  { %v8476_v60 = vadd.f32 %v6168_v49, %v1139_v32  ;;  %v1137_v33 = vadd.f32 %v1088_v27, %v8281_v55  ;;  %6513 = vmatprep.subr.bf16.mxu1 %v8458_v21  ;;  %6537 = vmatprep.subr.bf16.mxu0 %v8463_v20  ;;  %v8491_v55 = vld [vmem:[%s9252_s0 + $0x162] sm:$0xff]  ;;  %v3501_v32 = vpack.c.bf16 %v8496_v40, %v8077_v56  ;;  %v9389_v27 = vld [vmem:[#allocation9_spill] sm:$0xff] }
 0x132   :  { %v6147_v41 = vpop.f32.mrf.mxu1  ;;  %v6171_v30 = vpop.f32.mrf.mxu0  ;;  %6434 = vmatmul.mubr.msk.bf16.gmra.mxu1 %vm104_vm0, %v3305_v8  ;;  %6458 = vmatmul.mubr.msk.bf16.gmra.mxu0 %vm104_vm0, %v3499_v48  ;;  %v3307_v48 = vpack.c.bf16 %v8491_v55, %v9387_v12 }
 0x133   :  { %v8483_v34 = vadd.f32 %v1282_v13, %v1137_v33  ;;  %v1142_v43 = vadd.f32 %v6147_v41, %v8304_v7  ;;  %6437 = vmatprep.mubr.msk.bf16.mxu1 %vm104_vm0, %v3306_v6  ;;  %6461 = vmatprep.mubr.msk.bf16.mxu0 %vm104_vm0, %v3500_v2  ;;  %v9388_v2 = vld [vmem:[#allocation10_spill] sm:$0xff]  ;;  %v3883_v33 = vpack.c.bf16 %v8118_v44, %v8090_v50 }
 0x134   :  { %v1101_v5 = vpop.f32.mrf.mxu1  ;;  %v1295_v14 = vpop.f32.mrf.mxu0  ;;  %v3688_v13 = vpack.c.bf16 %v9389_v27, %v9388_v2  ;;  %v3884_v2 = vpack.c.bf16 %v8131_v58, %v8123_v51  ;;  %v6704_v51 = vld [vmem:[%s9251_s1 + $0x2d0] sm:$0xff]  }
 0x135   :  { %v8498_v17 = vadd.f32 %v6171_v30, %v1142_v43  ;;  %v1140_v7 = vadd.f32 %v1101_v5, %v8311_v23 }
 0x136   :  { %v6148_v49 = vpop.f32.mrf.mxu1  ;;  %v6172_v8 = vpop.f32.mrf.mxu0 }
 0x137   :  { %v8505_v61 = vadd.f32 %v1295_v14, %v1140_v7  ;;  %v1143_v6 = vadd.f32 %v6148_v49, %v8317_v46  ;;  %v8528_v7 = vld [vmem:[%s9252_s0 + $0x84] sm:$0xff]  ;;  %v5533_v49 = vld [vmem:[%s9252_s0 + $0x90] sm:$0xff] }
 0x138   :  { %v1104_v41 = vpop.f32.mrf.mxu1  ;;  %v1298_v23 = vpop.f32.mrf.mxu0 }
 0x139   :  { %v8512_v30 = vadd.f32 %v6172_v8, %v1143_v6  ;;  %v1141_v43 = vadd.f32 %v1104_v41, %v8322_v0  ;;  %v9392_v41 = vld [vmem:[#allocation13_spill] sm:$0xff] }
 0x13a   :  { %v6151_v5 = vpop.f32.mrf.mxu1  ;;  %v6175_v12 = vpop.f32.mrf.mxu0  ;;  %6438 = vmatmul.mubr.msk.bf16.gmra.mxu1 %vm104_vm0, %v3307_v48  ;;  %6462 = vmatmul.mubr.msk.bf16.gmra.mxu0 %vm104_vm0, %v3501_v32  ;;  %v9390_v48 = vld [vmem:[#allocation22_spill] sm:$0xff] }
 0x13b   :  { %v8517_v56 = vadd.f32 %v1298_v23, %v1141_v43  ;;  %v1146_v46 = vadd.f32 %v6151_v5, %v8337_v16  ;;  %6473 = vmatprep.mubr.msk.bf16.mxu1 %vm104_vm0, %v3688_v13  ;;  %6497 = vmatprep.mubr.msk.bf16.mxu0 %vm104_vm0, %v3883_v33  ;;  %v9391_v32 = vld [vmem:[#allocation14_spill] sm:$0xff]  ;;  %v3690_v23 = vpack.c.bf16 %v8528_v7, %v9392_v41 }
 0x13c   :  { %v1117_v50 = vpop.f32.mrf.mxu1  ;;  %v1311_v44 = vpop.f32.mrf.mxu0  ;;  %v3689_v6 = vpack.c.bf16 %v9391_v32, %v9390_v48  ;;  %v3885_v43 = vpack.c.bf16 %v5533_v49, %v8136_v57  ;;  %v9393_v32 = vld [vmem:[#allocation3_spill] sm:$0xff] }
 0x13d   :  { %v8522_v14 = vadd.f32 %v6175_v12, %v1146_v46  ;;  %v1144_v0 = vadd.f32 %v1117_v50, %v8359_v52  ;;  %v6703_v46 = vld [vmem:[%s9251_s1 + $0x2b0] sm:$0xff]  }
 0x13e   :  { %v6152_v16 = vpop.f32.mrf.mxu1  ;;  %v6176_v8 = vpop.f32.mrf.mxu0 }
 0x13f   :  { %v8537_v27 = vadd.f32 %v1311_v44, %v1144_v0  ;;  %v1147_v52 = vadd.f32 %v6152_v16, %v8366_v26  ;;  %v5535_v44 = vld [vmem:[%s9252_s0 + $0xb0] sm:$0xff] }
 0x140   :  { %v1120_v13 = vpop.f32.mrf.mxu1  ;;  %v1314_v33 = vpop.f32.mrf.mxu0 }
 0x141   :  { %v8543_v5 = vadd.f32 %v6176_v8, %v1147_v52  ;;  %v1145_v12 = vadd.f32 %v1120_v13, %v8382_v4  ;;  %v8562_v4 = vld [vmem:[%s9252_s0 + $0xa4] sm:$0xff]  ;;  %v9394_v52 = vld [vmem:[#allocation16_spill] sm:$0xff] }
 0x142   :  { %v6187_v58 = vpop.f32.mrf.mxu1  ;;  %v6211_v26 = vpop.f32.mrf.mxu0  ;;  %6474 = vmatmul.mubr.msk.bf16.vlgmr.msra.gmra.mxu1 %vm104_vm0, %v3689_v6  ;;  %6498 = vmatmul.mubr.msk.bf16.vlgmr.msra.gmra.mxu0 %vm104_vm0, %v3884_v2  ;;  %v3691_v6 = vpack.c.bf16 %v8562_v4, %v9393_v32  ;;  %v3886_v2 = vpack.c.bf16 %v5535_v44, %v8168_v28  ;;  %v3692_v13 = vpack.c.bf16 %v8011_v31, %v9394_v52  ;;  %v6707_v31 = vld [vmem:[%s9251_s1 + $0x2a0] sm:$0xff]  }
 0x143   :  { %v8554_v50 = vadd.f32 %v1314_v33, %v1145_v12  ;;  %v1522_v57 = vadd.f32 %v6187_v58, %v8408_v10  ;;  %6514 = vmatpush3.bf16.msra.mxu1 %v8458_v21  ;;  %6538 = vmatpush3.bf16.msra.mxu0 %v8463_v20  ;;  %v6705_v10 = vld [vmem:[%s9251_s1 + $0x2a8] sm:$0xff]  }
 0x144   :  { %v1457_v0 = vpop.f32.mrf.mxu1  ;;  %v1651_v49 = vpop.f32.mrf.mxu0  ;;  %6477 = vmatprep.mubr.msk.bf16.mxu1 %vm104_vm0, %v3690_v23  ;;  %6501 = vmatprep.mubr.msk.bf16.mxu0 %vm104_vm0, %v3885_v43  ;;  %v6706_v21 = vld [vmem:[%s9251_s1 + $0x2c8] sm:$0xff]  }
 0x145   :  { %v8575_v20 = vadd.f32 %v6211_v26, %v1522_v57  ;;  %v1520_v16 = vadd.f32 %v1457_v0, %v8416_v9  ;;  %6515 = vmatprep.subr.bf16.mxu1 %v6703_v46  ;;  %6539 = vmatprep.subr.bf16.mxu0 %v6704_v51  ;;  %v3887_v9 = vpack.c.bf16 %v8228_v18, %v8186_v38  ;;  %v8607_v26 = vld [vmem:[%s9252_s0 + $0x144] sm:$0xff]  ;;  %v5541_v57 = vld [vmem:[%s9252_s0 + $0x150] sm:$0xff]  ;;  %v8618_v0 = vld [vmem:[%s9251_s1 + $0x2f8] sm:$0xff]  }
 0x146   :  { %v6188_v8 = vpop.f32.mrf.mxu1  ;;  %v6212_v48 = vpop.f32.mrf.mxu0 }
 0x147   :  { %v8583_v33 = vadd.f32 %v1651_v49, %v1520_v16  ;;  %v1523_v41 = vadd.f32 %v6188_v8, %v8421_v53  ;;  %6516 = vmatpush3.bf16.msra.mxu1 %v6703_v46  ;;  %6540 = vmatpush3.bf16.msra.mxu0 %v6704_v51  ;;  %v6708_v53 = vld [vmem:[%s9251_s1 + $0x2c0] sm:$0xff]   ;;  %v8623_v49 = vld [vmem:[%s9251_s1 + $0x318] sm:$0xff]  }
 0x148   :  { %v1460_v23 = vpop.f32.mrf.mxu1  ;;  %v1654_v43 = vpop.f32.mrf.mxu0  ;;  %6517 = vmatprep.subr.bf16.mxu1 %v6705_v10  ;;  %6541 = vmatprep.subr.bf16.mxu0 %v6706_v21  ;;  %v9395_v16 = vld [vmem:[#allocation5_spill] sm:$0xff] }
 0x149   :  { %v8588_v12 = vadd.f32 %v6212_v48, %v1523_v41  ;;  %v1521_v28 = vadd.f32 %v1460_v23, %v8432_v24  ;;  %v9396_v8 = vld [vmem:[#allocation17_spill] sm:$0xff] }
 0x14a   :  { %v6191_v46 = vpop.f32.mrf.mxu1  ;;  %v6215_v51 = vpop.f32.mrf.mxu0  ;;  %6478 = vmatmul.mubr.msk.bf16.gmra.mxu1 %vm104_vm0, %v3691_v6  ;;  %6502 = vmatmul.mubr.msk.bf16.gmra.mxu0 %vm104_vm0, %v3886_v2  ;;  %v3693_v48 = vpack.c.bf16 %v9396_v8, %v9395_v16  ;;  %v9397_v2 = vld [vmem:[#allocation11_spill] sm:$0xff]  ;;  %v4271_v8 = vpack.c.bf16 %v8330_v54, %v8302_v47  ;;  %v5567_v54 = vld [vmem:[%s9252_s0 + $0x71] sm:$0xff] }
 0x14b   :  { %v8599_v38 = vadd.f32 %v1654_v43, %v1521_v28  ;;  %v1526_v18 = vadd.f32 %v6191_v46, %v8452_v35  ;;  %6481 = vmatprep.mubr.msk.bf16.mxu1 %vm104_vm0, %v3692_v13  ;;  %6505 = vmatprep.mubr.msk.bf16.mxu0 %vm104_vm0, %v3887_v9  ;;  %v3694_v52 = vpack.c.bf16 %v8607_v26, %v9397_v2  ;;  %v5543_v28 = vld [vmem:[%s9252_s0 + $0x170] sm:$0xff]  ;;  %v5564_v46 = vld [vmem:[%s9252_s0 + $0x41] sm:$0xff] }
 0x14c   :  { %v1473_v24 = vpop.f32.mrf.mxu1  ;;  %v1667_v58 = vpop.f32.mrf.mxu0  ;;  %6518 = vmatpush3.bf16.msra.mxu1 %v6705_v10  ;;  %6542 = vmatpush3.bf16.msra.mxu0 %v6706_v21  ;;  %v3889_v13 = vpack.c.bf16 %v5541_v57, %v8243_v22  ;;  %v5566_v47 = vld [vmem:[%s9252_s0 + $0x61] sm:$0xff] }
 0x14d   :  { %v8612_v44 = vadd.f32 %v6215_v51, %v1526_v18  ;;  %v1524_v35 = vadd.f32 %v1473_v24, %v8469_v39  ;;  %6519 = vmatprep.subr.bf16.mxu1 %v6707_v31  ;;  %6543 = vmatprep.subr.bf16.mxu0 %v6708_v53  ;;  %v3888_v39 = vpack.c.bf16 %v8238_v29, %v8233_v63 }
 0x14e   :  { %v6192_v10 = vpop.f32.mrf.mxu1  ;;  %v6216_v21 = vpop.f32.mrf.mxu0 }
 0x14f   :  { %v8629_v32 = vadd.f32 %v1667_v58, %v1524_v35  ;;  %v1527_v6 = vadd.f32 %v6192_v10, %v8476_v60  ;;  %v3890_v35 = vpack.c.bf16 %v5543_v28, %v8289_v36 }
 0x150   :  { %v1476_v41 = vpop.f32.mrf.mxu1  ;;  %v1670_v9 = vpop.f32.mrf.mxu0  ;;  %6520 = vmatpush3.bf16.msra.mxu1 %v6707_v31  ;;  %6544 = vmatpush3.bf16.msra.mxu0 %v6708_v53 }
 0x151   :  { %v8635_v23 = vadd.f32 %v6216_v21, %v1527_v6  ;;  %v1525_v43 = vadd.f32 %v1476_v41, %v8483_v34  ;;  %6561 = vmatprep.subr.bf16.mxu1 %v8618_v0  ;;  %6585 = vmatprep.subr.bf16.mxu0 %v8623_v49  ;;  %v8650_v34 = vld [vmem:[%s9252_s0 + $0x164] sm:$0xff] }
 0x152   :  { %v6195_v63 = vpop.f32.mrf.mxu1  ;;  %v6219_v29 = vpop.f32.mrf.mxu0  ;;  %6482 = vmatmul.mubr.msk.bf16.gmra.mxu1 %vm104_vm0, %v3693_v48  ;;  %6506 = vmatmul.mubr.msk.bf16.gmra.mxu0 %vm104_vm0, %v3888_v39  ;;  %v3695_v57 = vpack.c.bf16 %v8650_v34, %v8082_v15 }
 0x153   :  { %v8642_v60 = vadd.f32 %v1670_v9, %v1525_v43  ;;  %v1530_v22 = vadd.f32 %v6195_v63, %v8498_v17  ;;  %6485 = vmatprep.mubr.msk.bf16.mxu1 %vm104_vm0, %v3694_v52  ;;  %6509 = vmatprep.mubr.msk.bf16.mxu0 %vm104_vm0, %v3889_v13  ;;  %v5565_v17 = vld [vmem:[%s9252_s0 + $0x51] sm:$0xff] }
 0x154   :  { %v1489_v31 = vpop.f32.mrf.mxu1  ;;  %v1683_v53 = vpop.f32.mrf.mxu0  ;;  %v4077_v16 = vpack.c.bf16 %v5565_v17, %v5564_v46  ;;  %v5605_v9 = vld [vmem:[%s9252_s0 + $0x92] sm:$0xff]  ;;  %v9398_v46 = vld [vmem:[#allocation18_spill] sm:$0xff] }
 0x155   :  { %v8661_v51 = vadd.f32 %v6219_v29, %v1530_v22  ;;  %v1528_v18 = vadd.f32 %v1489_v31, %v8505_v61  ;;  %v4078_v29 = vpack.c.bf16 %v5567_v54, %v5566_v47  ;;  %v4272_v22 = vpack.c.bf16 %v8343_v19, %v8335_v37  ;;  %v6712_v37 = vld [vmem:[%s9251_s1 + $0x310] sm:$0xff]  }
 0x156   :  { %v6196_v24 = vpop.f32.mrf.mxu1  ;;  %v6220_v58 = vpop.f32.mrf.mxu0 }
 0x157   :  { %v8667_v10 = vadd.f32 %v1683_v53, %v1528_v18  ;;  %v1531_v21 = vadd.f32 %v6196_v24, %v8512_v30  ;;  %v4273_v18 = vpack.c.bf16 %v5605_v9, %v8348_v11  ;;  %v5571_v11 = vld [vmem:[%s9252_s0 + $0xb1] sm:$0xff] }
 0x158   :  { %v1492_v48 = vpop.f32.mrf.mxu1  ;;  %v1686_v39 = vpop.f32.mrf.mxu0 }
 0x159   :  { %v8672_v6 = vadd.f32 %v6220_v58, %v1531_v21  ;;  %v1529_v61 = vadd.f32 %v1492_v48, %v8517_v56  ;;  %v5607_v21 = vld [vmem:[%s9252_s0 + $0xb2] sm:$0xff] }
 0x15a   :  { %v6199_v2 = vpop.f32.mrf.mxu1  ;;  %v6223_v52 = vpop.f32.mrf.mxu0  ;;  %6486 = vmatmul.mubr.msk.bf16.gmra.mxu1 %vm104_vm0, %v3695_v57  ;;  %6510 = vmatmul.mubr.msk.bf16.gmra.mxu0 %vm104_vm0, %v3890_v35  ;;  %v6711_v57 = vld [vmem:[%s9251_s1 + $0x2f0] sm:$0xff]   ;;  %v4274_v54 = vpack.c.bf16 %v5607_v21, %v8380_v62  ;;  %v6715_v62 = vld [vmem:[%s9251_s1 + $0x2e0] sm:$0xff]  }
 0x15b   :  { %v8677_v15 = vadd.f32 %v1686_v39, %v1529_v61  ;;  %v1534_v36 = vadd.f32 %v6199_v2, %v8522_v14  ;;  %6521 = vmatprep.mubr.msk.bf16.mxu1 %vm104_vm0, %v4077_v16  ;;  %6545 = vmatprep.mubr.msk.bf16.mxu0 %vm104_vm0, %v4271_v8  ;;  %v5569_v14 = vld [vmem:[%s9252_s0 + $0x91] sm:$0xff]  ;;  %v5572_v16 = vld [vmem:[%s9252_s0 + $0x101] sm:$0xff] }
 0x15c   :  { %v1505_v30 = vpop.f32.mrf.mxu1  ;;  %v1699_v56 = vpop.f32.mrf.mxu0  ;;  %v4079_v17 = vpack.c.bf16 %v5569_v14, %v9398_v46  ;;  %v5573_v8 = vld [vmem:[%s9252_s0 + $0x111] sm:$0xff]  ;;  %v4275_v14 = vpack.c.bf16 %v8440_v3, %v8398_v25  ;;  %v5574_v25 = vld [vmem:[%s9252_s0 + $0x121] sm:$0xff] }
 0x15d   :  { %v8688_v13 = vadd.f32 %v6223_v52, %v1534_v36  ;;  %v1532_v41 = vadd.f32 %v1505_v30, %v8537_v27  ;;  %v9399_v36 = vld [vmem:[#allocation23_spill] sm:$0xff]  ;;  %v4081_v30 = vpack.c.bf16 %v5573_v8, %v5572_v16 }
 0x15e   :  { %v6200_v43 = vpop.f32.mrf.mxu1  ;;  %v6224_v63 = vpop.f32.mrf.mxu0  ;;  %v4080_v47 = vpack.c.bf16 %v5571_v11, %v9399_v36 }
 0x15f   :  { %v8699_v28 = vadd.f32 %v1699_v56, %v1532_v41  ;;  %v1535_v31 = vadd.f32 %v6200_v43, %v8543_v5 }
 0x160   :  { %v1508_v53 = vpop.f32.mrf.mxu1  ;;  %v1702_v27 = vpop.f32.mrf.mxu0 }
 0x161   :  { %v8704_v24 = vadd.f32 %v6224_v63, %v1535_v31  ;;  %v1533_v58 = vadd.f32 %v1508_v53, %v8554_v50  ;;  %v5575_v31 = vld [vmem:[%s9252_s0 + $0x131] sm:$0xff]  ;;  %v5610_v53 = vld [vmem:[%s9252_s0 + $0x122] sm:$0xff] }
 0x162   :  { %v6235_v19 = vpop.f32.mrf.mxu1  ;;  %v6259_v5 = vpop.f32.mrf.mxu0  ;;  %6522 = vmatmul.mubr.msk.bf16.vlgmr.msra.gmra.mxu1 %vm104_vm0, %v4078_v29  ;;  %6546 = vmatmul.mubr.msk.bf16.vlgmr.msra.gmra.mxu0 %vm104_vm0, %v4272_v22 }
 0x163   :  { %v8718_v35 = vadd.f32 %v1702_v27, %v1533_v58  ;;  %v1910_v50 = vadd.f32 %v6235_v19, %v8575_v20  ;;  %6562 = vmatpush3.bf16.msra.mxu1 %v8618_v0  ;;  %6586 = vmatpush3.bf16.msra.mxu0 %v8623_v49  ;;  %v6713_v20 = vld [vmem:[%s9251_s1 + $0x2e8] sm:$0xff]   ;;  %v5611_v27 = vld [vmem:[%s9252_s0 + $0x132] sm:$0xff] }
 0x164   :  { %v1845_v48 = vpop.f32.mrf.mxu1  ;;  %v2040_v39 = vpop.f32.mrf.mxu0  ;;  %6525 = vmatprep.mubr.msk.bf16.mxu1 %vm104_vm0, %v4079_v17  ;;  %6549 = vmatprep.mubr.msk.bf16.mxu0 %vm104_vm0, %v4273_v18  ;;  %v6714_v0 = vld [vmem:[%s9251_s1 + $0x308] sm:$0xff]   ;;  %v5613_v18 = vld [vmem:[%s9252_s0 + $0x152] sm:$0xff]  ;;  %v4276_v11 = vpack.c.bf16 %v5611_v27, %v5610_v53 }
 0x165   :  { %v8740_v49 = vadd.f32 %v6259_v5, %v1910_v50  ;;  %v1908_v61 = vadd.f32 %v1845_v48, %v8583_v33  ;;  %6563 = vmatprep.subr.bf16.mxu1 %v6711_v57  ;;  %6587 = vmatprep.subr.bf16.mxu0 %v6712_v37  ;;  %v4082_v5 = vpack.c.bf16 %v5575_v31, %v5574_v25 }
 0x166   :  { %v6236_v2 = vpop.f32.mrf.mxu1  ;;  %v6260_v52 = vpop.f32.mrf.mxu0  ;;  %v4277_v8 = vpack.c.bf16 %v5613_v18, %v8445_v45  ;;  %v5579_v45 = vld [vmem:[%s9252_s0 + $0x171] sm:$0xff] }
 0x167   :  { %v8745_v56 = vadd.f32 %v2040_v39, %v1908_v61  ;;  %v1911_v41 = vadd.f32 %v6236_v2, %v8588_v12  ;;  %6564 = vmatpush3.bf16.msra.mxu1 %v6711_v57  ;;  %6588 = vmatpush3.bf16.msra.mxu0 %v6712_v37  ;;  %v6716_v12 = vld [vmem:[%s9251_s1 + $0x300] sm:$0xff]  }
 0x168   :  { %v1848_v9 = vpop.f32.mrf.mxu1  ;;  %v2043_v33 = vpop.f32.mrf.mxu0  ;;  %6565 = vmatprep.subr.bf16.mxu1 %v6713_v20  ;;  %6589 = vmatprep.subr.bf16.mxu0 %v6714_v0 }
 0x169   :  { %v8750_v43 = vadd.f32 %v6260_v52, %v1911_v41  ;;  %v1909_v63 = vadd.f32 %v1848_v9, %v8599_v38 }
 0x16a   :  { %v6239_v29 = vpop.f32.mrf.mxu1  ;;  %v6263_v22 = vpop.f32.mrf.mxu0  ;;  %6526 = vmatmul.mubr.msk.bf16.gmra.mxu1 %vm104_vm0, %v4080_v47  ;;  %6550 = vmatmul.mubr.msk.bf16.gmra.mxu0 %vm104_vm0, %v4274_v54  ;;  %v5672_v47 = vld [vmem:[%s9252_s0 + $0x44] sm:$0xff]  ;;  %v5673_v54 = vld [vmem:[%s9252_s0 + $0x54] sm:$0xff] }
 0x16b   :  { %v8764_v3 = vadd.f32 %v2043_v33, %v1909_v63  ;;  %v1914_v38 = vadd.f32 %v6239_v29, %v8612_v44  ;;  %6529 = vmatprep.mubr.msk.bf16.mxu1 %vm104_vm0, %v4081_v30  ;;  %6553 = vmatprep.mubr.msk.bf16.mxu0 %vm104_vm0, %v4275_v14  ;;  %v5577_v44 = vld [vmem:[%s9252_s0 + $0x151] sm:$0xff]  ;;  %v4084_v33 = vpack.c.bf16 %v5579_v45, %v8294_v59  ;;  %v5638_v59 = vld [vmem:[%s9252_s0 + $0x63] sm:$0xff] }
 0x16c   :  { %v1861_v46 = vpop.f32.mrf.mxu1  ;;  %v2056_v17 = vpop.f32.mrf.mxu0  ;;  %6566 = vmatpush3.bf16.msra.mxu1 %v6713_v20  ;;  %6590 = vmatpush3.bf16.msra.mxu0 %v6714_v0  ;;  %v4083_v16 = vpack.c.bf16 %v5577_v44, %v8248_v42 }
 0x16d   :  { %v8784_v58 = vadd.f32 %v6263_v22, %v1914_v38  ;;  %v1912_v57 = vadd.f32 %v1861_v46, %v8629_v32  ;;  %6567 = vmatprep.subr.bf16.mxu1 %v6715_v62  ;;  %6591 = vmatprep.subr.bf16.mxu0 %v6716_v12  ;;  %v4659_v22 = vpack.c.bf16 %v5673_v54, %v5672_v47  ;;  %v5674_v46 = vld [vmem:[%s9252_s0 + $0x64] sm:$0xff] }
 0x16e   :  { %v6240_v37 = vpop.f32.mrf.mxu1  ;;  %v6264_v19 = vpop.f32.mrf.mxu0  ;;  %v5680_v54 = vld [vmem:[%s9252_s0 + $0x104] sm:$0xff] }
 0x16f   :  { %v8787_v50 = vadd.f32 %v2056_v17, %v1912_v57  ;;  %v1915_v21 = vadd.f32 %v6240_v37, %v8635_v23  ;;  %v5615_v23 = vld [vmem:[%s9252_s0 + $0x172] sm:$0xff] }
 0x170   :  { %v1864_v48 = vpop.f32.mrf.mxu1  ;;  %v2059_v39 = vpop.f32.mrf.mxu0  ;;  %6568 = vmatpush3.bf16.msra.mxu1 %v6715_v62  ;;  %6592 = vmatpush3.bf16.msra.mxu0 %v6716_v12  ;;  %v4278_v63 = vpack.c.bf16 %v5615_v23, %v8491_v55  ;;  %v5675_v17 = vld [vmem:[%s9252_s0 + $0x74] sm:$0xff] }
 0x171   :  { %v8792_v20 = vadd.f32 %v6264_v19, %v1915_v21  ;;  %v1913_v32 = vadd.f32 %v1864_v48, %v8642_v60  ;;  %v5636_v60 = vld [vmem:[%s9252_s0 + $0x43] sm:$0xff]  ;;  %v5677_v57 = vld [vmem:[%s9252_s0 + $0x94] sm:$0xff] }
 0x172   :  { %v6243_v0 = vpop.f32.mrf.mxu1  ;;  %v6267_v61 = vpop.f32.mrf.mxu0  ;;  %6530 = vmatmul.mubr.msk.bf16.gmra.mxu1 %vm104_vm0, %v4082_v5  ;;  %6554 = vmatmul.mubr.msk.bf16.gmra.mxu0 %vm104_vm0, %v4276_v11 }
 0x173   :  { %v8797_v2 = vadd.f32 %v2059_v39, %v1913_v32  ;;  %v1918_v42 = vadd.f32 %v6243_v0, %v8661_v51  ;;  %6533 = vmatprep.mubr.msk.bf16.mxu1 %vm104_vm0, %v4083_v16  ;;  %6557 = vmatprep.mubr.msk.bf16.mxu0 %vm104_vm0, %v4277_v8  ;;  %v5637_v51 = vld [vmem:[%s9252_s0 + $0x53] sm:$0xff]  ;;  %v4660_v16 = vpack.c.bf16 %v5675_v17, %v5674_v46 }
 0x174   :  { %v1877_v52 = vpop.f32.mrf.mxu1  ;;  %v2072_v36 = vpop.f32.mrf.mxu0  ;;  %v4465_v29 = vpack.c.bf16 %v5637_v51, %v5636_v60  ;;  %v9400_v39 = vld [vmem:[#allocation20_spill] sm:$0xff]  ;;  %v4661_v0 = vpack.c.bf16 %v5677_v57, %v8528_v7 }
 0x175   :  { %v8820_v30 = vadd.f32 %v6267_v61, %v1918_v42  ;;  %v1916_v41 = vadd.f32 %v1877_v52, %v8667_v10  ;;  %v5643_v7 = vld [vmem:[%s9252_s0 + $0xb3] sm:$0xff] }
 0x176   :  { %v6244_v14 = vpop.f32.mrf.mxu1  ;;  %v6268_v9 = vpop.f32.mrf.mxu0 }
 0x177   :  { %v8825_v62 = vadd.f32 %v2072_v36, %v1916_v41  ;;  %v1919_v12 = vadd.f32 %v6244_v14, %v8672_v6  ;;  %v5644_v36 = vld [vmem:[%s9252_s0 + $0x103] sm:$0xff]  ;;  %v5681_v41 = vld [vmem:[%s9252_s0 + $0x114] sm:$0xff] }
 0x178   :  { %v1880_v25 = vpop.f32.mrf.mxu1  ;;  %v2075_v38 = vpop.f32.mrf.mxu0 }
 0x179   :  { %v8828_v31 = vadd.f32 %v6268_v9, %v1919_v12  ;;  %v1917_v53 = vadd.f32 %v1880_v25, %v8677_v15  ;;  %v5639_v15 = vld [vmem:[%s9252_s0 + $0x73] sm:$0xff] }
 0x17a   :  { %v6247_v27 = vpop.f32.mrf.mxu1  ;;  %v6271_v10 = vpop.f32.mrf.mxu0  ;;  %6534 = vmatmul.mubr.msk.bf16.gmra.mxu1 %vm104_vm0, %v4084_v33  ;;  %6558 = vmatmul.mubr.msk.bf16.gmra.mxu0 %vm104_vm0, %v4278_v63  ;;  %v4466_v21 = vpack.c.bf16 %v5639_v15, %v5638_v59  ;;  %v9401_v12 = vld [vmem:[#allocation24_spill] sm:$0xff] }
 0x17b   :  { %v8836_v55 = vadd.f32 %v2075_v38, %v1917_v53  ;;  %v1922_v6 = vadd.f32 %v6247_v27, %v8688_v13  ;;  %6569 = vmatprep.mubr.msk.bf16.mxu1 %vm104_vm0, %v4465_v29  ;;  %6593 = vmatprep.mubr.msk.bf16.mxu0 %vm104_vm0, %v4659_v22  ;;  %v5641_v13 = vld [vmem:[%s9252_s0 + $0x93] sm:$0xff]  ;;  %v4468_v29 = vpack.c.bf16 %v5643_v7, %v9401_v12 }
 0x17c   :  { %v1893_v44 = vpop.f32.mrf.mxu1  ;;  %v2088_v18 = vpop.f32.mrf.mxu0  ;;  %v4467_v32 = vpack.c.bf16 %v5641_v13, %v9400_v39  ;;  %v4663_v27 = vpack.c.bf16 %v5681_v41, %v5680_v54 }
 0x17d   :  { %v8856_v37 = vadd.f32 %v6271_v10, %v1922_v6  ;;  %v1920_v19 = vadd.f32 %v1893_v44, %v8699_v28  ;;  %v5682_v44 = vld [vmem:[%s9252_s0 + $0x124] sm:$0xff] }
 0x17e   :  { %v6248_v5 = vpop.f32.mrf.mxu1  ;;  %v6272_v11 = vpop.f32.mrf.mxu0 }
 0x17f   :  { %v8859_v8 = vadd.f32 %v2088_v18, %v1920_v19  ;;  %v1923_v48 = vadd.f32 %v6248_v5, %v8704_v24  ;;  %v5683_v18 = vld [vmem:[%s9252_s0 + $0x134] sm:$0xff] }
 0x180   :  { %v1896_v61 = vpop.f32.mrf.mxu1  ;;  %v2091_v42 = vpop.f32.mrf.mxu0  ;;  %v5685_v19 = vld [vmem:[%s9252_s0 + $0x154] sm:$0xff]  ;;  %v4664_v39 = vpack.c.bf16 %v5683_v18, %v5682_v44 }
 0x181   :  { %v8864_v45 = vadd.f32 %v6272_v11, %v1923_v48  ;;  %v1921_v23 = vadd.f32 %v1896_v61, %v8718_v35  ;;  %v5679_v35 = vld [vmem:[%s9252_s0 + $0xb4] sm:$0xff] }
 0x182   :  { %v6283_v60 = vpop.f32.mrf.mxu1  ;;  %v6307_v28 = vpop.f32.mrf.mxu0  ;;  %6570 = vmatmul.mubr.msk.bf16.vlgmr.msra.gmra.mxu1 %vm104_vm0, %v4466_v21  ;;  %6594 = vmatmul.mubr.msk.bf16.vlgmr.msra.gmra.mxu0 %vm104_vm0, %v4660_v16  ;;  %v4662_v22 = vpack.c.bf16 %v5679_v35, %v8562_v4  ;;  %v5646_v4 = vld [vmem:[%s9252_s0 + $0x123] sm:$0xff] }
 0x183   :  { %v8869_v52 = vadd.f32 %v2091_v42, %v1921_v23  ;;  %v2299_v24 = vadd.f32 %v6283_v60, %v8740_v49  ;;  %6573 = vmatprep.mubr.msk.bf16.mxu1 %vm104_vm0, %v4467_v32  ;;  %6597 = vmatprep.mubr.msk.bf16.mxu0 %vm104_vm0, %v4661_v0  ;;  %v5645_v49 = vld [vmem:[%s9252_s0 + $0x113] sm:$0xff]  ;;  %v4665_v42 = vpack.c.bf16 %v5685_v19, %v8607_v26 }
 0x184   :  { %v2234_v51 = vpop.f32.mrf.mxu1  ;;  %v2428_v47 = vpop.f32.mrf.mxu0  ;;  %v4469_v53 = vpack.c.bf16 %v5645_v49, %v5644_v36  ;;  %v5687_v26 = vld [vmem:[%s9252_s0 + $0x174] sm:$0xff] }
 0x185   :  { %v8892_v14 = vadd.f32 %v6307_v28, %v2299_v24  ;;  %v2297_v9 = vadd.f32 %v2234_v51, %v8745_v56  ;;  %v4666_v41 = vpack.c.bf16 %v5687_v26, %v8650_v34 }
 0x186   :  { %v6284_v33 = vpop.f32.mrf.mxu1  ;;  %v6308_v63 = vpop.f32.mrf.mxu0 }
 0x187   :  { %v8897_v25 = vadd.f32 %v2428_v47, %v2297_v9  ;;  %v2300_v38 = vadd.f32 %v6284_v33, %v8750_v43 }
 0x188   :  { %v2237_v10 = vpop.f32.mrf.mxu1  ;;  %v2431_v59 = vpop.f32.mrf.mxu0 }
 0x189   :  { %v8900_v6 = vadd.f32 %v6308_v63, %v2300_v38  ;;  %v2298_v15 = vadd.f32 %v2237_v10, %v8764_v3  ;;  %v5647_v3 = vld [vmem:[%s9252_s0 + $0x133] sm:$0xff] }
 0x18a   :  { %v6287_v46 = vpop.f32.mrf.mxu1  ;;  %v6311_v56 = vpop.f32.mrf.mxu0  ;;  %6574 = vmatmul.mubr.msk.bf16.gmra.mxu1 %vm104_vm0, %v4468_v29  ;;  %6598 = vmatmul.mubr.msk.bf16.gmra.mxu0 %vm104_vm0, %v4662_v22  ;;  %v4470_v48 = vpack.c.bf16 %v5647_v3, %v5646_v4 }
 0x18b   :  { %v8908_v17 = vadd.f32 %v2431_v59, %v2298_v15  ;;  %v2303_v43 = vadd.f32 %v6287_v46, %v8784_v58  ;;  %6577 = vmatprep.mubr.msk.bf16.mxu1 %vm104_vm0, %v4469_v53  ;;  %6601 = vmatprep.mubr.msk.bf16.mxu0 %vm104_vm0, %v4663_v27  ;;  %v5649_v58 = vld [vmem:[%s9252_s0 + $0x153] sm:$0xff] }
 0x18c   :  { %v2250_v13 = vpop.f32.mrf.mxu1  ;;  %v2444_v57 = vpop.f32.mrf.mxu0  ;;  %v4471_v61 = vpack.c.bf16 %v5649_v58, %v8450_v1  ;;  %v5651_v1 = vld [vmem:[%s9252_s0 + $0x173] sm:$0xff] }
 0x18d   :  { %v8928_v5 = vadd.f32 %v6311_v56, %v2303_v43  ;;  %v2301_v11 = vadd.f32 %v2250_v13, %v8787_v50  ;;  %v4472_v54 = vpack.c.bf16 %v5651_v1, %v8496_v40 }
 0x18e   :  { %v6288_v21 = vpop.f32.mrf.mxu1  ;;  %v6312_v16 = vpop.f32.mrf.mxu0 }
 0x18f   :  { %v8931_v32 = vadd.f32 %v2444_v57, %v2301_v11  ;;  %v2304_v0 = vadd.f32 %v6288_v21, %v8792_v20 }
 0x190   :  { %v2253_v23 = vpop.f32.mrf.mxu1  ;;  %v2447_v60 = vpop.f32.mrf.mxu0 }
 0x191   :  { %v8936_v28 = vadd.f32 %v6312_v16, %v2304_v0  ;;  %v2302_v24 = vadd.f32 %v2253_v23, %v8797_v2 }
 0x192   :  { %v6291_v7 = vpop.f32.mrf.mxu1  ;;  %v6315_v50 = vpop.f32.mrf.mxu0  ;;  %6578 = vmatmul.mubr.msk.bf16.gmra.mxu1 %vm104_vm0, %v4470_v48  ;;  %6602 = vmatmul.mubr.msk.bf16.gmra.mxu0 %vm104_vm0, %v4664_v39 }
 0x193   :  { %v8941_v35 = vadd.f32 %v2447_v60, %v2302_v24  ;;  %v2307_v20 = vadd.f32 %v6291_v7, %v8820_v30  ;;  %6581 = vmatprep.mubr.msk.bf16.mxu1 %vm104_vm0, %v4471_v61  ;;  %6605 = vmatprep.mubr.msk.bf16.mxu0 %vm104_vm0, %v4665_v42 }
 0x194   :  { %v2266_v2 = vpop.f32.mrf.mxu1  ;;  %v2460_v36 = vpop.f32.mrf.mxu0 }
 0x195   :  { %v8952_v51 = vadd.f32 %v6315_v50, %v2307_v20  ;;  %v2305_v47 = vadd.f32 %v2266_v2, %v8825_v62 }
 0x196   :  { %v6292_v49 = vpop.f32.mrf.mxu1  ;;  %v6316_v30 = vpop.f32.mrf.mxu0 }
 0x197   :  { %v8957_v9 = vadd.f32 %v2460_v36, %v2305_v47  ;;  %v2308_v33 = vadd.f32 %v6292_v49, %v8828_v31 }
 0x198   :  { %v2269_v63 = vpop.f32.mrf.mxu1  ;;  %v2463_v12 = vpop.f32.mrf.mxu0 }
 0x199   :  { %v8960_v29 = vadd.f32 %v6316_v30, %v2308_v33  ;;  %v2306_v22 = vadd.f32 %v2269_v63, %v8836_v55 }
 0x19a   :  { %v6295_v38 = vpop.f32.mrf.mxu1  ;;  %v6319_v53 = vpop.f32.mrf.mxu0  ;;  %6582 = vmatmul.mubr.msk.bf16.gmra.mxu1 %vm104_vm0, %v4472_v54  ;;  %6606 = vmatmul.mubr.msk.bf16.gmra.mxu0 %vm104_vm0, %v4666_v41 }
 0x19b   :  { %v2500_v62 = vadd.f32 %v2463_v12, %v2306_v22  ;;  %v2311_v40 = vadd.f32 %v6295_v38, %v8856_v37 }
 0x19c   :  { %v2282_v34 = vpop.f32.mrf.mxu1  ;;  %v2476_v27 = vpop.f32.mrf.mxu0 }
 0x19d   :  { %v2505_v10 = vadd.f32 %v6319_v53, %v2311_v40  ;;  %v2309_v31 = vadd.f32 %v2282_v34, %v8859_v8 }
 0x19e   :  { %v6296_v59 = vpop.f32.mrf.mxu1  ;;  %v6320_v15 = vpop.f32.mrf.mxu0 }
 0x19f   :  { %v2503_v46 = vadd.f32 %v2476_v27, %v2309_v31  ;;  %v2312_v56 = vadd.f32 %v6296_v59, %v8864_v45 }
 0x1a0   :  { %v2285_v55 = vpop.f32.mrf.mxu1  ;;  %v2479_v4 = vpop.f32.mrf.mxu0 }
 0x1a1   :  { %v2506_v43 = vadd.f32 %v6320_v15, %v2312_v56  ;;  %v2310_v3 = vadd.f32 %v2285_v55, %v8869_v52 }
 0x1a2   :  { %v6331_v44 = vpop.f32.mrf.mxu1  ;;  %v6355_v18 = vpop.f32.mrf.mxu0 }
 0x1a3   :  { %v2504_v13 = vadd.f32 %v2479_v4, %v2310_v3  ;;  %v2687_v37 = vadd.f32 %v6331_v44, %v8892_v14 }
 0x1a4   :  { %v2622_v57 = vpop.f32.mrf.mxu1  ;;  %v2816_v58 = vpop.f32.mrf.mxu0 }
 0x1a5   :  { %v2881_v19 = vadd.f32 %v6355_v18, %v2687_v37  ;;  %v2685_v8 = vadd.f32 %v2622_v57, %v8897_v25 }
 0x1a6   :  { %v6332_v11 = vpop.f32.mrf.mxu1  ;;  %v6356_v21 = vpop.f32.mrf.mxu0 }
 0x1a7   :  { %v2879_v16 = vadd.f32 %v2816_v58, %v2685_v8  ;;  %v2688_v45 = vadd.f32 %v6332_v11, %v8900_v6 }
 0x1a8   :  { %v2625_v48 = vpop.f32.mrf.mxu1  ;;  %v2819_v39 = vpop.f32.mrf.mxu0 }
 0x1a9   :  { %v2882_v0 = vadd.f32 %v6356_v21, %v2688_v45  ;;  %v2686_v52 = vadd.f32 %v2625_v48, %v8908_v17 }
 0x1aa   :  { %v6335_v61 = vpop.f32.mrf.mxu1  ;;  %v6359_v42 = vpop.f32.mrf.mxu0 }
 0x1ab   :  { %v2880_v23 = vadd.f32 %v2819_v39, %v2686_v52  ;;  %v2691_v14 = vadd.f32 %v6335_v61, %v8928_v5 }
 0x1ac   :  { %v2638_v60 = vpop.f32.mrf.mxu1  ;;  %v2832_v24 = vpop.f32.mrf.mxu0 }
 0x1ad   :  { %v2885_v7 = vadd.f32 %v6359_v42, %v2691_v14  ;;  %v2689_v25 = vadd.f32 %v2638_v60, %v8931_v32 }
 0x1ae   :  { %v6336_v50 = vpop.f32.mrf.mxu1  ;;  %v6360_v20 = vpop.f32.mrf.mxu0 }
 0x1af   :  { %v2883_v1 = vadd.f32 %v2832_v24, %v2689_v25  ;;  %v2692_v6 = vadd.f32 %v6336_v50, %v8936_v28 }
 0x1b0   :  { %v2641_v26 = vpop.f32.mrf.mxu1  ;;  %v2835_v2 = vpop.f32.mrf.mxu0 }
 0x1b1   :  { %v2886_v36 = vadd.f32 %v6360_v20, %v2692_v6  ;;  %v2690_v17 = vadd.f32 %v2641_v26, %v8941_v35 }
 0x1b2   :  { %v6339_v47 = vpop.f32.mrf.mxu1  ;;  %v6363_v49 = vpop.f32.mrf.mxu0 }
 0x1b3   :  { %v2884_v30 = vadd.f32 %v2835_v2, %v2690_v17  ;;  %v2695_v5 = vadd.f32 %v6339_v47, %v8952_v51 }
 0x1b4   :  { %v2654_v54 = vpop.f32.mrf.mxu1  ;;  %v2848_v41 = vpop.f32.mrf.mxu0 }
 0x1b5   :  { %v2889_v33 = vadd.f32 %v6363_v49, %v2695_v5  ;;  %v2693_v32 = vadd.f32 %v2654_v54, %v8957_v9 }
 0x1b6   :  { %v6340_v63 = vpop.f32.mrf.mxu1  ;;  %v6364_v12 = vpop.f32.mrf.mxu0 }
 0x1b7   :  { %v2887_v22 = vadd.f32 %v2848_v41, %v2693_v32  ;;  %v2696_v28 = vadd.f32 %v6340_v63, %v8960_v29 }
 0x1b8   :  { %v2657_v38 = vpop.f32.mrf.mxu1  ;;  %v2851_v53 = vpop.f32.mrf.mxu0 }
 0x1b9   :  { %v2890_v40 = vadd.f32 %v6364_v12, %v2696_v28  ;;  %v2694_v34 = vadd.f32 %v2657_v38, %v2500_v62 }
 0x1ba   :  { %v6343_v35 = vpop.f32.mrf.mxu1  ;;  %v6367_v27 = vpop.f32.mrf.mxu0 }
 0x1bb   :  { %v2888_v31 = vadd.f32 %v2851_v53, %v2694_v34  ;;  %v2699_v59 = vadd.f32 %v6343_v35, %v2505_v10 }
 0x1bc   :  { %v2670_v15 = vpop.f32.mrf.mxu1  ;;  %v2864_v51 = vpop.f32.mrf.mxu0 }
 0x1bd   :  { %v2893_v56 = vadd.f32 %v6367_v27, %v2699_v59  ;;  %v2697_v55 = vadd.f32 %v2670_v15, %v2503_v46 }
 0x1be   :  { %v6344_v4 = vpop.f32.mrf.mxu1  ;;  %v6368_v3 = vpop.f32.mrf.mxu0 }
 0x1bf   :  { %v2891_v9 = vadd.f32 %v2864_v51, %v2697_v55  ;;  %v2700_v44 = vadd.f32 %v6344_v4, %v2506_v43 }
 0x1c0   :  { %v2673_v18 = vpop.f32.mrf.mxu1  ;;  %v2867_v37 = vpop.f32.mrf.mxu0 }
 0x1c1   :  { %v2894_v57 = vadd.f32 %v6368_v3, %v2700_v44  ;;  %v2698_v29 = vadd.f32 %v2673_v18, %v2504_v13 }
 0x1c2   :  { %v6379_v58 = vpop.f32.mrf.mxu1  ;;  %v6403_v8 = vpop.f32.mrf.mxu0 }
 0x1c3   :  { %v2892_v11 = vadd.f32 %v2867_v37, %v2698_v29  ;;  %v3076_v62 = vadd.f32 %v6379_v58, %v2881_v19 }
 0x1c4   :  { %v3011_v21 = vpop.f32.mrf.mxu1  ;;  %v3205_v45 = vpop.f32.mrf.mxu0 }
 0x1c5   :  { %v3270_v48 = vadd.f32 %v6403_v8, %v3076_v62  ;;  %v3074_v10 = vadd.f32 %v3011_v21, %v2879_v16 }
 0x1c6   :  { %v6380_v39 = vpop.f32.mrf.mxu1  ;;  %v6404_v52 = vpop.f32.mrf.mxu0 }
 0x1c7   :  { %v3268_v61 = vadd.f32 %v3205_v45, %v3074_v10  ;;  %v3077_v46 = vadd.f32 %v6380_v39, %v2882_v0 }
 0x1c8   :  { %v3014_v42 = vpop.f32.mrf.mxu1  ;;  %v3208_v14 = vpop.f32.mrf.mxu0 }
 0x1c9   :  { %v3271_v60 = vadd.f32 %v6404_v52, %v3077_v46  ;;  %v3075_v43 = vadd.f32 %v3014_v42, %v2880_v23 }
 0x1ca   :  { %v6383_v24 = vpop.f32.mrf.mxu1  ;;  %v6407_v25 = vpop.f32.mrf.mxu0 }
 0x1cb   :  { %v3269_v50 = vadd.f32 %v3208_v14, %v3075_v43  ;;  %v3080_v13 = vadd.f32 %v6383_v24, %v2885_v7 }
 0x1cc   :  { %v3027_v20 = vpop.f32.mrf.mxu1  ;;  %v3221_v6 = vpop.f32.mrf.mxu0 }
 0x1cd   :  { %v3274_v26 = vadd.f32 %v6407_v25, %v3080_v13  ;;  %v3078_v19 = vadd.f32 %v3027_v20, %v2883_v1 }
 0x1ce   :  { %v6384_v2 = vpop.f32.mrf.mxu1  ;;  %v6408_v17 = vpop.f32.mrf.mxu0 }
 0x1cf   :  { %v3272_v47 = vadd.f32 %v3221_v6, %v3078_v19  ;;  %v3081_v16 = vadd.f32 %v6384_v2, %v2886_v36 }
 0x1d0   :  { %v3030_v49 = vpop.f32.mrf.mxu1  ;;  %v3224_v5 = vpop.f32.mrf.mxu0 }
 0x1d1   :  { %v3275_v54 = vadd.f32 %v6408_v17, %v3081_v16  ;;  %v3079_v0 = vadd.f32 %v3030_v49, %v2884_v30 }
 0x1d2   :  { %v6387_v41 = vpop.f32.mrf.mxu1  ;;  %v6411_v32 = vpop.f32.mrf.mxu0 }
 0x1d3   :  { %v3273_v63 = vadd.f32 %v3224_v5, %v3079_v0  ;;  %v3084_v23 = vadd.f32 %v6387_v41, %v2889_v33 }
 0x1d4   :  { %v3043_v12 = vpop.f32.mrf.mxu1  ;;  %v3237_v28 = vpop.f32.mrf.mxu0 }
 0x1d5   :  { %v3278_v38 = vadd.f32 %v6411_v32, %v3084_v23  ;;  %v3082_v7 = vadd.f32 %v3043_v12, %v2887_v22 }
 0x1d6   :  { %v6388_v53 = vpop.f32.mrf.mxu1  ;;  %v6412_v34 = vpop.f32.mrf.mxu0 }
 0x1d7   :  { %v3276_v35 = vadd.f32 %v3237_v28, %v3082_v7  ;;  %v3085_v1 = vadd.f32 %v6388_v53, %v2890_v40 }
 0x1d8   :  { %v3046_v27 = vpop.f32.mrf.mxu1  ;;  %v3240_v59 = vpop.f32.mrf.mxu0 }
 0x1d9   :  { %v3279_v15 = vadd.f32 %v6412_v34, %v3085_v1  ;;  %v3083_v36 = vadd.f32 %v3046_v27, %v2888_v31 }
 0x1da   :  { %v6391_v51 = vpop.f32.mrf.mxu1  ;;  %v6415_v55 = vpop.f32.mrf.mxu0 }
 0x1db   :  { %v3277_v4 = vadd.f32 %v3240_v59, %v3083_v36  ;;  %v3088_v30 = vadd.f32 %v6391_v51, %v2893_v56 }
 0x1dc   :  { %v3059_v3 = vpop.f32.mrf.mxu1  ;;  %v3253_v44 = vpop.f32.mrf.mxu0 }
 0x1dd   :  { %v3282_v18 = vadd.f32 %v6415_v55, %v3088_v30  ;;  %v3086_v33 = vadd.f32 %v3059_v3, %v2891_v9 }
 0x1de   :  { %v6392_v37 = vpop.f32.mrf.mxu1  ;;  %v6416_v29 = vpop.f32.mrf.mxu0 }
 0x1df   :  { %v3280_v58 = vadd.f32 %v3253_v44, %v3086_v33  ;;  %v3089_v22 = vadd.f32 %v6392_v37, %v2894_v57 }
 0x1e0   :  { %v3062_v8 = vpop.f32.mrf.mxu1  ;;  %v3256_v62 = vpop.f32.mrf.mxu0 }
 0x1e1   :  { %v3283_v21 = vadd.f32 %v6416_v29, %v3089_v22  ;;  %v3087_v40 = vadd.f32 %v3062_v8, %v2892_v11 }
 0x1e2   :  { %v6427_v45 = vpop.f32.mrf.mxu1  ;;  %v6451_v10 = vpop.f32.mrf.mxu0 }
 0x1e3   :  { %v3281_v39 = vadd.f32 %v3256_v62, %v3087_v40  ;;  %v3464_v31 = vadd.f32 %v6427_v45, %v3270_v48 }
 0x1e4   :  { %v3399_v52 = vpop.f32.mrf.mxu1  ;;  %v3593_v46 = vpop.f32.mrf.mxu0 }
 0x1e5   :  { %v8980_v42 = vadd.f32 %v6451_v10, %v3464_v31  ;;  %v3462_v56 = vadd.f32 %v3399_v52, %v3268_v61 }
 0x1e6   :  { %v6428_v14 = vpop.f32.mrf.mxu1  ;;  %v6452_v43 = vpop.f32.mrf.mxu0 }
 0x1e7   :  { %v8982_v9 = vadd.f32 %v3593_v46, %v3462_v56  ;;  %v3465_v24 = vadd.f32 %v6428_v14, %v3271_v60 }
 0x1e8   :  { %v3402_v25 = vpop.f32.mrf.mxu1  ;;  %v3596_v57 = vpop.f32.mrf.mxu0 }
 0x1e9   :  { %v8984_v13 = vadd.f32 %v6452_v43, %v3465_v24  ;;  %v3463_v20 = vadd.f32 %v3402_v25, %v3269_v50 }
 0x1ea   :  { %v6431_v11 = vpop.f32.mrf.mxu1  ;;  %v6455_v6 = vpop.f32.mrf.mxu0 }
 0x1eb   :  { %v8986_v19 = vadd.f32 %v3596_v57, %v3463_v20  ;;  %v3468_v48 = vadd.f32 %v6431_v11, %v3274_v26 }
 0x1ec   :  { %v3415_v2 = vpop.f32.mrf.mxu1  ;;  %v3609_v17 = vpop.f32.mrf.mxu0 }
 0x1ed   :  { %v8988_v16 = vadd.f32 %v6455_v6, %v3468_v48  ;;  %v3466_v61 = vadd.f32 %v3415_v2, %v3272_v47 }
 0x1ee   :  { %v6432_v49 = vpop.f32.mrf.mxu1  ;;  %v6456_v5 = vpop.f32.mrf.mxu0 }
 0x1ef   :  { %v8990_v0 = vadd.f32 %v3609_v17, %v3466_v61  ;;  %v3469_v60 = vadd.f32 %v6432_v49, %v3275_v54 }
 0x1f0   :  { %v3418_v41 = vpop.f32.mrf.mxu1  ;;  %v3612_v32 = vpop.f32.mrf.mxu0 }
 0x1f1   :  { %v8992_v23 = vadd.f32 %v6456_v5, %v3469_v60  ;;  %v3467_v50 = vadd.f32 %v3418_v41, %v3273_v63 }
 0x1f2   :  { %v6435_v12 = vpop.f32.mrf.mxu1  ;;  %v6459_v28 = vpop.f32.mrf.mxu0 }
 0x1f3   :  { %v8994_v7 = vadd.f32 %v3612_v32, %v3467_v50  ;;  %v3472_v26 = vadd.f32 %v6435_v12, %v3278_v38 }
 0x1f4   :  { %v3431_v53 = vpop.f32.mrf.mxu1  ;;  %v3625_v34 = vpop.f32.mrf.mxu0 }
 0x1f5   :  { %v8996_v1 = vadd.f32 %v6459_v28, %v3472_v26  ;;  %v3470_v47 = vadd.f32 %v3431_v53, %v3276_v35 }
 0x1f6   :  { %v6436_v27 = vpop.f32.mrf.mxu1  ;;  %v6460_v59 = vpop.f32.mrf.mxu0 }
 0x1f7   :  { %v8998_v36 = vadd.f32 %v3625_v34, %v3470_v47  ;;  %v3473_v54 = vadd.f32 %v6436_v27, %v3279_v15 }
 0x1f8   :  { %v3434_v51 = vpop.f32.mrf.mxu1  ;;  %v3628_v55 = vpop.f32.mrf.mxu0 }
 0x1f9   :  { %v9000_v30 = vadd.f32 %v6460_v59, %v3473_v54  ;;  %v3471_v63 = vadd.f32 %v3434_v51, %v3277_v4 }
 0x1fa   :  { %v6439_v3 = vpop.f32.mrf.mxu1  ;;  %v6463_v44 = vpop.f32.mrf.mxu0 }
 0x1fb   :  { %v9002_v33 = vadd.f32 %v3628_v55, %v3471_v63  ;;  %v3476_v38 = vadd.f32 %v6439_v3, %v3282_v18 }
 0x1fc   :  { %v3447_v37 = vpop.f32.mrf.mxu1  ;;  %v3641_v29 = vpop.f32.mrf.mxu0 }
 0x1fd   :  { %v9004_v22 = vadd.f32 %v6463_v44, %v3476_v38  ;;  %v3474_v35 = vadd.f32 %v3447_v37, %v3280_v58 }
 0x1fe   :  { %v6440_v8 = vpop.f32.mrf.mxu1  ;;  %v6464_v62 = vpop.f32.mrf.mxu0 }
 0x1ff   :  { %v9006_v40 = vadd.f32 %v3641_v29, %v3474_v35  ;;  %v3477_v15 = vadd.f32 %v6440_v8, %v3283_v21 }
 0x200   :  { %v3450_v45 = vpop.f32.mrf.mxu1  ;;  %v3644_v10 = vpop.f32.mrf.mxu0 }
 0x201   :  { %9402 = vst [vmem:[#allocation25_spill] sm:$0xff] %v9006_v40  ;;  %v9008_v31 = vadd.f32 %v6464_v62, %v3477_v15  ;;  %v3475_v4 = vadd.f32 %v3450_v45, %v3281_v39 }
 0x202   :  { %v6475_v52 = vpop.f32.mrf.mxu1  ;;  %v6499_v46 = vpop.f32.mrf.mxu0 }
 0x203   :  { %9403 = vst [vmem:[#allocation26_spill] sm:$0xff] %v9008_v31  ;;  %v9010_v56 = vadd.f32 %v3644_v10, %v3475_v4  ;;  %v3852_v31 = vadd.f32 %v6475_v52, %v8980_v42 }
 0x204   :  { %v3787_v18 = vpop.f32.mrf.mxu1  ;;  %v3982_v14 = vpop.f32.mrf.mxu0 }
 0x205   :  { %9404 = vst [vmem:[#allocation4_spill] sm:$0xff] %v9010_v56  ;;  %v3850_v40 = vadd.f32 %v3787_v18, %v8982_v9 }
 0x206   :  { %v6476_v43 = vpop.f32.mrf.mxu1  ;;  %v9012_v24 = vpop.f32.mrf.mxu0 }
 0x208   :  { %v3790_v58 = vpop.f32.mrf.mxu1  ;;  %v9014_v25 = vpop.f32.mrf.mxu0 }
 0x209   :  { %v3851_v42 = vadd.f32 %v3790_v58, %v8986_v19 }
 0x20a   :  { %v6479_v57 = vpop.f32.mrf.mxu1  ;;  %v9016_v20 = vpop.f32.mrf.mxu0 }
 0x20c   :  { %v3803_v21 = vpop.f32.mrf.mxu1  ;;  %v9018_v11 = vpop.f32.mrf.mxu0 }
 0x20e   :  { %v9020_v6 = vpop.f32.mrf.mxu1  ;;  %v9022_v39 = vpop.f32.mrf.mxu0 }
 0x210   :  { %v9024_v48 = vpop.f32.mrf.mxu1  ;;  %v9026_v2 = vpop.f32.mrf.mxu0 }
 0x212   :  { %v9028_v17 = vpop.f32.mrf.mxu1  ;;  %v9030_v61 = vpop.f32.mrf.mxu0 }
 0x214   :  { %v9032_v49 = vpop.f32.mrf.mxu1  ;;  %v9034_v5 = vpop.f32.mrf.mxu0 }
 0x216   :  { %v9036_v60 = vpop.f32.mrf.mxu1  ;;  %v9038_v41 = vpop.f32.mrf.mxu0 }
 0x218   :  { %v9040_v32 = vpop.f32.mrf.mxu1  ;;  %v9042_v50 = vpop.f32.mrf.mxu0 }
 0x219   :  { %9405 = vst [vmem:[#allocation6_spill] sm:$0xff] %v9042_v50 }
 0x21a   :  { %v9044_v12 = vpop.f32.mrf.mxu1  ;;  %v9046_v28 = vpop.f32.mrf.mxu0 }
 0x21b   :  { %9406 = vst [vmem:[#allocation12_spill] sm:$0xff] %v9046_v28 }
 0x21c   :  { %v9048_v26 = vpop.f32.mrf.mxu1  ;;  %v9050_v53 = vpop.f32.mrf.mxu0 }
 0x21d   :  { %9407 = vst [vmem:[#allocation19_spill] sm:$0xff] %v9048_v26  ;;  %9408 = vst [vmem:[#allocation21_spill] sm:$0xff] %v9050_v53 }
 0x21e   :  { %v9052_v34 = vpop.f32.mrf.mxu1  ;;  %v9054_v47 = vpop.f32.mrf.mxu0 }
 0x21f   :  { %9409 = vst [vmem:[#allocation2_spill] sm:$0xff] %v9052_v34  ;;  %9410 = vst [vmem:[#allocation15_spill] sm:$0xff] %v9054_v47 }
 0x220   :  { %v9056_v27 = vpop.f32.mrf.mxu1  ;;  %v9058_v59 = vpop.f32.mrf.mxu0 }
 0x221   :  { %9411 = vst [vmem:[#allocation8_spill] sm:$0xff] %v9056_v27  ;;  %9412 = vst [vmem:[#allocation7_spill] sm:$0xff] %v9058_v59 }
 0x222   :  { %v6523_v54 = vpop.f32.mrf.mxu1  ;;  %v6547_v51 = vpop.f32.mrf.mxu0 }
 0x224   :  { %v4176_v55 = vpop.f32.mrf.mxu1  ;;  %v4370_v63 = vpop.f32.mrf.mxu0 }
 0x226   :  { %v6524_v3 = vpop.f32.mrf.mxu1  ;;  %v6548_v44 = vpop.f32.mrf.mxu0 }
 0x228   :  { %v4179_v38 = vpop.f32.mrf.mxu1  ;;  %v4373_v37 = vpop.f32.mrf.mxu0 }
 0x22a   :  { %v6527_v29 = vpop.f32.mrf.mxu1  ;;  %v9060_v35 = vpop.f32.mrf.mxu0 }
 0x22c   :  { %v4192_v8 = vpop.f32.mrf.mxu1  ;;  %v9062_v62 = vpop.f32.mrf.mxu0 }
 0x22e   :  { %v9064_v15 = vpop.f32.mrf.mxu1  ;;  %v9066_v45 = vpop.f32.mrf.mxu0 }
 0x230   :  { %v9068_v10 = vpop.f32.mrf.mxu1  ;;  %v9070_v4 = vpop.f32.mrf.mxu0 }
 0x231   :  { %9413 = vst [vmem:[#allocation10_spill] sm:$0xff] %v9070_v4 }
 0x232   :  { %v9072_v59 = vpop.f32.mrf.mxu1  ;;  %v9074_v47 = vpop.f32.mrf.mxu0 }
 0x233   :  { %9414 = vst [vmem:[#allocation9_spill] sm:$0xff] %v9074_v47  ;;  %v4047_v47 = vadd.f32 %v6499_v46, %v3852_v31  ;;  %v3854_v31 = vadd.f32 %v3803_v21, %v8990_v0  ;;  %v3855_v21 = vadd.f32 %v9024_v48, %v8994_v7 }
 0x234   :  { %v9076_v27 = vpop.f32.mrf.mxu1  ;;  %v9078_v56 = vpop.f32.mrf.mxu0 }
 0x235   :  { %9415 = vst [vmem:[#allocation22_spill] sm:$0xff] %v9076_v27  ;;  %9416 = vst [vmem:[#allocation14_spill] sm:$0xff] %v9078_v56  ;;  %v3853_v27 = vadd.f32 %v6476_v43, %v8984_v13  ;;  %v4241_v52 = vadd.f32 %v6523_v54, %v4047_v47  ;;  %v4049_v0 = vadd.f32 %v9018_v11, %v3854_v31 }
 0x236   :  { %v9080_v53 = vpop.f32.mrf.mxu1  ;;  %v9082_v34 = vpop.f32.mrf.mxu0 }
 0x237   :  { %9417 = vst [vmem:[#allocation13_spill] sm:$0xff] %v9080_v53  ;;  %9418 = vst [vmem:[#allocation3_spill] sm:$0xff] %v9082_v34  ;;  %v4045_v34 = vadd.f32 %v3982_v14, %v3850_v40  ;;  %v4048_v18 = vadd.f32 %v9012_v24, %v3853_v27  ;;  %v4046_v40 = vadd.f32 %v9014_v25, %v3851_v42  ;;  %v9121_v25 = vld [vmem:[%s9253_s2] ss:$0 sm:$0xff] }
 0x238   :  { %v9085_v28 = vpop.f32.mrf.mxu1  ;;  %v9087_v26 = vpop.f32.mrf.mxu0  ;;  %v4435_v14 = vadd.f32 %v6547_v51, %v4241_v52  ;;  %v4243_v11 = vadd.f32 %v4192_v8, %v4049_v0 }
 0x239   :  { %9419 = vst [vmem:[#allocation16_spill] sm:$0xff] %v9085_v28  ;;  %9420 = vst [vmem:[#allocation5_spill] sm:$0xff] %v9087_v26  ;;  %v3856_v28 = vadd.f32 %v6479_v57, %v8988_v16  ;;  %v4242_v19 = vadd.f32 %v6524_v3, %v4048_v18  ;;  %v3857_v16 = vadd.f32 %v9020_v6, %v8992_v23 }
 0x23a   :  { %v9090_v50 = vpop.f32.mrf.mxu1  ;;  %v9092_v4 = vpop.f32.mrf.mxu0  ;;  %v4240_v24 = vadd.f32 %v4179_v38, %v4046_v40  ;;  %v3861_v40 = vadd.f32 %v9036_v60, %v9000_v30  ;;  %v3859_v30 = vadd.f32 %v9040_v32, %v9002_v33  ;;  %v3864_v33 = vadd.f32 %v9044_v12, %v9004_v22  ;;  %v9422_v32 = vld [vmem:[#allocation10_spill] sm:$0xff]  ;;  %v9426_v22 = vld [vmem:[#allocation19_spill] sm:$0xff] }
 0x23b   :  { %9421 = vst [vmem:[#allocation17_spill] sm:$0xff] %v9092_v4  ;;  %v4239_v4 = vadd.f32 %v4176_v55, %v4045_v34  ;;  %v4051_v43 = vadd.f32 %v9016_v20, %v3856_v28  ;;  %v4436_v54 = vadd.f32 %v6548_v44, %v4242_v19  ;;  %v4052_v51 = vadd.f32 %v9022_v39, %v3857_v16 }
 0x23c   :  { %v9095_v56 = vpop.f32.mrf.mxu1  ;;  %v9097_v53 = vpop.f32.mrf.mxu0  ;;  %v3860_v55 = vadd.f32 %v9028_v17, %v8996_v1  ;;  %v4434_v7 = vadd.f32 %v4373_v37, %v4240_v24  ;;  %v3858_v44 = vadd.f32 %v9032_v49, %v8998_v36 }
 0x23d   :  { %v4433_v47 = vadd.f32 %v4370_v63, %v4239_v4  ;;  %v4245_v27 = vadd.f32 %v6527_v29, %v4051_v43  ;;  %v4050_v4 = vadd.f32 %v9026_v2, %v3855_v21  ;;  %v4246_v39 = vadd.f32 %v9064_v15, %v4052_v51  ;;  %v9427_v51 = vld [vmem:[#allocation9_spill] sm:$0xff] }
 0x23e   :  { %v9101_v26 = vpop.f32.mrf.mxu1  ;;  %v9103_v9 = vpop.f32.mrf.mxu0  ;;  %v4055_v31 = vadd.f32 %v9030_v61, %v3860_v55  ;;  %v4437_v2 = vadd.f32 %v9062_v62, %v4243_v11  ;;  %v4053_v61 = vadd.f32 %v9034_v5, %v3858_v44  ;;  %v4056_v5 = vadd.f32 %v9038_v41, %v3861_v40  ;;  %v9424_v41 = vld [vmem:[#allocation6_spill] sm:$0xff]  ;;  %v9428_v11 = vld [vmem:[#allocation13_spill] sm:$0xff]  ;;  %v9429_v44 = vld [vmem:[#allocation12_spill] sm:$0xff] }
 0x23f   :  { %v4439_v42 = vadd.f32 %v9060_v35, %v4245_v27  ;;  %v4244_v36 = vadd.f32 %v9068_v10, %v4050_v4  ;;  %v4440_v60 = vadd.f32 %v9066_v45, %v4246_v39  ;;  %v9430_v39 = vld [vmem:[#allocation26_spill] sm:$0xff] }
 0x240   :  { %v9107_v13 = vpop.f32.mrf.mxu1  ;;  %v9109_v46 = vpop.f32.mrf.mxu0  ;;  %v4249_v62 = vadd.f32 %v9072_v59, %v4055_v31  ;;  %v9423_v59 = vld [vmem:[#allocation22_spill] sm:$0xff] }
 0x241   :  { %v4438_v45 = vadd.f32 %v9422_v32, %v4244_v36  ;;  %v9439_v32 = vld [vmem:[#allocation5_spill] sm:$0xff] }
 0x242   :  { %v6571_v58 = vpop.f32.mrf.mxu1  ;;  %v6595_v57 = vpop.f32.mrf.mxu0  ;;  %v4443_v55 = vadd.f32 %v9427_v51, %v4249_v62 }
 0x243   :  { %v4629_v34 = vadd.f32 %v6571_v58, %v4435_v14 }
 0x244   :  { %v4564_v20 = vpop.f32.mrf.mxu1  ;;  %v4758_v28 = vpop.f32.mrf.mxu0 }
 0x245   :  { %v4823_v23 = vadd.f32 %v6595_v57, %v4629_v34  ;;  %v4627_v6 = vadd.f32 %v4564_v20, %v4433_v47  ;;  %v4247_v34 = vadd.f32 %v9423_v59, %v4053_v61 }
 0x246   :  { %v6572_v63 = vpop.f32.mrf.mxu1  ;;  %v6596_v3 = vpop.f32.mrf.mxu0 }
 0x247   :  { %v4846_v48 = vadd.f32 %v9121_v25, %v4823_v23  ;;  %v4821_v38 = vadd.f32 %v4758_v28, %v4627_v6  ;;  %v4630_v29 = vadd.f32 %v6572_v63, %v4436_v54  ;;  %v4054_v23 = vadd.f32 %v9424_v41, %v3859_v30  ;;  %v9425_v6 = vld [vmem:[#allocation25_spill] sm:$0xff]  ;;  %v9437_v30 = vld [vmem:[#allocation3_spill] sm:$0xff] }
 0x248   :  { %v4567_v52 = vpop.f32.mrf.mxu1  ;;  %v4761_v18 = vpop.f32.mrf.mxu0  ;;  %v3862_v12 = vadd.f32 %v9426_v22, %v9425_v6  ;;  %v4250_v63 = vadd.f32 %v9428_v11, %v4056_v5  ;;  %v9438_v5 = vld [vmem:[#allocation15_spill] sm:$0xff]  ;;  %v9441_v41 = vld [vmem:[#allocation17_spill] sm:$0xff] }
 0x249   :  { %v4862_v1 = vmax.f32 %v4846_v48, 0.0  ;;  %v4844_v17 = vadd.f32 %v9121_v25, %v4821_v38  ;;  %v4824_v8 = vadd.f32 %v6596_v3, %v4630_v29  ;;  %v4628_v37 = vadd.f32 %v4567_v52, %v4434_v7  ;;  %v9431_v52 = vld [vmem:[#allocation2_spill] sm:$0xff] }
 0x24a   :  { %v6575_v49 = vpop.f32.mrf.mxu1  ;;  %v6599_v35 = vpop.f32.mrf.mxu0 }
 0x24b   :  { %4878 = vst.msk [vmem:[%s9254_s3 + $0x10] sm:$0xff] %vm104_vm0, %v4862_v1  ;;  %v4860_v15 = vmax.f32 %v4844_v17, 0.0  ;;  %v4847_v14 = vadd.f32 %v9121_v25, %v4824_v8  ;;  %v4822_v19 = vadd.f32 %v4761_v18, %v4628_v37  ;;  %v4633_v43 = vadd.f32 %v6575_v49, %v4439_v42  ;;  %v9432_v1 = vld [vmem:[#allocation14_spill] sm:$0xff]  ;;  %v9433_v8 = vld [vmem:[#allocation16_spill] sm:$0xff] }
 0x24c   :  { %v4580_v10 = vpop.f32.mrf.mxu1  ;;  %v4774_v16 = vpop.f32.mrf.mxu0  ;;  %v4059_v42 = vadd.f32 %v9429_v44, %v3864_v33  ;;  %v3865_v18 = vadd.f32 %v9431_v52, %v9430_v39  ;;  %v4441_v17 = vadd.f32 %v9432_v1, %v4247_v34  ;;  %v4248_v37 = vadd.f32 %v9433_v8, %v4054_v23 }
 0x24d   :  { %4876 = vst.msk [vmem:[%s9254_s3] sm:$0xff] %vm104_vm0, %v4860_v15  ;;  %v4863_v58 = vmax.f32 %v4847_v14, 0.0  ;;  %v4845_v57 = vadd.f32 %v9121_v25, %v4822_v19  ;;  %v4827_v47 = vadd.f32 %v6599_v35, %v4633_v43  ;;  %v4631_v24 = vadd.f32 %v4580_v10, %v4437_v2  ;;  %v9434_v15 = vld [vmem:[#allocation21_spill] sm:$0xff]  ;;  %v9435_v19 = vld [vmem:[#allocation4_spill] sm:$0xff] }
 0x24e   :  { %v6576_v0 = vpop.f32.mrf.mxu1  ;;  %v6600_v21 = vpop.f32.mrf.mxu0  ;;  %v4057_v14 = vadd.f32 %v9434_v15, %v3862_v12  ;;  %v9436_v43 = vld [vmem:[#allocation8_spill] sm:$0xff]  ;;  %v4253_v62 = vadd.f32 %v9090_v50, %v4059_v42  ;;  %v4060_v33 = vadd.f32 %v9438_v5, %v3865_v18 }
 0x24f   :  { %4879 = vst.msk [vmem:[%s9254_s3 + $0x18] sm:$0xff] %vm104_vm0, %v4863_v58  ;;  %v4861_v27 = vmax.f32 %v4845_v57, 0.0  ;;  %v4850_v20 = vadd.f32 %v9121_v25, %v4827_v47  ;;  %v4825_v28 = vadd.f32 %v4774_v16, %v4631_v24  ;;  %v4634_v54 = vadd.f32 %v6576_v0, %v4440_v60 }
 0x250   :  { %v4583_v3 = vpop.f32.mrf.mxu1  ;;  %v4777_v7 = vpop.f32.mrf.mxu0  ;;  %v3863_v61 = vadd.f32 %v9436_v43, %v9435_v19  ;;  %v4444_v60 = vadd.f32 %v9437_v30, %v4250_v63  ;;  %v4251_v59 = vadd.f32 %v9095_v56, %v4057_v14  ;;  %v4447_v23 = vadd.f32 %v9441_v41, %v4253_v62 }
 0x251   :  { %4877 = vst.msk [vmem:[%s9254_s3 + $0x8] sm:$0xff] %vm104_vm0, %v4861_v27  ;;  %v4866_v48 = vmax.f32 %v4850_v20, 0.0  ;;  %v4848_v38 = vadd.f32 %v9121_v25, %v4825_v28  ;;  %v4828_v29 = vadd.f32 %v6600_v21, %v4634_v54  ;;  %v4632_v4 = vadd.f32 %v4583_v3, %v4438_v45  ;;  %v9440_v28 = vld [vmem:[#allocation7_spill] sm:$0xff] }
 0x252   :  { %v6579_v31 = vpop.f32.mrf.mxu1  ;;  %v6603_v40 = vpop.f32.mrf.mxu0  ;;  %v4442_v45 = vadd.f32 %v9439_v32, %v4248_v37  ;;  %v4058_v54 = vadd.f32 %v9440_v28, %v3863_v61  ;;  %v4254_v6 = vadd.f32 %v9101_v26, %v4060_v33  ;;  %v4445_v63 = vadd.f32 %v9097_v53, %v4251_v59 }
 0x253   :  { %4882 = vst.msk [vmem:[%s9254_s3 + $0x30] sm:$0xff] %vm104_vm0, %v4866_v48  ;;  %v4864_v2 = vmax.f32 %v4848_v38, 0.0  ;;  %v4851_v36 = vadd.f32 %v9121_v25, %v4828_v29  ;;  %v4826_v49 = vadd.f32 %v4777_v7, %v4632_v4  ;;  %v4637_v35 = vadd.f32 %v6579_v31, %v4443_v55 }
 0x254   :  { %v4596_v10 = vpop.f32.mrf.mxu1  ;;  %v4790_v16 = vpop.f32.mrf.mxu0  ;;  %v4252_v3 = vadd.f32 %v9107_v13, %v4058_v54  ;;  %v4448_v44 = vadd.f32 %v9103_v9, %v4254_v6 }
 0x255   :  { %4880 = vst.msk [vmem:[%s9254_s3 + $0x20] sm:$0xff] %vm104_vm0, %v4864_v2  ;;  %v4867_v58 = vmax.f32 %v4851_v36, 0.0  ;;  %v4849_v57 = vadd.f32 %v9121_v25, %v4826_v49  ;;  %v4831_v47 = vadd.f32 %v6603_v40, %v4637_v35  ;;  %v4635_v24 = vadd.f32 %v4596_v10, %v4441_v17 }
 0x256   :  { %v6580_v34 = vpop.f32.mrf.mxu1  ;;  %v6604_v50 = vpop.f32.mrf.mxu0  ;;  %v4446_v1 = vadd.f32 %v9109_v46, %v4252_v3 }
 0x257   :  { %4883 = vst.msk [vmem:[%s9254_s3 + $0x38] sm:$0xff] %vm104_vm0, %v4867_v58  ;;  %v4865_v0 = vmax.f32 %v4849_v57, 0.0  ;;  %v4854_v21 = vadd.f32 %v9121_v25, %v4831_v47  ;;  %v4829_v27 = vadd.f32 %v4790_v16, %v4635_v24  ;;  %v4638_v20 = vadd.f32 %v6580_v34, %v4444_v60 }
 0x258   :  { %v4599_v22 = vpop.f32.mrf.mxu1  ;;  %v4793_v56 = vpop.f32.mrf.mxu0 }
 0x259   :  { %4881 = vst.msk [vmem:[%s9254_s3 + $0x28] sm:$0xff] %vm104_vm0, %v4865_v0  ;;  %v4870_v12 = vmax.f32 %v4854_v21, 0.0  ;;  %v4852_v51 = vadd.f32 %v9121_v25, %v4829_v27  ;;  %v4832_v55 = vadd.f32 %v6604_v50, %v4638_v20  ;;  %v4636_v11 = vadd.f32 %v4599_v22, %v4442_v45 }
 0x25a   :  { %v6583_v7 = vpop.f32.mrf.mxu1  ;;  %v6607_v48 = vpop.f32.mrf.mxu0 }
 0x25b   :  { %4886 = vst.msk [vmem:[%s9254_s3 + $0x50] sm:$0xff] %vm104_vm0, %v4870_v12  ;;  %v4868_v26 = vmax.f32 %v4852_v51, 0.0  ;;  %v4855_v38 = vadd.f32 %v9121_v25, %v4832_v55  ;;  %v4830_v29 = vadd.f32 %v4793_v56, %v4636_v11  ;;  %v4641_v4 = vadd.f32 %v6583_v7, %v4447_v23 }
 0x25c   :  { %v4612_v42 = vpop.f32.mrf.mxu1  ;;  %v4806_v39 = vpop.f32.mrf.mxu0 }
 0x25d   :  { %4884 = vst.msk [vmem:[%s9254_s3 + $0x40] sm:$0xff] %vm104_vm0, %v4868_v26  ;;  %v4871_v53 = vmax.f32 %v4855_v38, 0.0  ;;  %v4853_v13 = vadd.f32 %v9121_v25, %v4830_v29  ;;  %v4835_v52 = vadd.f32 %v6607_v48, %v4641_v4  ;;  %v4639_v18 = vadd.f32 %v4612_v42, %v4445_v63 }
 0x25e   :  { %v6584_v17 = vpop.f32.mrf.mxu1  ;;  %v6608_v8 = vpop.f32.mrf.mxu0 }
 0x25f   :  { %4887 = vst.msk [vmem:[%s9254_s3 + $0x58] sm:$0xff] %vm104_vm0, %v4871_v53  ;;  %v4869_v9 = vmax.f32 %v4853_v13, 0.0  ;;  %v4858_v37 = vadd.f32 %v9121_v25, %v4835_v52  ;;  %v4833_v31 = vadd.f32 %v4806_v39, %v4639_v18  ;;  %v4642_v40 = vadd.f32 %v6584_v17, %v4448_v44 }
 0x260   :  { %v4615_v2 = vpop.f32.mrf.mxu1  ;;  %v4809_v15 = vpop.f32.mrf.mxu0 }
 0x261   :  { %4885 = vst.msk [vmem:[%s9254_s3 + $0x48] sm:$0xff] %vm104_vm0, %v4869_v9  ;;  %v4874_v36 = vmax.f32 %v4858_v37, 0.0  ;;  %v4856_v46 = vadd.f32 %v9121_v25, %v4833_v31  ;;  %v4836_v49 = vadd.f32 %v6608_v8, %v4642_v40  ;;  %v4640_v35 = vadd.f32 %v4615_v2, %v4446_v1 }
 0x263   :  { %4890 = vst.msk [vmem:[%s9254_s3 + $0x70] sm:$0xff] %vm104_vm0, %v4874_v36  ;;  %v4872_v14 = vmax.f32 %v4856_v46, 0.0  ;;  %v4859_v19 = vadd.f32 %v9121_v25, %v4836_v49  ;;  %v4834_v43 = vadd.f32 %v4809_v15, %v4640_v35 }
 0x265   :  { %4888 = vst.msk [vmem:[%s9254_s3 + $0x60] sm:$0xff] %vm104_vm0, %v4872_v14  ;;  %v4875_v61 = vmax.f32 %v4859_v19, 0.0  ;;  %v4857_v30 = vadd.f32 %v9121_v25, %v4834_v43 }
 0x267   :  { %4891 = vst.msk [vmem:[%s9254_s3 + $0x78] sm:$0xff] %vm104_vm0, %v4875_v61  ;;  %v4873_v60 = vmax.f32 %v4857_v30, 0.0 }
 0x269   :  { %4889 = vst.msk [vmem:[%s9254_s3 + $0x68] sm:$0xff] %vm104_vm0, %v4873_v60 }

</bundles_post_ra>
